<compile_context>
chip_gen: v7x
topology: tpu7x:2x2x1
jax: 0.10.0
libtpu: 0.0.40
codegen_flags: <defaults>
</compile_context>

<pallas_src>
import functools

import jax
import jax.numpy as jnp
from jax import lax
from jax.experimental import pallas as pl
from jax.experimental.pallas import tpu as pltpu

E = 128        # embedding dim
H = 512        # GRU hidden size
LANE = 128     # TPU lane width (pad logits last dim to a multiple of this)
MIN_B = 16     # pad batch to >= 16 and a multiple of 16 (bf16 sublane packing)
MAX_TC = 8     # max timesteps handled per grid step


def _gru_cell(x, h, wih_t, whh_t, bih, bhh):
    """PyTorch nn.GRUCell semantics (gate order r, z, n); f32 accumulation."""
    cd = wih_t.dtype   # bf16 weights -> bf16 MXU inputs, f32 accumulation
    gi = jnp.dot(x.astype(cd), wih_t, preferred_element_type=jnp.float32) + bih
    gh = jnp.dot(h.astype(cd), whh_t, preferred_element_type=jnp.float32) + bhh
    r = jax.nn.sigmoid(gi[:, 0 * H:1 * H] + gh[:, 0 * H:1 * H])
    z = jax.nn.sigmoid(gi[:, 1 * H:2 * H] + gh[:, 1 * H:2 * H])
    n = jnp.tanh(gi[:, 2 * H:3 * H] + r * gh[:, 2 * H:3 * H])
    return (1.0 - z) * n + z * h


def multi_gru_kernel(x_ref, h0_ref,
                     wih1_ref, whh1_ref, bih1_ref, bhh1_ref,
                     wih2_ref, whh2_ref, bih2_ref, bhh2_ref,
                     wih3_ref, whh3_ref, bih3_ref, bhh3_ref,
                     wlin_ref, blin_ref,
                     logits_ref, hout_ref,
                     *, tc):
    c = pl.program_id(0)

    # hout (constant index_map) is the VMEM-resident hidden-state carry.
    @pl.when(c == 0)
    def _():
        hout_ref[...] = h0_ref[...]

    w_lin = wlin_ref[...]                                     # (H, voc_pad)
    b_lin = blin_ref[...]                                     # (1, voc_pad)

    def step(t, carry):
        h1, h2, h3 = carry
        x = x_ref[t]                                          # (B, E) bf16
        h1 = _gru_cell(x,  h1, wih1_ref[...], whh1_ref[...],
                       bih1_ref[...], bhh1_ref[...])
        h2 = _gru_cell(h1, h2, wih2_ref[...], whh2_ref[...],
                       bih2_ref[...], bhh2_ref[...])
        h3 = _gru_cell(h2, h3, wih3_ref[...], whh3_ref[...],
                       bih3_ref[...], bhh3_ref[...])
        logits_ref[t] = (jnp.dot(h3.astype(w_lin.dtype), w_lin,
                                 preferred_element_type=jnp.float32) + b_lin)
        return (h1, h2, h3)

    h1, h2, h3 = lax.fori_loop(
        0, tc, step, (hout_ref[0], hout_ref[1], hout_ref[2]), unroll=True)
    hout_ref[0] = h1
    hout_ref[1] = h2
    hout_ref[2] = h3


def init_params(key, voc_size, weight_dtype=jnp.bfloat16):
    ks = jax.random.split(key, 16)
    k_gru = 1.0 / jnp.sqrt(jnp.float32(H))
    k_lin = 1.0 / jnp.sqrt(jnp.float32(H))
    voc_pad = ((voc_size + LANE - 1) // LANE) * LANE

    def u(k, shape, bound):
        return jax.random.uniform(k, shape, jnp.float32, -bound, bound)

    def wt(k, out_dim, in_dim, bound):
        # torch layers store (out, in); keep pre-transposed (in, out) + pre-cast
        # so the forward path never pays a per-call transpose / cast.
        return u(k, (out_dim, in_dim), bound).T.astype(weight_dtype)

    w_lin_t = jnp.zeros((H, voc_pad), weight_dtype).at[:, :voc_size].set(
        wt(ks[13], voc_size, H, k_lin))
    b_lin = jnp.zeros((1, voc_pad), jnp.float32).at[:, :voc_size].set(
        u(ks[14], (voc_size,), k_lin)[None, :])

    params = {
        "emb":     jax.random.normal(ks[0], (voc_size, E), jnp.float32),
        # gru_1: input 128 -> hidden 512
        "w_ih1_t": wt(ks[1], 3 * H, E, k_gru),
        "w_hh1_t": wt(ks[2], 3 * H, H, k_gru),
        "b_ih1":   u(ks[3], (1, 3 * H), k_gru),
        "b_hh1":   u(ks[4], (1, 3 * H), k_gru),
        # gru_2: 512 -> 512
        "w_ih2_t": wt(ks[5], 3 * H, H, k_gru),
        "w_hh2_t": wt(ks[6], 3 * H, H, k_gru),
        "b_ih2":   u(ks[7], (1, 3 * H), k_gru),
        "b_hh2":   u(ks[8], (1, 3 * H), k_gru),
        # gru_3: 512 -> 512
        "w_ih3_t": wt(ks[9], 3 * H, H, k_gru),
        "w_hh3_t": wt(ks[10], 3 * H, H, k_gru),
        "b_ih3":   u(ks[11], (1, 3 * H), k_gru),
        "b_hh3":   u(ks[12], (1, 3 * H), k_gru),
        # linear: 512 -> voc (padded lane-dense; wrapper slices back to voc)
        "w_lin_t": w_lin_t,
        "b_lin":   b_lin,
    }
    return params


def _weight_args(params):
    return (
        params["w_ih1_t"], params["w_hh1_t"], params["b_ih1"], params["b_hh1"],
        params["w_ih2_t"], params["w_hh2_t"], params["b_ih2"], params["b_hh2"],
        params["w_ih3_t"], params["w_hh3_t"], params["b_ih3"], params["b_hh3"],
        params["w_lin_t"], params["b_lin"],
    )


def _resident_spec(arr):
    # Whole (2-D) array, same block every grid step => DMA'd to VMEM once.
    # Constant index_map + Buffered(1): no pointless second buffer.
    zeros = (0,) * arr.ndim
    return pl.BlockSpec(arr.shape, lambda c: zeros,
                        pipeline_mode=pl.Buffered(1))


def multi_gru_sequence(tokens_tb, h, params):
    """Run T autoregressive steps with weights resident in VMEM.

    tokens_tb : (T, B) int32 token ids
    h         : (3, B, H) float32 initial hidden state
    returns (logits (T, B, voc) float32, h_out (3, B, H) float32)
    """
    T, B = tokens_tb.shape
    voc = params["emb"].shape[0]
    voc_pad = params["w_lin_t"].shape[1]

    # Pad batch so the kernel sees sublane/lane-friendly shapes (bf16 packs 16
    # rows per vreg).  For real throughput, pack sequences so B ~ 128-256.
    B_pad = max(MIN_B, ((B + 15) // 16) * 16)
    # Largest divisor of T that is <= MAX_TC: chunking without time padding,
    # so the hidden-state carry is never advanced by dummy steps.
    tc = next(c for c in range(min(T, MAX_TC), 0, -1) if T % c == 0)

    if B_pad != B:
        tokens_p = jnp.zeros((T, B_pad), tokens_tb.dtype).at[:, :B].set(tokens_tb)
        h_p = jnp.zeros((3, B_pad, H), jnp.float32).at[:, :B, :].set(h)
    else:
        tokens_p, h_p = tokens_tb, h

    # Glue: embedding gather (tiny table) stays in plain JAX; cast to bf16 so
    # the per-step activation DMA is half the bytes.
    x_emb = jnp.take(params["emb"], tokens_p.reshape(-1), axis=0)
    x_emb = x_emb.reshape(T, B_pad, E).astype(jnp.bfloat16)

    weights = _weight_args(params)
    args = (x_emb, h_p) + weights

    in_specs = [
        pl.BlockSpec((tc, B_pad, E), lambda c: (c, 0, 0)),        # activations
        pl.BlockSpec((3, B_pad, H), lambda c: (0, 0, 0),          # initial h
                     pipeline_mode=pl.Buffered(1)),
    ] + [_resident_spec(w) for w in weights]                      # weights: once

    out_specs = (
        pl.BlockSpec((tc, B_pad, voc_pad), lambda c: (c, 0, 0)),  # logits
        pl.BlockSpec((3, B_pad, H), lambda c: (0, 0, 0)),         # h carry/out
    )

    out_shape = (
        jax.ShapeDtypeStruct((T, B_pad, voc_pad), jnp.float32),
        jax.ShapeDtypeStruct((3, B_pad, H), jnp.float32),
    )

    # Per-block VMEM residency (NOT the full HBM arrays):
    #   weights x1 (Buffered(1)) + activation block x2 + logits block x2
    #   + h0 x1 + hout x2 + headroom.
    weight_bytes = sum(int(a.size) * a.dtype.itemsize for a in weights)
    x_block = tc * B_pad * E * 2
    logit_block = tc * B_pad * voc_pad * 4
    h_block = 3 * B_pad * H * 4
    vmem_limit = (weight_bytes + 2 * x_block + 2 * logit_block + 3 * h_block
                  + (8 << 20))
    vmem_limit = int(min(vmem_limit, 48 << 20))   # stay well under v7x 64 MiB

    kernel = functools.partial(multi_gru_kernel, tc=tc)

    logits_pad, h_out = pl.pallas_call(
        kernel,
        out_shape=out_shape,
        grid_spec=pltpu.PrefetchScalarGridSpec(
            num_scalar_prefetch=0,
            grid=(T // tc,),
            in_specs=in_specs,
            out_specs=out_specs,
        ),
        compiler_params=pltpu.CompilerParams(
            dimension_semantics=("arbitrary",),   # sequential hidden-state carry
            vmem_limit_bytes=vmem_limit,
        ),
    )(*args)
    return logits_pad[:, :B, :voc], h_out[:, :B, :]


def multi_gru_forward(tokens, h, params):
    """Equivalent of MultiGRU.forward(x, h) -> (logits, h_out): one step."""
    logits, h_out = multi_gru_sequence(tokens[None, :], h, params)
    return logits[0], h_out


def multi_gru_reference(tokens, h, params):
    """Pure-JAX single-step reference (same bf16 weights, f32 accumulation)."""
    voc = params["emb"].shape[0]
    x = jnp.take(params["emb"], tokens, axis=0).astype(jnp.bfloat16)
    h1 = _gru_cell(x,  h[0], params["w_ih1_t"], params["w_hh1_t"],
                   params["b_ih1"], params["b_hh1"])
    h2 = _gru_cell(h1, h[1], params["w_ih2_t"], params["w_hh2_t"],
                   params["b_ih2"], params["b_hh2"])
    h3 = _gru_cell(h2, h[2], params["w_ih3_t"], params["w_hh3_t"],
                   params["b_ih3"], params["b_hh3"])
    w_lin = params["w_lin_t"]
    logits = (jnp.dot(h3.astype(w_lin.dtype), w_lin,
                      preferred_element_type=jnp.float32)
              + params["b_lin"])[:, :voc]
    return logits, jnp.stack([h1, h2, h3])


def init_h(batch_size):
    return jnp.zeros((3, batch_size, H), jnp.float32)


if __name__ == "__main__":
    VOC = 32
    B = 8
    T = 6

    key = jax.random.PRNGKey(0)
    k_par, k_tok, k_h = jax.random.split(key, 3)

    params = init_params(k_par, VOC)
    tokens_seq = jax.random.randint(k_tok, (T, B), 0, VOC, dtype=jnp.int32)
    h0 = jax.random.normal(k_h, (3, B, H), jnp.float32)

    fwd = jax.jit(multi_gru_forward)
    seq = jax.jit(multi_gru_sequence)

    # --- single step (module-equivalent forward) ---
    logits, h_out = fwd(tokens_seq[0], h0, params)
    jax.block_until_ready((logits, h_out))
    assert logits.shape == (B, VOC) and logits.dtype == jnp.float32
    assert h_out.shape == (3, B, H) and h_out.dtype == jnp.float32

    ref_logits, ref_h = multi_gru_reference(tokens_seq[0], h0, params)
    assert jnp.allclose(logits, ref_logits, atol=5e-3, rtol=5e-3)
    assert jnp.allclose(h_out, ref_h, atol=5e-3, rtol=5e-3)

    # --- T-step rollout: weights DMA'd to VMEM once, reused across steps ---
    logits_T, h_T = seq(tokens_seq, h0, params)
    jax.block_until_ready((logits_T, h_T))
    assert logits_T.shape == (T, B, VOC) and h_T.shape == (3, B, H)

    # Must match T applications of the pure-JAX single-step reference.
    h_ref = h0
    for t in range(T):
        step_logits, h_ref = multi_gru_reference(tokens_seq[t], h_ref, params)
        assert jnp.allclose(step_logits, logits_T[t], atol=5e-3, rtol=5e-3)
    assert jnp.allclose(h_ref, h_T, atol=5e-3, rtol=5e-3)

    print("KERNEL_OK")
</pallas_src>

<mosaic_0001>
module attributes {stable_mosaic.version = 11 : i64} {
  func.func @multi_gru_kernel(%arg0: i32, %arg1: memref<1x16x128xbf16, #tpu.memory_space<vmem>>, %arg2: memref<3x16x512xf32, #tpu.memory_space<vmem>>, %arg3: memref<128x1536xbf16, #tpu.memory_space<vmem>>, %arg4: memref<512x1536xbf16, #tpu.memory_space<vmem>>, %arg5: memref<1x1536xf32, #tpu.memory_space<vmem>>, %arg6: memref<1x1536xf32, #tpu.memory_space<vmem>>, %arg7: memref<512x1536xbf16, #tpu.memory_space<vmem>>, %arg8: memref<512x1536xbf16, #tpu.memory_space<vmem>>, %arg9: memref<1x1536xf32, #tpu.memory_space<vmem>>, %arg10: memref<1x1536xf32, #tpu.memory_space<vmem>>, %arg11: memref<512x1536xbf16, #tpu.memory_space<vmem>>, %arg12: memref<512x1536xbf16, #tpu.memory_space<vmem>>, %arg13: memref<1x1536xf32, #tpu.memory_space<vmem>>, %arg14: memref<1x1536xf32, #tpu.memory_space<vmem>>, %arg15: memref<512x128xbf16, #tpu.memory_space<vmem>>, %arg16: memref<1x128xf32, #tpu.memory_space<vmem>>, %arg17: memref<1x16x128xf32, #tpu.memory_space<vmem>>, %arg18: memref<3x16x512xf32, #tpu.memory_space<vmem>>) attributes {dimension_semantics = [#tpu.dimension_semantics<arbitrary>], iteration_bounds = array<i64: 1>, scalar_prefetch = 0 : i64, scratch_operands = 0 : i64, tpu.core_type = #tpu.core_type<tc>, window_params = [{transform_indices = @transform_0, window_bounds = array<i64: 1, 16, 128>}, {pipeline_mode = #tpu.pipeline_mode<synchronous>, transform_indices = @transform_1, window_bounds = array<i64: 3, 16, 512>}, {pipeline_mode = #tpu.pipeline_mode<synchronous>, transform_indices = @transform_2, window_bounds = array<i64: 128, 1536>}, {pipeline_mode = #tpu.pipeline_mode<synchronous>, transform_indices = @transform_3, window_bounds = array<i64: 512, 1536>}, {pipeline_mode = #tpu.pipeline_mode<synchronous>, transform_indices = @transform_4, window_bounds = array<i64: 1, 1536>}, {pipeline_mode = #tpu.pipeline_mode<synchronous>, transform_indices = @transform_5, window_bounds = array<i64: 1, 1536>}, {pipeline_mode = #tpu.pipeline_mode<synchronous>, transform_indices = @transform_6, window_bounds = array<i64: 512, 1536>}, {pipeline_mode = #tpu.pipeline_mode<synchronous>, transform_indices = @transform_7, window_bounds = array<i64: 512, 1536>}, {pipeline_mode = #tpu.pipeline_mode<synchronous>, transform_indices = @transform_8, window_bounds = array<i64: 1, 1536>}, {pipeline_mode = #tpu.pipeline_mode<synchronous>, transform_indices = @transform_9, window_bounds = array<i64: 1, 1536>}, {pipeline_mode = #tpu.pipeline_mode<synchronous>, transform_indices = @transform_10, window_bounds = array<i64: 512, 1536>}, {pipeline_mode = #tpu.pipeline_mode<synchronous>, transform_indices = @transform_11, window_bounds = array<i64: 512, 1536>}, {pipeline_mode = #tpu.pipeline_mode<synchronous>, transform_indices = @transform_12, window_bounds = array<i64: 1, 1536>}, {pipeline_mode = #tpu.pipeline_mode<synchronous>, transform_indices = @transform_13, window_bounds = array<i64: 1, 1536>}, {pipeline_mode = #tpu.pipeline_mode<synchronous>, transform_indices = @transform_14, window_bounds = array<i64: 512, 128>}, {pipeline_mode = #tpu.pipeline_mode<synchronous>, transform_indices = @transform_15, window_bounds = array<i64: 1, 128>}, {transform_indices = @transform_16, window_bounds = array<i64: 1, 16, 128>}, {pipeline_mode = #tpu.pipeline_mode<synchronous>, transform_indices = @transform_17, window_bounds = array<i64: 3, 16, 512>}]} {
    %c0_i32 = arith.constant 0 : i32
    %0 = arith.cmpi eq, %arg0, %c0_i32 : i32
    %1 = arith.extui %0 : i1 to i32
    %c0_i32_0 = arith.constant 0 : i32
    %2 = arith.cmpi ne, %1, %c0_i32_0 : i32
    scf.if %2 {
      %c0_64 = arith.constant 0 : index
      %c0_65 = arith.constant 0 : index
      %c0_66 = arith.constant 0 : index
      %144 = vector.load %arg2[%c0_64, %c0_65, %c0_66] : memref<3x16x512xf32, #tpu.memory_space<vmem>>, vector<3x16x512xf32>
      %c0_67 = arith.constant 0 : index
      %c0_68 = arith.constant 0 : index
      %c0_69 = arith.constant 0 : index
      %145 = vector.load %arg18[%c0_67, %c0_68, %c0_69] : memref<3x16x512xf32, #tpu.memory_space<vmem>>, vector<3x16x512xf32>
      tpu.vector_store %arg18[%c0_67, %c0_68, %c0_69], %144 {strides = array<i32>} : memref<3x16x512xf32, #tpu.memory_space<vmem>>, vector<3x16x512xf32>,
    } else {
    }
    %c0 = arith.constant 0 : index
    %c0_1 = arith.constant 0 : index
    %3 = vector.load %arg15[%c0, %c0_1] : memref<512x128xbf16, #tpu.memory_space<vmem>>, vector<512x128xbf16>
    %c0_2 = arith.constant 0 : index
    %c0_3 = arith.constant 0 : index
    %4 = vector.load %arg16[%c0_2, %c0_3] : memref<1x128xf32, #tpu.memory_space<vmem>>, vector<1x128xf32>
    %c0_4 = arith.constant 0 : index
    %c0_5 = arith.constant 0 : index
    %c0_6 = arith.constant 0 : index
    %5 = vector.load %arg18[%c0_4, %c0_5, %c0_6] : memref<3x16x512xf32, #tpu.memory_space<vmem>>, vector<1x16x512xf32>
    %6 = vector.shape_cast %5 : vector<1x16x512xf32> to vector<16x512xf32>
    %c1 = arith.constant 1 : index
    %c0_7 = arith.constant 0 : index
    %c0_8 = arith.constant 0 : index
    %7 = vector.load %arg18[%c1, %c0_7, %c0_8] : memref<3x16x512xf32, #tpu.memory_space<vmem>>, vector<1x16x512xf32>
    %8 = vector.shape_cast %7 : vector<1x16x512xf32> to vector<16x512xf32>
    %c2 = arith.constant 2 : index
    %c0_9 = arith.constant 0 : index
    %c0_10 = arith.constant 0 : index
    %9 = vector.load %arg18[%c2, %c0_9, %c0_10] : memref<3x16x512xf32, #tpu.memory_space<vmem>>, vector<1x16x512xf32>
    %10 = vector.shape_cast %9 : vector<1x16x512xf32> to vector<16x512xf32>
    %c0_i32_11 = arith.constant 0 : i32
    %11 = arith.index_cast %c0_i32_11 : i32 to index
    %c0_12 = arith.constant 0 : index
    %c0_13 = arith.constant 0 : index
    %12 = vector.load %arg1[%11, %c0_12, %c0_13] : memref<1x16x128xbf16, #tpu.memory_space<vmem>>, vector<1x16x128xbf16>
    %13 = vector.shape_cast %12 : vector<1x16x128xbf16> to vector<16x128xbf16>
    %c0_14 = arith.constant 0 : index
    %c0_15 = arith.constant 0 : index
    %14 = vector.load %arg3[%c0_14, %c0_15] : memref<128x1536xbf16, #tpu.memory_space<vmem>>, vector<128x1536xbf16>
    %c0_16 = arith.constant 0 : index
    %c0_17 = arith.constant 0 : index
    %15 = vector.load %arg4[%c0_16, %c0_17] : memref<512x1536xbf16, #tpu.memory_space<vmem>>, vector<512x1536xbf16>
    %c0_18 = arith.constant 0 : index
    %c0_19 = arith.constant 0 : index
    %16 = vector.load %arg5[%c0_18, %c0_19] : memref<1x1536xf32, #tpu.memory_space<vmem>>, vector<1x1536xf32>
    %c0_20 = arith.constant 0 : index
    %c0_21 = arith.constant 0 : index
    %17 = vector.load %arg6[%c0_20, %c0_21] : memref<1x1536xf32, #tpu.memory_space<vmem>>, vector<1x1536xf32>
    %cst = arith.constant dense<0.000000e+00> : vector<16x1536xf32>
    %18 = tpu.matmul %13, %14, %cst {dimension_numbers = #tpu.dot_dimension_numbers<[1], [0], [0], [1], [0, 0, 1, 1], [], []>} : vector<16x128xbf16>, vector<128x1536xbf16>, vector<16x1536xf32> -> vector<16x1536xf32>
    %19 = vector.broadcast %16 : vector<1x1536xf32> to vector<16x1536xf32>
    %20 = arith.addf %18, %19 : vector<16x1536xf32>
    %21 = arith.truncf %6 : vector<16x512xf32> to vector<16x512xbf16>
    %cst_22 = arith.constant dense<0.000000e+00> : vector<16x1536xf32>
    %22 = tpu.matmul %21, %15, %cst_22 {dimension_numbers = #tpu.dot_dimension_numbers<[1], [0], [0], [1], [0, 0, 1, 1], [], []>} : vector<16x512xbf16>, vector<512x1536xbf16>, vector<16x1536xf32> -> vector<16x1536xf32>
    %23 = vector.broadcast %17 : vector<1x1536xf32> to vector<16x1536xf32>
    %24 = arith.addf %22, %23 : vector<16x1536xf32>
    %25 = vector.extract_strided_slice %20 {offsets = [0, 0], sizes = [16, 512], strides = [1, 1]} : vector<16x1536xf32> to vector<16x512xf32>
    %26 = vector.extract_strided_slice %24 {offsets = [0, 0], sizes = [16, 512], strides = [1, 1]} : vector<16x1536xf32> to vector<16x512xf32>
    %27 = arith.addf %25, %26 : vector<16x512xf32>
    %28 = arith.negf %27 : vector<16x512xf32>
    %29 = math.exp %28 : vector<16x512xf32>
    %cst_23 = arith.constant 1.000000e+00 : f32
    %30 = vector.broadcast %cst_23 : f32 to vector<16x512xf32>
    %31 = arith.addf %30, %29 : vector<16x512xf32>
    %32 = arith.divf %30, %31 : vector<16x512xf32>
    %33 = vector.extract_strided_slice %20 {offsets = [0, 512], sizes = [16, 512], strides = [1, 1]} : vector<16x1536xf32> to vector<16x512xf32>
    %34 = vector.extract_strided_slice %24 {offsets = [0, 512], sizes = [16, 512], strides = [1, 1]} : vector<16x1536xf32> to vector<16x512xf32>
    %35 = arith.addf %33, %34 : vector<16x512xf32>
    %36 = arith.negf %35 : vector<16x512xf32>
    %37 = math.exp %36 : vector<16x512xf32>
    %cst_24 = arith.constant 1.000000e+00 : f32
    %38 = vector.broadcast %cst_24 : f32 to vector<16x512xf32>
    %39 = arith.addf %38, %37 : vector<16x512xf32>
    %40 = arith.divf %38, %39 : vector<16x512xf32>
    %41 = vector.extract_strided_slice %20 {offsets = [0, 1024], sizes = [16, 512], strides = [1, 1]} : vector<16x1536xf32> to vector<16x512xf32>
    %42 = vector.extract_strided_slice %24 {offsets = [0, 1024], sizes = [16, 512], strides = [1, 1]} : vector<16x1536xf32> to vector<16x512xf32>
    %43 = arith.mulf %32, %42 : vector<16x512xf32>
    %44 = arith.addf %41, %43 : vector<16x512xf32>
    %45 = math.tanh %44 : vector<16x512xf32>
    %cst_25 = arith.constant 1.000000e+00 : f32
    %46 = vector.broadcast %cst_25 : f32 to vector<16x512xf32>
    %47 = arith.subf %46, %40 : vector<16x512xf32>
    %48 = arith.mulf %47, %45 : vector<16x512xf32>
    %49 = arith.mulf %40, %6 : vector<16x512xf32>
    %50 = arith.addf %48, %49 : vector<16x512xf32>
    %c0_26 = arith.constant 0 : index
    %c0_27 = arith.constant 0 : index
    %51 = vector.load %arg7[%c0_26, %c0_27] : memref<512x1536xbf16, #tpu.memory_space<vmem>>, vector<512x1536xbf16>
    %c0_28 = arith.constant 0 : index
    %c0_29 = arith.constant 0 : index
    %52 = vector.load %arg8[%c0_28, %c0_29] : memref<512x1536xbf16, #tpu.memory_space<vmem>>, vector<512x1536xbf16>
    %c0_30 = arith.constant 0 : index
    %c0_31 = arith.constant 0 : index
    %53 = vector.load %arg9[%c0_30, %c0_31] : memref<1x1536xf32, #tpu.memory_space<vmem>>, vector<1x1536xf32>
    %c0_32 = arith.constant 0 : index
    %c0_33 = arith.constant 0 : index
    %54 = vector.load %arg10[%c0_32, %c0_33] : memref<1x1536xf32, #tpu.memory_space<vmem>>, vector<1x1536xf32>
    %55 = arith.truncf %50 : vector<16x512xf32> to vector<16x512xbf16>
    %cst_34 = arith.constant dense<0.000000e+00> : vector<16x1536xf32>
    %56 = tpu.matmul %55, %51, %cst_34 {dimension_numbers = #tpu.dot_dimension_numbers<[1], [0], [0], [1], [0, 0, 1, 1], [], []>} : vector<16x512xbf16>, vector<512x1536xbf16>, vector<16x1536xf32> -> vector<16x1536xf32>
    %57 = vector.broadcast %53 : vector<1x1536xf32> to vector<16x1536xf32>
    %58 = arith.addf %56, %57 : vector<16x1536xf32>
    %59 = arith.truncf %8 : vector<16x512xf32> to vector<16x512xbf16>
    %cst_35 = arith.constant dense<0.000000e+00> : vector<16x1536xf32>
    %60 = tpu.matmul %59, %52, %cst_35 {dimension_numbers = #tpu.dot_dimension_numbers<[1], [0], [0], [1], [0, 0, 1, 1], [], []>} : vector<16x512xbf16>, vector<512x1536xbf16>, vector<16x1536xf32> -> vector<16x1536xf32>
    %61 = vector.broadcast %54 : vector<1x1536xf32> to vector<16x1536xf32>
    %62 = arith.addf %60, %61 : vector<16x1536xf32>
    %63 = vector.extract_strided_slice %58 {offsets = [0, 0], sizes = [16, 512], strides = [1, 1]} : vector<16x1536xf32> to vector<16x512xf32>
    %64 = vector.extract_strided_slice %62 {offsets = [0, 0], sizes = [16, 512], strides = [1, 1]} : vector<16x1536xf32> to vector<16x512xf32>
    %65 = arith.addf %63, %64 : vector<16x512xf32>
    %66 = arith.negf %65 : vector<16x512xf32>
    %67 = math.exp %66 : vector<16x512xf32>
    %cst_36 = arith.constant 1.000000e+00 : f32
    %68 = vector.broadcast %cst_36 : f32 to vector<16x512xf32>
    %69 = arith.addf %68, %67 : vector<16x512xf32>
    %70 = arith.divf %68, %69 : vector<16x512xf32>
    %71 = vector.extract_strided_slice %58 {offsets = [0, 512], sizes = [16, 512], strides = [1, 1]} : vector<16x1536xf32> to vector<16x512xf32>
    %72 = vector.extract_strided_slice %62 {offsets = [0, 512], sizes = [16, 512], strides = [1, 1]} : vector<16x1536xf32> to vector<16x512xf32>
    %73 = arith.addf %71, %72 : vector<16x512xf32>
    %74 = arith.negf %73 : vector<16x512xf32>
    %75 = math.exp %74 : vector<16x512xf32>
    %cst_37 = arith.constant 1.000000e+00 : f32
    %76 = vector.broadcast %cst_37 : f32 to vector<16x512xf32>
    %77 = arith.addf %76, %75 : vector<16x512xf32>
    %78 = arith.divf %76, %77 : vector<16x512xf32>
    %79 = vector.extract_strided_slice %58 {offsets = [0, 1024], sizes = [16, 512], strides = [1, 1]} : vector<16x1536xf32> to vector<16x512xf32>
    %80 = vector.extract_strided_slice %62 {offsets = [0, 1024], sizes = [16, 512], strides = [1, 1]} : vector<16x1536xf32> to vector<16x512xf32>
    %81 = arith.mulf %70, %80 : vector<16x512xf32>
    %82 = arith.addf %79, %81 : vector<16x512xf32>
    %83 = math.tanh %82 : vector<16x512xf32>
    %cst_38 = arith.constant 1.000000e+00 : f32
    %84 = vector.broadcast %cst_38 : f32 to vector<16x512xf32>
    %85 = arith.subf %84, %78 : vector<16x512xf32>
    %86 = arith.mulf %85, %83 : vector<16x512xf32>
    %87 = arith.mulf %78, %8 : vector<16x512xf32>
    %88 = arith.addf %86, %87 : vector<16x512xf32>
    %c0_39 = arith.constant 0 : index
    %c0_40 = arith.constant 0 : index
    %89 = vector.load %arg11[%c0_39, %c0_40] : memref<512x1536xbf16, #tpu.memory_space<vmem>>, vector<512x1536xbf16>
    %c0_41 = arith.constant 0 : index
    %c0_42 = arith.constant 0 : index
    %90 = vector.load %arg12[%c0_41, %c0_42] : memref<512x1536xbf16, #tpu.memory_space<vmem>>, vector<512x1536xbf16>
    %c0_43 = arith.constant 0 : index
    %c0_44 = arith.constant 0 : index
    %91 = vector.load %arg13[%c0_43, %c0_44] : memref<1x1536xf32, #tpu.memory_space<vmem>>, vector<1x1536xf32>
    %c0_45 = arith.constant 0 : index
    %c0_46 = arith.constant 0 : index
    %92 = vector.load %arg14[%c0_45, %c0_46] : memref<1x1536xf32, #tpu.memory_space<vmem>>, vector<1x1536xf32>
    %93 = arith.truncf %88 : vector<16x512xf32> to vector<16x512xbf16>
    %cst_47 = arith.constant dense<0.000000e+00> : vector<16x1536xf32>
    %94 = tpu.matmul %93, %89, %cst_47 {dimension_numbers = #tpu.dot_dimension_numbers<[1], [0], [0], [1], [0, 0, 1, 1], [], []>} : vector<16x512xbf16>, vector<512x1536xbf16>, vector<16x1536xf32> -> vector<16x1536xf32>
    %95 = vector.broadcast %91 : vector<1x1536xf32> to vector<16x1536xf32>
    %96 = arith.addf %94, %95 : vector<16x1536xf32>
    %97 = arith.truncf %10 : vector<16x512xf32> to vector<16x512xbf16>
    %cst_48 = arith.constant dense<0.000000e+00> : vector<16x1536xf32>
    %98 = tpu.matmul %97, %90, %cst_48 {dimension_numbers = #tpu.dot_dimension_numbers<[1], [0], [0], [1], [0, 0, 1, 1], [], []>} : vector<16x512xbf16>, vector<512x1536xbf16>, vector<16x1536xf32> -> vector<16x1536xf32>
    %99 = vector.broadcast %92 : vector<1x1536xf32> to vector<16x1536xf32>
    %100 = arith.addf %98, %99 : vector<16x1536xf32>
    %101 = vector.extract_strided_slice %96 {offsets = [0, 0], sizes = [16, 512], strides = [1, 1]} : vector<16x1536xf32> to vector<16x512xf32>
    %102 = vector.extract_strided_slice %100 {offsets = [0, 0], sizes = [16, 512], strides = [1, 1]} : vector<16x1536xf32> to vector<16x512xf32>
    %103 = arith.addf %101, %102 : vector<16x512xf32>
    %104 = arith.negf %103 : vector<16x512xf32>
    %105 = math.exp %104 : vector<16x512xf32>
    %cst_49 = arith.constant 1.000000e+00 : f32
    %106 = vector.broadcast %cst_49 : f32 to vector<16x512xf32>
    %107 = arith.addf %106, %105 : vector<16x512xf32>
    %108 = arith.divf %106, %107 : vector<16x512xf32>
    %109 = vector.extract_strided_slice %96 {offsets = [0, 512], sizes = [16, 512], strides = [1, 1]} : vector<16x1536xf32> to vector<16x512xf32>
    %110 = vector.extract_strided_slice %100 {offsets = [0, 512], sizes = [16, 512], strides = [1, 1]} : vector<16x1536xf32> to vector<16x512xf32>
    %111 = arith.addf %109, %110 : vector<16x512xf32>
    %112 = arith.negf %111 : vector<16x512xf32>
    %113 = math.exp %112 : vector<16x512xf32>
    %cst_50 = arith.constant 1.000000e+00 : f32
    %114 = vector.broadcast %cst_50 : f32 to vector<16x512xf32>
    %115 = arith.addf %114, %113 : vector<16x512xf32>
    %116 = arith.divf %114, %115 : vector<16x512xf32>
    %117 = vector.extract_strided_slice %96 {offsets = [0, 1024], sizes = [16, 512], strides = [1, 1]} : vector<16x1536xf32> to vector<16x512xf32>
    %118 = vector.extract_strided_slice %100 {offsets = [0, 1024], sizes = [16, 512], strides = [1, 1]} : vector<16x1536xf32> to vector<16x512xf32>
    %119 = arith.mulf %108, %118 : vector<16x512xf32>
    %120 = arith.addf %117, %119 : vector<16x512xf32>
    %121 = math.tanh %120 : vector<16x512xf32>
    %cst_51 = arith.constant 1.000000e+00 : f32
    %122 = vector.broadcast %cst_51 : f32 to vector<16x512xf32>
    %123 = arith.subf %122, %116 : vector<16x512xf32>
    %124 = arith.mulf %123, %121 : vector<16x512xf32>
    %125 = arith.mulf %116, %10 : vector<16x512xf32>
    %126 = arith.addf %124, %125 : vector<16x512xf32>
    %127 = arith.truncf %126 : vector<16x512xf32> to vector<16x512xbf16>
    %cst_52 = arith.constant dense<0.000000e+00> : vector<16x128xf32>
    %128 = tpu.matmul %127, %3, %cst_52 {dimension_numbers = #tpu.dot_dimension_numbers<[1], [0], [0], [1], [0, 0, 1, 1], [], []>} : vector<16x512xbf16>, vector<512x128xbf16>, vector<16x128xf32> -> vector<16x128xf32>
    %129 = vector.broadcast %4 : vector<1x128xf32> to vector<16x128xf32>
    %130 = arith.addf %128, %129 : vector<16x128xf32>
    %131 = arith.index_cast %c0_i32_11 : i32 to index
    %c0_53 = arith.constant 0 : index
    %c0_54 = arith.constant 0 : index
    %132 = vector.load %arg17[%131, %c0_53, %c0_54] : memref<1x16x128xf32, #tpu.memory_space<vmem>>, vector<1x16x128xf32>
    %133 = vector.shape_cast %132 : vector<1x16x128xf32> to vector<16x128xf32>
    %134 = vector.shape_cast %130 : vector<16x128xf32> to vector<1x16x128xf32>
    tpu.vector_store %arg17[%131, %c0_53, %c0_54], %134 {strides = array<i32>} : memref<1x16x128xf32, #tpu.memory_space<vmem>>, vector<1x16x128xf32>,
    %c1_i32 = arith.constant 1 : i32
    %c0_55 = arith.constant 0 : index
    %c0_56 = arith.constant 0 : index
    %c0_57 = arith.constant 0 : index
    %135 = vector.load %arg18[%c0_55, %c0_56, %c0_57] : memref<3x16x512xf32, #tpu.memory_space<vmem>>, vector<1x16x512xf32>
    %136 = vector.shape_cast %135 : vector<1x16x512xf32> to vector<16x512xf32>
    %137 = vector.shape_cast %50 : vector<16x512xf32> to vector<1x16x512xf32>
    tpu.vector_store %arg18[%c0_55, %c0_56, %c0_57], %137 {strides = array<i32>} : memref<3x16x512xf32, #tpu.memory_space<vmem>>, vector<1x16x512xf32>,
    %c1_58 = arith.constant 1 : index
    %c0_59 = arith.constant 0 : index
    %c0_60 = arith.constant 0 : index
    %138 = vector.load %arg18[%c1_58, %c0_59, %c0_60] : memref<3x16x512xf32, #tpu.memory_space<vmem>>, vector<1x16x512xf32>
    %139 = vector.shape_cast %138 : vector<1x16x512xf32> to vector<16x512xf32>
    %140 = vector.shape_cast %88 : vector<16x512xf32> to vector<1x16x512xf32>
    tpu.vector_store %arg18[%c1_58, %c0_59, %c0_60], %140 {strides = array<i32>} : memref<3x16x512xf32, #tpu.memory_space<vmem>>, vector<1x16x512xf32>,
    %c2_61 = arith.constant 2 : index
    %c0_62 = arith.constant 0 : index
    %c0_63 = arith.constant 0 : index
    %141 = vector.load %arg18[%c2_61, %c0_62, %c0_63] : memref<3x16x512xf32, #tpu.memory_space<vmem>>, vector<1x16x512xf32>
    %142 = vector.shape_cast %141 : vector<1x16x512xf32> to vector<16x512xf32>
    %143 = vector.shape_cast %126 : vector<16x512xf32> to vector<1x16x512xf32>
    tpu.vector_store %arg18[%c2_61, %c0_62, %c0_63], %143 {strides = array<i32>} : memref<3x16x512xf32, #tpu.memory_space<vmem>>, vector<1x16x512xf32>,
    return
  }
  func.func @transform_0(%arg0: i32) -> (i32, i32, i32) {
    %c0_i32 = arith.constant 0 : i32
    %c0_i32_0 = arith.constant 0 : i32
    %c0_i32_1 = arith.constant 0 : i32
    return %arg0, %c0_i32, %c0_i32_0 : i32, i32, i32
  }
  func.func @transform_1(%arg0: i32) -> (i32, i32, i32) {
    %c0_i32 = arith.constant 0 : i32
    %c0_i32_0 = arith.constant 0 : i32
    %c0_i32_1 = arith.constant 0 : i32
    %c0_i32_2 = arith.constant 0 : i32
    return %c0_i32, %c0_i32_0, %c0_i32_1 : i32, i32, i32
  }
  func.func @transform_2(%arg0: i32) -> (i32, i32) {
    %c0_i32 = arith.constant 0 : i32
    %c0_i32_0 = arith.constant 0 : i32
    %c0_i32_1 = arith.constant 0 : i32
    return %c0_i32, %c0_i32_0 : i32, i32
  }
  func.func @transform_3(%arg0: i32) -> (i32, i32) {
    %c0_i32 = arith.constant 0 : i32
    %c0_i32_0 = arith.constant 0 : i32
    %c0_i32_1 = arith.constant 0 : i32
    return %c0_i32, %c0_i32_0 : i32, i32
  }
  func.func @transform_4(%arg0: i32) -> (i32, i32) {
    %c0_i32 = arith.constant 0 : i32
    %c0_i32_0 = arith.constant 0 : i32
    %c0_i32_1 = arith.constant 0 : i32
    return %c0_i32, %c0_i32_0 : i32, i32
  }
  func.func @transform_5(%arg0: i32) -> (i32, i32) {
    %c0_i32 = arith.constant 0 : i32
    %c0_i32_0 = arith.constant 0 : i32
    %c0_i32_1 = arith.constant 0 : i32
    return %c0_i32, %c0_i32_0 : i32, i32
  }
  func.func @transform_6(%arg0: i32) -> (i32, i32) {
    %c0_i32 = arith.constant 0 : i32
    %c0_i32_0 = arith.constant 0 : i32
    %c0_i32_1 = arith.constant 0 : i32
    return %c0_i32, %c0_i32_0 : i32, i32
  }
  func.func @transform_7(%arg0: i32) -> (i32, i32) {
    %c0_i32 = arith.constant 0 : i32
    %c0_i32_0 = arith.constant 0 : i32
    %c0_i32_1 = arith.constant 0 : i32
    return %c0_i32, %c0_i32_0 : i32, i32
  }
  func.func @transform_8(%arg0: i32) -> (i32, i32) {
    %c0_i32 = arith.constant 0 : i32
    %c0_i32_0 = arith.constant 0 : i32
    %c0_i32_1 = arith.constant 0 : i32
    return %c0_i32, %c0_i32_0 : i32, i32
  }
  func.func @transform_9(%arg0: i32) -> (i32, i32) {
    %c0_i32 = arith.constant 0 : i32
    %c0_i32_0 = arith.constant 0 : i32
    %c0_i32_1 = arith.constant 0 : i32
    return %c0_i32, %c0_i32_0 : i32, i32
  }
  func.func @transform_10(%arg0: i32) -> (i32, i32) {
    %c0_i32 = arith.constant 0 : i32
    %c0_i32_0 = arith.constant 0 : i32
    %c0_i32_1 = arith.constant 0 : i32
    return %c0_i32, %c0_i32_0 : i32, i32
  }
  func.func @transform_11(%arg0: i32) -> (i32, i32) {
    %c0_i32 = arith.constant 0 : i32
    %c0_i32_0 = arith.constant 0 : i32
    %c0_i32_1 = arith.constant 0 : i32
    return %c0_i32, %c0_i32_0 : i32, i32
  }
  func.func @transform_12(%arg0: i32) -> (i32, i32) {
    %c0_i32 = arith.constant 0 : i32
    %c0_i32_0 = arith.constant 0 : i32
    %c0_i32_1 = arith.constant 0 : i32
    return %c0_i32, %c0_i32_0 : i32, i32
  }
  func.func @transform_13(%arg0: i32) -> (i32, i32) {
    %c0_i32 = arith.constant 0 : i32
    %c0_i32_0 = arith.constant 0 : i32
    %c0_i32_1 = arith.constant 0 : i32
    return %c0_i32, %c0_i32_0 : i32, i32
  }
  func.func @transform_14(%arg0: i32) -> (i32, i32) {
    %c0_i32 = arith.constant 0 : i32
    %c0_i32_0 = arith.constant 0 : i32
    %c0_i32_1 = arith.constant 0 : i32
    return %c0_i32, %c0_i32_0 : i32, i32
  }
  func.func @transform_15(%arg0: i32) -> (i32, i32) {
    %c0_i32 = arith.constant 0 : i32
    %c0_i32_0 = arith.constant 0 : i32
    %c0_i32_1 = arith.constant 0 : i32
    return %c0_i32, %c0_i32_0 : i32, i32
  }
  func.func @transform_16(%arg0: i32) -> (i32, i32, i32) {
    %c0_i32 = arith.constant 0 : i32
    %c0_i32_0 = arith.constant 0 : i32
    %c0_i32_1 = arith.constant 0 : i32
    return %arg0, %c0_i32, %c0_i32_0 : i32, i32, i32
  }
  func.func @transform_17(%arg0: i32) -> (i32, i32, i32) {
    %c0_i32 = arith.constant 0 : i32
    %c0_i32_0 = arith.constant 0 : i32
    %c0_i32_1 = arith.constant 0 : i32
    %c0_i32_2 = arith.constant 0 : i32
    return %c0_i32, %c0_i32_0, %c0_i32_1 : i32, i32, i32
  }
}

</mosaic_0001>

<bundles_post_ra>
// kernel: multi_gru_forward.1
= control target key start
LH: loop header
LB: loop body
LE: loop exit
PB: predicated region body
PF: predicated region fallthrough
CT: control target
= control target key end

     0   :  { %s23691_s0 = inlined_call_operand.vmem [shape: bf16[1,16,128], index: 0, kind: input, shape index: {}]   ;;  %s23692_s1 = inlined_call_operand.vmem [shape: f32[3,16,512], index: 1, kind: input, shape index: {}]   ;;  %s23693_s2 = inlined_call_operand.hbm [shape: bf16[128,1536], index: 2, kind: input, shape index: {}]   ;;  %s23694_s3 = inlined_call_operand.hbm [shape: bf16[512,1536], index: 3, kind: input, shape index: {}]   ;;  %s23695_s4 = inlined_call_operand.hbm [shape: f32[1,1536], index: 4, kind: input, shape index: {}]   ;;  %s23696_s5 = inlined_call_operand.hbm [shape: f32[1,1536], index: 5, kind: input, shape index: {}]   ;;  %s23697_s6 = inlined_call_operand.hbm [shape: bf16[512,1536], index: 6, kind: input, shape index: {}]   ;;  %s23698_s7 = inlined_call_operand.hbm [shape: bf16[512,1536], index: 7, kind: input, shape index: {}]   ;;  %s23699_s8 = inlined_call_operand.hbm [shape: f32[1,1536], index: 8, kind: input, shape index: {}]   ;;  %s23700_s9 = inlined_call_operand.hbm [shape: f32[1,1536], index: 9, kind: input, shape index: {}]   ;;  %s23701_s10 = inlined_call_operand.hbm [shape: bf16[512,1536], index: 10, kind: input, shape index: {}]   ;;  %s23702_s11 = inlined_call_operand.hbm [shape: bf16[512,1536], index: 11, kind: input, shape index: {}]   ;;  %s23703_s12 = inlined_call_operand.hbm [shape: f32[1,1536], index: 12, kind: input, shape index: {}]   ;;  %s23704_s13 = inlined_call_operand.hbm [shape: f32[1,1536], index: 13, kind: input, shape index: {}]   ;;  %s23705_s14 = inlined_call_operand.hbm [shape: bf16[512,128], index: 14, kind: input, shape index: {}]   ;;  %s23706_s15 = inlined_call_operand.hbm [shape: f32[1,128], index: 15, kind: input, shape index: {}]   ;;  %s23707_s16 = inlined_call_operand.vmem [shape: f32[1,16,128], index: 16, kind: output, shape index: {0}]   ;;  %s23708_s17 = inlined_call_operand.vmem [shape: f32[3,16,512], index: 17, kind: output, shape index: {1}]  }
   0x1   :  { %23710 = sst [smem:[#allocation32_spill]] %s23691_s0 }
   0x2   :  { %23711 = sst [smem:[#allocation33_spill]] %s23692_s1 }
   0x3   :  { %23 = vsyncpa [#allocation3], 0 }
   0x4   :  { %24 = vsyncpa [#allocation5], 0 }
   0x5   :  { %25 = vsyncpa [#allocation8], 0 }
   0x6   :  { %26 = vsyncpa [#allocation11], 0 }
   0x7   :  { %27 = vsyncpa [#allocation14], 0 }
   0x8   :  { %28 = vsyncpa [#allocation17], 0 }
   0x9   :  { %29 = vsyncpa [#allocation20], 0 }
   0xa   :  { %30 = vsyncpa [#allocation23], 0  ;;  %s22693_s24 = smov [#allocation4]   ;;  %s22694_s26 = smov [#allocation7]  }
   0xb   :  { %s52_s25 = sshll.u32 %s22693_s24, 4  ;;  %s75_s27 = sshll.u32 %s22694_s26, 4  ;;  %s53_s25 = int_to_ptr.vmem [resolvable:$true] %s52_s25  ;;  %s76_s27 = int_to_ptr.vmem [resolvable:$true] %s75_s27 }
   0xc   :  { %s22369_s0 = scalar_lea.hbm %s23694_s3, 49152 }
   0xd   :  { %p22370_p0 = scmp.ne.s32.totalorder %s23694_s3, %s22369_s0  ;;  %p22373_p1 = scmp.lt.u32.totalorder %s22369_s0, %s23694_s3 }
   0xf   :  { %p22375_p2 = pnand %p22373_p1, %p22370_p0 }
  0x11   :  { %22378 = shalt.err (!%p22375_p2)
}
  0x12   :  { %s22379_s20 = scalar_lea.vmem %s53_s25, 49152  ;;  %p22384_p4 = scmp.lt.s32.totalorder %s53_s25, %s53_s25 }
  0x13   :  { %p22380_p3 = scmp.ne.s32.totalorder %s53_s25, %s22379_s20  ;;  %p22385_p5 = scmp.lt.s32.totalorder %s22379_s20, %s22379_s20 }
  0x15   :  { %p22386_p6 = por %p22385_p5, %p22384_p4 }
  0x17   :  { %p22387_p7 = pnand %p22386_p6, %p22380_p3 }
  0x19   :  { %22390 = shalt.err (!%p22387_p7)
}
  0x1a   :  { %s22695_s21 = smov 768   ;;  %s22696_s22 = smov 48  }
  0x1b   :  { %58 = dma.hbm_to_vmem [thread:$0]  %s23694_s3, 49152, %s53_s25, [#allocation5], %s22695_s21, %s22695_s21, %s22696_s22  }
  0x1c   :  { %s22391_s29 = scalar_lea.hbm %s23696_s5, 192 }
  0x1d   :  { %p22392_p8 = scmp.ne.s32.totalorder %s23696_s5, %s22391_s29  ;;  %p22395_p9 = scmp.lt.u32.totalorder %s22391_s29, %s23696_s5 }
  0x1f   :  { %p22397_p10 = pnand %p22395_p9, %p22392_p8 }
  0x21   :  { %22400 = shalt.err (!%p22397_p10)
}
  0x22   :  { %s22401_s1 = scalar_lea.vmem %s76_s27, 192  ;;  %p22406_p12 = scmp.lt.s32.totalorder %s76_s27, %s76_s27 }
  0x23   :  { %p22402_p11 = scmp.ne.s32.totalorder %s76_s27, %s22401_s1  ;;  %p22407_p13 = scmp.lt.s32.totalorder %s22401_s1, %s22401_s1 }
  0x25   :  { %p22408_p0 = por %p22407_p13, %p22406_p12 }
  0x27   :  { %p22409_p1 = pnand %p22408_p0, %p22402_p11 }
  0x29   :  { %22412 = shalt.err (!%p22409_p1)
}
  0x2a   :  { %78 = dma.hbm_to_vmem [thread:$0]  %s23696_s5, 192, %s76_s27, [#allocation8]  }
  0x2b   :  { %s22697_s20 = smov [#allocation10]   ;;  %s22698_s24 = smov [#allocation13]  }
  0x2c   :  { %s96_s23 = sshll.u32 %s22697_s20, 4  ;;  %s119_s26 = sshll.u32 %s22698_s24, 4  ;;  %s97_s23 = int_to_ptr.vmem [resolvable:$true] %s96_s23  ;;  %s120_s26 = int_to_ptr.vmem [resolvable:$true] %s119_s26 }
  0x2d   :  { %s22413_s0 = scalar_lea.hbm %s23698_s7, 49152 }
  0x2e   :  { %p22414_p2 = scmp.ne.s32.totalorder %s23698_s7, %s22413_s0  ;;  %p22417_p3 = scmp.lt.u32.totalorder %s22413_s0, %s23698_s7 }
  0x30   :  { %p22419_p4 = pnand %p22417_p3, %p22414_p2 }
  0x32   :  { %22422 = shalt.err (!%p22419_p4)
}
  0x33   :  { %s22423_s5 = scalar_lea.vmem %s97_s23, 49152  ;;  %p22428_p6 = scmp.lt.s32.totalorder %s97_s23, %s97_s23 }
  0x34   :  { %p22424_p5 = scmp.ne.s32.totalorder %s97_s23, %s22423_s5  ;;  %p22429_p7 = scmp.lt.s32.totalorder %s22423_s5, %s22423_s5 }
  0x36   :  { %p22430_p8 = por %p22429_p7, %p22428_p6 }
  0x38   :  { %p22431_p9 = pnand %p22430_p8, %p22424_p5 }
  0x3a   :  { %22434 = shalt.err (!%p22431_p9)
}
  0x3b   :  { %102 = dma.hbm_to_vmem [thread:$0]  %s23698_s7, 49152, %s97_s23, [#allocation11], %s22695_s21, %s22695_s21, %s22696_s22  }
  0x3c   :  { %s22435_s24 = scalar_lea.hbm %s23700_s9, 192 }
  0x3d   :  { %p22436_p10 = scmp.ne.s32.totalorder %s23700_s9, %s22435_s24  ;;  %p22439_p11 = scmp.lt.u32.totalorder %s22435_s24, %s23700_s9 }
  0x3f   :  { %p22441_p12 = pnand %p22439_p11, %p22436_p10 }
  0x41   :  { %22444 = shalt.err (!%p22441_p12)
}
  0x42   :  { %s22445_s18 = scalar_lea.vmem %s120_s26, 192  ;;  %p22450_p0 = scmp.lt.s32.totalorder %s120_s26, %s120_s26 }
  0x43   :  { %p22446_p13 = scmp.ne.s32.totalorder %s120_s26, %s22445_s18  ;;  %p22451_p1 = scmp.lt.s32.totalorder %s22445_s18, %s22445_s18 }
  0x45   :  { %p22452_p2 = por %p22451_p1, %p22450_p0 }
  0x47   :  { %p22453_p3 = pnand %p22452_p2, %p22446_p13 }
  0x49   :  { %22456 = shalt.err (!%p22453_p3)
}
  0x4a   :  { %122 = dma.hbm_to_vmem [thread:$0]  %s23700_s9, 192, %s120_s26, [#allocation14]  }
  0x4b   :  { %s22699_s19 = smov [#allocation16]   ;;  %s22700_s5 = smov [#allocation19]  }
  0x4c   :  { %s140_s1 = sshll.u32 %s22699_s19, 4  ;;  %s163_s27 = sshll.u32 %s22700_s5, 4  ;;  %s141_s1 = int_to_ptr.vmem [resolvable:$true] %s140_s1  ;;  %s164_s27 = int_to_ptr.vmem [resolvable:$true] %s163_s27 }
  0x4d   :  { %s22457_s20 = scalar_lea.hbm %s23702_s11, 49152 }
  0x4e   :  { %p22458_p4 = scmp.ne.s32.totalorder %s23702_s11, %s22457_s20  ;;  %p22461_p5 = scmp.lt.u32.totalorder %s22457_s20, %s23702_s11 }
  0x50   :  { %p22463_p6 = pnand %p22461_p5, %p22458_p4 }
  0x52   :  { %22466 = shalt.err (!%p22463_p6)
}
  0x53   :  { %s22467_s9 = scalar_lea.vmem %s141_s1, 49152  ;;  %p22472_p8 = scmp.lt.s32.totalorder %s141_s1, %s141_s1 }
  0x54   :  { %p22468_p7 = scmp.ne.s32.totalorder %s141_s1, %s22467_s9  ;;  %p22473_p9 = scmp.lt.s32.totalorder %s22467_s9, %s22467_s9 }
  0x56   :  { %p22474_p10 = por %p22473_p9, %p22472_p8 }
  0x58   :  { %p22475_p11 = pnand %p22474_p10, %p22468_p7 }
  0x5a   :  { %22478 = shalt.err (!%p22475_p11)
}
  0x5b   :  { %146 = dma.hbm_to_vmem [thread:$0]  %s23702_s11, 49152, %s141_s1, [#allocation17], %s22695_s21, %s22695_s21, %s22696_s22  }
  0x5c   :  { %s22479_s23 = scalar_lea.hbm %s23704_s13, 192 }
  0x5d   :  { %p22480_p12 = scmp.ne.s32.totalorder %s23704_s13, %s22479_s23  ;;  %p22483_p13 = scmp.lt.u32.totalorder %s22479_s23, %s23704_s13 }
  0x5f   :  { %p22485_p0 = pnand %p22483_p13, %p22480_p12 }
  0x61   :  { %22488 = shalt.err (!%p22485_p0)
}
  0x62   :  { %s22489_s20 = scalar_lea.vmem %s164_s27, 192  ;;  %p22494_p2 = scmp.lt.s32.totalorder %s164_s27, %s164_s27 }
  0x63   :  { %p22490_p1 = scmp.ne.s32.totalorder %s164_s27, %s22489_s20  ;;  %p22495_p3 = scmp.lt.s32.totalorder %s22489_s20, %s22489_s20 }
  0x65   :  { %p22496_p4 = por %p22495_p3, %p22494_p2 }
  0x67   :  { %p22497_p5 = pnand %p22496_p4, %p22490_p1 }
  0x69   :  { %22500 = shalt.err (!%p22497_p5)
}
  0x6a   :  { %166 = dma.hbm_to_vmem [thread:$0]  %s23704_s13, 192, %s164_s27, [#allocation20]  }
  0x6b   :  { %s22701_s24 = smov [#allocation2]   ;;  %s22702_s29 = smov [#allocation6]  }
  0x6c   :  { %s40_s28 = sshll.u32 %s22701_s24, 4  ;;  %s65_s0 = sshll.u32 %s22702_s29, 4  ;;  %s41_s28 = int_to_ptr.vmem [resolvable:$true] %s40_s28  ;;  %s66_s0 = int_to_ptr.vmem [resolvable:$true] %s65_s0 }
  0x6d   :  { %s22501_s30 = scalar_lea.hbm %s23693_s2, 12288 }
  0x6e   :  { %p22502_p6 = scmp.ne.s32.totalorder %s23693_s2, %s22501_s30  ;;  %p22505_p7 = scmp.lt.u32.totalorder %s22501_s30, %s23693_s2 }
  0x70   :  { %p22507_p8 = pnand %p22505_p7, %p22502_p6 }
  0x72   :  { %22510 = shalt.err (!%p22507_p8)
}
  0x73   :  { %s22511_s13 = scalar_lea.vmem %s41_s28, 12288  ;;  %p22516_p10 = scmp.lt.s32.totalorder %s41_s28, %s41_s28 }
  0x74   :  { %p22512_p9 = scmp.ne.s32.totalorder %s41_s28, %s22511_s13  ;;  %p22517_p11 = scmp.lt.s32.totalorder %s22511_s13, %s22511_s13 }
  0x76   :  { %p22518_p12 = por %p22517_p11, %p22516_p10 }
  0x78   :  { %p22519_p13 = pnand %p22518_p12, %p22512_p9 }
  0x7a   :  { %22522 = shalt.err (!%p22519_p13)
}
  0x7b   :  { %46 = dma.hbm_to_vmem [thread:$0]  %s23693_s2, 12288, %s41_s28, [#allocation3], %s22695_s21, %s22695_s21, %s22696_s22  }
  0x7c   :  { %s22523_s20 = scalar_lea.hbm %s23695_s4, 192 }
  0x7d   :  { %p22524_p0 = scmp.ne.s32.totalorder %s23695_s4, %s22523_s20  ;;  %p22527_p1 = scmp.lt.u32.totalorder %s22523_s20, %s23695_s4 }
  0x7f   :  { %p22529_p2 = pnand %p22527_p1, %p22524_p0 }
  0x81   :  { %22532 = shalt.err (!%p22529_p2)
}
  0x82   :  { %s22533_s9 = scalar_lea.vmem %s66_s0, 192  ;;  %p22538_p4 = scmp.lt.s32.totalorder %s66_s0, %s66_s0 }
  0x83   :  { %p22534_p3 = scmp.ne.s32.totalorder %s66_s0, %s22533_s9  ;;  %p22539_p5 = scmp.lt.s32.totalorder %s22533_s9, %s22533_s9 }
  0x85   :  { %p22540_p6 = por %p22539_p5, %p22538_p4 }
  0x87   :  { %p22541_p7 = pnand %p22540_p6, %p22534_p3 }
  0x89   :  { %22544 = shalt.err (!%p22541_p7)
}
  0x8a   :  { %68 = dma.hbm_to_vmem [thread:$0]  %s23695_s4, 192, %s66_s0, [#allocation5]  }
  0x8b   :  { %s22703_s26 = smov [#allocation9]   ;;  %s22704_s18 = smov [#allocation12]  }
  0x8c   :  { %s84_s30 = sshll.u32 %s22703_s26, 4  ;;  %s109_s7 = sshll.u32 %s22704_s18, 4  ;;  %s85_s30 = int_to_ptr.vmem [resolvable:$true] %s84_s30  ;;  %s110_s7 = int_to_ptr.vmem [resolvable:$true] %s109_s7 }
  0x8d   :  { %s22545_s13 = scalar_lea.hbm %s23697_s6, 49152 }
  0x8e   :  { %p22546_p8 = scmp.ne.s32.totalorder %s23697_s6, %s22545_s13  ;;  %p22549_p9 = scmp.lt.u32.totalorder %s22545_s13, %s23697_s6 }
  0x90   :  { %p22551_p10 = pnand %p22549_p9, %p22546_p8 }
  0x92   :  { %22554 = shalt.err (!%p22551_p10)
}
  0x93   :  { %s22555_s4 = scalar_lea.vmem %s85_s30, 49152  ;;  %p22560_p12 = scmp.lt.s32.totalorder %s85_s30, %s85_s30 }
  0x94   :  { %p22556_p11 = scmp.ne.s32.totalorder %s85_s30, %s22555_s4  ;;  %p22561_p13 = scmp.lt.s32.totalorder %s22555_s4, %s22555_s4 }
  0x96   :  { %p22562_p0 = por %p22561_p13, %p22560_p12 }
  0x98   :  { %p22563_p1 = pnand %p22562_p0, %p22556_p11 }
  0x9a   :  { %22566 = shalt.err (!%p22563_p1)
}
  0x9b   :  { %90 = dma.hbm_to_vmem [thread:$0]  %s23697_s6, 49152, %s85_s30, [#allocation8], %s22695_s21, %s22695_s21, %s22696_s22  }
  0x9c   :  { %s22567_s24 = scalar_lea.hbm %s23699_s8, 192 }
  0x9d   :  { %p22568_p2 = scmp.ne.s32.totalorder %s23699_s8, %s22567_s24  ;;  %p22571_p3 = scmp.lt.u32.totalorder %s22567_s24, %s23699_s8 }
  0x9f   :  { %p22573_p4 = pnand %p22571_p3, %p22568_p2 }
  0xa1   :  { %22576 = shalt.err (!%p22573_p4)
}
  0xa2   :  { %s22577_s26 = scalar_lea.vmem %s110_s7, 192  ;;  %p22582_p6 = scmp.lt.s32.totalorder %s110_s7, %s110_s7 }
  0xa3   :  { %p22578_p5 = scmp.ne.s32.totalorder %s110_s7, %s22577_s26  ;;  %p22583_p7 = scmp.lt.s32.totalorder %s22577_s26, %s22577_s26 }
  0xa5   :  { %p22584_p8 = por %p22583_p7, %p22582_p6 }
  0xa7   :  { %p22585_p9 = pnand %p22584_p8, %p22578_p5 }
  0xa9   :  { %22588 = shalt.err (!%p22585_p9)
}
  0xaa   :  { %112 = dma.hbm_to_vmem [thread:$0]  %s23699_s8, 192, %s110_s7, [#allocation11]  }
  0xab   :  { %s22705_s18 = smov [#allocation15]   ;;  %s22706_s19 = smov [#allocation18]  }
  0xac   :  { %s128_s23 = sshll.u32 %s22705_s18, 4  ;;  %s153_s13 = sshll.u32 %s22706_s19, 4  ;;  %s129_s23 = int_to_ptr.vmem [resolvable:$true] %s128_s23  ;;  %s154_s13 = int_to_ptr.vmem [resolvable:$true] %s153_s13 }
  0xad   :  { %s22589_s3 = scalar_lea.hbm %s23701_s10, 49152 }
  0xae   :  { %p22590_p10 = scmp.ne.s32.totalorder %s23701_s10, %s22589_s3  ;;  %p22593_p11 = scmp.lt.u32.totalorder %s22589_s3, %s23701_s10 }
  0xb0   :  { %p22595_p12 = pnand %p22593_p11, %p22590_p10 }
  0xb2   :  { %22598 = shalt.err (!%p22595_p12)
}
  0xb3   :  { %s22599_s8 = scalar_lea.vmem %s129_s23, 49152  ;;  %p22604_p0 = scmp.lt.s32.totalorder %s129_s23, %s129_s23 }
  0xb4   :  { %p22600_p13 = scmp.ne.s32.totalorder %s129_s23, %s22599_s8  ;;  %p22605_p1 = scmp.lt.s32.totalorder %s22599_s8, %s22599_s8 }
  0xb6   :  { %p22606_p2 = por %p22605_p1, %p22604_p0 }
  0xb8   :  { %p22607_p3 = pnand %p22606_p2, %p22600_p13 }
  0xba   :  { %22610 = shalt.err (!%p22607_p3)
}
  0xbb   :  { %134 = dma.hbm_to_vmem [thread:$0]  %s23701_s10, 49152, %s129_s23, [#allocation14], %s22695_s21, %s22695_s21, %s22696_s22  }
  0xbc   :  { %s22611_s29 = scalar_lea.hbm %s23703_s12, 192 }
  0xbd   :  { %p22612_p4 = scmp.ne.s32.totalorder %s23703_s12, %s22611_s29  ;;  %p22615_p5 = scmp.lt.u32.totalorder %s22611_s29, %s23703_s12 }
  0xbf   :  { %p22617_p6 = pnand %p22615_p5, %p22612_p4 }
  0xc1   :  { %22620 = shalt.err (!%p22617_p6)
}
  0xc2   :  { %s22621_s6 = scalar_lea.vmem %s154_s13, 192  ;;  %p22626_p8 = scmp.lt.s32.totalorder %s154_s13, %s154_s13 }
  0xc3   :  { %p22622_p7 = scmp.ne.s32.totalorder %s154_s13, %s22621_s6  ;;  %p22627_p9 = scmp.lt.s32.totalorder %s22621_s6, %s22621_s6 }
  0xc5   :  { %p22628_p10 = por %p22627_p9, %p22626_p8 }
  0xc7   :  { %p22629_p11 = pnand %p22628_p10, %p22622_p7 }
  0xc9   :  { %22632 = shalt.err (!%p22629_p11)
}
  0xca   :  { %156 = dma.hbm_to_vmem [thread:$0]  %s23703_s12, 192, %s154_s13, [#allocation17]  }
  0xcb   :  { %s22707_s22 = smov [#allocation21]   ;;  %s22633_s19 = scalar_lea.hbm %s23705_s14, 4096 }
  0xcc   :  { %s172_s30 = sshll.u32 %s22707_s22, 4  ;;  %p22634_p12 = scmp.ne.s32.totalorder %s23705_s14, %s22633_s19  ;;  %s173_s30 = int_to_ptr.vmem [resolvable:$true] %s172_s30 }
  0xcd   :  { %p22637_p13 = scmp.lt.u32.totalorder %s22633_s19, %s23705_s14 }
  0xcf   :  { %p22639_p0 = pnand %p22637_p13, %p22634_p12 }
  0xd1   :  { %22642 = shalt.err (!%p22639_p0)
}
  0xd2   :  { %s22643_s4 = scalar_lea.vmem %s173_s30, 4096  ;;  %p22648_p2 = scmp.lt.s32.totalorder %s173_s30, %s173_s30 }
  0xd3   :  { %p22644_p1 = scmp.ne.s32.totalorder %s173_s30, %s22643_s4  ;;  %p22649_p3 = scmp.lt.s32.totalorder %s22643_s4, %s22643_s4 }
  0xd5   :  { %p22650_p4 = por %p22649_p3, %p22648_p2 }
  0xd7   :  { %p22651_p5 = pnand %p22650_p4, %p22644_p1 }
  0xd9   :  { %22654 = shalt.err (!%p22651_p5)
}
  0xda   :  { %s22708_s12 = smov 64   ;;  %s22709_s13 = smov 4  }
  0xdb   :  { %178 = dma.hbm_to_vmem [thread:$0]  %s23705_s14, 4096, %s173_s30, [#allocation20], %s22708_s12, %s22708_s12, %s22709_s13  }
  0xdc   :  { %s22710_s8 = smov [#allocation22]   ;;  %s22655_s24 = scalar_lea.hbm %s23706_s15, 16 }
  0xdd   :  { %s185_s7 = sshll.u32 %s22710_s8, 4  ;;  %p22656_p6 = scmp.ne.s32.totalorder %s23706_s15, %s22655_s24  ;;  %s186_s7 = int_to_ptr.vmem [resolvable:$true] %s185_s7 }
  0xde   :  { %p22659_p7 = scmp.lt.u32.totalorder %s22655_s24, %s23706_s15 }
  0xe0   :  { %p22661_p8 = pnand %p22659_p7, %p22656_p6 }
  0xe2   :  { %22664 = shalt.err (!%p22661_p8)
}
  0xe3   :  { %s22665_s26 = scalar_lea.vmem %s186_s7, 16  ;;  %s22669_s14 = scalar_lea.vmem %s186_s7, 32 }
  0xe4   :  { %p22666_p9 = scmp.ne.s32.totalorder %s186_s7, %s22665_s26  ;;  %p22670_p10 = scmp.lt.s32.totalorder %s186_s7, %s186_s7 }
  0xe5   :  { %p22671_p11 = scmp.lt.s32.totalorder %s22669_s14, %s22665_s26 }
  0xe7   :  { %p22672_p12 = por %p22671_p11, %p22670_p10 }
  0xe9   :  { %p22673_p13 = pnand %p22672_p12, %p22666_p9 }
  0xeb   :  { %22676 = shalt.err (!%p22673_p13)
}
  0xec   :  { %188 = dma.hbm_to_vmem [thread:$0]  %s23706_s15, 16, %s186_s7, [#allocation23]  }
  0xed   :  { %22677 = dma.done.wait [#allocation3], 12288  }
  0xee   :  { %22678 = vsyncadd [#allocation3], 4294955008 }
  0xef   :  { %22679 = dma.done.wait [#allocation5], 49344  }
  0xf0   :  { %22680 = vsyncadd [#allocation5], 4294917952 }
  0xf1   :  { %22681 = dma.done.wait [#allocation8], 49344  }
  0xf2   :  { %22682 = vsyncadd [#allocation8], 4294917952 }
  0xf3   :  { %22683 = dma.done.wait [#allocation11], 49344  }
  0xf4   :  { %22684 = vsyncadd [#allocation11], 4294917952 }
  0xf5   :  { %22685 = dma.done.wait [#allocation14], 49344  }
  0xf6   :  { %22686 = vsyncadd [#allocation14], 4294917952 }
  0xf7   :  { %22687 = dma.done.wait [#allocation17], 49344  }
  0xf8   :  { %22688 = vsyncadd [#allocation17], 4294917952 }
  0xf9   :  { %22689 = dma.done.wait [#allocation20], 4288  }
  0xfa   :  { %22690 = vsyncadd [#allocation20], 4294963008 }
  0xfb   :  { %22691 = dma.done.wait [#allocation23], 16  }
  0xfc   :  { %22692 = vsyncadd [#allocation23], 4294967280  ;;  %v22711_v0 = vmov 0   ;;  %v19048_v1 = vld [vmem:[#allocation2 + $0x4] ss:$48 sps:$4 sm:$0xff]   ;;  %s23712_s22 = sld [smem:[#allocation32_spill]] }
  0xfd   :  { %1441 = vmatprep.mubr.bf16.mxu0 %v22711_v0  ;;  %1484 = vmatprep.mubr.bf16.mxu1 %v22711_v0  ;;  %v19050_v2 = vld [vmem:[#allocation2 + $0xc] ss:$48 sps:$4 sm:$0xff]   ;;  %v19052_v3 = vld [vmem:[#allocation2] ss:$48 sps:$4 sm:$0xff]   ;;  %v19053_v4 = vld [vmem:[#allocation2 + $0x8] ss:$48 sps:$4 sm:$0xff]  }
  0xfe   :  { %1409 = vmatprep.subr.bf16.mxu0 %v19048_v1  ;;  %1452 = vmatprep.subr.bf16.mxu1 %v19050_v2  ;;  %v19054_v5 = vld [vmem:[#allocation2 + $0x64] ss:$48 sps:$4 sm:$0xff]   ;;  %v19056_v6 = vld [vmem:[#allocation2 + $0x6c] ss:$48 sps:$4 sm:$0xff]   ;;  %v19058_v7 = vld [vmem:[#allocation2 + $0x60] ss:$48 sps:$4 sm:$0xff]  }
  0xff   :  { %1410 = vmatpush1.bf16.msra.mxu0 %v19052_v3  ;;  %1453 = vmatpush1.bf16.msra.mxu1 %v19053_v4  ;;  %v19059_v8 = vld [vmem:[#allocation2 + $0x68] ss:$48 sps:$4 sm:$0xff]   ;;  %v19060_v9 = vld [vmem:[#allocation2 + $0xc4] ss:$48 sps:$4 sm:$0xff]   ;;  %v19062_v10 = vld [vmem:[#allocation2 + $0xcc] ss:$48 sps:$4 sm:$0xff]  }
 0x100   :  { %1411 = vmatprep.subr.bf16.mxu0 %v19054_v5  ;;  %1454 = vmatprep.subr.bf16.mxu1 %v19056_v6  ;;  %v19064_v11 = vld [vmem:[#allocation2 + $0xc0] ss:$48 sps:$4 sm:$0xff]   ;;  %v19065_v12 = vld [vmem:[#allocation2 + $0xc8] ss:$48 sps:$4 sm:$0xff]   ;;  %v19066_v13 = vld [vmem:[#allocation2 + $0x124] ss:$48 sps:$4 sm:$0xff]  }
 0x101   :  { %v19068_v14 = vld [vmem:[#allocation2 + $0x12c] ss:$48 sps:$4 sm:$0xff]   ;;  %v19070_v15 = vld [vmem:[#allocation2 + $0x120] ss:$48 sps:$4 sm:$0xff]   ;;  %v19071_v16 = vld [vmem:[#allocation2 + $0x128] ss:$48 sps:$4 sm:$0xff]  }
 0x102   :  { %v19072_v17 = vld [vmem:[#allocation2 + $0x184] ss:$48 sps:$4 sm:$0xff]   ;;  %v19074_v18 = vld [vmem:[#allocation2 + $0x18c] ss:$48 sps:$4 sm:$0xff]   ;;  %v19076_v19 = vld [vmem:[#allocation2 + $0x180] ss:$48 sps:$4 sm:$0xff]  }
 0x103   :  { %1412 = vmatpush1.bf16.msra.mxu0 %v19058_v7  ;;  %1455 = vmatpush1.bf16.msra.mxu1 %v19059_v8  ;;  %v19077_v20 = vld [vmem:[#allocation2 + $0x188] ss:$48 sps:$4 sm:$0xff]   ;;  %v19078_v21 = vld [vmem:[#allocation2 + $0x1e4] ss:$48 sps:$4 sm:$0xff]   ;;  %v19080_v22 = vld [vmem:[#allocation2 + $0x1ec] ss:$48 sps:$4 sm:$0xff]  }
 0x104   :  { %1413 = vmatprep.subr.bf16.mxu0 %v19060_v9  ;;  %1456 = vmatprep.subr.bf16.mxu1 %v19062_v10  ;;  %v19082_v23 = vld [vmem:[#allocation2 + $0x1e0] ss:$48 sps:$4 sm:$0xff]   ;;  %v19083_v24 = vld [vmem:[#allocation2 + $0x1e8] ss:$48 sps:$4 sm:$0xff]   ;;  %v19084_v25 = vld [vmem:[#allocation2 + $0x244] ss:$48 sps:$4 sm:$0xff]  }
 0x105   :  { %v19086_v26 = vld [vmem:[#allocation2 + $0x24c] ss:$48 sps:$4 sm:$0xff]   ;;  %v19088_v27 = vld [vmem:[#allocation2 + $0x240] ss:$48 sps:$4 sm:$0xff]   ;;  %v19089_v28 = vld [vmem:[#allocation2 + $0x248] ss:$48 sps:$4 sm:$0xff]  }
 0x106   :  { %v19090_v29 = vld [vmem:[#allocation2 + $0x2a4] ss:$48 sps:$4 sm:$0xff]   ;;  %v19092_v30 = vld [vmem:[#allocation2 + $0x2ac] ss:$48 sps:$4 sm:$0xff]   ;;  %v19094_v31 = vld [vmem:[#allocation2 + $0x2a0] ss:$48 sps:$4 sm:$0xff]  }
 0x107   :  { %1414 = vmatpush1.bf16.msra.mxu0 %v19064_v11  ;;  %1457 = vmatpush1.bf16.msra.mxu1 %v19065_v12  ;;  %v19095_v32 = vld [vmem:[#allocation2 + $0x2a8] ss:$48 sps:$4 sm:$0xff]   ;;  %v19098_v33 = vld [vmem:[#allocation2 + $0x14] ss:$48 sps:$4 sm:$0xff]   ;;  %v19101_v34 = vld [vmem:[#allocation2 + $0x1c] ss:$48 sps:$4 sm:$0xff]  }
 0x108   :  { %1415 = vmatprep.subr.bf16.mxu0 %v19066_v13  ;;  %1458 = vmatprep.subr.bf16.mxu1 %v19068_v14  ;;  %v19096_v35 = vld [vmem:[#allocation2 + $0x10] ss:$48 sps:$4 sm:$0xff]   ;;  %v19099_v37 = vld [vmem:[#allocation2 + $0x18] ss:$48 sps:$4 sm:$0xff]   ;;  %v19105_v38 = vld [vmem:[#allocation2 + $0x74] ss:$48 sps:$4 sm:$0xff]  }
 0x109   :  { %v22993_v36 = vld [vmem:[%s23712_s22] sm:$0xff]   ;;  %v19108_v39 = vld [vmem:[#allocation2 + $0x7c] ss:$48 sps:$4 sm:$0xff]   ;;  %v19106_v41 = vld [vmem:[#allocation2 + $0x78] ss:$48 sps:$4 sm:$0xff]   ;;  %s23713_s23 = sld [smem:[#allocation33_spill]] }
 0x10a   :  { %v19103_v40 = vld [vmem:[#allocation2 + $0x70] ss:$48 sps:$4 sm:$0xff]   ;;  %v19111_v42 = vld [vmem:[#allocation2 + $0xd4] ss:$48 sps:$4 sm:$0xff]   ;;  %v19114_v43 = vld [vmem:[#allocation2 + $0xdc] ss:$48 sps:$4 sm:$0xff]  }
 0x10b   :  { %1416 = vmatpush1.bf16.msra.mxu0 %v19070_v15  ;;  %1459 = vmatpush1.bf16.msra.mxu1 %v19071_v16  ;;  %v19109_v44 = vld [vmem:[#allocation2 + $0xd0] ss:$48 sps:$4 sm:$0xff]   ;;  %v19112_v45 = vld [vmem:[#allocation2 + $0xd8] ss:$48 sps:$4 sm:$0xff]   ;;  %v19117_v46 = vld [vmem:[#allocation2 + $0x134] ss:$48 sps:$4 sm:$0xff]  }
 0x10c   :  { %1417 = vmatprep.subr.bf16.mxu0 %v19072_v17  ;;  %1460 = vmatprep.subr.bf16.mxu1 %v19074_v18  ;;  %v19120_v47 = vld [vmem:[#allocation2 + $0x13c] ss:$48 sps:$4 sm:$0xff]   ;;  %v19115_v48 = vld [vmem:[#allocation2 + $0x130] ss:$48 sps:$4 sm:$0xff]   ;;  %v19118_v49 = vld [vmem:[#allocation2 + $0x138] ss:$48 sps:$4 sm:$0xff]  }
 0x10d   :  { %v19123_v50 = vld [vmem:[#allocation2 + $0x194] ss:$48 sps:$4 sm:$0xff]   ;;  %v19126_v51 = vld [vmem:[#allocation2 + $0x19c] ss:$48 sps:$4 sm:$0xff]   ;;  %v19121_v52 = vld [vmem:[#allocation2 + $0x190] ss:$48 sps:$4 sm:$0xff]  }
 0x10e   :  { %v19124_v53 = vld [vmem:[#allocation2 + $0x198] ss:$48 sps:$4 sm:$0xff]   ;;  %v19129_v54 = vld [vmem:[#allocation2 + $0x1f4] ss:$48 sps:$4 sm:$0xff]   ;;  %v19132_v55 = vld [vmem:[#allocation2 + $0x1fc] ss:$48 sps:$4 sm:$0xff]  }
 0x10f   :  { %1418 = vmatpush1.bf16.msra.mxu0 %v19076_v19  ;;  %1461 = vmatpush1.bf16.msra.mxu1 %v19077_v20  ;;  %v19127_v56 = vld [vmem:[#allocation2 + $0x1f0] ss:$48 sps:$4 sm:$0xff]   ;;  %v19130_v57 = vld [vmem:[#allocation2 + $0x1f8] ss:$48 sps:$4 sm:$0xff]   ;;  %v19135_v58 = vld [vmem:[#allocation2 + $0x254] ss:$48 sps:$4 sm:$0xff]  }
 0x110   :  { %1419 = vmatprep.subr.bf16.mxu0 %v19078_v21  ;;  %1462 = vmatprep.subr.bf16.mxu1 %v19080_v22  ;;  %v19138_v59 = vld [vmem:[#allocation2 + $0x25c] ss:$48 sps:$4 sm:$0xff]   ;;  %v19133_v60 = vld [vmem:[#allocation2 + $0x250] ss:$48 sps:$4 sm:$0xff]   ;;  %v19136_v61 = vld [vmem:[#allocation2 + $0x258] ss:$48 sps:$4 sm:$0xff]  }
 0x111   :  { %v19141_v62 = vld [vmem:[#allocation2 + $0x2b4] ss:$48 sps:$4 sm:$0xff]   ;;  %v19144_v63 = vld [vmem:[#allocation2 + $0x2bc] ss:$48 sps:$4 sm:$0xff]   ;;  %v19139_v1 = vld [vmem:[#allocation2 + $0x2b0] ss:$48 sps:$4 sm:$0xff]  }
 0x112   :  { %v19142_v2 = vld [vmem:[#allocation2 + $0x2b8] ss:$48 sps:$4 sm:$0xff]   ;;  %v19147_v3 = vld [vmem:[#allocation2 + $0x24] ss:$48 sps:$4 sm:$0xff]   ;;  %v19150_v4 = vld [vmem:[#allocation2 + $0x2c] ss:$48 sps:$4 sm:$0xff]  }
 0x113   :  { %1420 = vmatpush1.bf16.msra.mxu0 %v19082_v23  ;;  %1463 = vmatpush1.bf16.msra.mxu1 %v19083_v24  ;;  %v19145_v5 = vld [vmem:[#allocation2 + $0x20] ss:$48 sps:$4 sm:$0xff]   ;;  %v19148_v6 = vld [vmem:[#allocation2 + $0x28] ss:$48 sps:$4 sm:$0xff]   ;;  %v19153_v7 = vld [vmem:[#allocation2 + $0x84] ss:$48 sps:$4 sm:$0xff]  }
 0x114   :  { %1421 = vmatprep.subr.bf16.mxu0 %v19084_v25  ;;  %1464 = vmatprep.subr.bf16.mxu1 %v19086_v26  ;;  %v19156_v8 = vld [vmem:[#allocation2 + $0x8c] ss:$48 sps:$4 sm:$0xff]   ;;  %v19151_v9 = vld [vmem:[#allocation2 + $0x80] ss:$48 sps:$4 sm:$0xff]   ;;  %v19154_v10 = vld [vmem:[#allocation2 + $0x88] ss:$48 sps:$4 sm:$0xff]  }
 0x115   :  { %v19159_v11 = vld [vmem:[#allocation2 + $0xe4] ss:$48 sps:$4 sm:$0xff]   ;;  %v19162_v12 = vld [vmem:[#allocation2 + $0xec] ss:$48 sps:$4 sm:$0xff]   ;;  %v19157_v13 = vld [vmem:[#allocation2 + $0xe0] ss:$48 sps:$4 sm:$0xff]  }
 0x116   :  { %v19160_v14 = vld [vmem:[#allocation2 + $0xe8] ss:$48 sps:$4 sm:$0xff]   ;;  %v19165_v15 = vld [vmem:[#allocation2 + $0x144] ss:$48 sps:$4 sm:$0xff]   ;;  %v19168_v16 = vld [vmem:[#allocation2 + $0x14c] ss:$48 sps:$4 sm:$0xff]  }
 0x117   :  { %1422 = vmatpush1.bf16.msra.mxu0 %v19088_v27  ;;  %1465 = vmatpush1.bf16.msra.mxu1 %v19089_v28  ;;  %v19163_v17 = vld [vmem:[#allocation2 + $0x140] ss:$48 sps:$4 sm:$0xff]   ;;  %v19166_v18 = vld [vmem:[#allocation2 + $0x148] ss:$48 sps:$4 sm:$0xff]   ;;  %v19171_v19 = vld [vmem:[#allocation2 + $0x1a4] ss:$48 sps:$4 sm:$0xff]  }
 0x118   :  { %1423 = vmatprep.subr.bf16.mxu0 %v19090_v29  ;;  %1466 = vmatprep.subr.bf16.mxu1 %v19092_v30  ;;  %v19174_v20 = vld [vmem:[#allocation2 + $0x1ac] ss:$48 sps:$4 sm:$0xff]   ;;  %v19169_v21 = vld [vmem:[#allocation2 + $0x1a0] ss:$48 sps:$4 sm:$0xff]   ;;  %v19177_v22 = vld [vmem:[#allocation2 + $0x204] ss:$48 sps:$4 sm:$0xff]  }
 0x119   :  { %v19180_v23 = vld [vmem:[#allocation2 + $0x20c] ss:$48 sps:$4 sm:$0xff]   ;;  %v19175_v24 = vld [vmem:[#allocation2 + $0x200] ss:$48 sps:$4 sm:$0xff]   ;;  %v19178_v25 = vld [vmem:[#allocation2 + $0x208] ss:$48 sps:$4 sm:$0xff]  }
 0x11a   :  { %v19183_v26 = vld [vmem:[#allocation2 + $0x264] ss:$48 sps:$4 sm:$0xff]   ;;  %v19186_v27 = vld [vmem:[#allocation2 + $0x26c] ss:$48 sps:$4 sm:$0xff]   ;;  %v19181_v28 = vld [vmem:[#allocation2 + $0x260] ss:$48 sps:$4 sm:$0xff]  }
 0x11b   :  { %1424 = vmatpush1.bf16.msra.mxu0 %v19094_v31  ;;  %1467 = vmatpush1.bf16.msra.mxu1 %v19095_v32  ;;  %v19184_v29 = vld [vmem:[#allocation2 + $0x268] ss:$48 sps:$4 sm:$0xff]   ;;  %v19189_v30 = vld [vmem:[#allocation2 + $0x2c4] ss:$48 sps:$4 sm:$0xff]   ;;  %v19192_v31 = vld [vmem:[#allocation2 + $0x2cc] ss:$48 sps:$4 sm:$0xff]  }
 0x11c   :  { %1495 = vmatprep.subr.bf16.mxu0 %v19098_v33  ;;  %1538 = vmatprep.subr.bf16.mxu1 %v19101_v34  ;;  %v19187_v32 = vld [vmem:[#allocation2 + $0x2c0] ss:$48 sps:$4 sm:$0xff]   ;;  %v19190_v33 = vld [vmem:[#allocation2 + $0x2c8] ss:$48 sps:$4 sm:$0xff]   ;;  %v19195_v34 = vld [vmem:[#allocation4 + $0x4] ss:$48 sps:$4 sm:$0xff]  }
 0x11e   :  { %1442 = vmatmul.mubr.bf16.vlgmr.msra.gmra.mrb[0].mxu0 %v22993_v36  ;;  %1485 = vmatmul.mubr.bf16.vlgmr.msra.gmra.mrb[0].mxu1 %v22993_v36 }
 0x11f   :  { %1496 = vmatpush1.bf16.msra.mxu0 %v19096_v35  ;;  %1539 = vmatpush1.bf16.msra.mxu1 %v19099_v37  ;;  %v19198_v35 = vld [vmem:[#allocation4 + $0xc] ss:$48 sps:$4 sm:$0xff]   ;;  %v19193_v37 = vld [vmem:[#allocation4] ss:$48 sps:$4 sm:$0xff]  }
 0x120   :  { %1497 = vmatprep.subr.bf16.mxu0 %v19105_v38  ;;  %1540 = vmatprep.subr.bf16.mxu1 %v19108_v39  ;;  %v19196_v38 = vld [vmem:[#allocation4 + $0x8] ss:$48 sps:$4 sm:$0xff]   ;;  %v19201_v39 = vld [vmem:[#allocation4 + $0x64] ss:$48 sps:$4 sm:$0xff]  }
 0x121   :  { %1527 = vmatprep.mubr.bf16.mxu0 %v22711_v0  ;;  %1570 = vmatprep.mubr.bf16.mxu1 %v22711_v0 }
 0x123   :  { %1498 = vmatpush1.bf16.msra.mxu0 %v19103_v40  ;;  %1541 = vmatpush1.bf16.msra.mxu1 %v19106_v41  ;;  %v19204_v40 = vld [vmem:[#allocation4 + $0x6c] ss:$48 sps:$4 sm:$0xff]   ;;  %v19199_v41 = vld [vmem:[#allocation4 + $0x60] ss:$48 sps:$4 sm:$0xff]  }
 0x124   :  { %1499 = vmatprep.subr.bf16.mxu0 %v19111_v42  ;;  %1542 = vmatprep.subr.bf16.mxu1 %v19114_v43  ;;  %v19202_v42 = vld [vmem:[#allocation4 + $0x68] ss:$48 sps:$4 sm:$0xff]   ;;  %v19207_v43 = vld [vmem:[#allocation4 + $0xc4] ss:$48 sps:$4 sm:$0xff]  }
 0x127   :  { %1500 = vmatpush1.bf16.msra.mxu0 %v19109_v44  ;;  %1543 = vmatpush1.bf16.msra.mxu1 %v19112_v45  ;;  %v19210_v44 = vld [vmem:[#allocation4 + $0xcc] ss:$48 sps:$4 sm:$0xff]   ;;  %v19205_v45 = vld [vmem:[#allocation4 + $0xc0] ss:$48 sps:$4 sm:$0xff]  }
 0x128   :  { %1501 = vmatprep.subr.bf16.mxu0 %v19117_v46  ;;  %1544 = vmatprep.subr.bf16.mxu1 %v19120_v47  ;;  %v19208_v46 = vld [vmem:[#allocation4 + $0xc8] ss:$48 sps:$4 sm:$0xff]   ;;  %v19213_v47 = vld [vmem:[#allocation4 + $0x124] ss:$48 sps:$4 sm:$0xff]  }
 0x12b   :  { %1502 = vmatpush1.bf16.msra.mxu0 %v19115_v48  ;;  %1545 = vmatpush1.bf16.msra.mxu1 %v19118_v49  ;;  %v19216_v48 = vld [vmem:[#allocation4 + $0x12c] ss:$48 sps:$4 sm:$0xff]   ;;  %v19211_v49 = vld [vmem:[#allocation4 + $0x120] ss:$48 sps:$4 sm:$0xff]  }
 0x12c   :  { %1503 = vmatprep.subr.bf16.mxu0 %v19123_v50  ;;  %1546 = vmatprep.subr.bf16.mxu1 %v19126_v51  ;;  %v19214_v50 = vld [vmem:[#allocation4 + $0x128] ss:$48 sps:$4 sm:$0xff]  }
 0x12d   :  { %v241_v51 = vld [vmem:[%s23713_s23 + $0x28] sm:$0xff] }
 0x12f   :  { %1504 = vmatpush1.bf16.msra.mxu0 %v19121_v52  ;;  %1547 = vmatpush1.bf16.msra.mxu1 %v19124_v53  ;;  %v19219_v52 = vld [vmem:[#allocation4 + $0x184] ss:$48 sps:$4 sm:$0xff]   ;;  %v19222_v53 = vld [vmem:[#allocation4 + $0x18c] ss:$48 sps:$4 sm:$0xff]  }
 0x130   :  { %1505 = vmatprep.subr.bf16.mxu0 %v19129_v54  ;;  %1548 = vmatprep.subr.bf16.mxu1 %v19132_v55  ;;  %v19217_v55 = vld [vmem:[#allocation4 + $0x180] ss:$48 sps:$4 sm:$0xff]  }
 0x133   :  { %1506 = vmatpush1.bf16.msra.mxu0 %v19127_v56  ;;  %1549 = vmatpush1.bf16.msra.mxu1 %v19130_v57  ;;  %v19220_v56 = vld [vmem:[#allocation4 + $0x188] ss:$48 sps:$4 sm:$0xff]   ;;  %v19225_v57 = vld [vmem:[#allocation4 + $0x1e4] ss:$48 sps:$4 sm:$0xff]  }
 0x134   :  { %1507 = vmatprep.subr.bf16.mxu0 %v19135_v58  ;;  %1550 = vmatprep.subr.bf16.mxu1 %v19138_v59  ;;  %v19228_v58 = vld [vmem:[#allocation4 + $0x1ec] ss:$48 sps:$4 sm:$0xff]   ;;  %v19223_v59 = vld [vmem:[#allocation4 + $0x1e0] ss:$48 sps:$4 sm:$0xff]  }
 0x137   :  { %1508 = vmatpush1.bf16.msra.mxu0 %v19133_v60  ;;  %1551 = vmatpush1.bf16.msra.mxu1 %v19136_v61  ;;  %v19226_v60 = vld [vmem:[#allocation4 + $0x1e8] ss:$48 sps:$4 sm:$0xff]   ;;  %v19231_v61 = vld [vmem:[#allocation4 + $0x244] ss:$48 sps:$4 sm:$0xff]  }
 0x138   :  { %1509 = vmatprep.subr.bf16.mxu0 %v19141_v62  ;;  %1552 = vmatprep.subr.bf16.mxu1 %v19144_v63  ;;  %v19234_v62 = vld [vmem:[#allocation4 + $0x24c] ss:$48 sps:$4 sm:$0xff]   ;;  %v19229_v63 = vld [vmem:[#allocation4 + $0x240] ss:$48 sps:$4 sm:$0xff]  }
 0x13b   :  { %1510 = vmatpush1.bf16.msra.mxu0 %v19139_v1  ;;  %1553 = vmatpush1.bf16.msra.mxu1 %v19142_v2  ;;  %v19232_v1 = vld [vmem:[#allocation4 + $0x248] ss:$48 sps:$4 sm:$0xff]   ;;  %v19237_v2 = vld [vmem:[#allocation4 + $0x2a4] ss:$48 sps:$4 sm:$0xff]  }
 0x13c   :  { %1581 = vmatprep.subr.bf16.mxu0 %v19147_v3  ;;  %1624 = vmatprep.subr.bf16.mxu1 %v19150_v4  ;;  %v19240_v3 = vld [vmem:[#allocation4 + $0x2ac] ss:$48 sps:$4 sm:$0xff]   ;;  %v19235_v4 = vld [vmem:[#allocation4 + $0x2a0] ss:$48 sps:$4 sm:$0xff]  }
 0x13e   :  { %1528 = vmatmul.mubr.bf16.vlgmr.msra.gmra.mrb[4].mxu0 %v22993_v36  ;;  %1571 = vmatmul.mubr.bf16.vlgmr.msra.gmra.mrb[4].mxu1 %v22993_v36 }
 0x13f   :  { %1582 = vmatpush1.bf16.msra.mxu0 %v19145_v5  ;;  %1625 = vmatpush1.bf16.msra.mxu1 %v19148_v6  ;;  %v19238_v5 = vld [vmem:[#allocation4 + $0x2a8] ss:$48 sps:$4 sm:$0xff]   ;;  %v19243_v6 = vld [vmem:[#allocation4 + $0x304] ss:$48 sps:$4 sm:$0xff]  }
 0x140   :  { %1583 = vmatprep.subr.bf16.mxu0 %v19153_v7  ;;  %1626 = vmatprep.subr.bf16.mxu1 %v19156_v8  ;;  %v19246_v7 = vld [vmem:[#allocation4 + $0x30c] ss:$48 sps:$4 sm:$0xff]   ;;  %v19241_v8 = vld [vmem:[#allocation4 + $0x300] ss:$48 sps:$4 sm:$0xff]  }
 0x141   :  { %1613 = vmatprep.mubr.bf16.mxu0 %v22711_v0  ;;  %1656 = vmatprep.mubr.bf16.mxu1 %v22711_v0  ;;  %v19172_v0 = vld [vmem:[#allocation2 + $0x1a8] ss:$48 sps:$4 sm:$0xff]  }
 0x143   :  { %1584 = vmatpush1.bf16.msra.mxu0 %v19151_v9  ;;  %1627 = vmatpush1.bf16.msra.mxu1 %v19154_v10  ;;  %v19244_v9 = vld [vmem:[#allocation4 + $0x308] ss:$48 sps:$4 sm:$0xff]   ;;  %v19249_v10 = vld [vmem:[#allocation4 + $0x364] ss:$48 sps:$4 sm:$0xff]  }
 0x144   :  { %1585 = vmatprep.subr.bf16.mxu0 %v19159_v11  ;;  %1628 = vmatprep.subr.bf16.mxu1 %v19162_v12  ;;  %v19252_v11 = vld [vmem:[#allocation4 + $0x36c] ss:$48 sps:$4 sm:$0xff]   ;;  %v19247_v12 = vld [vmem:[#allocation4 + $0x360] ss:$48 sps:$4 sm:$0xff]  }
 0x147   :  { %1586 = vmatpush1.bf16.msra.mxu0 %v19157_v13  ;;  %1629 = vmatpush1.bf16.msra.mxu1 %v19160_v14  ;;  %v19250_v13 = vld [vmem:[#allocation4 + $0x368] ss:$48 sps:$4 sm:$0xff]   ;;  %v19255_v14 = vld [vmem:[#allocation4 + $0x3c4] ss:$48 sps:$4 sm:$0xff]  }
 0x148   :  { %1587 = vmatprep.subr.bf16.mxu0 %v19165_v15  ;;  %1630 = vmatprep.subr.bf16.mxu1 %v19168_v16  ;;  %v19258_v15 = vld [vmem:[#allocation4 + $0x3cc] ss:$48 sps:$4 sm:$0xff]   ;;  %v19253_v16 = vld [vmem:[#allocation4 + $0x3c0] ss:$48 sps:$4 sm:$0xff]  }
 0x14b   :  { %1588 = vmatpush1.bf16.msra.mxu0 %v19163_v17  ;;  %1631 = vmatpush1.bf16.msra.mxu1 %v19166_v18  ;;  %v19256_v17 = vld [vmem:[#allocation4 + $0x3c8] ss:$48 sps:$4 sm:$0xff]   ;;  %v19261_v18 = vld [vmem:[#allocation4 + $0x424] ss:$48 sps:$4 sm:$0xff]  }
 0x14c   :  { %1589 = vmatprep.subr.bf16.mxu0 %v19171_v19  ;;  %1632 = vmatprep.subr.bf16.mxu1 %v19174_v20  ;;  %v19264_v19 = vld [vmem:[#allocation4 + $0x42c] ss:$48 sps:$4 sm:$0xff]   ;;  %v19259_v20 = vld [vmem:[#allocation4 + $0x420] ss:$48 sps:$4 sm:$0xff]  }
 0x14f   :  { %1590 = vmatpush1.bf16.msra.mxu0 %v19169_v21  ;;  %1633 = vmatpush1.bf16.msra.mxu1 %v19172_v0  ;;  %v19262_v21 = vld [vmem:[#allocation4 + $0x428] ss:$48 sps:$4 sm:$0xff]   ;;  %v19267_v0 = vld [vmem:[#allocation4 + $0x484] ss:$48 sps:$4 sm:$0xff]  }
 0x150   :  { %1591 = vmatprep.subr.bf16.mxu0 %v19177_v22  ;;  %1634 = vmatprep.subr.bf16.mxu1 %v19180_v23  ;;  %v19270_v22 = vld [vmem:[#allocation4 + $0x48c] ss:$48 sps:$4 sm:$0xff]   ;;  %v19265_v23 = vld [vmem:[#allocation4 + $0x480] ss:$48 sps:$4 sm:$0xff]  }
 0x153   :  { %1592 = vmatpush1.bf16.msra.mxu0 %v19175_v24  ;;  %1635 = vmatpush1.bf16.msra.mxu1 %v19178_v25  ;;  %v19268_v24 = vld [vmem:[#allocation4 + $0x488] ss:$48 sps:$4 sm:$0xff]   ;;  %v19273_v25 = vld [vmem:[#allocation4 + $0x4e4] ss:$48 sps:$4 sm:$0xff]  }
 0x154   :  { %1593 = vmatprep.subr.bf16.mxu0 %v19183_v26  ;;  %1636 = vmatprep.subr.bf16.mxu1 %v19186_v27  ;;  %v19276_v26 = vld [vmem:[#allocation4 + $0x4ec] ss:$48 sps:$4 sm:$0xff]   ;;  %v19271_v27 = vld [vmem:[#allocation4 + $0x4e0] ss:$48 sps:$4 sm:$0xff]  }
 0x157   :  { %1594 = vmatpush1.bf16.msra.mxu0 %v19181_v28  ;;  %1637 = vmatpush1.bf16.msra.mxu1 %v19184_v29  ;;  %v19274_v28 = vld [vmem:[#allocation4 + $0x4e8] ss:$48 sps:$4 sm:$0xff]   ;;  %v19279_v29 = vld [vmem:[#allocation4 + $0x544] ss:$48 sps:$4 sm:$0xff]  }
 0x158   :  { %1595 = vmatprep.subr.bf16.mxu0 %v19189_v30  ;;  %1638 = vmatprep.subr.bf16.mxu1 %v19192_v31  ;;  %v19282_v30 = vld [vmem:[#allocation4 + $0x54c] ss:$48 sps:$4 sm:$0xff]   ;;  %v19277_v31 = vld [vmem:[#allocation4 + $0x540] ss:$48 sps:$4 sm:$0xff]  }
 0x15b   :  { %1596 = vmatpush1.bf16.msra.mxu0 %v19187_v32  ;;  %1639 = vmatpush1.bf16.msra.mxu1 %v19190_v33  ;;  %v19280_v32 = vld [vmem:[#allocation4 + $0x548] ss:$48 sps:$4 sm:$0xff]   ;;  %v19285_v33 = vld [vmem:[#allocation4 + $0x5a4] ss:$48 sps:$4 sm:$0xff]  }
 0x15c   :  { %3653 = vmatprep.subr.bf16.mxu0 %v19195_v34  ;;  %3739 = vmatprep.subr.bf16.mxu1 %v19198_v35  ;;  %v19288_v34 = vld [vmem:[#allocation4 + $0x5ac] ss:$48 sps:$4 sm:$0xff]   ;;  %v19283_v35 = vld [vmem:[#allocation4 + $0x5a0] ss:$48 sps:$4 sm:$0xff]  }
 0x15e   :  { %1614 = vmatmul.mubr.bf16.vlgmr.msra.gmra.mrb[8].mxu0 %v22993_v36  ;;  %1657 = vmatmul.mubr.bf16.vlgmr.msra.gmra.mrb[8].mxu1 %v22993_v36  ;;  %v237_v36 = vld [vmem:[%s23713_s23 + $0x8] sm:$0xff] }
 0x15f   :  { %3654 = vmatpush1.bf16.msra.mxu0 %v19193_v37  ;;  %3740 = vmatpush1.bf16.msra.mxu1 %v19196_v38  ;;  %v23011_v54 = vpack.c.bf16 %v241_v51, %v237_v36  ;;  %v19286_v37 = vld [vmem:[#allocation4 + $0x5a8] ss:$48 sps:$4 sm:$0xff]   ;;  %v19291_v38 = vld [vmem:[#allocation4 + $0x604] ss:$48 sps:$4 sm:$0xff]  }
 0x160   :  { %3655 = vmatprep.subr.bf16.mxu0 %v19201_v39  ;;  %3741 = vmatprep.subr.bf16.mxu1 %v19204_v40  ;;  %v236_v39 = vld [vmem:[%s23713_s23] sm:$0xff]  ;;  %v19298_v36 = vld [vmem:[#allocation4 + $0x668] ss:$48 sps:$4 sm:$0xff]  }
 0x161   :  { %3685 = vmatprep.mubr.bf16.mxu0 %v23011_v54  ;;  %3771 = vmatprep.mubr.bf16.mxu1 %v23011_v54  ;;  %v240_v40 = vld [vmem:[%s23713_s23 + $0x20] sm:$0xff] }
 0x162   :  { %v19303_v51 = vld [vmem:[#allocation4 + $0x6c4] ss:$48 sps:$4 sm:$0xff]  }
 0x163   :  { %3656 = vmatpush1.bf16.msra.mxu0 %v19199_v41  ;;  %3742 = vmatpush1.bf16.msra.mxu1 %v19202_v42  ;;  %v19294_v41 = vld [vmem:[#allocation4 + $0x60c] ss:$48 sps:$4 sm:$0xff]   ;;  %v19289_v42 = vld [vmem:[#allocation4 + $0x600] ss:$48 sps:$4 sm:$0xff]  }
 0x164   :  { %3657 = vmatprep.subr.bf16.mxu0 %v19207_v43  ;;  %3743 = vmatprep.subr.bf16.mxu1 %v19210_v44  ;;  %v23021_v43 = vpack.c.bf16 %v240_v40, %v236_v39  ;;  %v239_v44 = vld [vmem:[%s23713_s23 + $0x18] sm:$0xff]  ;;  %v19373_v39 = vld [vmem:[#allocation4 + $0xb40] ss:$48 sps:$4 sm:$0xff]  }
 0x165   :  { %v19376_v40 = vld [vmem:[#allocation4 + $0xb48] ss:$48 sps:$4 sm:$0xff]  }
 0x167   :  { %3658 = vmatpush1.bf16.msra.mxu0 %v19205_v45  ;;  %3744 = vmatpush1.bf16.msra.mxu1 %v19208_v46  ;;  %v243_v45 = vld [vmem:[%s23713_s23 + $0x38] sm:$0xff] }
 0x168   :  { %3659 = vmatprep.subr.bf16.mxu0 %v19213_v47  ;;  %3745 = vmatprep.subr.bf16.mxu1 %v19216_v48  ;;  %v19292_v46 = vld [vmem:[#allocation4 + $0x608] ss:$48 sps:$4 sm:$0xff]   ;;  %v19297_v47 = vld [vmem:[#allocation4 + $0x664] ss:$48 sps:$4 sm:$0xff]   ;;  %v19300_v48 = vld [vmem:[#allocation4 + $0x66c] ss:$48 sps:$4 sm:$0xff]  }
 0x16b   :  { %3660 = vmatpush1.bf16.msra.mxu0 %v19211_v49  ;;  %3746 = vmatpush1.bf16.msra.mxu1 %v19214_v50  ;;  %v23029_v49 = vpack.c.bf16 %v243_v45, %v239_v44  ;;  %v19295_v50 = vld [vmem:[#allocation4 + $0x660] ss:$48 sps:$4 sm:$0xff]   ;;  %v19382_v45 = vld [vmem:[#allocation4 + $0xba8] ss:$48 sps:$4 sm:$0xff]  }
 0x16c   :  { %3661 = vmatprep.subr.bf16.mxu0 %v19219_v52  ;;  %3747 = vmatprep.subr.bf16.mxu1 %v19222_v53  ;;  %v19306_v52 = vld [vmem:[#allocation4 + $0x6cc] ss:$48 sps:$4 sm:$0xff]   ;;  %v19301_v53 = vld [vmem:[#allocation4 + $0x6c0] ss:$48 sps:$4 sm:$0xff]  }
 0x16d   :  { %v19379_v44 = vld [vmem:[#allocation4 + $0xba0] ss:$48 sps:$4 sm:$0xff]  }
 0x16f   :  { %3662 = vmatpush1.bf16.msra.mxu0 %v19217_v55  ;;  %3748 = vmatpush1.bf16.msra.mxu1 %v19220_v56  ;;  %v19304_v55 = vld [vmem:[#allocation4 + $0x6c8] ss:$48 sps:$4 sm:$0xff]   ;;  %v19309_v56 = vld [vmem:[#allocation4 + $0x724] ss:$48 sps:$4 sm:$0xff]  }
 0x170   :  { %3663 = vmatprep.subr.bf16.mxu0 %v19225_v57  ;;  %3749 = vmatprep.subr.bf16.mxu1 %v19228_v58  ;;  %v19312_v57 = vld [vmem:[#allocation4 + $0x72c] ss:$48 sps:$4 sm:$0xff]   ;;  %v19307_v58 = vld [vmem:[#allocation4 + $0x720] ss:$48 sps:$4 sm:$0xff]  }
 0x173   :  { %3664 = vmatpush1.bf16.msra.mxu0 %v19223_v59  ;;  %3750 = vmatpush1.bf16.msra.mxu1 %v19226_v60  ;;  %v19310_v59 = vld [vmem:[#allocation4 + $0x728] ss:$48 sps:$4 sm:$0xff]   ;;  %v19315_v60 = vld [vmem:[#allocation4 + $0x784] ss:$48 sps:$4 sm:$0xff]  }
 0x174   :  { %3665 = vmatprep.subr.bf16.mxu0 %v19231_v61  ;;  %3751 = vmatprep.subr.bf16.mxu1 %v19234_v62  ;;  %v19318_v61 = vld [vmem:[#allocation4 + $0x78c] ss:$48 sps:$4 sm:$0xff]   ;;  %v19313_v62 = vld [vmem:[#allocation4 + $0x780] ss:$48 sps:$4 sm:$0xff]  }
 0x177   :  { %3666 = vmatpush1.bf16.msra.mxu0 %v19229_v63  ;;  %3752 = vmatpush1.bf16.msra.mxu1 %v19232_v1  ;;  %v19316_v63 = vld [vmem:[#allocation4 + $0x788] ss:$48 sps:$4 sm:$0xff]   ;;  %v19321_v1 = vld [vmem:[#allocation4 + $0x7e4] ss:$48 sps:$4 sm:$0xff]  }
 0x178   :  { %3667 = vmatprep.subr.bf16.mxu0 %v19237_v2  ;;  %3753 = vmatprep.subr.bf16.mxu1 %v19240_v3  ;;  %v19324_v2 = vld [vmem:[#allocation4 + $0x7ec] ss:$48 sps:$4 sm:$0xff]   ;;  %v19319_v3 = vld [vmem:[#allocation4 + $0x7e0] ss:$48 sps:$4 sm:$0xff]  }
 0x17b   :  { %3668 = vmatpush1.bf16.msra.mxu0 %v19235_v4  ;;  %3754 = vmatpush1.bf16.msra.mxu1 %v19238_v5  ;;  %v19322_v4 = vld [vmem:[#allocation4 + $0x7e8] ss:$48 sps:$4 sm:$0xff]   ;;  %v19327_v5 = vld [vmem:[#allocation4 + $0x844] ss:$48 sps:$4 sm:$0xff]  }
 0x17c   :  { %3669 = vmatprep.subr.bf16.mxu0 %v19243_v6  ;;  %3755 = vmatprep.subr.bf16.mxu1 %v19246_v7  ;;  %v19330_v6 = vld [vmem:[#allocation4 + $0x84c] ss:$48 sps:$4 sm:$0xff]   ;;  %v19325_v7 = vld [vmem:[#allocation4 + $0x840] ss:$48 sps:$4 sm:$0xff]  }
 0x17f   :  { %3670 = vmatpush1.bf16.msra.mxu0 %v19241_v8  ;;  %3756 = vmatpush1.bf16.msra.mxu1 %v19244_v9  ;;  %v19328_v8 = vld [vmem:[#allocation4 + $0x848] ss:$48 sps:$4 sm:$0xff]   ;;  %v19333_v9 = vld [vmem:[#allocation4 + $0x8a4] ss:$48 sps:$4 sm:$0xff]  }
 0x180   :  { %3671 = vmatprep.subr.bf16.mxu0 %v19249_v10  ;;  %3757 = vmatprep.subr.bf16.mxu1 %v19252_v11  ;;  %v19336_v10 = vld [vmem:[#allocation4 + $0x8ac] ss:$48 sps:$4 sm:$0xff]   ;;  %v19331_v11 = vld [vmem:[#allocation4 + $0x8a0] ss:$48 sps:$4 sm:$0xff]  }
 0x183   :  { %3672 = vmatpush1.bf16.msra.mxu0 %v19247_v12  ;;  %3758 = vmatpush1.bf16.msra.mxu1 %v19250_v13  ;;  %v19334_v12 = vld [vmem:[#allocation4 + $0x8a8] ss:$48 sps:$4 sm:$0xff]   ;;  %v19339_v13 = vld [vmem:[#allocation4 + $0x904] ss:$48 sps:$4 sm:$0xff]  }
 0x184   :  { %3673 = vmatprep.subr.bf16.mxu0 %v19255_v14  ;;  %3759 = vmatprep.subr.bf16.mxu1 %v19258_v15  ;;  %v19342_v14 = vld [vmem:[#allocation4 + $0x90c] ss:$48 sps:$4 sm:$0xff]   ;;  %v19337_v15 = vld [vmem:[#allocation4 + $0x900] ss:$48 sps:$4 sm:$0xff]  }
 0x187   :  { %3674 = vmatpush1.bf16.msra.mxu0 %v19253_v16  ;;  %3760 = vmatpush1.bf16.msra.mxu1 %v19256_v17  ;;  %v19340_v16 = vld [vmem:[#allocation4 + $0x908] ss:$48 sps:$4 sm:$0xff]   ;;  %v19345_v17 = vld [vmem:[#allocation4 + $0x964] ss:$48 sps:$4 sm:$0xff]  }
 0x188   :  { %3675 = vmatprep.subr.bf16.mxu0 %v19261_v18  ;;  %3761 = vmatprep.subr.bf16.mxu1 %v19264_v19  ;;  %v19348_v18 = vld [vmem:[#allocation4 + $0x96c] ss:$48 sps:$4 sm:$0xff]   ;;  %v19343_v19 = vld [vmem:[#allocation4 + $0x960] ss:$48 sps:$4 sm:$0xff]  }
 0x18b   :  { %3676 = vmatpush1.bf16.msra.mxu0 %v19259_v20  ;;  %3762 = vmatpush1.bf16.msra.mxu1 %v19262_v21  ;;  %v19346_v20 = vld [vmem:[#allocation4 + $0x968] ss:$48 sps:$4 sm:$0xff]   ;;  %v19351_v21 = vld [vmem:[#allocation4 + $0x9c4] ss:$48 sps:$4 sm:$0xff]  }
 0x18c   :  { %3677 = vmatprep.subr.bf16.mxu0 %v19267_v0  ;;  %3763 = vmatprep.subr.bf16.mxu1 %v19270_v22  ;;  %v19354_v0 = vld [vmem:[#allocation4 + $0x9cc] ss:$48 sps:$4 sm:$0xff]   ;;  %v19349_v22 = vld [vmem:[#allocation4 + $0x9c0] ss:$48 sps:$4 sm:$0xff]  }
 0x18f   :  { %3678 = vmatpush1.bf16.msra.mxu0 %v19265_v23  ;;  %3764 = vmatpush1.bf16.msra.mxu1 %v19268_v24  ;;  %v19352_v23 = vld [vmem:[#allocation4 + $0x9c8] ss:$48 sps:$4 sm:$0xff]   ;;  %v19357_v24 = vld [vmem:[#allocation4 + $0xa24] ss:$48 sps:$4 sm:$0xff]  }
 0x190   :  { %3679 = vmatprep.subr.bf16.mxu0 %v19273_v25  ;;  %3765 = vmatprep.subr.bf16.mxu1 %v19276_v26  ;;  %v19360_v25 = vld [vmem:[#allocation4 + $0xa2c] ss:$48 sps:$4 sm:$0xff]   ;;  %v19355_v26 = vld [vmem:[#allocation4 + $0xa20] ss:$48 sps:$4 sm:$0xff]  }
 0x193   :  { %3680 = vmatpush1.bf16.msra.mxu0 %v19271_v27  ;;  %3766 = vmatpush1.bf16.msra.mxu1 %v19274_v28  ;;  %v19358_v27 = vld [vmem:[#allocation4 + $0xa28] ss:$48 sps:$4 sm:$0xff]   ;;  %v19363_v28 = vld [vmem:[#allocation4 + $0xa84] ss:$48 sps:$4 sm:$0xff]  }
 0x194   :  { %3681 = vmatprep.subr.bf16.mxu0 %v19279_v29  ;;  %3767 = vmatprep.subr.bf16.mxu1 %v19282_v30  ;;  %v19366_v29 = vld [vmem:[#allocation4 + $0xa8c] ss:$48 sps:$4 sm:$0xff]   ;;  %v19361_v30 = vld [vmem:[#allocation4 + $0xa80] ss:$48 sps:$4 sm:$0xff]  }
 0x197   :  { %3682 = vmatpush1.bf16.msra.mxu0 %v19277_v31  ;;  %3768 = vmatpush1.bf16.msra.mxu1 %v19280_v32  ;;  %v19364_v31 = vld [vmem:[#allocation4 + $0xa88] ss:$48 sps:$4 sm:$0xff]   ;;  %v19369_v32 = vld [vmem:[#allocation4 + $0xae4] ss:$48 sps:$4 sm:$0xff]  }
 0x198   :  { %3683 = vmatprep.subr.bf16.mxu0 %v19285_v33  ;;  %3769 = vmatprep.subr.bf16.mxu1 %v19288_v34  ;;  %v19372_v33 = vld [vmem:[#allocation4 + $0xaec] ss:$48 sps:$4 sm:$0xff]   ;;  %v19367_v34 = vld [vmem:[#allocation4 + $0xae0] ss:$48 sps:$4 sm:$0xff]  }
 0x19b   :  { %3684 = vmatpush1.bf16.msra.mxu0 %v19283_v35  ;;  %3770 = vmatpush1.bf16.msra.mxu1 %v19286_v37  ;;  %v19370_v35 = vld [vmem:[#allocation4 + $0xae8] ss:$48 sps:$4 sm:$0xff]   ;;  %v19375_v37 = vld [vmem:[#allocation4 + $0xb44] ss:$48 sps:$4 sm:$0xff]  }
 0x19c   :  { %3696 = vmatprep.subr.bf16.mxu0 %v19291_v38  ;;  %3782 = vmatprep.subr.bf16.mxu1 %v19294_v41  ;;  %v19378_v38 = vld [vmem:[#allocation4 + $0xb4c] ss:$48 sps:$4 sm:$0xff]   ;;  %v19381_v41 = vld [vmem:[#allocation4 + $0xba4] ss:$48 sps:$4 sm:$0xff]  }
 0x19e   :  { %3686 = vmatmul.mubr.bf16.vlgmr.msra.gmra.mrb[0].mxu0 %v23021_v43  ;;  %3772 = vmatmul.mubr.bf16.vlgmr.msra.gmra.mrb[0].mxu1 %v23021_v43 }
 0x19f   :  { %3697 = vmatpush1.bf16.msra.mxu0 %v19289_v42  ;;  %3783 = vmatpush1.bf16.msra.mxu1 %v19292_v46  ;;  %v19384_v42 = vld [vmem:[#allocation4 + $0xbac] ss:$48 sps:$4 sm:$0xff]   ;;  %v238_v46 = vld [vmem:[%s23713_s23 + $0x10] sm:$0xff] }
 0x1a0   :  { %3698 = vmatprep.subr.bf16.mxu0 %v19297_v47  ;;  %3784 = vmatprep.subr.bf16.mxu1 %v19300_v48  ;;  %v242_v47 = vld [vmem:[%s23713_s23 + $0x30] sm:$0xff] }
 0x1a1   :  { %3728 = vmatprep.mubr.bf16.mxu0 %v23029_v49  ;;  %3814 = vmatprep.mubr.bf16.mxu1 %v23029_v49  ;;  %v19387_v48 = vld [vmem:[#allocation4 + $0x14] ss:$48 sps:$4 sm:$0xff]  }
 0x1a3   :  { %3699 = vmatpush1.bf16.msra.mxu0 %v19295_v50  ;;  %3785 = vmatpush1.bf16.msra.mxu1 %v19298_v36  ;;  %v19390_v50 = vld [vmem:[#allocation4 + $0x1c] ss:$48 sps:$4 sm:$0xff]   ;;  %v23041_v36 = vpack.c.bf16 %v242_v47, %v238_v46  ;;  %v19469_v46 = vld [vmem:[#allocation4 + $0x550] ss:$48 sps:$4 sm:$0xff]   ;;  %v19472_v47 = vld [vmem:[#allocation4 + $0x558] ss:$48 sps:$4 sm:$0xff]  }
 0x1a4   :  { %3700 = vmatprep.subr.bf16.mxu0 %v19303_v51  ;;  %3786 = vmatprep.subr.bf16.mxu1 %v19306_v52  ;;  %v19385_v51 = vld [vmem:[#allocation4 + $0x10] ss:$48 sps:$4 sm:$0xff]   ;;  %v19388_v52 = vld [vmem:[#allocation4 + $0x18] ss:$48 sps:$4 sm:$0xff]  }
 0x1a7   :  { %3701 = vmatpush1.bf16.msra.mxu0 %v19301_v53  ;;  %3787 = vmatpush1.bf16.msra.mxu1 %v19304_v55  ;;  %v19393_v53 = vld [vmem:[#allocation4 + $0x74] ss:$48 sps:$4 sm:$0xff]   ;;  %v19396_v55 = vld [vmem:[#allocation4 + $0x7c] ss:$48 sps:$4 sm:$0xff]  }
 0x1a8   :  { %3702 = vmatprep.subr.bf16.mxu0 %v19309_v56  ;;  %3788 = vmatprep.subr.bf16.mxu1 %v19312_v57  ;;  %v19391_v56 = vld [vmem:[#allocation4 + $0x70] ss:$48 sps:$4 sm:$0xff]   ;;  %v19394_v57 = vld [vmem:[#allocation4 + $0x78] ss:$48 sps:$4 sm:$0xff]  }
 0x1ab   :  { %3703 = vmatpush1.bf16.msra.mxu0 %v19307_v58  ;;  %3789 = vmatpush1.bf16.msra.mxu1 %v19310_v59  ;;  %v19399_v58 = vld [vmem:[#allocation4 + $0xd4] ss:$48 sps:$4 sm:$0xff]   ;;  %v19402_v59 = vld [vmem:[#allocation4 + $0xdc] ss:$48 sps:$4 sm:$0xff]  }
 0x1ac   :  { %3704 = vmatprep.subr.bf16.mxu0 %v19315_v60  ;;  %3790 = vmatprep.subr.bf16.mxu1 %v19318_v61  ;;  %v19397_v60 = vld [vmem:[#allocation4 + $0xd0] ss:$48 sps:$4 sm:$0xff]   ;;  %v19400_v61 = vld [vmem:[#allocation4 + $0xd8] ss:$48 sps:$4 sm:$0xff]  }
 0x1af   :  { %3705 = vmatpush1.bf16.msra.mxu0 %v19313_v62  ;;  %3791 = vmatpush1.bf16.msra.mxu1 %v19316_v63  ;;  %v19405_v62 = vld [vmem:[#allocation4 + $0x134] ss:$48 sps:$4 sm:$0xff]   ;;  %v19408_v63 = vld [vmem:[#allocation4 + $0x13c] ss:$48 sps:$4 sm:$0xff]  }
 0x1b0   :  { %3706 = vmatprep.subr.bf16.mxu0 %v19321_v1  ;;  %3792 = vmatprep.subr.bf16.mxu1 %v19324_v2  ;;  %v19403_v1 = vld [vmem:[#allocation4 + $0x130] ss:$48 sps:$4 sm:$0xff]   ;;  %v19406_v2 = vld [vmem:[#allocation4 + $0x138] ss:$48 sps:$4 sm:$0xff]  }
 0x1b3   :  { %3707 = vmatpush1.bf16.msra.mxu0 %v19319_v3  ;;  %3793 = vmatpush1.bf16.msra.mxu1 %v19322_v4  ;;  %v19411_v3 = vld [vmem:[#allocation4 + $0x194] ss:$48 sps:$4 sm:$0xff]   ;;  %v19414_v4 = vld [vmem:[#allocation4 + $0x19c] ss:$48 sps:$4 sm:$0xff]  }
 0x1b4   :  { %3708 = vmatprep.subr.bf16.mxu0 %v19327_v5  ;;  %3794 = vmatprep.subr.bf16.mxu1 %v19330_v6  ;;  %v19409_v5 = vld [vmem:[#allocation4 + $0x190] ss:$48 sps:$4 sm:$0xff]   ;;  %v19412_v6 = vld [vmem:[#allocation4 + $0x198] ss:$48 sps:$4 sm:$0xff]  }
 0x1b7   :  { %3709 = vmatpush1.bf16.msra.mxu0 %v19325_v7  ;;  %3795 = vmatpush1.bf16.msra.mxu1 %v19328_v8  ;;  %v19417_v7 = vld [vmem:[#allocation4 + $0x1f4] ss:$48 sps:$4 sm:$0xff]   ;;  %v19420_v8 = vld [vmem:[#allocation4 + $0x1fc] ss:$48 sps:$4 sm:$0xff]  }
 0x1b8   :  { %3710 = vmatprep.subr.bf16.mxu0 %v19333_v9  ;;  %3796 = vmatprep.subr.bf16.mxu1 %v19336_v10  ;;  %v19415_v9 = vld [vmem:[#allocation4 + $0x1f0] ss:$48 sps:$4 sm:$0xff]   ;;  %v19418_v10 = vld [vmem:[#allocation4 + $0x1f8] ss:$48 sps:$4 sm:$0xff]  }
 0x1bb   :  { %3711 = vmatpush1.bf16.msra.mxu0 %v19331_v11  ;;  %3797 = vmatpush1.bf16.msra.mxu1 %v19334_v12  ;;  %v19423_v11 = vld [vmem:[#allocation4 + $0x254] ss:$48 sps:$4 sm:$0xff]   ;;  %v19426_v12 = vld [vmem:[#allocation4 + $0x25c] ss:$48 sps:$4 sm:$0xff]  }
 0x1bc   :  { %3712 = vmatprep.subr.bf16.mxu0 %v19339_v13  ;;  %3798 = vmatprep.subr.bf16.mxu1 %v19342_v14  ;;  %v19421_v13 = vld [vmem:[#allocation4 + $0x250] ss:$48 sps:$4 sm:$0xff]   ;;  %v19424_v14 = vld [vmem:[#allocation4 + $0x258] ss:$48 sps:$4 sm:$0xff]  }
 0x1bf   :  { %3713 = vmatpush1.bf16.msra.mxu0 %v19337_v15  ;;  %3799 = vmatpush1.bf16.msra.mxu1 %v19340_v16  ;;  %v19429_v15 = vld [vmem:[#allocation4 + $0x2b4] ss:$48 sps:$4 sm:$0xff]   ;;  %v19432_v16 = vld [vmem:[#allocation4 + $0x2bc] ss:$48 sps:$4 sm:$0xff]  }
 0x1c0   :  { %3714 = vmatprep.subr.bf16.mxu0 %v19345_v17  ;;  %3800 = vmatprep.subr.bf16.mxu1 %v19348_v18  ;;  %v19427_v17 = vld [vmem:[#allocation4 + $0x2b0] ss:$48 sps:$4 sm:$0xff]   ;;  %v19430_v18 = vld [vmem:[#allocation4 + $0x2b8] ss:$48 sps:$4 sm:$0xff]  }
 0x1c3   :  { %3715 = vmatpush1.bf16.msra.mxu0 %v19343_v19  ;;  %3801 = vmatpush1.bf16.msra.mxu1 %v19346_v20  ;;  %v19435_v19 = vld [vmem:[#allocation4 + $0x314] ss:$48 sps:$4 sm:$0xff]   ;;  %v19438_v20 = vld [vmem:[#allocation4 + $0x31c] ss:$48 sps:$4 sm:$0xff]  }
 0x1c4   :  { %3716 = vmatprep.subr.bf16.mxu0 %v19351_v21  ;;  %3802 = vmatprep.subr.bf16.mxu1 %v19354_v0  ;;  %v19433_v21 = vld [vmem:[#allocation4 + $0x310] ss:$48 sps:$4 sm:$0xff]   ;;  %v19436_v0 = vld [vmem:[#allocation4 + $0x318] ss:$48 sps:$4 sm:$0xff]  }
 0x1c7   :  { %3717 = vmatpush1.bf16.msra.mxu0 %v19349_v22  ;;  %3803 = vmatpush1.bf16.msra.mxu1 %v19352_v23  ;;  %v19441_v22 = vld [vmem:[#allocation4 + $0x374] ss:$48 sps:$4 sm:$0xff]   ;;  %v19444_v23 = vld [vmem:[#allocation4 + $0x37c] ss:$48 sps:$4 sm:$0xff]  }
 0x1c8   :  { %3718 = vmatprep.subr.bf16.mxu0 %v19357_v24  ;;  %3804 = vmatprep.subr.bf16.mxu1 %v19360_v25  ;;  %v19439_v24 = vld [vmem:[#allocation4 + $0x370] ss:$48 sps:$4 sm:$0xff]   ;;  %v19442_v25 = vld [vmem:[#allocation4 + $0x378] ss:$48 sps:$4 sm:$0xff]  }
 0x1cb   :  { %3719 = vmatpush1.bf16.msra.mxu0 %v19355_v26  ;;  %3805 = vmatpush1.bf16.msra.mxu1 %v19358_v27  ;;  %v19447_v26 = vld [vmem:[#allocation4 + $0x3d4] ss:$48 sps:$4 sm:$0xff]   ;;  %v19450_v27 = vld [vmem:[#allocation4 + $0x3dc] ss:$48 sps:$4 sm:$0xff]  }
 0x1cc   :  { %3720 = vmatprep.subr.bf16.mxu0 %v19363_v28  ;;  %3806 = vmatprep.subr.bf16.mxu1 %v19366_v29  ;;  %v19445_v28 = vld [vmem:[#allocation4 + $0x3d0] ss:$48 sps:$4 sm:$0xff]   ;;  %v19448_v29 = vld [vmem:[#allocation4 + $0x3d8] ss:$48 sps:$4 sm:$0xff]  }
 0x1cf   :  { %3721 = vmatpush1.bf16.msra.mxu0 %v19361_v30  ;;  %3807 = vmatpush1.bf16.msra.mxu1 %v19364_v31  ;;  %v19453_v30 = vld [vmem:[#allocation4 + $0x434] ss:$48 sps:$4 sm:$0xff]   ;;  %v19456_v31 = vld [vmem:[#allocation4 + $0x43c] ss:$48 sps:$4 sm:$0xff]  }
 0x1d0   :  { %3722 = vmatprep.subr.bf16.mxu0 %v19369_v32  ;;  %3808 = vmatprep.subr.bf16.mxu1 %v19372_v33  ;;  %v19451_v32 = vld [vmem:[#allocation4 + $0x430] ss:$48 sps:$4 sm:$0xff]   ;;  %v19454_v33 = vld [vmem:[#allocation4 + $0x438] ss:$48 sps:$4 sm:$0xff]  }
 0x1d3   :  { %3723 = vmatpush1.bf16.msra.mxu0 %v19367_v34  ;;  %3809 = vmatpush1.bf16.msra.mxu1 %v19370_v35  ;;  %v19459_v34 = vld [vmem:[#allocation4 + $0x494] ss:$48 sps:$4 sm:$0xff]   ;;  %v19462_v35 = vld [vmem:[#allocation4 + $0x49c] ss:$48 sps:$4 sm:$0xff]  }
 0x1d4   :  { %3724 = vmatprep.subr.bf16.mxu0 %v19375_v37  ;;  %3810 = vmatprep.subr.bf16.mxu1 %v19378_v38  ;;  %v19457_v37 = vld [vmem:[#allocation4 + $0x490] ss:$48 sps:$4 sm:$0xff]   ;;  %v19460_v38 = vld [vmem:[#allocation4 + $0x498] ss:$48 sps:$4 sm:$0xff]  }
 0x1d7   :  { %3725 = vmatpush1.bf16.msra.mxu0 %v19373_v39  ;;  %3811 = vmatpush1.bf16.msra.mxu1 %v19376_v40  ;;  %v19465_v39 = vld [vmem:[#allocation4 + $0x4f4] ss:$48 sps:$4 sm:$0xff]   ;;  %v19468_v40 = vld [vmem:[#allocation4 + $0x4fc] ss:$48 sps:$4 sm:$0xff]  }
 0x1d8   :  { %3726 = vmatprep.subr.bf16.mxu0 %v19381_v41  ;;  %3812 = vmatprep.subr.bf16.mxu1 %v19384_v42  ;;  %v19463_v41 = vld [vmem:[#allocation4 + $0x4f0] ss:$48 sps:$4 sm:$0xff]   ;;  %v19466_v42 = vld [vmem:[#allocation4 + $0x4f8] ss:$48 sps:$4 sm:$0xff]  }
 0x1db   :  { %3727 = vmatpush1.bf16.msra.mxu0 %v19379_v44  ;;  %3813 = vmatpush1.bf16.msra.mxu1 %v19382_v45  ;;  %v19471_v44 = vld [vmem:[#allocation4 + $0x554] ss:$48 sps:$4 sm:$0xff]   ;;  %v19474_v45 = vld [vmem:[#allocation4 + $0x55c] ss:$48 sps:$4 sm:$0xff]  }
 0x1dc   :  { %3825 = vmatprep.subr.bf16.mxu0 %v19387_v48  ;;  %3911 = vmatprep.subr.bf16.mxu1 %v19390_v50  ;;  %v19477_v48 = vld [vmem:[#allocation4 + $0x5b4] ss:$48 sps:$4 sm:$0xff]   ;;  %v19480_v50 = vld [vmem:[#allocation4 + $0x5bc] ss:$48 sps:$4 sm:$0xff]  }
 0x1de   :  { %3729 = vmatmul.mubr.bf16.vlgmr.msra.gmra.mrb[0].mxu0 %v23041_v36  ;;  %3815 = vmatmul.mubr.bf16.vlgmr.msra.gmra.mrb[0].mxu1 %v23041_v36 }
 0x1df   :  { %3826 = vmatpush1.bf16.msra.mxu0 %v19385_v51  ;;  %3912 = vmatpush1.bf16.msra.mxu1 %v19388_v52  ;;  %v19475_v51 = vld [vmem:[#allocation4 + $0x5b0] ss:$48 sps:$4 sm:$0xff]   ;;  %v19478_v52 = vld [vmem:[#allocation4 + $0x5b8] ss:$48 sps:$4 sm:$0xff]  }
 0x1e0   :  { %3827 = vmatprep.subr.bf16.mxu0 %v19393_v53  ;;  %3913 = vmatprep.subr.bf16.mxu1 %v19396_v55  ;;  %v19483_v53 = vld [vmem:[#allocation4 + $0x614] ss:$48 sps:$4 sm:$0xff]   ;;  %v19486_v55 = vld [vmem:[#allocation4 + $0x61c] ss:$48 sps:$4 sm:$0xff]  }
 0x1e1   :  { %3857 = vmatprep.mubr.bf16.mxu0 %v23011_v54  ;;  %3943 = vmatprep.mubr.bf16.mxu1 %v23011_v54 }
 0x1e3   :  { %3828 = vmatpush1.bf16.msra.mxu0 %v19391_v56  ;;  %3914 = vmatpush1.bf16.msra.mxu1 %v19394_v57  ;;  %v19481_v56 = vld [vmem:[#allocation4 + $0x610] ss:$48 sps:$4 sm:$0xff]   ;;  %v19484_v57 = vld [vmem:[#allocation4 + $0x618] ss:$48 sps:$4 sm:$0xff]  }
 0x1e4   :  { %3829 = vmatprep.subr.bf16.mxu0 %v19399_v58  ;;  %3915 = vmatprep.subr.bf16.mxu1 %v19402_v59  ;;  %v19489_v58 = vld [vmem:[#allocation4 + $0x674] ss:$48 sps:$4 sm:$0xff]   ;;  %v19492_v59 = vld [vmem:[#allocation4 + $0x67c] ss:$48 sps:$4 sm:$0xff]  }
 0x1e7   :  { %3830 = vmatpush1.bf16.msra.mxu0 %v19397_v60  ;;  %3916 = vmatpush1.bf16.msra.mxu1 %v19400_v61  ;;  %v19487_v60 = vld [vmem:[#allocation4 + $0x670] ss:$48 sps:$4 sm:$0xff]   ;;  %v19490_v61 = vld [vmem:[#allocation4 + $0x678] ss:$48 sps:$4 sm:$0xff]  }
 0x1e8   :  { %3831 = vmatprep.subr.bf16.mxu0 %v19405_v62  ;;  %3917 = vmatprep.subr.bf16.mxu1 %v19408_v63  ;;  %v19495_v62 = vld [vmem:[#allocation4 + $0x6d4] ss:$48 sps:$4 sm:$0xff]   ;;  %v19498_v63 = vld [vmem:[#allocation4 + $0x6dc] ss:$48 sps:$4 sm:$0xff]  }
 0x1eb   :  { %3832 = vmatpush1.bf16.msra.mxu0 %v19403_v1  ;;  %3918 = vmatpush1.bf16.msra.mxu1 %v19406_v2  ;;  %v19493_v1 = vld [vmem:[#allocation4 + $0x6d0] ss:$48 sps:$4 sm:$0xff]   ;;  %v19496_v2 = vld [vmem:[#allocation4 + $0x6d8] ss:$48 sps:$4 sm:$0xff]  }
 0x1ec   :  { %3833 = vmatprep.subr.bf16.mxu0 %v19411_v3  ;;  %3919 = vmatprep.subr.bf16.mxu1 %v19414_v4  ;;  %v19501_v3 = vld [vmem:[#allocation4 + $0x734] ss:$48 sps:$4 sm:$0xff]   ;;  %v19504_v4 = vld [vmem:[#allocation4 + $0x73c] ss:$48 sps:$4 sm:$0xff]  }
 0x1ef   :  { %3834 = vmatpush1.bf16.msra.mxu0 %v19409_v5  ;;  %3920 = vmatpush1.bf16.msra.mxu1 %v19412_v6  ;;  %v19499_v5 = vld [vmem:[#allocation4 + $0x730] ss:$48 sps:$4 sm:$0xff]   ;;  %v19502_v6 = vld [vmem:[#allocation4 + $0x738] ss:$48 sps:$4 sm:$0xff]  }
 0x1f0   :  { %3835 = vmatprep.subr.bf16.mxu0 %v19417_v7  ;;  %3921 = vmatprep.subr.bf16.mxu1 %v19420_v8  ;;  %v19507_v7 = vld [vmem:[#allocation4 + $0x794] ss:$48 sps:$4 sm:$0xff]   ;;  %v19510_v8 = vld [vmem:[#allocation4 + $0x79c] ss:$48 sps:$4 sm:$0xff]  }
 0x1f3   :  { %3836 = vmatpush1.bf16.msra.mxu0 %v19415_v9  ;;  %3922 = vmatpush1.bf16.msra.mxu1 %v19418_v10  ;;  %v19505_v9 = vld [vmem:[#allocation4 + $0x790] ss:$48 sps:$4 sm:$0xff]   ;;  %v19508_v10 = vld [vmem:[#allocation4 + $0x798] ss:$48 sps:$4 sm:$0xff]  }
 0x1f4   :  { %3837 = vmatprep.subr.bf16.mxu0 %v19423_v11  ;;  %3923 = vmatprep.subr.bf16.mxu1 %v19426_v12  ;;  %v19513_v11 = vld [vmem:[#allocation4 + $0x7f4] ss:$48 sps:$4 sm:$0xff]   ;;  %v19516_v12 = vld [vmem:[#allocation4 + $0x7fc] ss:$48 sps:$4 sm:$0xff]  }
 0x1f7   :  { %3838 = vmatpush1.bf16.msra.mxu0 %v19421_v13  ;;  %3924 = vmatpush1.bf16.msra.mxu1 %v19424_v14  ;;  %v19511_v13 = vld [vmem:[#allocation4 + $0x7f0] ss:$48 sps:$4 sm:$0xff]   ;;  %v19514_v14 = vld [vmem:[#allocation4 + $0x7f8] ss:$48 sps:$4 sm:$0xff]  }
 0x1f8   :  { %3839 = vmatprep.subr.bf16.mxu0 %v19429_v15  ;;  %3925 = vmatprep.subr.bf16.mxu1 %v19432_v16  ;;  %v19519_v15 = vld [vmem:[#allocation4 + $0x854] ss:$48 sps:$4 sm:$0xff]   ;;  %v19522_v16 = vld [vmem:[#allocation4 + $0x85c] ss:$48 sps:$4 sm:$0xff]  }
 0x1fb   :  { %3840 = vmatpush1.bf16.msra.mxu0 %v19427_v17  ;;  %3926 = vmatpush1.bf16.msra.mxu1 %v19430_v18 }
 0x1fc   :  { %3841 = vmatprep.subr.bf16.mxu0 %v19435_v19  ;;  %3927 = vmatprep.subr.bf16.mxu1 %v19438_v20  ;;  %v19517_v20 = vld [vmem:[#allocation4 + $0x850] ss:$48 sps:$4 sm:$0xff]  }
 0x1ff   :  { %3842 = vmatpush1.bf16.msra.mxu0 %v19433_v21  ;;  %3928 = vmatpush1.bf16.msra.mxu1 %v19436_v0  ;;  %v19520_v21 = vld [vmem:[#allocation4 + $0x858] ss:$48 sps:$4 sm:$0xff]  }
 0x200   :  { %3843 = vmatprep.subr.bf16.mxu0 %v19441_v22  ;;  %3929 = vmatprep.subr.bf16.mxu1 %v19444_v23  ;;  %v19525_v23 = vld [vmem:[#allocation4 + $0x8b4] ss:$48 sps:$4 sm:$0xff]  }
 0x203   :  { %3844 = vmatpush1.bf16.msra.mxu0 %v19439_v24  ;;  %3930 = vmatpush1.bf16.msra.mxu1 %v19442_v25  ;;  %v19528_v24 = vld [vmem:[#allocation4 + $0x8bc] ss:$48 sps:$4 sm:$0xff]  }
 0x204   :  { %3845 = vmatprep.subr.bf16.mxu0 %v19447_v26  ;;  %3931 = vmatprep.subr.bf16.mxu1 %v19450_v27 }
 0x207   :  { %3846 = vmatpush1.bf16.msra.mxu0 %v19445_v28  ;;  %3932 = vmatpush1.bf16.msra.mxu1 %v19448_v29  ;;  %v19523_v28 = vld [vmem:[#allocation4 + $0x8b0] ss:$48 sps:$4 sm:$0xff]   ;;  %v19526_v29 = vld [vmem:[#allocation4 + $0x8b8] ss:$48 sps:$4 sm:$0xff]  }
 0x208   :  { %3847 = vmatprep.subr.bf16.mxu0 %v19453_v30  ;;  %3933 = vmatprep.subr.bf16.mxu1 %v19456_v31  ;;  %v19531_v30 = vld [vmem:[#allocation4 + $0x914] ss:$48 sps:$4 sm:$0xff]   ;;  %v19534_v31 = vld [vmem:[#allocation4 + $0x91c] ss:$48 sps:$4 sm:$0xff]  }
 0x20b   :  { %3848 = vmatpush1.bf16.msra.mxu0 %v19451_v32  ;;  %3934 = vmatpush1.bf16.msra.mxu1 %v19454_v33  ;;  %v19529_v32 = vld [vmem:[#allocation4 + $0x910] ss:$48 sps:$4 sm:$0xff]   ;;  %v19532_v33 = vld [vmem:[#allocation4 + $0x918] ss:$48 sps:$4 sm:$0xff]  }
 0x20c   :  { %3849 = vmatprep.subr.bf16.mxu0 %v19459_v34  ;;  %3935 = vmatprep.subr.bf16.mxu1 %v19462_v35  ;;  %v19537_v34 = vld [vmem:[#allocation4 + $0x974] ss:$48 sps:$4 sm:$0xff]   ;;  %v19540_v35 = vld [vmem:[#allocation4 + $0x97c] ss:$48 sps:$4 sm:$0xff]  }
 0x20f   :  { %3850 = vmatpush1.bf16.msra.mxu0 %v19457_v37  ;;  %3936 = vmatpush1.bf16.msra.mxu1 %v19460_v38  ;;  %v19535_v37 = vld [vmem:[#allocation4 + $0x970] ss:$48 sps:$4 sm:$0xff]   ;;  %v19538_v38 = vld [vmem:[#allocation4 + $0x978] ss:$48 sps:$4 sm:$0xff]  }
 0x210   :  { %3851 = vmatprep.subr.bf16.mxu0 %v19465_v39  ;;  %3937 = vmatprep.subr.bf16.mxu1 %v19468_v40  ;;  %v19543_v39 = vld [vmem:[#allocation4 + $0x9d4] ss:$48 sps:$4 sm:$0xff]   ;;  %v19546_v40 = vld [vmem:[#allocation4 + $0x9dc] ss:$48 sps:$4 sm:$0xff]  }
 0x213   :  { %3852 = vmatpush1.bf16.msra.mxu0 %v19463_v41  ;;  %3938 = vmatpush1.bf16.msra.mxu1 %v19466_v42  ;;  %v19541_v41 = vld [vmem:[#allocation4 + $0x9d0] ss:$48 sps:$4 sm:$0xff]   ;;  %v19544_v42 = vld [vmem:[#allocation4 + $0x9d8] ss:$48 sps:$4 sm:$0xff]  }
 0x214   :  { %3853 = vmatprep.subr.bf16.mxu0 %v19471_v44  ;;  %3939 = vmatprep.subr.bf16.mxu1 %v19474_v45  ;;  %v19549_v44 = vld [vmem:[#allocation4 + $0xa34] ss:$48 sps:$4 sm:$0xff]   ;;  %v19552_v45 = vld [vmem:[#allocation4 + $0xa3c] ss:$48 sps:$4 sm:$0xff]  }
 0x217   :  { %3854 = vmatpush1.bf16.msra.mxu0 %v19469_v46  ;;  %3940 = vmatpush1.bf16.msra.mxu1 %v19472_v47  ;;  %v19547_v46 = vld [vmem:[#allocation4 + $0xa30] ss:$48 sps:$4 sm:$0xff]   ;;  %v19550_v47 = vld [vmem:[#allocation4 + $0xa38] ss:$48 sps:$4 sm:$0xff]  }
 0x218   :  { %3855 = vmatprep.subr.bf16.mxu0 %v19477_v48  ;;  %3941 = vmatprep.subr.bf16.mxu1 %v19480_v50  ;;  %v19555_v48 = vld [vmem:[#allocation4 + $0xa94] ss:$48 sps:$4 sm:$0xff]   ;;  %v19558_v50 = vld [vmem:[#allocation4 + $0xa9c] ss:$48 sps:$4 sm:$0xff]  }
 0x21b   :  { %3856 = vmatpush1.bf16.msra.mxu0 %v19475_v51  ;;  %3942 = vmatpush1.bf16.msra.mxu1 %v19478_v52  ;;  %v19553_v51 = vld [vmem:[#allocation4 + $0xa90] ss:$48 sps:$4 sm:$0xff]   ;;  %v19556_v52 = vld [vmem:[#allocation4 + $0xa98] ss:$48 sps:$4 sm:$0xff]  }
 0x21c   :  { %3868 = vmatprep.subr.bf16.mxu0 %v19483_v53  ;;  %3954 = vmatprep.subr.bf16.mxu1 %v19486_v55  ;;  %v19561_v53 = vld [vmem:[#allocation4 + $0xaf4] ss:$48 sps:$4 sm:$0xff]   ;;  %v19564_v55 = vld [vmem:[#allocation4 + $0xafc] ss:$48 sps:$4 sm:$0xff]  }
 0x21e   :  { %3858 = vmatmul.mubr.bf16.vlgmr.msra.gmra.mrb[4].mxu0 %v23021_v43  ;;  %3944 = vmatmul.mubr.bf16.vlgmr.msra.gmra.mrb[4].mxu1 %v23021_v43 }
 0x21f   :  { %3869 = vmatpush1.bf16.msra.mxu0 %v19481_v56  ;;  %3955 = vmatpush1.bf16.msra.mxu1 %v19484_v57  ;;  %v19559_v56 = vld [vmem:[#allocation4 + $0xaf0] ss:$48 sps:$4 sm:$0xff]   ;;  %v19562_v57 = vld [vmem:[#allocation4 + $0xaf8] ss:$48 sps:$4 sm:$0xff]  }
 0x220   :  { %3870 = vmatprep.subr.bf16.mxu0 %v19489_v58  ;;  %3956 = vmatprep.subr.bf16.mxu1 %v19492_v59  ;;  %v19567_v58 = vld [vmem:[#allocation4 + $0xb54] ss:$48 sps:$4 sm:$0xff]   ;;  %v19570_v59 = vld [vmem:[#allocation4 + $0xb5c] ss:$48 sps:$4 sm:$0xff]  }
 0x221   :  { %3900 = vmatprep.mubr.bf16.mxu0 %v23029_v49  ;;  %3986 = vmatprep.mubr.bf16.mxu1 %v23029_v49 }
 0x223   :  { %3871 = vmatpush1.bf16.msra.mxu0 %v19487_v60  ;;  %3957 = vmatpush1.bf16.msra.mxu1 %v19490_v61  ;;  %v19565_v60 = vld [vmem:[#allocation4 + $0xb50] ss:$48 sps:$4 sm:$0xff]   ;;  %v19568_v61 = vld [vmem:[#allocation4 + $0xb58] ss:$48 sps:$4 sm:$0xff]  }
 0x224   :  { %3872 = vmatprep.subr.bf16.mxu0 %v19495_v62  ;;  %3958 = vmatprep.subr.bf16.mxu1 %v19498_v63  ;;  %v19573_v62 = vld [vmem:[#allocation4 + $0xbb4] ss:$48 sps:$4 sm:$0xff]   ;;  %v19576_v63 = vld [vmem:[#allocation4 + $0xbbc] ss:$48 sps:$4 sm:$0xff]  }
 0x227   :  { %3873 = vmatpush1.bf16.msra.mxu0 %v19493_v1  ;;  %3959 = vmatpush1.bf16.msra.mxu1 %v19496_v2  ;;  %v19571_v1 = vld [vmem:[#allocation4 + $0xbb0] ss:$48 sps:$4 sm:$0xff]   ;;  %v19574_v2 = vld [vmem:[#allocation4 + $0xbb8] ss:$48 sps:$4 sm:$0xff]  }
 0x228   :  { %3874 = vmatprep.subr.bf16.mxu0 %v19501_v3  ;;  %3960 = vmatprep.subr.bf16.mxu1 %v19504_v4  ;;  %v19579_v3 = vld [vmem:[#allocation4 + $0x24] ss:$48 sps:$4 sm:$0xff]   ;;  %v19582_v4 = vld [vmem:[#allocation4 + $0x2c] ss:$48 sps:$4 sm:$0xff]  }
 0x22b   :  { %3875 = vmatpush1.bf16.msra.mxu0 %v19499_v5  ;;  %3961 = vmatpush1.bf16.msra.mxu1 %v19502_v6  ;;  %v19577_v5 = vld [vmem:[#allocation4 + $0x20] ss:$48 sps:$4 sm:$0xff]   ;;  %v19580_v6 = vld [vmem:[#allocation4 + $0x28] ss:$48 sps:$4 sm:$0xff]  }
 0x22c   :  { %3876 = vmatprep.subr.bf16.mxu0 %v19507_v7  ;;  %3962 = vmatprep.subr.bf16.mxu1 %v19510_v8  ;;  %v19585_v7 = vld [vmem:[#allocation4 + $0x84] ss:$48 sps:$4 sm:$0xff]   ;;  %v19588_v8 = vld [vmem:[#allocation4 + $0x8c] ss:$48 sps:$4 sm:$0xff]  }
 0x22f   :  { %3877 = vmatpush1.bf16.msra.mxu0 %v19505_v9  ;;  %3963 = vmatpush1.bf16.msra.mxu1 %v19508_v10  ;;  %v19583_v9 = vld [vmem:[#allocation4 + $0x80] ss:$48 sps:$4 sm:$0xff]   ;;  %v19586_v10 = vld [vmem:[#allocation4 + $0x88] ss:$48 sps:$4 sm:$0xff]  }
 0x230   :  { %3878 = vmatprep.subr.bf16.mxu0 %v19513_v11  ;;  %3964 = vmatprep.subr.bf16.mxu1 %v19516_v12  ;;  %v19591_v11 = vld [vmem:[#allocation4 + $0xe4] ss:$48 sps:$4 sm:$0xff]   ;;  %v19594_v12 = vld [vmem:[#allocation4 + $0xec] ss:$48 sps:$4 sm:$0xff]  }
 0x231   :  { %v23051_v17 = vpop.f32.mrb[8].mxu0  ;;  %v23053_v18 = vpop.f32.mrb[8].mxu1 }
 0x232   :  { %v23055_v19 = vpop.f32.mrb[9].mxu0  ;;  %v23057_v0 = vpop.f32.mrb[9].mxu1 }
 0x233   :  { %v23059_v22 = vpop.f32.mrb[10].mxu0  ;;  %3879 = vmatpush1.bf16.msra.mxu0 %v19511_v13  ;;  %3965 = vmatpush1.bf16.msra.mxu1 %v19514_v14  ;;  %v23061_v25 = vpop.f32.mrb[10].mxu1  ;;  %v19589_v13 = vld [vmem:[#allocation4 + $0xe0] ss:$48 sps:$4 sm:$0xff]   ;;  %v19592_v14 = vld [vmem:[#allocation4 + $0xe8] ss:$48 sps:$4 sm:$0xff]  }
 0x234   :  { %v23063_v26 = vpop.f32.mrb[11].mxu0  ;;  %3880 = vmatprep.subr.bf16.mxu0 %v19519_v15  ;;  %3966 = vmatprep.subr.bf16.mxu1 %v19522_v16  ;;  %v23065_v27 = vpop.f32.mrb[11].mxu1  ;;  %v19597_v15 = vld [vmem:[#allocation4 + $0x144] ss:$48 sps:$4 sm:$0xff]   ;;  %v19600_v16 = vld [vmem:[#allocation4 + $0x14c] ss:$48 sps:$4 sm:$0xff]  }
 0x237   :  { %3881 = vmatpush1.bf16.msra.mxu0 %v19517_v20  ;;  %3967 = vmatpush1.bf16.msra.mxu1 %v19520_v21  ;;  %v19595_v20 = vld [vmem:[#allocation4 + $0x140] ss:$48 sps:$4 sm:$0xff]   ;;  %v19598_v21 = vld [vmem:[#allocation4 + $0x148] ss:$48 sps:$4 sm:$0xff]  }
 0x238   :  { %3882 = vmatprep.subr.bf16.mxu0 %v19525_v23  ;;  %3968 = vmatprep.subr.bf16.mxu1 %v19528_v24  ;;  %v19603_v23 = vld [vmem:[#allocation4 + $0x1a4] ss:$48 sps:$4 sm:$0xff]   ;;  %v19606_v24 = vld [vmem:[#allocation4 + $0x1ac] ss:$48 sps:$4 sm:$0xff]  }
 0x23b   :  { %3883 = vmatpush1.bf16.msra.mxu0 %v19523_v28  ;;  %3969 = vmatpush1.bf16.msra.mxu1 %v19526_v29  ;;  %v19601_v28 = vld [vmem:[#allocation4 + $0x1a0] ss:$48 sps:$4 sm:$0xff]   ;;  %v19604_v29 = vld [vmem:[#allocation4 + $0x1a8] ss:$48 sps:$4 sm:$0xff]  }
 0x23c   :  { %3884 = vmatprep.subr.bf16.mxu0 %v19531_v30  ;;  %3970 = vmatprep.subr.bf16.mxu1 %v19534_v31  ;;  %v19609_v30 = vld [vmem:[#allocation4 + $0x204] ss:$48 sps:$4 sm:$0xff]   ;;  %v19612_v31 = vld [vmem:[#allocation4 + $0x20c] ss:$48 sps:$4 sm:$0xff]  }
 0x23f   :  { %3885 = vmatpush1.bf16.msra.mxu0 %v19529_v32  ;;  %3971 = vmatpush1.bf16.msra.mxu1 %v19532_v33  ;;  %v19610_v32 = vld [vmem:[#allocation4 + $0x208] ss:$48 sps:$4 sm:$0xff]   ;;  %v19615_v33 = vld [vmem:[#allocation4 + $0x264] ss:$48 sps:$4 sm:$0xff]  }
 0x240   :  { %3886 = vmatprep.subr.bf16.mxu0 %v19537_v34  ;;  %3972 = vmatprep.subr.bf16.mxu1 %v19540_v35  ;;  %v19618_v34 = vld [vmem:[#allocation4 + $0x26c] ss:$48 sps:$4 sm:$0xff]   ;;  %v19613_v35 = vld [vmem:[#allocation4 + $0x260] ss:$48 sps:$4 sm:$0xff]  }
 0x243   :  { %3887 = vmatpush1.bf16.msra.mxu0 %v19535_v37  ;;  %3973 = vmatpush1.bf16.msra.mxu1 %v19538_v38  ;;  %v19616_v37 = vld [vmem:[#allocation4 + $0x268] ss:$48 sps:$4 sm:$0xff]   ;;  %v19621_v38 = vld [vmem:[#allocation4 + $0x2c4] ss:$48 sps:$4 sm:$0xff]  }
 0x244   :  { %3888 = vmatprep.subr.bf16.mxu0 %v19543_v39  ;;  %3974 = vmatprep.subr.bf16.mxu1 %v19546_v40  ;;  %v19624_v39 = vld [vmem:[#allocation4 + $0x2cc] ss:$48 sps:$4 sm:$0xff]   ;;  %v19619_v40 = vld [vmem:[#allocation4 + $0x2c0] ss:$48 sps:$4 sm:$0xff]  }
 0x247   :  { %3889 = vmatpush1.bf16.msra.mxu0 %v19541_v41  ;;  %3975 = vmatpush1.bf16.msra.mxu1 %v19544_v42  ;;  %v19622_v41 = vld [vmem:[#allocation4 + $0x2c8] ss:$48 sps:$4 sm:$0xff]   ;;  %v19627_v42 = vld [vmem:[#allocation4 + $0x324] ss:$48 sps:$4 sm:$0xff]  }
 0x248   :  { %3890 = vmatprep.subr.bf16.mxu0 %v19549_v44  ;;  %3976 = vmatprep.subr.bf16.mxu1 %v19552_v45  ;;  %v19630_v44 = vld [vmem:[#allocation4 + $0x32c] ss:$48 sps:$4 sm:$0xff]   ;;  %v19625_v45 = vld [vmem:[#allocation4 + $0x320] ss:$48 sps:$4 sm:$0xff]  }
 0x24b   :  { %3891 = vmatpush1.bf16.msra.mxu0 %v19547_v46  ;;  %3977 = vmatpush1.bf16.msra.mxu1 %v19550_v47  ;;  %v19628_v46 = vld [vmem:[#allocation4 + $0x328] ss:$48 sps:$4 sm:$0xff]   ;;  %v19633_v47 = vld [vmem:[#allocation4 + $0x384] ss:$48 sps:$4 sm:$0xff]  }
 0x24c   :  { %3892 = vmatprep.subr.bf16.mxu0 %v19555_v48  ;;  %3978 = vmatprep.subr.bf16.mxu1 %v19558_v50  ;;  %v19636_v48 = vld [vmem:[#allocation4 + $0x38c] ss:$48 sps:$4 sm:$0xff]   ;;  %v19631_v50 = vld [vmem:[#allocation4 + $0x380] ss:$48 sps:$4 sm:$0xff]  }
 0x24f   :  { %3893 = vmatpush1.bf16.msra.mxu0 %v19553_v51  ;;  %3979 = vmatpush1.bf16.msra.mxu1 %v19556_v52  ;;  %v19634_v51 = vld [vmem:[#allocation4 + $0x388] ss:$48 sps:$4 sm:$0xff]   ;;  %v19639_v52 = vld [vmem:[#allocation4 + $0x3e4] ss:$48 sps:$4 sm:$0xff]  }
 0x250   :  { %3894 = vmatprep.subr.bf16.mxu0 %v19561_v53  ;;  %3980 = vmatprep.subr.bf16.mxu1 %v19564_v55  ;;  %v19642_v53 = vld [vmem:[#allocation4 + $0x3ec] ss:$48 sps:$4 sm:$0xff]   ;;  %v19637_v55 = vld [vmem:[#allocation4 + $0x3e0] ss:$48 sps:$4 sm:$0xff]  }
 0x253   :  { %3895 = vmatpush1.bf16.msra.mxu0 %v19559_v56  ;;  %3981 = vmatpush1.bf16.msra.mxu1 %v19562_v57  ;;  %v19640_v56 = vld [vmem:[#allocation4 + $0x3e8] ss:$48 sps:$4 sm:$0xff]   ;;  %v19645_v57 = vld [vmem:[#allocation4 + $0x444] ss:$48 sps:$4 sm:$0xff]  }
 0x254   :  { %3896 = vmatprep.subr.bf16.mxu0 %v19567_v58  ;;  %3982 = vmatprep.subr.bf16.mxu1 %v19570_v59  ;;  %v19648_v58 = vld [vmem:[#allocation4 + $0x44c] ss:$48 sps:$4 sm:$0xff]   ;;  %v19643_v59 = vld [vmem:[#allocation4 + $0x440] ss:$48 sps:$4 sm:$0xff]  }
 0x257   :  { %3897 = vmatpush1.bf16.msra.mxu0 %v19565_v60  ;;  %3983 = vmatpush1.bf16.msra.mxu1 %v19568_v61  ;;  %v19646_v60 = vld [vmem:[#allocation4 + $0x448] ss:$48 sps:$4 sm:$0xff]   ;;  %v19651_v61 = vld [vmem:[#allocation4 + $0x4a4] ss:$48 sps:$4 sm:$0xff]  }
 0x258   :  { %3898 = vmatprep.subr.bf16.mxu0 %v19573_v62  ;;  %3984 = vmatprep.subr.bf16.mxu1 %v19576_v63  ;;  %v19654_v62 = vld [vmem:[#allocation4 + $0x4ac] ss:$48 sps:$4 sm:$0xff]   ;;  %v19649_v63 = vld [vmem:[#allocation4 + $0x4a0] ss:$48 sps:$4 sm:$0xff]  }
 0x25b   :  { %3899 = vmatpush1.bf16.msra.mxu0 %v19571_v1  ;;  %3985 = vmatpush1.bf16.msra.mxu1 %v19574_v2  ;;  %v19652_v1 = vld [vmem:[#allocation4 + $0x4a8] ss:$48 sps:$4 sm:$0xff]   ;;  %v19657_v2 = vld [vmem:[#allocation4 + $0x504] ss:$48 sps:$4 sm:$0xff]  }
 0x25c   :  { %3997 = vmatprep.subr.bf16.mxu0 %v19579_v3  ;;  %4083 = vmatprep.subr.bf16.mxu1 %v19582_v4  ;;  %v19660_v3 = vld [vmem:[#allocation4 + $0x50c] ss:$48 sps:$4 sm:$0xff]   ;;  %v19655_v4 = vld [vmem:[#allocation4 + $0x500] ss:$48 sps:$4 sm:$0xff]  }
 0x25e   :  { %3901 = vmatmul.mubr.bf16.vlgmr.msra.gmra.mrb[4].mxu0 %v23041_v36  ;;  %3987 = vmatmul.mubr.bf16.vlgmr.msra.gmra.mrb[4].mxu1 %v23041_v36 }
 0x25f   :  { %3998 = vmatpush1.bf16.msra.mxu0 %v19577_v5  ;;  %4084 = vmatpush1.bf16.msra.mxu1 %v19580_v6  ;;  %v19658_v5 = vld [vmem:[#allocation4 + $0x508] ss:$48 sps:$4 sm:$0xff]   ;;  %v19663_v6 = vld [vmem:[#allocation4 + $0x564] ss:$48 sps:$4 sm:$0xff]  }
 0x260   :  { %3999 = vmatprep.subr.bf16.mxu0 %v19585_v7  ;;  %4085 = vmatprep.subr.bf16.mxu1 %v19588_v8  ;;  %v19666_v7 = vld [vmem:[#allocation4 + $0x56c] ss:$48 sps:$4 sm:$0xff]   ;;  %v19661_v8 = vld [vmem:[#allocation4 + $0x560] ss:$48 sps:$4 sm:$0xff]  }
 0x261   :  { %4029 = vmatprep.mubr.bf16.mxu0 %v23011_v54  ;;  %4115 = vmatprep.mubr.bf16.mxu1 %v23011_v54  ;;  %v19607_v54 = vld [vmem:[#allocation4 + $0x200] ss:$48 sps:$4 sm:$0xff]  }
 0x263   :  { %4000 = vmatpush1.bf16.msra.mxu0 %v19583_v9  ;;  %4086 = vmatpush1.bf16.msra.mxu1 %v19586_v10  ;;  %v19664_v9 = vld [vmem:[#allocation4 + $0x568] ss:$48 sps:$4 sm:$0xff]   ;;  %v19669_v10 = vld [vmem:[#allocation4 + $0x5c4] ss:$48 sps:$4 sm:$0xff]  }
 0x264   :  { %4001 = vmatprep.subr.bf16.mxu0 %v19591_v11  ;;  %4087 = vmatprep.subr.bf16.mxu1 %v19594_v12  ;;  %v19672_v11 = vld [vmem:[#allocation4 + $0x5cc] ss:$48 sps:$4 sm:$0xff]   ;;  %v19667_v12 = vld [vmem:[#allocation4 + $0x5c0] ss:$48 sps:$4 sm:$0xff]  }
 0x267   :  { %4002 = vmatpush1.bf16.msra.mxu0 %v19589_v13  ;;  %4088 = vmatpush1.bf16.msra.mxu1 %v19592_v14  ;;  %v19670_v13 = vld [vmem:[#allocation4 + $0x5c8] ss:$48 sps:$4 sm:$0xff]   ;;  %v19675_v14 = vld [vmem:[#allocation4 + $0x624] ss:$48 sps:$4 sm:$0xff]  }
 0x268   :  { %4003 = vmatprep.subr.bf16.mxu0 %v19597_v15  ;;  %4089 = vmatprep.subr.bf16.mxu1 %v19600_v16  ;;  %v19678_v15 = vld [vmem:[#allocation4 + $0x62c] ss:$48 sps:$4 sm:$0xff]   ;;  %v19673_v16 = vld [vmem:[#allocation4 + $0x620] ss:$48 sps:$4 sm:$0xff]  }
 0x26b   :  { %4004 = vmatpush1.bf16.msra.mxu0 %v19595_v20  ;;  %4090 = vmatpush1.bf16.msra.mxu1 %v19598_v21  ;;  %v19676_v20 = vld [vmem:[#allocation4 + $0x628] ss:$48 sps:$4 sm:$0xff]   ;;  %v19681_v21 = vld [vmem:[#allocation4 + $0x684] ss:$48 sps:$4 sm:$0xff]  }
 0x26c   :  { %4005 = vmatprep.subr.bf16.mxu0 %v19603_v23  ;;  %4091 = vmatprep.subr.bf16.mxu1 %v19606_v24  ;;  %v19684_v23 = vld [vmem:[#allocation4 + $0x68c] ss:$48 sps:$4 sm:$0xff]   ;;  %v19679_v24 = vld [vmem:[#allocation4 + $0x680] ss:$48 sps:$4 sm:$0xff]  }
 0x26f   :  { %4006 = vmatpush1.bf16.msra.mxu0 %v19601_v28  ;;  %4092 = vmatpush1.bf16.msra.mxu1 %v19604_v29  ;;  %v19682_v28 = vld [vmem:[#allocation4 + $0x688] ss:$48 sps:$4 sm:$0xff]   ;;  %v19687_v29 = vld [vmem:[#allocation4 + $0x6e4] ss:$48 sps:$4 sm:$0xff]  }
 0x270   :  { %4007 = vmatprep.subr.bf16.mxu0 %v19609_v30  ;;  %4093 = vmatprep.subr.bf16.mxu1 %v19612_v31  ;;  %v19690_v30 = vld [vmem:[#allocation4 + $0x6ec] ss:$48 sps:$4 sm:$0xff]   ;;  %v19685_v31 = vld [vmem:[#allocation4 + $0x6e0] ss:$48 sps:$4 sm:$0xff]  }
 0x273   :  { %4008 = vmatpush1.bf16.msra.mxu0 %v19607_v54  ;;  %4094 = vmatpush1.bf16.msra.mxu1 %v19610_v32  ;;  %v19688_v54 = vld [vmem:[#allocation4 + $0x6e8] ss:$48 sps:$4 sm:$0xff]   ;;  %v19693_v32 = vld [vmem:[#allocation4 + $0x744] ss:$48 sps:$4 sm:$0xff]  }
 0x274   :  { %4009 = vmatprep.subr.bf16.mxu0 %v19615_v33  ;;  %4095 = vmatprep.subr.bf16.mxu1 %v19618_v34  ;;  %v19696_v33 = vld [vmem:[#allocation4 + $0x74c] ss:$48 sps:$4 sm:$0xff]   ;;  %v19691_v34 = vld [vmem:[#allocation4 + $0x740] ss:$48 sps:$4 sm:$0xff]  }
 0x277   :  { %4010 = vmatpush1.bf16.msra.mxu0 %v19613_v35  ;;  %4096 = vmatpush1.bf16.msra.mxu1 %v19616_v37  ;;  %v19699_v35 = vld [vmem:[#allocation4 + $0x7a4] ss:$48 sps:$4 sm:$0xff]   ;;  %v19702_v37 = vld [vmem:[#allocation4 + $0x7ac] ss:$48 sps:$4 sm:$0xff]  }
 0x278   :  { %4011 = vmatprep.subr.bf16.mxu0 %v19621_v38  ;;  %4097 = vmatprep.subr.bf16.mxu1 %v19624_v39  ;;  %v19697_v38 = vld [vmem:[#allocation4 + $0x7a0] ss:$48 sps:$4 sm:$0xff]   ;;  %v19700_v39 = vld [vmem:[#allocation4 + $0x7a8] ss:$48 sps:$4 sm:$0xff]  }
 0x27b   :  { %4012 = vmatpush1.bf16.msra.mxu0 %v19619_v40  ;;  %4098 = vmatpush1.bf16.msra.mxu1 %v19622_v41  ;;  %v19705_v40 = vld [vmem:[#allocation4 + $0x804] ss:$48 sps:$4 sm:$0xff]   ;;  %v19708_v41 = vld [vmem:[#allocation4 + $0x80c] ss:$48 sps:$4 sm:$0xff]  }
 0x27c   :  { %4013 = vmatprep.subr.bf16.mxu0 %v19627_v42  ;;  %4099 = vmatprep.subr.bf16.mxu1 %v19630_v44  ;;  %v19706_v42 = vld [vmem:[#allocation4 + $0x808] ss:$48 sps:$4 sm:$0xff]   ;;  %v19711_v44 = vld [vmem:[#allocation4 + $0x864] ss:$48 sps:$4 sm:$0xff]  }
 0x27f   :  { %4014 = vmatpush1.bf16.msra.mxu0 %v19625_v45  ;;  %4100 = vmatpush1.bf16.msra.mxu1 %v19628_v46  ;;  %v19714_v45 = vld [vmem:[#allocation4 + $0x86c] ss:$48 sps:$4 sm:$0xff]  }
 0x280   :  { %4015 = vmatprep.subr.bf16.mxu0 %v19633_v47  ;;  %4101 = vmatprep.subr.bf16.mxu1 %v19636_v48  ;;  %v19709_v48 = vld [vmem:[#allocation4 + $0x860] ss:$48 sps:$4 sm:$0xff]  }
 0x283   :  { %4016 = vmatpush1.bf16.msra.mxu0 %v19631_v50  ;;  %4102 = vmatpush1.bf16.msra.mxu1 %v19634_v51  ;;  %v19712_v50 = vld [vmem:[#allocation4 + $0x868] ss:$48 sps:$4 sm:$0xff]  }
 0x284   :  { %4017 = vmatprep.subr.bf16.mxu0 %v19639_v52  ;;  %4103 = vmatprep.subr.bf16.mxu1 %v19642_v53 }
 0x287   :  { %4018 = vmatpush1.bf16.msra.mxu0 %v19637_v55  ;;  %4104 = vmatpush1.bf16.msra.mxu1 %v19640_v56 }
 0x288   :  { %4019 = vmatprep.subr.bf16.mxu0 %v19645_v57  ;;  %4105 = vmatprep.subr.bf16.mxu1 %v19648_v58  ;;  %v19717_v58 = vld [vmem:[#allocation4 + $0x8c4] ss:$48 sps:$4 sm:$0xff]  }
 0x28b   :  { %4020 = vmatpush1.bf16.msra.mxu0 %v19643_v59  ;;  %4106 = vmatpush1.bf16.msra.mxu1 %v19646_v60  ;;  %v19720_v59 = vld [vmem:[#allocation4 + $0x8cc] ss:$48 sps:$4 sm:$0xff]   ;;  %v19715_v60 = vld [vmem:[#allocation4 + $0x8c0] ss:$48 sps:$4 sm:$0xff]  }
 0x28c   :  { %4021 = vmatprep.subr.bf16.mxu0 %v19651_v61  ;;  %4107 = vmatprep.subr.bf16.mxu1 %v19654_v62  ;;  %v19718_v61 = vld [vmem:[#allocation4 + $0x8c8] ss:$48 sps:$4 sm:$0xff]   ;;  %v19723_v62 = vld [vmem:[#allocation4 + $0x924] ss:$48 sps:$4 sm:$0xff]  }
 0x28f   :  { %4022 = vmatpush1.bf16.msra.mxu0 %v19649_v63  ;;  %4108 = vmatpush1.bf16.msra.mxu1 %v19652_v1  ;;  %v19726_v63 = vld [vmem:[#allocation4 + $0x92c] ss:$48 sps:$4 sm:$0xff]   ;;  %v19721_v1 = vld [vmem:[#allocation4 + $0x920] ss:$48 sps:$4 sm:$0xff]  }
 0x290   :  { %4023 = vmatprep.subr.bf16.mxu0 %v19657_v2  ;;  %4109 = vmatprep.subr.bf16.mxu1 %v19660_v3  ;;  %v19724_v2 = vld [vmem:[#allocation4 + $0x928] ss:$48 sps:$4 sm:$0xff]   ;;  %v19729_v3 = vld [vmem:[#allocation4 + $0x984] ss:$48 sps:$4 sm:$0xff]  }
 0x293   :  { %4024 = vmatpush1.bf16.msra.mxu0 %v19655_v4  ;;  %4110 = vmatpush1.bf16.msra.mxu1 %v19658_v5  ;;  %v19732_v4 = vld [vmem:[#allocation4 + $0x98c] ss:$48 sps:$4 sm:$0xff]   ;;  %v19727_v5 = vld [vmem:[#allocation4 + $0x980] ss:$48 sps:$4 sm:$0xff]  }
 0x294   :  { %4025 = vmatprep.subr.bf16.mxu0 %v19663_v6  ;;  %4111 = vmatprep.subr.bf16.mxu1 %v19666_v7  ;;  %v19730_v6 = vld [vmem:[#allocation4 + $0x988] ss:$48 sps:$4 sm:$0xff]   ;;  %v19735_v7 = vld [vmem:[#allocation4 + $0x9e4] ss:$48 sps:$4 sm:$0xff]  }
 0x297   :  { %4026 = vmatpush1.bf16.msra.mxu0 %v19661_v8  ;;  %4112 = vmatpush1.bf16.msra.mxu1 %v19664_v9  ;;  %v19738_v8 = vld [vmem:[#allocation4 + $0x9ec] ss:$48 sps:$4 sm:$0xff]   ;;  %v19733_v9 = vld [vmem:[#allocation4 + $0x9e0] ss:$48 sps:$4 sm:$0xff]  }
 0x298   :  { %4027 = vmatprep.subr.bf16.mxu0 %v19669_v10  ;;  %4113 = vmatprep.subr.bf16.mxu1 %v19672_v11  ;;  %v19736_v10 = vld [vmem:[#allocation4 + $0x9e8] ss:$48 sps:$4 sm:$0xff]   ;;  %v19741_v11 = vld [vmem:[#allocation4 + $0xa44] ss:$48 sps:$4 sm:$0xff]  }
 0x29b   :  { %4028 = vmatpush1.bf16.msra.mxu0 %v19667_v12  ;;  %4114 = vmatpush1.bf16.msra.mxu1 %v19670_v13  ;;  %v19744_v12 = vld [vmem:[#allocation4 + $0xa4c] ss:$48 sps:$4 sm:$0xff]   ;;  %v19739_v13 = vld [vmem:[#allocation4 + $0xa40] ss:$48 sps:$4 sm:$0xff]  }
 0x29c   :  { %4040 = vmatprep.subr.bf16.mxu0 %v19675_v14  ;;  %4126 = vmatprep.subr.bf16.mxu1 %v19678_v15  ;;  %v19742_v14 = vld [vmem:[#allocation4 + $0xa48] ss:$48 sps:$4 sm:$0xff]   ;;  %v19747_v15 = vld [vmem:[#allocation4 + $0xaa4] ss:$48 sps:$4 sm:$0xff]  }
 0x29e   :  { %4030 = vmatmul.mubr.bf16.vlgmr.msra.gmra.mrb[12].mxu0 %v23021_v43  ;;  %4116 = vmatmul.mubr.bf16.vlgmr.msra.gmra.mrb[12].mxu1 %v23021_v43  ;;  %v19694_v43 = vld [vmem:[#allocation4 + $0x748] ss:$48 sps:$4 sm:$0xff]  }
 0x29f   :  { %4041 = vmatpush1.bf16.msra.mxu0 %v19673_v16  ;;  %4127 = vmatpush1.bf16.msra.mxu1 %v19676_v20  ;;  %v19750_v16 = vld [vmem:[#allocation4 + $0xaac] ss:$48 sps:$4 sm:$0xff]   ;;  %v19745_v20 = vld [vmem:[#allocation4 + $0xaa0] ss:$48 sps:$4 sm:$0xff]  }
 0x2a0   :  { %4042 = vmatprep.subr.bf16.mxu0 %v19681_v21  ;;  %4128 = vmatprep.subr.bf16.mxu1 %v19684_v23  ;;  %v19748_v21 = vld [vmem:[#allocation4 + $0xaa8] ss:$48 sps:$4 sm:$0xff]   ;;  %v19753_v23 = vld [vmem:[#allocation4 + $0xb04] ss:$48 sps:$4 sm:$0xff]  }
 0x2a1   :  { %4072 = vmatprep.mubr.bf16.mxu0 %v23029_v49  ;;  %4158 = vmatprep.mubr.bf16.mxu1 %v23029_v49  ;;  %v19703_v49 = vld [vmem:[#allocation4 + $0x800] ss:$48 sps:$4 sm:$0xff]  }
 0x2a3   :  { %4043 = vmatpush1.bf16.msra.mxu0 %v19679_v24  ;;  %4129 = vmatpush1.bf16.msra.mxu1 %v19682_v28  ;;  %v19756_v24 = vld [vmem:[#allocation4 + $0xb0c] ss:$48 sps:$4 sm:$0xff]   ;;  %v19751_v28 = vld [vmem:[#allocation4 + $0xb00] ss:$48 sps:$4 sm:$0xff]  }
 0x2a4   :  { %4044 = vmatprep.subr.bf16.mxu0 %v19687_v29  ;;  %4130 = vmatprep.subr.bf16.mxu1 %v19690_v30  ;;  %v19754_v29 = vld [vmem:[#allocation4 + $0xb08] ss:$48 sps:$4 sm:$0xff]   ;;  %v19759_v30 = vld [vmem:[#allocation4 + $0xb64] ss:$48 sps:$4 sm:$0xff]  }
 0x2a7   :  { %4045 = vmatpush1.bf16.msra.mxu0 %v19685_v31  ;;  %4131 = vmatpush1.bf16.msra.mxu1 %v19688_v54  ;;  %v19762_v31 = vld [vmem:[#allocation4 + $0xb6c] ss:$48 sps:$4 sm:$0xff]   ;;  %v19757_v54 = vld [vmem:[#allocation4 + $0xb60] ss:$48 sps:$4 sm:$0xff]  }
 0x2a8   :  { %4046 = vmatprep.subr.bf16.mxu0 %v19693_v32  ;;  %4132 = vmatprep.subr.bf16.mxu1 %v19696_v33  ;;  %v19760_v32 = vld [vmem:[#allocation4 + $0xb68] ss:$48 sps:$4 sm:$0xff]   ;;  %v19765_v33 = vld [vmem:[#allocation4 + $0xbc4] ss:$48 sps:$4 sm:$0xff]  }
 0x2ab   :  { %4047 = vmatpush1.bf16.msra.mxu0 %v19691_v34  ;;  %4133 = vmatpush1.bf16.msra.mxu1 %v19694_v43  ;;  %v19768_v34 = vld [vmem:[#allocation4 + $0xbcc] ss:$48 sps:$4 sm:$0xff]   ;;  %v19763_v43 = vld [vmem:[#allocation4 + $0xbc0] ss:$48 sps:$4 sm:$0xff]  }
 0x2ac   :  { %4048 = vmatprep.subr.bf16.mxu0 %v19699_v35  ;;  %4134 = vmatprep.subr.bf16.mxu1 %v19702_v37  ;;  %v19766_v35 = vld [vmem:[#allocation4 + $0xbc8] ss:$48 sps:$4 sm:$0xff]   ;;  %v19771_v37 = vld [vmem:[#allocation9 + $0x4] ss:$48 sps:$4 sm:$0xff]  }
 0x2af   :  { %4049 = vmatpush1.bf16.msra.mxu0 %v19697_v38  ;;  %4135 = vmatpush1.bf16.msra.mxu1 %v19700_v39  ;;  %v19774_v38 = vld [vmem:[#allocation9 + $0xc] ss:$48 sps:$4 sm:$0xff]   ;;  %v19769_v39 = vld [vmem:[#allocation9] ss:$48 sps:$4 sm:$0xff]  }
 0x2b0   :  { %4050 = vmatprep.subr.bf16.mxu0 %v19705_v40  ;;  %4136 = vmatprep.subr.bf16.mxu1 %v19708_v41  ;;  %v19772_v40 = vld [vmem:[#allocation9 + $0x8] ss:$48 sps:$4 sm:$0xff]   ;;  %v19777_v41 = vld [vmem:[#allocation9 + $0x64] ss:$48 sps:$4 sm:$0xff]  }
 0x2b1   :  { %v23075_v46 = vpop.f32.mrb[0].mxu0  ;;  %v23077_v47 = vpop.f32.mrb[0].mxu1 }
 0x2b2   :  { %v23079_v51 = vpop.f32.mrb[1].mxu0  ;;  %v23081_v52 = vpop.f32.mrb[1].mxu1 }
 0x2b3   :  { %v23083_v53 = vpop.f32.mrb[2].mxu0  ;;  %v23085_v55 = vpop.f32.mrb[2].mxu1  ;;  %4051 = vmatpush1.bf16.msra.mxu0 %v19703_v49  ;;  %4137 = vmatpush1.bf16.msra.mxu1 %v19706_v42  ;;  %v19780_v49 = vld [vmem:[#allocation9 + $0x6c] ss:$48 sps:$4 sm:$0xff]   ;;  %v19775_v42 = vld [vmem:[#allocation9 + $0x60] ss:$48 sps:$4 sm:$0xff]  }
 0x2b4   :  { %v23087_v56 = vpop.f32.mrb[3].mxu0  ;;  %v23089_v57 = vpop.f32.mrb[3].mxu1  ;;  %4052 = vmatprep.subr.bf16.mxu0 %v19711_v44  ;;  %4138 = vmatprep.subr.bf16.mxu1 %v19714_v45  ;;  %v19778_v44 = vld [vmem:[#allocation9 + $0x68] ss:$48 sps:$4 sm:$0xff]   ;;  %v19783_v45 = vld [vmem:[#allocation9 + $0xc4] ss:$48 sps:$4 sm:$0xff]  }
 0x2b7   :  { %4053 = vmatpush1.bf16.msra.mxu0 %v19709_v48  ;;  %4139 = vmatpush1.bf16.msra.mxu1 %v19712_v50  ;;  %v19786_v48 = vld [vmem:[#allocation9 + $0xcc] ss:$48 sps:$4 sm:$0xff]   ;;  %v19781_v50 = vld [vmem:[#allocation9 + $0xc0] ss:$48 sps:$4 sm:$0xff]  }
 0x2b8   :  { %4054 = vmatprep.subr.bf16.mxu0 %v19717_v58  ;;  %4140 = vmatprep.subr.bf16.mxu1 %v19720_v59  ;;  %v19784_v58 = vld [vmem:[#allocation9 + $0xc8] ss:$48 sps:$4 sm:$0xff]   ;;  %v19789_v59 = vld [vmem:[#allocation9 + $0x124] ss:$48 sps:$4 sm:$0xff]  }
 0x2bb   :  { %4055 = vmatpush1.bf16.msra.mxu0 %v19715_v60  ;;  %4141 = vmatpush1.bf16.msra.mxu1 %v19718_v61  ;;  %v19792_v60 = vld [vmem:[#allocation9 + $0x12c] ss:$48 sps:$4 sm:$0xff]   ;;  %v19787_v61 = vld [vmem:[#allocation9 + $0x120] ss:$48 sps:$4 sm:$0xff]  }
 0x2bc   :  { %4056 = vmatprep.subr.bf16.mxu0 %v19723_v62  ;;  %4142 = vmatprep.subr.bf16.mxu1 %v19726_v63  ;;  %v19790_v62 = vld [vmem:[#allocation9 + $0x128] ss:$48 sps:$4 sm:$0xff]   ;;  %v19795_v63 = vld [vmem:[#allocation9 + $0x184] ss:$48 sps:$4 sm:$0xff]  }
 0x2bf   :  { %4057 = vmatpush1.bf16.msra.mxu0 %v19721_v1  ;;  %4143 = vmatpush1.bf16.msra.mxu1 %v19724_v2  ;;  %v19793_v1 = vld [vmem:[#allocation9 + $0x180] ss:$48 sps:$4 sm:$0xff]   ;;  %v19796_v2 = vld [vmem:[#allocation9 + $0x188] ss:$48 sps:$4 sm:$0xff]  }
 0x2c0   :  { %4058 = vmatprep.subr.bf16.mxu0 %v19729_v3  ;;  %4144 = vmatprep.subr.bf16.mxu1 %v19732_v4  ;;  %v19801_v3 = vld [vmem:[#allocation9 + $0x1e4] ss:$48 sps:$4 sm:$0xff]   ;;  %v19804_v4 = vld [vmem:[#allocation9 + $0x1ec] ss:$48 sps:$4 sm:$0xff]  }
 0x2c3   :  { %4059 = vmatpush1.bf16.msra.mxu0 %v19727_v5  ;;  %4145 = vmatpush1.bf16.msra.mxu1 %v19730_v6  ;;  %v19799_v5 = vld [vmem:[#allocation9 + $0x1e0] ss:$48 sps:$4 sm:$0xff]   ;;  %v19802_v6 = vld [vmem:[#allocation9 + $0x1e8] ss:$48 sps:$4 sm:$0xff]  }
 0x2c4   :  { %4060 = vmatprep.subr.bf16.mxu0 %v19735_v7  ;;  %4146 = vmatprep.subr.bf16.mxu1 %v19738_v8  ;;  %v19807_v7 = vld [vmem:[#allocation9 + $0x244] ss:$48 sps:$4 sm:$0xff]   ;;  %v19810_v8 = vld [vmem:[#allocation9 + $0x24c] ss:$48 sps:$4 sm:$0xff]  }
 0x2c7   :  { %4061 = vmatpush1.bf16.msra.mxu0 %v19733_v9  ;;  %4147 = vmatpush1.bf16.msra.mxu1 %v19736_v10  ;;  %v19805_v9 = vld [vmem:[#allocation9 + $0x240] ss:$48 sps:$4 sm:$0xff]   ;;  %v19808_v10 = vld [vmem:[#allocation9 + $0x248] ss:$48 sps:$4 sm:$0xff]  }
 0x2c8   :  { %4062 = vmatprep.subr.bf16.mxu0 %v19741_v11  ;;  %4148 = vmatprep.subr.bf16.mxu1 %v19744_v12  ;;  %v19813_v11 = vld [vmem:[#allocation9 + $0x2a4] ss:$48 sps:$4 sm:$0xff]   ;;  %v19816_v12 = vld [vmem:[#allocation9 + $0x2ac] ss:$48 sps:$4 sm:$0xff]  }
 0x2cb   :  { %4063 = vmatpush1.bf16.msra.mxu0 %v19739_v13  ;;  %4149 = vmatpush1.bf16.msra.mxu1 %v19742_v14  ;;  %v19811_v13 = vld [vmem:[#allocation9 + $0x2a0] ss:$48 sps:$4 sm:$0xff]   ;;  %v19814_v14 = vld [vmem:[#allocation9 + $0x2a8] ss:$48 sps:$4 sm:$0xff]  }
 0x2cc   :  { %4064 = vmatprep.subr.bf16.mxu0 %v19747_v15  ;;  %4150 = vmatprep.subr.bf16.mxu1 %v19750_v16  ;;  %v19819_v15 = vld [vmem:[#allocation9 + $0x304] ss:$48 sps:$4 sm:$0xff]   ;;  %v19822_v16 = vld [vmem:[#allocation9 + $0x30c] ss:$48 sps:$4 sm:$0xff]  }
 0x2cf   :  { %4065 = vmatpush1.bf16.msra.mxu0 %v19745_v20  ;;  %4151 = vmatpush1.bf16.msra.mxu1 %v19748_v21  ;;  %v19817_v20 = vld [vmem:[#allocation9 + $0x300] ss:$48 sps:$4 sm:$0xff]   ;;  %v19820_v21 = vld [vmem:[#allocation9 + $0x308] ss:$48 sps:$4 sm:$0xff]  }
 0x2d0   :  { %4066 = vmatprep.subr.bf16.mxu0 %v19753_v23  ;;  %4152 = vmatprep.subr.bf16.mxu1 %v19756_v24  ;;  %v19825_v23 = vld [vmem:[#allocation9 + $0x364] ss:$48 sps:$4 sm:$0xff]   ;;  %v19828_v24 = vld [vmem:[#allocation9 + $0x36c] ss:$48 sps:$4 sm:$0xff]  }
 0x2d3   :  { %4067 = vmatpush1.bf16.msra.mxu0 %v19751_v28  ;;  %4153 = vmatpush1.bf16.msra.mxu1 %v19754_v29  ;;  %v19823_v28 = vld [vmem:[#allocation9 + $0x360] ss:$48 sps:$4 sm:$0xff]   ;;  %v19826_v29 = vld [vmem:[#allocation9 + $0x368] ss:$48 sps:$4 sm:$0xff]  }
 0x2d4   :  { %4068 = vmatprep.subr.bf16.mxu0 %v19759_v30  ;;  %4154 = vmatprep.subr.bf16.mxu1 %v19762_v31 }
 0x2d7   :  { %4069 = vmatpush1.bf16.msra.mxu0 %v19757_v54  ;;  %4155 = vmatpush1.bf16.msra.mxu1 %v19760_v32 }
 0x2d8   :  { %4070 = vmatprep.subr.bf16.mxu0 %v19765_v33  ;;  %4156 = vmatprep.subr.bf16.mxu1 %v19768_v34 }
 0x2db   :  { %4071 = vmatpush1.bf16.msra.mxu0 %v19763_v43  ;;  %4157 = vmatpush1.bf16.msra.mxu1 %v19766_v35 }
 0x2dc   :  { %7095 = vmatprep.subr.bf16.mxu0 %v19771_v37  ;;  %7181 = vmatprep.subr.bf16.mxu1 %v19774_v38  ;;  %v19831_v37 = vld [vmem:[#allocation9 + $0x3c4] ss:$48 sps:$4 sm:$0xff]   ;;  %v19829_v38 = vld [vmem:[#allocation9 + $0x3c0] ss:$48 sps:$4 sm:$0xff]  }
 0x2de   :  { %4073 = vmatmul.mubr.bf16.vlgmr.msra.gmra.mrb[12].mxu0 %v23041_v36  ;;  %4159 = vmatmul.mubr.bf16.vlgmr.msra.gmra.mrb[12].mxu1 %v23041_v36  ;;  %v19798_v36 = vld [vmem:[#allocation9 + $0x18c] ss:$48 sps:$4 sm:$0xff]  }
 0x2df   :  { %7096 = vmatpush1.bf16.msra.mxu0 %v19769_v39  ;;  %7182 = vmatpush1.bf16.msra.mxu1 %v19772_v40  ;;  %v19832_v39 = vld [vmem:[#allocation9 + $0x3c8] ss:$48 sps:$4 sm:$0xff]   ;;  %v19834_v40 = vld [vmem:[#allocation9 + $0x3cc] ss:$48 sps:$4 sm:$0xff]  }
 0x2e0   :  { %7097 = vmatprep.subr.bf16.mxu0 %v19777_v41  ;;  %7183 = vmatprep.subr.bf16.mxu1 %v19780_v49  ;;  %v19837_v41 = vld [vmem:[#allocation9 + $0x424] ss:$48 sps:$4 sm:$0xff]   ;;  %v19840_v49 = vld [vmem:[#allocation9 + $0x42c] ss:$48 sps:$4 sm:$0xff]  }
 0x2e3   :  { %7098 = vmatpush1.bf16.msra.mxu0 %v19775_v42  ;;  %7184 = vmatpush1.bf16.msra.mxu1 %v19778_v44  ;;  %v19835_v42 = vld [vmem:[#allocation9 + $0x420] ss:$48 sps:$4 sm:$0xff]   ;;  %v19838_v44 = vld [vmem:[#allocation9 + $0x428] ss:$48 sps:$4 sm:$0xff]  }
 0x2e4   :  { %7099 = vmatprep.subr.bf16.mxu0 %v19783_v45  ;;  %7185 = vmatprep.subr.bf16.mxu1 %v19786_v48  ;;  %v19843_v45 = vld [vmem:[#allocation9 + $0x484] ss:$48 sps:$4 sm:$0xff]   ;;  %v19846_v48 = vld [vmem:[#allocation9 + $0x48c] ss:$48 sps:$4 sm:$0xff]  }
 0x2e7   :  { %7100 = vmatpush1.bf16.msra.mxu0 %v19781_v50  ;;  %7186 = vmatpush1.bf16.msra.mxu1 %v19784_v58  ;;  %v19841_v50 = vld [vmem:[#allocation9 + $0x480] ss:$48 sps:$4 sm:$0xff]   ;;  %v19844_v58 = vld [vmem:[#allocation9 + $0x488] ss:$48 sps:$4 sm:$0xff]  }
 0x2e8   :  { %7101 = vmatprep.subr.bf16.mxu0 %v19789_v59  ;;  %7187 = vmatprep.subr.bf16.mxu1 %v19792_v60  ;;  %v19849_v59 = vld [vmem:[#allocation9 + $0x4e4] ss:$48 sps:$4 sm:$0xff]   ;;  %v19852_v60 = vld [vmem:[#allocation9 + $0x4ec] ss:$48 sps:$4 sm:$0xff]  }
 0x2eb   :  { %7102 = vmatpush1.bf16.msra.mxu0 %v19787_v61  ;;  %7188 = vmatpush1.bf16.msra.mxu1 %v19790_v62  ;;  %v19847_v61 = vld [vmem:[#allocation9 + $0x4e0] ss:$48 sps:$4 sm:$0xff]   ;;  %v19850_v62 = vld [vmem:[#allocation9 + $0x4e8] ss:$48 sps:$4 sm:$0xff]  }
 0x2ec   :  { %7103 = vmatprep.subr.bf16.mxu0 %v19795_v63  ;;  %7189 = vmatprep.subr.bf16.mxu1 %v19798_v36  ;;  %v19855_v63 = vld [vmem:[#allocation9 + $0x544] ss:$48 sps:$4 sm:$0xff]   ;;  %v19858_v36 = vld [vmem:[#allocation9 + $0x54c] ss:$48 sps:$4 sm:$0xff]  }
 0x2ef   :  { %7104 = vmatpush1.bf16.msra.mxu0 %v19793_v1  ;;  %7190 = vmatpush1.bf16.msra.mxu1 %v19796_v2  ;;  %v19853_v1 = vld [vmem:[#allocation9 + $0x540] ss:$48 sps:$4 sm:$0xff]   ;;  %v19856_v2 = vld [vmem:[#allocation9 + $0x548] ss:$48 sps:$4 sm:$0xff]  }
 0x2f0   :  { %7105 = vmatprep.subr.bf16.mxu0 %v19801_v3  ;;  %7191 = vmatprep.subr.bf16.mxu1 %v19804_v4  ;;  %v19861_v3 = vld [vmem:[#allocation9 + $0x5a4] ss:$48 sps:$4 sm:$0xff]   ;;  %v19864_v4 = vld [vmem:[#allocation9 + $0x5ac] ss:$48 sps:$4 sm:$0xff]  }
 0x2f3   :  { %7106 = vmatpush1.bf16.msra.mxu0 %v19799_v5  ;;  %7192 = vmatpush1.bf16.msra.mxu1 %v19802_v6  ;;  %v19859_v5 = vld [vmem:[#allocation9 + $0x5a0] ss:$48 sps:$4 sm:$0xff]   ;;  %v19862_v6 = vld [vmem:[#allocation9 + $0x5a8] ss:$48 sps:$4 sm:$0xff]  }
 0x2f4   :  { %7107 = vmatprep.subr.bf16.mxu0 %v19807_v7  ;;  %7193 = vmatprep.subr.bf16.mxu1 %v19810_v8  ;;  %v19867_v7 = vld [vmem:[#allocation9 + $0x604] ss:$48 sps:$4 sm:$0xff]   ;;  %v19870_v8 = vld [vmem:[#allocation9 + $0x60c] ss:$48 sps:$4 sm:$0xff]  }
 0x2f7   :  { %7108 = vmatpush1.bf16.msra.mxu0 %v19805_v9  ;;  %7194 = vmatpush1.bf16.msra.mxu1 %v19808_v10  ;;  %v863_v9 = vlaneseq }
 0x2f8   :  { %7109 = vmatprep.subr.bf16.mxu0 %v19813_v11  ;;  %7195 = vmatprep.subr.bf16.mxu1 %v19816_v12  ;;  %v857_v11 = vld [vmem:[#allocation6] sm:$0xff]  ;;  %v859_v12 = vld [vmem:[#allocation7] sm:$0xff] }
 0x2f9   :  { %v864_v10 = vshrl.u32 %v863_v9, 7 }
 0x2fb   :  { %7110 = vmatpush1.bf16.msra.mxu0 %v19811_v13  ;;  %7196 = vmatpush1.bf16.msra.mxu1 %v19814_v14  ;;  %v23109_v13 = vsub.s32 0, %v864_v10  ;;  %v23111_v14 = vsub.s32 2, %v864_v10 }
 0x2fc   :  { %7111 = vmatprep.subr.bf16.mxu0 %v19819_v15  ;;  %7197 = vmatprep.subr.bf16.mxu1 %v19822_v16  ;;  %v23113_v15 = vsub.s32 1, %v864_v10 }
 0x2fd   :  { %v866_v16 = vrot.slane %v857_v11, %v23109_v13 }
 0x2ff   :  { %7112 = vmatpush1.bf16.msra.mxu0 %v19817_v20  ;;  %7198 = vmatpush1.bf16.msra.mxu1 %v19820_v21  ;;  %v1676_v20 = vrot.slane %v859_v12, %v23109_v13  ;;  %v23117_v21 = vsub.s32 3, %v864_v10 }
 0x300   :  { %7113 = vmatprep.subr.bf16.mxu0 %v19825_v23  ;;  %7199 = vmatprep.subr.bf16.mxu1 %v19828_v24  ;;  %v874_v23 = vrot.slane %v857_v11, %v23111_v14  ;;  %v1684_v24 = vrot.slane %v859_v12, %v23111_v14 }
 0x303   :  { %7114 = vmatpush1.bf16.msra.mxu0 %v19823_v28  ;;  %7200 = vmatpush1.bf16.msra.mxu1 %v19826_v29  ;;  %v870_v28 = vrot.slane %v857_v11, %v23113_v15  ;;  %v1680_v29 = vrot.slane %v859_v12, %v23113_v15 }
 0x304   :  { %7115 = vmatprep.subr.bf16.mxu0 %v19831_v37  ;;  %7201 = vmatprep.subr.bf16.mxu1 %v19834_v40  ;;  %v878_v37 = vrot.slane %v857_v11, %v23117_v21  ;;  %v23125_v40 = vsub.s32 4, %v864_v10 }
 0x307   :  { %7116 = vmatpush1.bf16.msra.mxu0 %v19829_v38  ;;  %7202 = vmatpush1.bf16.msra.mxu1 %v19832_v39  ;;  %v1688_v38 = vrot.slane %v859_v12, %v23117_v21  ;;  %v18725_v39 = vadd.f32 %v1676_v20, %v866_v16 }
 0x308   :  { %7117 = vmatprep.subr.bf16.mxu0 %v19837_v41  ;;  %7203 = vmatprep.subr.bf16.mxu1 %v19840_v49  ;;  %v18733_v41 = vadd.f32 %v1684_v24, %v874_v23  ;;  %v23127_v49 = vsub.s32 6, %v864_v10 }
 0x30b   :  { %7118 = vmatpush1.bf16.msra.mxu0 %v19835_v42  ;;  %7204 = vmatpush1.bf16.msra.mxu1 %v19838_v44  ;;  %v18727_v42 = vadd.f32 %v1680_v29, %v870_v28  ;;  %v23129_v44 = vsub.s32 5, %v864_v10 }
 0x30c   :  { %7119 = vmatprep.subr.bf16.mxu0 %v19843_v45  ;;  %7205 = vmatprep.subr.bf16.mxu1 %v19846_v48  ;;  %v18735_v45 = vadd.f32 %v1688_v38, %v878_v37  ;;  %v23131_v48 = vsub.s32 7, %v864_v10 }
 0x30e   :  { %v18740_v20 = vadd.f32 %v18735_v45, %v23089_v57 }
 0x30f   :  { %7120 = vmatpush1.bf16.msra.mxu0 %v19841_v50  ;;  %7206 = vmatpush1.bf16.msra.mxu1 %v19844_v58  ;;  %v18726_v50 = vadd.f32 %v18725_v39, %v23075_v46  ;;  %v882_v58 = vrot.slane %v857_v11, %v23125_v40  ;;  %v894_v46 = vrot.slane %v857_v11, %v23131_v48 }
 0x310   :  { %7121 = vmatprep.subr.bf16.mxu0 %v19849_v59  ;;  %7207 = vmatprep.subr.bf16.mxu1 %v19852_v60  ;;  %v1692_v59 = vrot.slane %v859_v12, %v23125_v40  ;;  %v18734_v60 = vadd.f32 %v18733_v41, %v23077_v47  ;;  %v17055_v28 = vmul.f32 -1.442695, %v18740_v20 }
 0x312   :  { %v18741_v47 = vadd.f32 %v1692_v59, %v882_v58 }
 0x313   :  { %7122 = vmatpush1.bf16.msra.mxu0 %v19847_v61  ;;  %7208 = vmatpush1.bf16.msra.mxu1 %v19850_v62  ;;  %v890_v61 = vrot.slane %v857_v11, %v23127_v49  ;;  %v1700_v62 = vrot.slane %v859_v12, %v23127_v49 }
 0x314   :  { %7123 = vmatprep.subr.bf16.mxu0 %v19855_v63  ;;  %7209 = vmatprep.subr.bf16.mxu1 %v19858_v36  ;;  %v18728_v63 = vadd.f32 %v18727_v42, %v23079_v51  ;;  %v886_v36 = vrot.slane %v857_v11, %v23129_v44  ;;  %v18732_v51 = vadd.f32 %v18727_v42, %v23087_v56 }
 0x316   :  { %v17049_v9 = vmul.f32 -1.442695, %v18728_v63  ;;  %v17053_v24 = vmul.f32 -1.442695, %v18732_v51 }
 0x317   :  { %7124 = vmatpush1.bf16.msra.mxu0 %v19853_v1  ;;  %7210 = vmatpush1.bf16.msra.mxu1 %v19856_v2  ;;  %v1696_v1 = vrot.slane %v859_v12, %v23129_v44  ;;  %v18736_v2 = vadd.f32 %v18735_v45, %v23081_v52 }
 0x318   :  { %7125 = vmatprep.subr.bf16.mxu0 %v19861_v3  ;;  %7211 = vmatprep.subr.bf16.mxu1 %v19864_v4  ;;  %v1704_v3 = vrot.slane %v859_v12, %v23131_v48  ;;  %v17048_v4 = vmul.f32 -1.442695, %v18726_v50 }
 0x319   :  { %v18743_v10 = vadd.f32 %v1696_v1, %v886_v36  ;;  %v17051_v16 = vmul.f32 -1.442695, %v18736_v2 }
 0x31a   :  { %v18751_v52 = vadd.f32 %v1704_v3, %v894_v46  ;;  %22105 = vpow2.f32 %v17048_v4 }
 0x31b   :  { %7126 = vmatpush1.bf16.msra.mxu0 %v19859_v5  ;;  %7212 = vmatpush1.bf16.msra.mxu1 %v19862_v6  ;;  %v18730_v5 = vadd.f32 %v18725_v39, %v23083_v53  ;;  %v17050_v6 = vmul.f32 -1.442695, %v18734_v60 }
 0x31c   :  { %7138 = vmatprep.subr.bf16.mxu0 %v19867_v7  ;;  %7224 = vmatprep.subr.bf16.mxu1 %v19870_v8  ;;  %v18738_v7 = vadd.f32 %v18733_v41, %v23085_v55  ;;  %v18749_v8 = vadd.f32 %v1700_v62, %v890_v61 }
 0x31d   :  { %v17052_v11 = vmul.f32 -1.442695, %v18730_v5  ;;  %22107 = vpow2.f32 %v17050_v6 }
 0x31e   :  { %v17054_v23 = vmul.f32 -1.442695, %v18738_v7  ;;  %22109 = vpow2.f32 %v17049_v9 }
 0x31f   :  { %22111 = vpow2.f32 %v17051_v16 }
 0x320   :  { %22113 = vpow2.f32 %v17052_v11 }
 0x321   :  { %22115 = vpow2.f32 %v17054_v23 }
 0x322   :  { %22117 = vpow2.f32 %v17053_v24 }
 0x323   :  { %22119 = vpow2.f32 %v17055_v28 }
 0x324   :  { %v22106_v42 = vpop.eup %22105 }
 0x325   :  { %v4201_v59 = vadd.f32 1.0, %v22106_v42 }
 0x331   :  { %v23093_v30 = vpop.f32.mrb[4].mxu0  ;;  %v23095_v31 = vpop.f32.mrb[4].mxu1 }
 0x332   :  { %v23097_v54 = vpop.f32.mrb[5].mxu0  ;;  %v23099_v32 = vpop.f32.mrb[5].mxu1  ;;  %v18742_v12 = vadd.f32 %v18741_v47, %v23093_v30  ;;  %v18750_v53 = vadd.f32 %v18749_v8, %v23095_v31 }
 0x333   :  { %v23101_v33 = vpop.f32.mrb[6].mxu0  ;;  %v23103_v34 = vpop.f32.mrb[6].mxu1  ;;  %v18744_v55 = vadd.f32 %v18743_v10, %v23097_v54  ;;  %v18752_v56 = vadd.f32 %v18751_v52, %v23099_v32 }
 0x334   :  { %v23105_v43 = vpop.f32.mrb[7].mxu0  ;;  %v23107_v35 = vpop.f32.mrb[7].mxu1  ;;  %v17056_v29 = vmul.f32 -1.442695, %v18742_v12  ;;  %v18746_v57 = vadd.f32 %v18741_v47, %v23101_v33  ;;  %v17058_v37 = vmul.f32 -1.442695, %v18750_v53  ;;  %v18754_v30 = vadd.f32 %v18749_v8, %v23103_v34 }
 0x335   :  { %v17057_v38 = vmul.f32 -1.442695, %v18744_v55  ;;  %v18748_v31 = vadd.f32 %v18743_v10, %v23105_v43  ;;  %v17059_v39 = vmul.f32 -1.442695, %v18752_v56  ;;  %v18756_v54 = vadd.f32 %v18751_v52, %v23107_v35  ;;  %v22108_v33 = vpop.eup %22107  ;;  %v858_v47 = vld [vmem:[#allocation6 + $0x8] sm:$0xf] }
 0x336   :  { %22121 = vpow2.f32 %v17056_v29  ;;  %v17060_v41 = vmul.f32 -1.442695, %v18746_v57  ;;  %v17062_v32 = vmul.f32 -1.442695, %v18754_v30  ;;  %v22110_v58 = vpop.eup %22109  ;;  %v4203_v60 = vadd.f32 1.0, %v22108_v33 }
 0x337   :  { %22123 = vpow2.f32 %v17058_v37  ;;  %v17061_v45 = vmul.f32 -1.442695, %v18748_v31  ;;  %v17063_v50 = vmul.f32 -1.442695, %v18756_v54  ;;  %v22112_v34 = vpop.eup %22111  ;;  %v4202_v35 = vadd.f32 1.0, %v22110_v58 }
 0x338   :  { %22125 = vpow2.f32 %v17057_v38  ;;  %v22114_v43 = vpop.eup %22113  ;;  %v4204_v63 = vadd.f32 1.0, %v22112_v34  ;;  %v898_v52 = vrot.slane %v858_v47, %v23109_v13  ;;  %v860_v12 = vld [vmem:[#allocation7 + $0x8] sm:$0xf]  ;;  %v902_v53 = vrot.slane %v858_v47, %v23113_v15 }
 0x339   :  { %22127 = vpow2.f32 %v17059_v39  ;;  %v22116_v61 = vpop.eup %22115  ;;  %v4205_v1 = vadd.f32 1.0, %v22114_v43  ;;  %v906_v24 = vrot.slane %v858_v47, %v23111_v14  ;;  %v910_v28 = vrot.slane %v858_v47, %v23117_v21 }
 0x33a   :  { %22129 = vpow2.f32 %v17060_v41  ;;  %v22118_v62 = vpop.eup %22117  ;;  %v4207_v46 = vadd.f32 1.0, %v22116_v61  ;;  %v1708_v37 = vrot.slane %v860_v12, %v23109_v13  ;;  %v1716_v30 = vrot.slane %v860_v12, %v23111_v14 }
 0x33b   :  { %22131 = vpow2.f32 %v17062_v32  ;;  %v22120_v36 = vpop.eup %22119  ;;  %v4206_v4 = vadd.f32 1.0, %v22118_v62  ;;  %v1712_v39 = vrot.slane %v860_v12, %v23113_v15  ;;  %v1720_v54 = vrot.slane %v860_v12, %v23117_v21 }
 0x33c   :  { %22133 = vpow2.f32 %v17061_v45  ;;  %v4208_v6 = vadd.f32 1.0, %v22120_v36  ;;  %v1616_v32 = vadd.f32 %v23051_v17, %v898_v52  ;;  %v1618_v42 = vadd.f32 %v23055_v19, %v902_v53 }
 0x33d   :  { %22135 = vpow2.f32 %v17063_v50  ;;  %v1659_v45 = vadd.f32 %v23053_v18, %v906_v24  ;;  %v1620_v50 = vadd.f32 %v23059_v22, %v898_v52  ;;  %v1661_v58 = vadd.f32 %v23057_v0, %v910_v28 }
 0x33e   :  { %22137 = vrcp.f32 %v4201_v59  ;;  %v1663_v34 = vadd.f32 %v23061_v25, %v906_v24  ;;  %v1622_v61 = vadd.f32 %v23063_v26, %v902_v53 }
 0x33f   :  { %22139 = vrcp.f32 %v4203_v60 }
 0x340   :  { %v22122_v2 = vpop.eup %22121  ;;  %22141 = vrcp.f32 %v4202_v35 }
 0x341   :  { %v22124_v3 = vpop.eup %22123  ;;  %22143 = vrcp.f32 %v4204_v63  ;;  %v4257_v8 = vadd.f32 1.0, %v22122_v2  ;;  %v1665_v63 = vadd.f32 %v23065_v27, %v910_v28 }
 0x342   :  { %v22126_v5 = vpop.eup %22125  ;;  %22145 = vrcp.f32 %v4205_v1  ;;  %v4259_v51 = vadd.f32 1.0, %v22124_v3 }
 0x343   :  { %v22128_v7 = vpop.eup %22127  ;;  %22147 = vrcp.f32 %v4207_v46  ;;  %v4258_v16 = vadd.f32 1.0, %v22126_v5 }
 0x344   :  { %v22130_v9 = vpop.eup %22129  ;;  %22149 = vrcp.f32 %v4206_v4  ;;  %v4260_v11 = vadd.f32 1.0, %v22128_v7 }
 0x345   :  { %v22132_v10 = vpop.eup %22131  ;;  %22151 = vrcp.f32 %v4208_v6  ;;  %v4261_v55 = vadd.f32 1.0, %v22130_v9 }
 0x346   :  { %v22134_v20 = vpop.eup %22133  ;;  %22153 = vrcp.f32 %v4257_v8  ;;  %v4263_v56 = vadd.f32 1.0, %v22132_v10 }
 0x347   :  { %v22136_v23 = vpop.eup %22135  ;;  %22155 = vrcp.f32 %v4259_v51  ;;  %v4262_v57 = vadd.f32 1.0, %v22134_v20 }
 0x348   :  { %v22138_v29 = vpop.eup %22137  ;;  %22157 = vrcp.f32 %v4258_v16  ;;  %v4264_v31 = vadd.f32 1.0, %v22136_v23 }
 0x349   :  { %v22140_v38 = vpop.eup %22139  ;;  %22159 = vrcp.f32 %v4260_v11 }
 0x34a   :  { %v22142_v41 = vpop.eup %22141  ;;  %22161 = vrcp.f32 %v4261_v55 }
 0x34b   :  { %v22144_v33 = vpop.eup %22143  ;;  %22163 = vrcp.f32 %v4263_v56 }
 0x34c   :  { %v22146_v60 = vpop.eup %22145  ;;  %22165 = vrcp.f32 %v4262_v57 }
 0x34d   :  { %v22148_v18 = vpop.eup %22147  ;;  %22167 = vrcp.f32 %v4264_v31 }
 0x34e   :  { %v22150_v25 = vpop.eup %22149 }
 0x34f   :  { %v22152_v47 = vpop.eup %22151 }
 0x350   :  { %v22154_v51 = vpop.eup %22153 }
 0x351   :  { %v22156_v52 = vpop.eup %22155 }
 0x352   :  { %v22158_v24 = vpop.eup %22157 }
 0x353   :  { %v22160_v56 = vpop.eup %22159 }
 0x3b1   :  { %v4074_v59 = vpop.f32.mrb[12].mxu0  ;;  %v4160_v43 = vpop.f32.mrb[12].mxu1 }
 0x3b2   :  { %v18757_v17 = vadd.f32 %v4074_v59, %v1708_v37  ;;  %v18761_v35 = vadd.f32 %v4160_v43, %v1716_v30  ;;  %v4076_v19 = vpop.f32.mrb[13].mxu0  ;;  %v4162_v62 = vpop.f32.mrb[13].mxu1  ;;  %v4308_v43 = vsub.f32 1.0, %v22160_v56 }
 0x3b3   :  { %v18758_v22 = vadd.f32 %v4076_v19, %v1712_v39  ;;  %v18762_v36 = vadd.f32 %v4162_v62, %v1720_v54  ;;  %v4078_v0 = vpop.f32.mrb[14].mxu0  ;;  %v4164_v1 = vpop.f32.mrb[14].mxu1 }
 0x3b4   :  { %v4281_v2 = vmul.f32 %v22138_v29, %v18757_v17  ;;  %v4283_v46 = vmul.f32 %v22140_v38, %v18761_v35  ;;  %v18759_v3 = vadd.f32 %v4078_v0, %v1708_v37  ;;  %v18763_v4 = vadd.f32 %v4164_v1, %v1716_v30  ;;  %v4080_v5 = vpop.f32.mrb[15].mxu0  ;;  %v4166_v26 = vpop.f32.mrb[15].mxu1  ;;  %v22347_v17 = vld [vmem:[%s23713_s23 + $0x8] sm:$0xff] }
 0x3b5   :  { %v4282_v6 = vmul.f32 %v22142_v41, %v18758_v22  ;;  %v4284_v7 = vmul.f32 %v22144_v33, %v18762_v36  ;;  %v18760_v8 = vadd.f32 %v4080_v5, %v1712_v39  ;;  %v18764_v9 = vadd.f32 %v4166_v26, %v1720_v54  ;;  %v22162_v37 = vpop.eup %22161  ;;  %v22348_v22 = vld [vmem:[%s23713_s23 + $0x18] sm:$0xff] }
 0x3b6   :  { %v4289_v10 = vadd.f32 %v4281_v2, %v1616_v32  ;;  %v4291_v27 = vadd.f32 %v4283_v46, %v1659_v45  ;;  %v4285_v16 = vmul.f32 %v22146_v60, %v18759_v3  ;;  %v4287_v20 = vmul.f32 %v22148_v18, %v18763_v4  ;;  %v22164_v30 = vpop.eup %22163  ;;  %v22349_v46 = vld [vmem:[%s23713_s23 + $0x20] sm:$0xff] }
 0x3b7   :  { %v4290_v11 = vadd.f32 %v4282_v6, %v1618_v42  ;;  %v4292_v12 = vadd.f32 %v4284_v7, %v1661_v58  ;;  %v4286_v23 = vmul.f32 %v22150_v25, %v18760_v8  ;;  %v4288_v53 = vmul.f32 %v22152_v47, %v18764_v9  ;;  %v22166_v38 = vpop.eup %22165  ;;  %v22345_v42 = vld [vmem:[%s23713_s23] sm:$0xff]  ;;  %v22350_v6 = vld [vmem:[%s23713_s23 + $0x30] sm:$0xff] }
 0x3b8   :  { %22169 = vtanh.f32 %v4289_v10  ;;  %v4293_v55 = vadd.f32 %v4285_v16, %v1620_v50  ;;  %v4295_v28 = vadd.f32 %v4287_v20, %v1663_v34  ;;  %v22168_v31 = vpop.eup %22167  ;;  %v4305_v39 = vsub.f32 1.0, %v22154_v51  ;;  %v22346_v34 = vld [vmem:[%s23713_s23 + $0x10] sm:$0xff] }
 0x3b9   :  { %22171 = vtanh.f32 %v4291_v27  ;;  %v4294_v29 = vadd.f32 %v4286_v23, %v1622_v61  ;;  %v4296_v57 = vadd.f32 %v4288_v53, %v1665_v63  ;;  %v4307_v41 = vsub.f32 1.0, %v22156_v52  ;;  %v22351_v27 = vld [vmem:[%s23713_s23 + $0x28] sm:$0xff] }
 0x3ba   :  { %22173 = vtanh.f32 %v4290_v11  ;;  %v4321_v45 = vmul.f32 %v22345_v42, %v22154_v51  ;;  %v4306_v33 = vsub.f32 1.0, %v22158_v24  ;;  %v4323_v59 = vmul.f32 %v22346_v34, %v22156_v52  ;;  %v22352_v11 = vld [vmem:[%s23713_s23 + $0x38] sm:$0xff]  ;;  %v19886_v34 = vld [vmem:[#allocation9 + $0x728] ss:$48 sps:$4 sm:$0xff]  }
 0x3bb   :  { %22175 = vtanh.f32 %v4292_v12  ;;  %v4322_v35 = vmul.f32 %v22347_v17, %v22158_v24  ;;  %v4309_v19 = vsub.f32 1.0, %v22162_v37  ;;  %v4324_v36 = vmul.f32 %v22348_v22, %v22160_v56  ;;  %v19877_v42 = vld [vmem:[#allocation9 + $0x6c0] ss:$48 sps:$4 sm:$0xff]   ;;  %v19897_v17 = vld [vmem:[#allocation9 + $0x7e4] ss:$48 sps:$4 sm:$0xff]  }
 0x3bc   :  { %22177 = vtanh.f32 %v4293_v55  ;;  %v4311_v0 = vsub.f32 1.0, %v22164_v30  ;;  %v4325_v3 = vmul.f32 %v22349_v46, %v22162_v37  ;;  %v4310_v4 = vsub.f32 1.0, %v22166_v38  ;;  %v19865_v55 = vld [vmem:[#allocation9 + $0x600] ss:$48 sps:$4 sm:$0xff]   ;;  %v19915_v46 = vld [vmem:[#allocation9 + $0x904] ss:$48 sps:$4 sm:$0xff]  }
 0x3bd   :  { %22179 = vtanh.f32 %v4295_v28  ;;  %v4327_v7 = vmul.f32 %v22350_v6, %v22164_v30  ;;  %v4312_v8 = vsub.f32 1.0, %v22168_v31  ;;  %v4326_v16 = vmul.f32 %v22351_v27, %v22166_v38  ;;  %v19868_v28 = vld [vmem:[#allocation9 + $0x608] ss:$48 sps:$4 sm:$0xff]   ;;  %v19873_v30 = vld [vmem:[#allocation9 + $0x664] ss:$48 sps:$4 sm:$0xff]  }
 0x3be   :  { %22181 = vtanh.f32 %v4294_v29  ;;  %v4328_v12 = vmul.f32 %v22352_v11, %v22168_v31  ;;  %v19871_v31 = vld [vmem:[#allocation9 + $0x660] ss:$48 sps:$4 sm:$0xff]   ;;  %v19933_v27 = vld [vmem:[#allocation9 + $0xa24] ss:$48 sps:$4 sm:$0xff]  }
 0x3bf   :  { %22183 = vtanh.f32 %v4296_v57  ;;  %v19901_v22 = vld [vmem:[#allocation9 + $0x840] ss:$48 sps:$4 sm:$0xff]   ;;  %v19939_v11 = vld [vmem:[#allocation9 + $0xa84] ss:$48 sps:$4 sm:$0xff]  }
 0x3c0   :  { %v19919_v6 = vld [vmem:[#allocation9 + $0x960] ss:$48 sps:$4 sm:$0xff]  }
 0x3c2   :  { %v22170_v54 = vpop.eup %22169 }
 0x3c3   :  { %v22172_v32 = vpop.eup %22171  ;;  %v4313_v50 = vmul.f32 %v22170_v54, %v4305_v39  ;;  %v19874_v39 = vld [vmem:[#allocation9 + $0x668] ss:$48 sps:$4 sm:$0xff]   ;;  %v19876_v54 = vld [vmem:[#allocation9 + $0x66c] ss:$48 sps:$4 sm:$0xff]  }
 0x3c4   :  { %v22174_v58 = vpop.eup %22173  ;;  %v4315_v60 = vmul.f32 %v22172_v32, %v4307_v41  ;;  %v19879_v41 = vld [vmem:[#allocation9 + $0x6c4] ss:$48 sps:$4 sm:$0xff]   ;;  %v19882_v32 = vld [vmem:[#allocation9 + $0x6cc] ss:$48 sps:$4 sm:$0xff]  }
 0x3c5   :  { %v22176_v61 = vpop.eup %22175  ;;  %v4329_v62 = vadd.f32 %v4321_v45, %v4313_v50  ;;  %v4314_v18 = vmul.f32 %v22174_v58, %v4306_v33  ;;  %v19880_v45 = vld [vmem:[#allocation9 + $0x6c8] ss:$48 sps:$4 sm:$0xff]   ;;  %v19885_v33 = vld [vmem:[#allocation9 + $0x724] ss:$48 sps:$4 sm:$0xff]   ;;  %v19888_v50 = vld [vmem:[#allocation9 + $0x72c] ss:$48 sps:$4 sm:$0xff]  }
 0x3c6   :  { %v22178_v63 = vpop.eup %22177  ;;  %v4331_v1 = vadd.f32 %v4323_v59, %v4315_v60  ;;  %v4316_v25 = vmul.f32 %v22176_v61, %v4308_v43  ;;  %v19883_v58 = vld [vmem:[#allocation9 + $0x720] ss:$48 sps:$4 sm:$0xff]   ;;  %v19891_v59 = vld [vmem:[#allocation9 + $0x784] ss:$48 sps:$4 sm:$0xff]   ;;  %v19894_v43 = vld [vmem:[#allocation9 + $0x78c] ss:$48 sps:$4 sm:$0xff]  }
 0x3c7   :  { %v22180_v2 = vpop.eup %22179  ;;  %16511 = vst [vmem:[%s23708_s17] sm:$0xff] %v4329_v62  ;;  %v4330_v5 = vadd.f32 %v4322_v35, %v4314_v18  ;;  %v4317_v26 = vmul.f32 %v22178_v63, %v4309_v19  ;;  %v19889_v60 = vld [vmem:[#allocation9 + $0x780] ss:$48 sps:$4 sm:$0xff]   ;;  %v19892_v61 = vld [vmem:[#allocation9 + $0x788] ss:$48 sps:$4 sm:$0xff]   ;;  %v19900_v35 = vld [vmem:[#allocation9 + $0x7ec] ss:$48 sps:$4 sm:$0xff]  }
 0x3c8   :  { %v22182_v47 = vpop.eup %22181  ;;  %16513 = vst [vmem:[%s23708_s17 + $0x10] sm:$0xff] %v4331_v1  ;;  %v4332_v9 = vadd.f32 %v4324_v36, %v4316_v25  ;;  %v4319_v51 = vmul.f32 %v22180_v2, %v4311_v0  ;;  %v19895_v19 = vld [vmem:[#allocation9 + $0x7e0] ss:$48 sps:$4 sm:$0xff]   ;;  %v19903_v18 = vld [vmem:[#allocation9 + $0x844] ss:$48 sps:$4 sm:$0xff]  }
 0x3c9   :  { %v22184_v10 = vpop.eup %22183  ;;  %16512 = vst [vmem:[%s23708_s17 + $0x8] sm:$0xff] %v4330_v5  ;;  %v4333_v20 = vadd.f32 %v4325_v3, %v4317_v26  ;;  %v4318_v52 = vmul.f32 %v22182_v47, %v4310_v4  ;;  %v19906_v63 = vld [vmem:[#allocation9 + $0x84c] ss:$48 sps:$4 sm:$0xff]   ;;  %v19904_v36 = vld [vmem:[#allocation9 + $0x848] ss:$48 sps:$4 sm:$0xff]  }
 0x3ca   :  { %16514 = vst [vmem:[%s23708_s17 + $0x18] sm:$0xff] %v4332_v9  ;;  %v4335_v23 = vadd.f32 %v4327_v7, %v4319_v51  ;;  %v4320_v53 = vmul.f32 %v22184_v10, %v4312_v8  ;;  %v19909_v0 = vld [vmem:[#allocation9 + $0x8a4] ss:$48 sps:$4 sm:$0xff]   ;;  %v19907_v25 = vld [vmem:[#allocation9 + $0x8a0] ss:$48 sps:$4 sm:$0xff]  }
 0x3cb   :  { %16515 = vst [vmem:[%s23708_s17 + $0x20] sm:$0xff] %v4333_v20  ;;  %v4334_v24 = vadd.f32 %v4326_v16, %v4318_v52  ;;  %v23212_v56 = vpack.c.bf16 %v4333_v20, %v4329_v62  ;;  %v19898_v62 = vld [vmem:[#allocation9 + $0x7e8] ss:$48 sps:$4 sm:$0xff]   ;;  %v19918_v3 = vld [vmem:[#allocation9 + $0x90c] ss:$48 sps:$4 sm:$0xff]  }
 0x3cc   :  { %16517 = vst [vmem:[%s23708_s17 + $0x30] sm:$0xff] %v4335_v23  ;;  %v4336_v29 = vadd.f32 %v4328_v12, %v4320_v53  ;;  %v23217_v57 = vpack.c.bf16 %v4335_v23, %v4331_v1  ;;  %v19912_v1 = vld [vmem:[#allocation9 + $0x8ac] ss:$48 sps:$4 sm:$0xff]   ;;  %v19910_v2 = vld [vmem:[#allocation9 + $0x8a8] ss:$48 sps:$4 sm:$0xff]  }
 0x3cd   :  { %16516 = vst [vmem:[%s23708_s17 + $0x28] sm:$0xff] %v4334_v24  ;;  %v23222_v37 = vpack.c.bf16 %v4334_v24, %v4330_v5  ;;  %v19913_v4 = vld [vmem:[#allocation9 + $0x900] ss:$48 sps:$4 sm:$0xff]   ;;  %v19916_v5 = vld [vmem:[#allocation9 + $0x908] ss:$48 sps:$4 sm:$0xff]  }
 0x3ce   :  { %16518 = vst [vmem:[%s23708_s17 + $0x38] sm:$0xff] %v4336_v29  ;;  %v23227_v38 = vpack.c.bf16 %v4336_v29, %v4332_v9  ;;  %v19921_v26 = vld [vmem:[#allocation9 + $0x964] ss:$48 sps:$4 sm:$0xff]   ;;  %v19924_v47 = vld [vmem:[#allocation9 + $0x96c] ss:$48 sps:$4 sm:$0xff]  }
 0x3cf   :  { %7127 = vmatprep.mubr.bf16.mxu0 %v23222_v37  ;;  %7213 = vmatprep.mubr.bf16.mxu1 %v23222_v37  ;;  %v19922_v7 = vld [vmem:[#allocation9 + $0x968] ss:$48 sps:$4 sm:$0xff]   ;;  %v19927_v8 = vld [vmem:[#allocation9 + $0x9c4] ss:$48 sps:$4 sm:$0xff]   ;;  %v19930_v9 = vld [vmem:[#allocation9 + $0x9cc] ss:$48 sps:$4 sm:$0xff]  }
 0x3d0   :  { %7128 = vmatmul.mubr.bf16.vlgmr.msra.gmra.mrb[16].mxu0 %v23212_v56  ;;  %7214 = vmatmul.mubr.bf16.vlgmr.msra.gmra.mrb[16].mxu1 %v23212_v56  ;;  %v19925_v51 = vld [vmem:[#allocation9 + $0x9c0] ss:$48 sps:$4 sm:$0xff]   ;;  %v19928_v10 = vld [vmem:[#allocation9 + $0x9c8] ss:$48 sps:$4 sm:$0xff]   ;;  %v19936_v16 = vld [vmem:[#allocation9 + $0xa2c] ss:$48 sps:$4 sm:$0xff]  }
 0x3d1   :  { %7139 = vmatpush1.bf16.msra.mxu0 %v19865_v55  ;;  %7225 = vmatpush1.bf16.msra.mxu1 %v19868_v28  ;;  %v19931_v20 = vld [vmem:[#allocation9 + $0xa20] ss:$48 sps:$4 sm:$0xff]   ;;  %v19934_v52 = vld [vmem:[#allocation9 + $0xa28] ss:$48 sps:$4 sm:$0xff]   ;;  %v19942_v12 = vld [vmem:[#allocation9 + $0xa8c] ss:$48 sps:$4 sm:$0xff]  }
 0x3d2   :  { %7170 = vmatprep.mubr.bf16.mxu0 %v23227_v38  ;;  %7256 = vmatprep.mubr.bf16.mxu1 %v23227_v38  ;;  %v19937_v23 = vld [vmem:[#allocation9 + $0xa80] ss:$48 sps:$4 sm:$0xff]   ;;  %v19940_v53 = vld [vmem:[#allocation9 + $0xa88] ss:$48 sps:$4 sm:$0xff]   ;;  %v19945_v24 = vld [vmem:[#allocation9 + $0xae4] ss:$48 sps:$4 sm:$0xff]  }
 0x3d3   :  { %7140 = vmatprep.subr.bf16.mxu0 %v19873_v30  ;;  %7226 = vmatprep.subr.bf16.mxu1 %v19876_v54  ;;  %v19948_v55 = vld [vmem:[#allocation9 + $0xaec] ss:$48 sps:$4 sm:$0xff]   ;;  %v19943_v28 = vld [vmem:[#allocation9 + $0xae0] ss:$48 sps:$4 sm:$0xff]   ;;  %v19946_v29 = vld [vmem:[#allocation9 + $0xae8] ss:$48 sps:$4 sm:$0xff]  }
 0x3d4   :  { %v19951_v30 = vld [vmem:[#allocation9 + $0xb44] ss:$48 sps:$4 sm:$0xff]   ;;  %v19952_v54 = vld [vmem:[#allocation9 + $0xb48] ss:$48 sps:$4 sm:$0xff]  }
 0x3d5   :  { %7141 = vmatpush1.bf16.msra.mxu0 %v19871_v31  ;;  %7227 = vmatpush1.bf16.msra.mxu1 %v19874_v39  ;;  %v19954_v31 = vld [vmem:[#allocation9 + $0xb4c] ss:$48 sps:$4 sm:$0xff]   ;;  %v19949_v39 = vld [vmem:[#allocation9 + $0xb40] ss:$48 sps:$4 sm:$0xff]  }
 0x3d6   :  { %7142 = vmatprep.subr.bf16.mxu0 %v19879_v41  ;;  %7228 = vmatprep.subr.bf16.mxu1 %v19882_v32  ;;  %v19957_v41 = vld [vmem:[#allocation9 + $0xba4] ss:$48 sps:$4 sm:$0xff]   ;;  %v19960_v32 = vld [vmem:[#allocation9 + $0xbac] ss:$48 sps:$4 sm:$0xff]  }
 0x3d9   :  { %7143 = vmatpush1.bf16.msra.mxu0 %v19877_v42  ;;  %7229 = vmatpush1.bf16.msra.mxu1 %v19880_v45  ;;  %v19955_v42 = vld [vmem:[#allocation9 + $0xba0] ss:$48 sps:$4 sm:$0xff]   ;;  %v19958_v45 = vld [vmem:[#allocation9 + $0xba8] ss:$48 sps:$4 sm:$0xff]  }
 0x3da   :  { %7144 = vmatprep.subr.bf16.mxu0 %v19885_v33  ;;  %7230 = vmatprep.subr.bf16.mxu1 %v19888_v50  ;;  %v19963_v33 = vld [vmem:[#allocation9 + $0x14] ss:$48 sps:$4 sm:$0xff]   ;;  %v19966_v50 = vld [vmem:[#allocation9 + $0x1c] ss:$48 sps:$4 sm:$0xff]  }
 0x3dd   :  { %7145 = vmatpush1.bf16.msra.mxu0 %v19883_v58  ;;  %7231 = vmatpush1.bf16.msra.mxu1 %v19886_v34  ;;  %v19961_v58 = vld [vmem:[#allocation9 + $0x10] ss:$48 sps:$4 sm:$0xff]   ;;  %v19964_v34 = vld [vmem:[#allocation9 + $0x18] ss:$48 sps:$4 sm:$0xff]  }
 0x3de   :  { %7146 = vmatprep.subr.bf16.mxu0 %v19891_v59  ;;  %7232 = vmatprep.subr.bf16.mxu1 %v19894_v43  ;;  %v19969_v59 = vld [vmem:[#allocation9 + $0x74] ss:$48 sps:$4 sm:$0xff]   ;;  %v19972_v43 = vld [vmem:[#allocation9 + $0x7c] ss:$48 sps:$4 sm:$0xff]  }
 0x3e1   :  { %7147 = vmatpush1.bf16.msra.mxu0 %v19889_v60  ;;  %7233 = vmatpush1.bf16.msra.mxu1 %v19892_v61  ;;  %v19967_v60 = vld [vmem:[#allocation9 + $0x70] ss:$48 sps:$4 sm:$0xff]   ;;  %v19970_v61 = vld [vmem:[#allocation9 + $0x78] ss:$48 sps:$4 sm:$0xff]  }
 0x3e2   :  { %7148 = vmatprep.subr.bf16.mxu0 %v19897_v17  ;;  %7234 = vmatprep.subr.bf16.mxu1 %v19900_v35  ;;  %v19975_v17 = vld [vmem:[#allocation9 + $0xd4] ss:$48 sps:$4 sm:$0xff]   ;;  %v19978_v35 = vld [vmem:[#allocation9 + $0xdc] ss:$48 sps:$4 sm:$0xff]  }
 0x3e5   :  { %7149 = vmatpush1.bf16.msra.mxu0 %v19895_v19  ;;  %7235 = vmatpush1.bf16.msra.mxu1 %v19898_v62  ;;  %v19973_v19 = vld [vmem:[#allocation9 + $0xd0] ss:$48 sps:$4 sm:$0xff]   ;;  %v19976_v62 = vld [vmem:[#allocation9 + $0xd8] ss:$48 sps:$4 sm:$0xff]  }
 0x3e6   :  { %7150 = vmatprep.subr.bf16.mxu0 %v19903_v18  ;;  %7236 = vmatprep.subr.bf16.mxu1 %v19906_v63  ;;  %v19981_v18 = vld [vmem:[#allocation9 + $0x134] ss:$48 sps:$4 sm:$0xff]   ;;  %v19979_v63 = vld [vmem:[#allocation9 + $0x130] ss:$48 sps:$4 sm:$0xff]  }
 0x3e9   :  { %7151 = vmatpush1.bf16.msra.mxu0 %v19901_v22  ;;  %7237 = vmatpush1.bf16.msra.mxu1 %v19904_v36  ;;  %v19984_v22 = vld [vmem:[#allocation9 + $0x13c] ss:$48 sps:$4 sm:$0xff]   ;;  %v19982_v36 = vld [vmem:[#allocation9 + $0x138] ss:$48 sps:$4 sm:$0xff]  }
 0x3ea   :  { %7152 = vmatprep.subr.bf16.mxu0 %v19909_v0  ;;  %7238 = vmatprep.subr.bf16.mxu1 %v19912_v1  ;;  %v19987_v0 = vld [vmem:[#allocation9 + $0x194] ss:$48 sps:$4 sm:$0xff]   ;;  %v19985_v1 = vld [vmem:[#allocation9 + $0x190] ss:$48 sps:$4 sm:$0xff]  }
 0x3ed   :  { %7153 = vmatpush1.bf16.msra.mxu0 %v19907_v25  ;;  %7239 = vmatpush1.bf16.msra.mxu1 %v19910_v2  ;;  %v19990_v25 = vld [vmem:[#allocation9 + $0x19c] ss:$48 sps:$4 sm:$0xff]   ;;  %v19988_v2 = vld [vmem:[#allocation9 + $0x198] ss:$48 sps:$4 sm:$0xff]  }
 0x3ee   :  { %7154 = vmatprep.subr.bf16.mxu0 %v19915_v46  ;;  %7240 = vmatprep.subr.bf16.mxu1 %v19918_v3  ;;  %v19993_v46 = vld [vmem:[#allocation9 + $0x1f4] ss:$48 sps:$4 sm:$0xff]   ;;  %v19991_v3 = vld [vmem:[#allocation9 + $0x1f0] ss:$48 sps:$4 sm:$0xff]  }
 0x3f1   :  { %7155 = vmatpush1.bf16.msra.mxu0 %v19913_v4  ;;  %7241 = vmatpush1.bf16.msra.mxu1 %v19916_v5  ;;  %v19996_v4 = vld [vmem:[#allocation9 + $0x1fc] ss:$48 sps:$4 sm:$0xff]   ;;  %v19994_v5 = vld [vmem:[#allocation9 + $0x1f8] ss:$48 sps:$4 sm:$0xff]  }
 0x3f2   :  { %7156 = vmatprep.subr.bf16.mxu0 %v19921_v26  ;;  %7242 = vmatprep.subr.bf16.mxu1 %v19924_v47  ;;  %v19999_v26 = vld [vmem:[#allocation9 + $0x254] ss:$48 sps:$4 sm:$0xff]   ;;  %v19997_v47 = vld [vmem:[#allocation9 + $0x250] ss:$48 sps:$4 sm:$0xff]  }
 0x3f5   :  { %7157 = vmatpush1.bf16.msra.mxu0 %v19919_v6  ;;  %7243 = vmatpush1.bf16.msra.mxu1 %v19922_v7  ;;  %v20002_v6 = vld [vmem:[#allocation9 + $0x25c] ss:$48 sps:$4 sm:$0xff]   ;;  %v20000_v7 = vld [vmem:[#allocation9 + $0x258] ss:$48 sps:$4 sm:$0xff]  }
 0x3f6   :  { %7158 = vmatprep.subr.bf16.mxu0 %v19927_v8  ;;  %7244 = vmatprep.subr.bf16.mxu1 %v19930_v9  ;;  %v20005_v8 = vld [vmem:[#allocation9 + $0x2b4] ss:$48 sps:$4 sm:$0xff]   ;;  %v20003_v9 = vld [vmem:[#allocation9 + $0x2b0] ss:$48 sps:$4 sm:$0xff]  }
 0x3f9   :  { %7159 = vmatpush1.bf16.msra.mxu0 %v19925_v51  ;;  %7245 = vmatpush1.bf16.msra.mxu1 %v19928_v10  ;;  %v20008_v51 = vld [vmem:[#allocation9 + $0x2bc] ss:$48 sps:$4 sm:$0xff]   ;;  %v20006_v10 = vld [vmem:[#allocation9 + $0x2b8] ss:$48 sps:$4 sm:$0xff]  }
 0x3fa   :  { %7160 = vmatprep.subr.bf16.mxu0 %v19933_v27  ;;  %7246 = vmatprep.subr.bf16.mxu1 %v19936_v16  ;;  %v20011_v27 = vld [vmem:[#allocation9 + $0x314] ss:$48 sps:$4 sm:$0xff]   ;;  %v20009_v16 = vld [vmem:[#allocation9 + $0x310] ss:$48 sps:$4 sm:$0xff]  }
 0x3fd   :  { %7161 = vmatpush1.bf16.msra.mxu0 %v19931_v20  ;;  %7247 = vmatpush1.bf16.msra.mxu1 %v19934_v52  ;;  %v20014_v20 = vld [vmem:[#allocation9 + $0x31c] ss:$48 sps:$4 sm:$0xff]   ;;  %v20012_v52 = vld [vmem:[#allocation9 + $0x318] ss:$48 sps:$4 sm:$0xff]  }
 0x3fe   :  { %7162 = vmatprep.subr.bf16.mxu0 %v19939_v11  ;;  %7248 = vmatprep.subr.bf16.mxu1 %v19942_v12  ;;  %v20017_v11 = vld [vmem:[#allocation9 + $0x374] ss:$48 sps:$4 sm:$0xff]   ;;  %v20015_v12 = vld [vmem:[#allocation9 + $0x370] ss:$48 sps:$4 sm:$0xff]  }
 0x401   :  { %7163 = vmatpush1.bf16.msra.mxu0 %v19937_v23  ;;  %7249 = vmatpush1.bf16.msra.mxu1 %v19940_v53  ;;  %v20020_v23 = vld [vmem:[#allocation9 + $0x37c] ss:$48 sps:$4 sm:$0xff]   ;;  %v20018_v53 = vld [vmem:[#allocation9 + $0x378] ss:$48 sps:$4 sm:$0xff]  }
 0x402   :  { %7164 = vmatprep.subr.bf16.mxu0 %v19945_v24  ;;  %7250 = vmatprep.subr.bf16.mxu1 %v19948_v55  ;;  %v20023_v24 = vld [vmem:[#allocation9 + $0x3d4] ss:$48 sps:$4 sm:$0xff]   ;;  %v20021_v55 = vld [vmem:[#allocation9 + $0x3d0] ss:$48 sps:$4 sm:$0xff]  }
 0x405   :  { %7165 = vmatpush1.bf16.msra.mxu0 %v19943_v28  ;;  %7251 = vmatpush1.bf16.msra.mxu1 %v19946_v29  ;;  %v20026_v28 = vld [vmem:[#allocation9 + $0x3dc] ss:$48 sps:$4 sm:$0xff]   ;;  %v20024_v29 = vld [vmem:[#allocation9 + $0x3d8] ss:$48 sps:$4 sm:$0xff]  }
 0x406   :  { %7166 = vmatprep.subr.bf16.mxu0 %v19951_v30  ;;  %7252 = vmatprep.subr.bf16.mxu1 %v19954_v31  ;;  %v20029_v30 = vld [vmem:[#allocation9 + $0x434] ss:$48 sps:$4 sm:$0xff]   ;;  %v20027_v31 = vld [vmem:[#allocation9 + $0x430] ss:$48 sps:$4 sm:$0xff]  }
 0x409   :  { %7167 = vmatpush1.bf16.msra.mxu0 %v19949_v39  ;;  %7253 = vmatpush1.bf16.msra.mxu1 %v19952_v54  ;;  %v20032_v39 = vld [vmem:[#allocation9 + $0x43c] ss:$48 sps:$4 sm:$0xff]   ;;  %v20030_v54 = vld [vmem:[#allocation9 + $0x438] ss:$48 sps:$4 sm:$0xff]  }
 0x40a   :  { %7168 = vmatprep.subr.bf16.mxu0 %v19957_v41  ;;  %7254 = vmatprep.subr.bf16.mxu1 %v19960_v32  ;;  %v20035_v41 = vld [vmem:[#allocation9 + $0x494] ss:$48 sps:$4 sm:$0xff]   ;;  %v20033_v32 = vld [vmem:[#allocation9 + $0x490] ss:$48 sps:$4 sm:$0xff]  }
 0x40d   :  { %7169 = vmatpush1.bf16.msra.mxu0 %v19955_v42  ;;  %7255 = vmatpush1.bf16.msra.mxu1 %v19958_v45  ;;  %v20038_v42 = vld [vmem:[#allocation9 + $0x49c] ss:$48 sps:$4 sm:$0xff]   ;;  %v20036_v45 = vld [vmem:[#allocation9 + $0x498] ss:$48 sps:$4 sm:$0xff]  }
 0x40e   :  { %7267 = vmatprep.subr.bf16.mxu0 %v19963_v33  ;;  %7353 = vmatprep.subr.bf16.mxu1 %v19966_v50  ;;  %v20041_v33 = vld [vmem:[#allocation9 + $0x4f4] ss:$48 sps:$4 sm:$0xff]   ;;  %v20039_v50 = vld [vmem:[#allocation9 + $0x4f0] ss:$48 sps:$4 sm:$0xff]  }
 0x410   :  { %7171 = vmatmul.mubr.bf16.vlgmr.msra.gmra.mrb[16].mxu0 %v23217_v57  ;;  %7257 = vmatmul.mubr.bf16.vlgmr.msra.gmra.mrb[16].mxu1 %v23217_v57 }
 0x411   :  { %7268 = vmatpush1.bf16.msra.mxu0 %v19961_v58  ;;  %7299 = vmatprep.mubr.bf16.mxu0 %v23222_v37  ;;  %v20044_v58 = vld [vmem:[#allocation9 + $0x4fc] ss:$48 sps:$4 sm:$0xff]  }
 0x412   :  { %7354 = vmatpush1.bf16.msra.mxu1 %v19964_v34  ;;  %7385 = vmatprep.mubr.bf16.mxu1 %v23222_v37  ;;  %v20042_v34 = vld [vmem:[#allocation9 + $0x4f8] ss:$48 sps:$4 sm:$0xff]  }
 0x413   :  { %7269 = vmatprep.subr.bf16.mxu0 %v19969_v59  ;;  %7355 = vmatprep.subr.bf16.mxu1 %v19972_v43  ;;  %v20047_v59 = vld [vmem:[#allocation9 + $0x554] ss:$48 sps:$4 sm:$0xff]   ;;  %v20045_v43 = vld [vmem:[#allocation9 + $0x550] ss:$48 sps:$4 sm:$0xff]  }
 0x415   :  { %7270 = vmatpush1.bf16.msra.mxu0 %v19967_v60  ;;  %v20050_v60 = vld [vmem:[#allocation9 + $0x55c] ss:$48 sps:$4 sm:$0xff]  }
 0x416   :  { %7356 = vmatpush1.bf16.msra.mxu1 %v19970_v61  ;;  %7271 = vmatprep.subr.bf16.mxu0 %v19975_v17  ;;  %v20048_v61 = vld [vmem:[#allocation9 + $0x558] ss:$48 sps:$4 sm:$0xff]   ;;  %v20053_v17 = vld [vmem:[#allocation9 + $0x5b4] ss:$48 sps:$4 sm:$0xff]  }
 0x417   :  { %7357 = vmatprep.subr.bf16.mxu1 %v19978_v35  ;;  %v20051_v35 = vld [vmem:[#allocation9 + $0x5b0] ss:$48 sps:$4 sm:$0xff]  }
 0x419   :  { %7272 = vmatpush1.bf16.msra.mxu0 %v19973_v19  ;;  %v20056_v19 = vld [vmem:[#allocation9 + $0x5bc] ss:$48 sps:$4 sm:$0xff]  }
 0x41a   :  { %7358 = vmatpush1.bf16.msra.mxu1 %v19976_v62  ;;  %7273 = vmatprep.subr.bf16.mxu0 %v19981_v18  ;;  %v20054_v62 = vld [vmem:[#allocation9 + $0x5b8] ss:$48 sps:$4 sm:$0xff]   ;;  %v20059_v18 = vld [vmem:[#allocation9 + $0x614] ss:$48 sps:$4 sm:$0xff]  }
 0x41b   :  { %7359 = vmatprep.subr.bf16.mxu1 %v19984_v22  ;;  %v20057_v22 = vld [vmem:[#allocation9 + $0x610] ss:$48 sps:$4 sm:$0xff]  }
 0x41d   :  { %7274 = vmatpush1.bf16.msra.mxu0 %v19979_v63  ;;  %v20062_v63 = vld [vmem:[#allocation9 + $0x61c] ss:$48 sps:$4 sm:$0xff]  }
 0x41e   :  { %7360 = vmatpush1.bf16.msra.mxu1 %v19982_v36  ;;  %7275 = vmatprep.subr.bf16.mxu0 %v19987_v0  ;;  %v20060_v36 = vld [vmem:[#allocation9 + $0x618] ss:$48 sps:$4 sm:$0xff]   ;;  %v20065_v0 = vld [vmem:[#allocation9 + $0x674] ss:$48 sps:$4 sm:$0xff]  }
 0x41f   :  { %7361 = vmatprep.subr.bf16.mxu1 %v19990_v25  ;;  %v20066_v25 = vld [vmem:[#allocation9 + $0x678] ss:$48 sps:$4 sm:$0xff]  }
 0x421   :  { %7276 = vmatpush1.bf16.msra.mxu0 %v19985_v1  ;;  %v20063_v1 = vld [vmem:[#allocation9 + $0x670] ss:$48 sps:$4 sm:$0xff]  }
 0x422   :  { %7362 = vmatpush1.bf16.msra.mxu1 %v19988_v2  ;;  %7277 = vmatprep.subr.bf16.mxu0 %v19993_v46  ;;  %v20068_v2 = vld [vmem:[#allocation9 + $0x67c] ss:$48 sps:$4 sm:$0xff]   ;;  %v20071_v46 = vld [vmem:[#allocation9 + $0x6d4] ss:$48 sps:$4 sm:$0xff]  }
 0x423   :  { %7363 = vmatprep.subr.bf16.mxu1 %v19996_v4  ;;  %v20069_v4 = vld [vmem:[#allocation9 + $0x6d0] ss:$48 sps:$4 sm:$0xff]  }
 0x425   :  { %7278 = vmatpush1.bf16.msra.mxu0 %v19991_v3  ;;  %v20074_v3 = vld [vmem:[#allocation9 + $0x6dc] ss:$48 sps:$4 sm:$0xff]  }
 0x426   :  { %7364 = vmatpush1.bf16.msra.mxu1 %v19994_v5  ;;  %7279 = vmatprep.subr.bf16.mxu0 %v19999_v26  ;;  %v20072_v5 = vld [vmem:[#allocation9 + $0x6d8] ss:$48 sps:$4 sm:$0xff]   ;;  %v20077_v26 = vld [vmem:[#allocation9 + $0x734] ss:$48 sps:$4 sm:$0xff]  }
 0x427   :  { %7365 = vmatprep.subr.bf16.mxu1 %v20002_v6  ;;  %v20080_v6 = vld [vmem:[#allocation9 + $0x73c] ss:$48 sps:$4 sm:$0xff]  }
 0x429   :  { %7280 = vmatpush1.bf16.msra.mxu0 %v19997_v47  ;;  %v20075_v47 = vld [vmem:[#allocation9 + $0x730] ss:$48 sps:$4 sm:$0xff]  }
 0x42a   :  { %7366 = vmatpush1.bf16.msra.mxu1 %v20000_v7  ;;  %7281 = vmatprep.subr.bf16.mxu0 %v20005_v8  ;;  %v20078_v7 = vld [vmem:[#allocation9 + $0x738] ss:$48 sps:$4 sm:$0xff]   ;;  %v20083_v8 = vld [vmem:[#allocation9 + $0x794] ss:$48 sps:$4 sm:$0xff]  }
 0x42b   :  { %7367 = vmatprep.subr.bf16.mxu1 %v20008_v51  ;;  %v20086_v51 = vld [vmem:[#allocation9 + $0x79c] ss:$48 sps:$4 sm:$0xff]  }
 0x42d   :  { %7282 = vmatpush1.bf16.msra.mxu0 %v20003_v9  ;;  %v20081_v9 = vld [vmem:[#allocation9 + $0x790] ss:$48 sps:$4 sm:$0xff]  }
 0x42e   :  { %7368 = vmatpush1.bf16.msra.mxu1 %v20006_v10  ;;  %7283 = vmatprep.subr.bf16.mxu0 %v20011_v27  ;;  %v20084_v10 = vld [vmem:[#allocation9 + $0x798] ss:$48 sps:$4 sm:$0xff]   ;;  %v20089_v27 = vld [vmem:[#allocation9 + $0x7f4] ss:$48 sps:$4 sm:$0xff]  }
 0x42f   :  { %7369 = vmatprep.subr.bf16.mxu1 %v20014_v20  ;;  %v20092_v20 = vld [vmem:[#allocation9 + $0x7fc] ss:$48 sps:$4 sm:$0xff]  }
 0x431   :  { %7284 = vmatpush1.bf16.msra.mxu0 %v20009_v16  ;;  %v20087_v16 = vld [vmem:[#allocation9 + $0x7f0] ss:$48 sps:$4 sm:$0xff]  }
 0x432   :  { %7370 = vmatpush1.bf16.msra.mxu1 %v20012_v52  ;;  %7285 = vmatprep.subr.bf16.mxu0 %v20017_v11  ;;  %v20090_v52 = vld [vmem:[#allocation9 + $0x7f8] ss:$48 sps:$4 sm:$0xff]   ;;  %v20095_v11 = vld [vmem:[#allocation9 + $0x854] ss:$48 sps:$4 sm:$0xff]  }
 0x433   :  { %7371 = vmatprep.subr.bf16.mxu1 %v20020_v23  ;;  %v20098_v23 = vld [vmem:[#allocation9 + $0x85c] ss:$48 sps:$4 sm:$0xff]  }
 0x435   :  { %7286 = vmatpush1.bf16.msra.mxu0 %v20015_v12  ;;  %v20093_v12 = vld [vmem:[#allocation9 + $0x850] ss:$48 sps:$4 sm:$0xff]  }
 0x436   :  { %7372 = vmatpush1.bf16.msra.mxu1 %v20018_v53  ;;  %7287 = vmatprep.subr.bf16.mxu0 %v20023_v24  ;;  %v20096_v53 = vld [vmem:[#allocation9 + $0x858] ss:$48 sps:$4 sm:$0xff]   ;;  %v20101_v24 = vld [vmem:[#allocation9 + $0x8b4] ss:$48 sps:$4 sm:$0xff]  }
 0x437   :  { %7373 = vmatprep.subr.bf16.mxu1 %v20026_v28  ;;  %v20104_v28 = vld [vmem:[#allocation9 + $0x8bc] ss:$48 sps:$4 sm:$0xff]  }
 0x439   :  { %7288 = vmatpush1.bf16.msra.mxu0 %v20021_v55  ;;  %v20099_v55 = vld [vmem:[#allocation9 + $0x8b0] ss:$48 sps:$4 sm:$0xff]  }
 0x43a   :  { %7374 = vmatpush1.bf16.msra.mxu1 %v20024_v29  ;;  %7289 = vmatprep.subr.bf16.mxu0 %v20029_v30  ;;  %v20102_v29 = vld [vmem:[#allocation9 + $0x8b8] ss:$48 sps:$4 sm:$0xff]   ;;  %v20107_v30 = vld [vmem:[#allocation9 + $0x914] ss:$48 sps:$4 sm:$0xff]  }
 0x43b   :  { %7375 = vmatprep.subr.bf16.mxu1 %v20032_v39  ;;  %v20110_v39 = vld [vmem:[#allocation9 + $0x91c] ss:$48 sps:$4 sm:$0xff]  }
 0x43d   :  { %7290 = vmatpush1.bf16.msra.mxu0 %v20027_v31  ;;  %v20105_v31 = vld [vmem:[#allocation9 + $0x910] ss:$48 sps:$4 sm:$0xff]  }
 0x43e   :  { %7376 = vmatpush1.bf16.msra.mxu1 %v20030_v54  ;;  %7291 = vmatprep.subr.bf16.mxu0 %v20035_v41  ;;  %v20108_v54 = vld [vmem:[#allocation9 + $0x918] ss:$48 sps:$4 sm:$0xff]   ;;  %v20113_v41 = vld [vmem:[#allocation9 + $0x974] ss:$48 sps:$4 sm:$0xff]  }
 0x43f   :  { %7377 = vmatprep.subr.bf16.mxu1 %v20038_v42  ;;  %v20116_v42 = vld [vmem:[#allocation9 + $0x97c] ss:$48 sps:$4 sm:$0xff]  }
 0x441   :  { %7292 = vmatpush1.bf16.msra.mxu0 %v20033_v32  ;;  %v20111_v32 = vld [vmem:[#allocation9 + $0x970] ss:$48 sps:$4 sm:$0xff]  }
 0x442   :  { %7378 = vmatpush1.bf16.msra.mxu1 %v20036_v45  ;;  %7293 = vmatprep.subr.bf16.mxu0 %v20041_v33  ;;  %v20114_v45 = vld [vmem:[#allocation9 + $0x978] ss:$48 sps:$4 sm:$0xff]   ;;  %v20119_v33 = vld [vmem:[#allocation9 + $0x9d4] ss:$48 sps:$4 sm:$0xff]  }
 0x443   :  { %7379 = vmatprep.subr.bf16.mxu1 %v20044_v58  ;;  %v20122_v58 = vld [vmem:[#allocation9 + $0x9dc] ss:$48 sps:$4 sm:$0xff]  }
 0x445   :  { %7294 = vmatpush1.bf16.msra.mxu0 %v20039_v50  ;;  %v20117_v50 = vld [vmem:[#allocation9 + $0x9d0] ss:$48 sps:$4 sm:$0xff]  }
 0x446   :  { %7380 = vmatpush1.bf16.msra.mxu1 %v20042_v34  ;;  %7295 = vmatprep.subr.bf16.mxu0 %v20047_v59  ;;  %v20120_v34 = vld [vmem:[#allocation9 + $0x9d8] ss:$48 sps:$4 sm:$0xff]   ;;  %v20125_v59 = vld [vmem:[#allocation9 + $0xa34] ss:$48 sps:$4 sm:$0xff]  }
 0x447   :  { %7381 = vmatprep.subr.bf16.mxu1 %v20050_v60  ;;  %v20128_v60 = vld [vmem:[#allocation9 + $0xa3c] ss:$48 sps:$4 sm:$0xff]  }
 0x449   :  { %7296 = vmatpush1.bf16.msra.mxu0 %v20045_v43  ;;  %v20123_v43 = vld [vmem:[#allocation9 + $0xa30] ss:$48 sps:$4 sm:$0xff]  }
 0x44a   :  { %7382 = vmatpush1.bf16.msra.mxu1 %v20048_v61  ;;  %7297 = vmatprep.subr.bf16.mxu0 %v20053_v17  ;;  %v20126_v61 = vld [vmem:[#allocation9 + $0xa38] ss:$48 sps:$4 sm:$0xff]   ;;  %v20131_v17 = vld [vmem:[#allocation9 + $0xa94] ss:$48 sps:$4 sm:$0xff]  }
 0x44b   :  { %7383 = vmatprep.subr.bf16.mxu1 %v20056_v19  ;;  %v20134_v19 = vld [vmem:[#allocation9 + $0xa9c] ss:$48 sps:$4 sm:$0xff]  }
 0x44d   :  { %7298 = vmatpush1.bf16.msra.mxu0 %v20051_v35  ;;  %v20129_v35 = vld [vmem:[#allocation9 + $0xa90] ss:$48 sps:$4 sm:$0xff]  }
 0x44e   :  { %7384 = vmatpush1.bf16.msra.mxu1 %v20054_v62  ;;  %7310 = vmatprep.subr.bf16.mxu0 %v20059_v18  ;;  %v20132_v62 = vld [vmem:[#allocation9 + $0xa98] ss:$48 sps:$4 sm:$0xff]   ;;  %v20137_v18 = vld [vmem:[#allocation9 + $0xaf4] ss:$48 sps:$4 sm:$0xff]  }
 0x44f   :  { %7396 = vmatprep.subr.bf16.mxu1 %v20062_v63  ;;  %v20135_v63 = vld [vmem:[#allocation9 + $0xaf0] ss:$48 sps:$4 sm:$0xff]  }
 0x450   :  { %7300 = vmatmul.mubr.bf16.vlgmr.msra.gmra.mrb[20].mxu0 %v23212_v56 }
 0x451   :  { %7386 = vmatmul.mubr.bf16.vlgmr.msra.gmra.mrb[20].mxu1 %v23212_v56  ;;  %7311 = vmatpush1.bf16.msra.mxu0 %v20057_v22  ;;  %v20140_v22 = vld [vmem:[#allocation9 + $0xafc] ss:$48 sps:$4 sm:$0xff]  }
 0x452   :  { %7342 = vmatprep.mubr.bf16.mxu0 %v23227_v38  ;;  %7397 = vmatpush1.bf16.msra.mxu1 %v20060_v36  ;;  %v20138_v36 = vld [vmem:[#allocation9 + $0xaf8] ss:$48 sps:$4 sm:$0xff]  }
 0x453   :  { %7428 = vmatprep.mubr.bf16.mxu1 %v23227_v38  ;;  %7312 = vmatprep.subr.bf16.mxu0 %v20065_v0  ;;  %v20143_v0 = vld [vmem:[#allocation9 + $0xb54] ss:$48 sps:$4 sm:$0xff]  }
 0x454   :  { %7398 = vmatprep.subr.bf16.mxu1 %v20068_v2  ;;  %v20144_v2 = vld [vmem:[#allocation9 + $0xb58] ss:$48 sps:$4 sm:$0xff]  }
 0x455   :  { %7313 = vmatpush1.bf16.msra.mxu0 %v20063_v1  ;;  %v20141_v1 = vld [vmem:[#allocation9 + $0xb50] ss:$48 sps:$4 sm:$0xff]  }
 0x456   :  { %7399 = vmatpush1.bf16.msra.mxu1 %v20066_v25  ;;  %7314 = vmatprep.subr.bf16.mxu0 %v20071_v46  ;;  %v20146_v25 = vld [vmem:[#allocation9 + $0xb5c] ss:$48 sps:$4 sm:$0xff]   ;;  %v20149_v46 = vld [vmem:[#allocation9 + $0xbb4] ss:$48 sps:$4 sm:$0xff]  }
 0x457   :  { %7400 = vmatprep.subr.bf16.mxu1 %v20074_v3  ;;  %v20147_v3 = vld [vmem:[#allocation9 + $0xbb0] ss:$48 sps:$4 sm:$0xff]  }
 0x459   :  { %7315 = vmatpush1.bf16.msra.mxu0 %v20069_v4  ;;  %v20152_v4 = vld [vmem:[#allocation9 + $0xbbc] ss:$48 sps:$4 sm:$0xff]  }
 0x45a   :  { %7401 = vmatpush1.bf16.msra.mxu1 %v20072_v5  ;;  %7316 = vmatprep.subr.bf16.mxu0 %v20077_v26  ;;  %v20150_v5 = vld [vmem:[#allocation9 + $0xbb8] ss:$48 sps:$4 sm:$0xff]   ;;  %v20155_v26 = vld [vmem:[#allocation9 + $0x24] ss:$48 sps:$4 sm:$0xff]  }
 0x45b   :  { %7402 = vmatprep.subr.bf16.mxu1 %v20080_v6  ;;  %v20153_v6 = vld [vmem:[#allocation9 + $0x20] ss:$48 sps:$4 sm:$0xff]  }
 0x45d   :  { %7317 = vmatpush1.bf16.msra.mxu0 %v20075_v47  ;;  %v20158_v47 = vld [vmem:[#allocation9 + $0x2c] ss:$48 sps:$4 sm:$0xff]  }
 0x45e   :  { %7403 = vmatpush1.bf16.msra.mxu1 %v20078_v7  ;;  %7318 = vmatprep.subr.bf16.mxu0 %v20083_v8  ;;  %v20156_v7 = vld [vmem:[#allocation9 + $0x28] ss:$48 sps:$4 sm:$0xff]   ;;  %v20161_v8 = vld [vmem:[#allocation9 + $0x84] ss:$48 sps:$4 sm:$0xff]  }
 0x45f   :  { %7404 = vmatprep.subr.bf16.mxu1 %v20086_v51  ;;  %v20159_v51 = vld [vmem:[#allocation9 + $0x80] ss:$48 sps:$4 sm:$0xff]  }
 0x461   :  { %7319 = vmatpush1.bf16.msra.mxu0 %v20081_v9  ;;  %v20164_v9 = vld [vmem:[#allocation9 + $0x8c] ss:$48 sps:$4 sm:$0xff]  }
 0x462   :  { %7405 = vmatpush1.bf16.msra.mxu1 %v20084_v10  ;;  %7320 = vmatprep.subr.bf16.mxu0 %v20089_v27  ;;  %v20162_v10 = vld [vmem:[#allocation9 + $0x88] ss:$48 sps:$4 sm:$0xff]   ;;  %v20167_v27 = vld [vmem:[#allocation9 + $0xe4] ss:$48 sps:$4 sm:$0xff]  }
 0x463   :  { %7406 = vmatprep.subr.bf16.mxu1 %v20092_v20  ;;  %v20170_v20 = vld [vmem:[#allocation9 + $0xec] ss:$48 sps:$4 sm:$0xff]  }
 0x465   :  { %7321 = vmatpush1.bf16.msra.mxu0 %v20087_v16  ;;  %v20165_v16 = vld [vmem:[#allocation9 + $0xe0] ss:$48 sps:$4 sm:$0xff]  }
 0x466   :  { %7407 = vmatpush1.bf16.msra.mxu1 %v20090_v52  ;;  %7322 = vmatprep.subr.bf16.mxu0 %v20095_v11  ;;  %v20168_v52 = vld [vmem:[#allocation9 + $0xe8] ss:$48 sps:$4 sm:$0xff]   ;;  %v20173_v11 = vld [vmem:[#allocation9 + $0x144] ss:$48 sps:$4 sm:$0xff]  }
 0x467   :  { %7408 = vmatprep.subr.bf16.mxu1 %v20098_v23  ;;  %v20176_v23 = vld [vmem:[#allocation9 + $0x14c] ss:$48 sps:$4 sm:$0xff]  }
 0x469   :  { %7323 = vmatpush1.bf16.msra.mxu0 %v20093_v12  ;;  %v20171_v12 = vld [vmem:[#allocation9 + $0x140] ss:$48 sps:$4 sm:$0xff]  }
 0x46a   :  { %7409 = vmatpush1.bf16.msra.mxu1 %v20096_v53  ;;  %7324 = vmatprep.subr.bf16.mxu0 %v20101_v24  ;;  %v20174_v53 = vld [vmem:[#allocation9 + $0x148] ss:$48 sps:$4 sm:$0xff]   ;;  %v20179_v24 = vld [vmem:[#allocation9 + $0x1a4] ss:$48 sps:$4 sm:$0xff]  }
 0x46b   :  { %7410 = vmatprep.subr.bf16.mxu1 %v20104_v28  ;;  %v20180_v28 = vld [vmem:[#allocation9 + $0x1a8] ss:$48 sps:$4 sm:$0xff]  }
 0x46d   :  { %7325 = vmatpush1.bf16.msra.mxu0 %v20099_v55  ;;  %v20177_v55 = vld [vmem:[#allocation9 + $0x1a0] ss:$48 sps:$4 sm:$0xff]  }
 0x46e   :  { %7411 = vmatpush1.bf16.msra.mxu1 %v20102_v29  ;;  %7326 = vmatprep.subr.bf16.mxu0 %v20107_v30  ;;  %v20185_v29 = vld [vmem:[#allocation9 + $0x204] ss:$48 sps:$4 sm:$0xff]   ;;  %v20183_v30 = vld [vmem:[#allocation9 + $0x200] ss:$48 sps:$4 sm:$0xff]  }
 0x46f   :  { %7412 = vmatprep.subr.bf16.mxu1 %v20110_v39  ;;  %v20186_v39 = vld [vmem:[#allocation9 + $0x208] ss:$48 sps:$4 sm:$0xff]  }
 0x471   :  { %7327 = vmatpush1.bf16.msra.mxu0 %v20105_v31  ;;  %v20188_v31 = vld [vmem:[#allocation9 + $0x20c] ss:$48 sps:$4 sm:$0xff]  }
 0x472   :  { %7413 = vmatpush1.bf16.msra.mxu1 %v20108_v54  ;;  %7328 = vmatprep.subr.bf16.mxu0 %v20113_v41  ;;  %v20191_v54 = vld [vmem:[#allocation9 + $0x264] ss:$48 sps:$4 sm:$0xff]   ;;  %v20189_v41 = vld [vmem:[#allocation9 + $0x260] ss:$48 sps:$4 sm:$0xff]  }
 0x473   :  { %7414 = vmatprep.subr.bf16.mxu1 %v20116_v42  ;;  %v20192_v42 = vld [vmem:[#allocation9 + $0x268] ss:$48 sps:$4 sm:$0xff]  }
 0x475   :  { %7329 = vmatpush1.bf16.msra.mxu0 %v20111_v32  ;;  %v20194_v32 = vld [vmem:[#allocation9 + $0x26c] ss:$48 sps:$4 sm:$0xff]  }
 0x476   :  { %7415 = vmatpush1.bf16.msra.mxu1 %v20114_v45  ;;  %7330 = vmatprep.subr.bf16.mxu0 %v20119_v33  ;;  %v20197_v45 = vld [vmem:[#allocation9 + $0x2c4] ss:$48 sps:$4 sm:$0xff]   ;;  %v20195_v33 = vld [vmem:[#allocation9 + $0x2c0] ss:$48 sps:$4 sm:$0xff]  }
 0x477   :  { %7416 = vmatprep.subr.bf16.mxu1 %v20122_v58  ;;  %v20198_v58 = vld [vmem:[#allocation9 + $0x2c8] ss:$48 sps:$4 sm:$0xff]  }
 0x479   :  { %7331 = vmatpush1.bf16.msra.mxu0 %v20117_v50  ;;  %v20200_v50 = vld [vmem:[#allocation9 + $0x2cc] ss:$48 sps:$4 sm:$0xff]  }
 0x47a   :  { %7417 = vmatpush1.bf16.msra.mxu1 %v20120_v34  ;;  %7332 = vmatprep.subr.bf16.mxu0 %v20125_v59  ;;  %v20203_v34 = vld [vmem:[#allocation9 + $0x324] ss:$48 sps:$4 sm:$0xff]   ;;  %v20201_v59 = vld [vmem:[#allocation9 + $0x320] ss:$48 sps:$4 sm:$0xff]  }
 0x47b   :  { %7418 = vmatprep.subr.bf16.mxu1 %v20128_v60  ;;  %v20204_v60 = vld [vmem:[#allocation9 + $0x328] ss:$48 sps:$4 sm:$0xff]  }
 0x47d   :  { %7333 = vmatpush1.bf16.msra.mxu0 %v20123_v43  ;;  %v20206_v43 = vld [vmem:[#allocation9 + $0x32c] ss:$48 sps:$4 sm:$0xff]  }
 0x47e   :  { %7419 = vmatpush1.bf16.msra.mxu1 %v20126_v61  ;;  %7334 = vmatprep.subr.bf16.mxu0 %v20131_v17  ;;  %v20209_v61 = vld [vmem:[#allocation9 + $0x384] ss:$48 sps:$4 sm:$0xff]   ;;  %v20207_v17 = vld [vmem:[#allocation9 + $0x380] ss:$48 sps:$4 sm:$0xff]  }
 0x47f   :  { %7420 = vmatprep.subr.bf16.mxu1 %v20134_v19  ;;  %v20210_v19 = vld [vmem:[#allocation9 + $0x388] ss:$48 sps:$4 sm:$0xff]  }
 0x481   :  { %7335 = vmatpush1.bf16.msra.mxu0 %v20129_v35  ;;  %v20212_v35 = vld [vmem:[#allocation9 + $0x38c] ss:$48 sps:$4 sm:$0xff]  }
 0x482   :  { %7421 = vmatpush1.bf16.msra.mxu1 %v20132_v62  ;;  %7336 = vmatprep.subr.bf16.mxu0 %v20137_v18  ;;  %v20215_v62 = vld [vmem:[#allocation9 + $0x3e4] ss:$48 sps:$4 sm:$0xff]   ;;  %v20213_v18 = vld [vmem:[#allocation9 + $0x3e0] ss:$48 sps:$4 sm:$0xff]  }
 0x483   :  { %7422 = vmatprep.subr.bf16.mxu1 %v20140_v22  ;;  %v20216_v22 = vld [vmem:[#allocation9 + $0x3e8] ss:$48 sps:$4 sm:$0xff]  }
 0x485   :  { %7337 = vmatpush1.bf16.msra.mxu0 %v20135_v63  ;;  %v20218_v63 = vld [vmem:[#allocation9 + $0x3ec] ss:$48 sps:$4 sm:$0xff]  }
 0x486   :  { %7423 = vmatpush1.bf16.msra.mxu1 %v20138_v36  ;;  %7338 = vmatprep.subr.bf16.mxu0 %v20143_v0  ;;  %v20221_v36 = vld [vmem:[#allocation9 + $0x444] ss:$48 sps:$4 sm:$0xff]   ;;  %v20219_v0 = vld [vmem:[#allocation9 + $0x440] ss:$48 sps:$4 sm:$0xff]  }
 0x487   :  { %7424 = vmatprep.subr.bf16.mxu1 %v20146_v25  ;;  %v20222_v25 = vld [vmem:[#allocation9 + $0x448] ss:$48 sps:$4 sm:$0xff]  }
 0x489   :  { %7339 = vmatpush1.bf16.msra.mxu0 %v20141_v1  ;;  %v20224_v1 = vld [vmem:[#allocation9 + $0x44c] ss:$48 sps:$4 sm:$0xff]  }
 0x48a   :  { %7425 = vmatpush1.bf16.msra.mxu1 %v20144_v2  ;;  %7340 = vmatprep.subr.bf16.mxu0 %v20149_v46  ;;  %v20227_v2 = vld [vmem:[#allocation9 + $0x4a4] ss:$48 sps:$4 sm:$0xff]   ;;  %v20225_v46 = vld [vmem:[#allocation9 + $0x4a0] ss:$48 sps:$4 sm:$0xff]  }
 0x48b   :  { %7426 = vmatprep.subr.bf16.mxu1 %v20152_v4  ;;  %v20228_v4 = vld [vmem:[#allocation9 + $0x4a8] ss:$48 sps:$4 sm:$0xff]  }
 0x48d   :  { %7341 = vmatpush1.bf16.msra.mxu0 %v20147_v3  ;;  %v20230_v3 = vld [vmem:[#allocation9 + $0x4ac] ss:$48 sps:$4 sm:$0xff]  }
 0x48e   :  { %7427 = vmatpush1.bf16.msra.mxu1 %v20150_v5  ;;  %7439 = vmatprep.subr.bf16.mxu0 %v20155_v26  ;;  %v20233_v5 = vld [vmem:[#allocation9 + $0x504] ss:$48 sps:$4 sm:$0xff]   ;;  %v20231_v26 = vld [vmem:[#allocation9 + $0x500] ss:$48 sps:$4 sm:$0xff]  }
 0x48f   :  { %7525 = vmatprep.subr.bf16.mxu1 %v20158_v47  ;;  %v20236_v47 = vld [vmem:[#allocation9 + $0x50c] ss:$48 sps:$4 sm:$0xff]  }
 0x490   :  { %7343 = vmatmul.mubr.bf16.vlgmr.msra.gmra.mrb[20].mxu0 %v23217_v57 }
 0x491   :  { %7429 = vmatmul.mubr.bf16.vlgmr.msra.gmra.mrb[20].mxu1 %v23217_v57  ;;  %7440 = vmatpush1.bf16.msra.mxu0 %v20153_v6  ;;  %v20234_v6 = vld [vmem:[#allocation9 + $0x508] ss:$48 sps:$4 sm:$0xff]  }
 0x492   :  { %7471 = vmatprep.mubr.bf16.mxu0 %v23222_v37  ;;  %7526 = vmatpush1.bf16.msra.mxu1 %v20156_v7  ;;  %v20239_v7 = vld [vmem:[#allocation9 + $0x564] ss:$48 sps:$4 sm:$0xff]  }
 0x493   :  { %7557 = vmatprep.mubr.bf16.mxu1 %v23222_v37  ;;  %7441 = vmatprep.subr.bf16.mxu0 %v20161_v8  ;;  %v20182_v37 = vld [vmem:[#allocation9 + $0x1ac] ss:$48 sps:$4 sm:$0xff]   ;;  %v20237_v8 = vld [vmem:[#allocation9 + $0x560] ss:$48 sps:$4 sm:$0xff]  }
 0x494   :  { %7527 = vmatprep.subr.bf16.mxu1 %v20164_v9  ;;  %v20242_v9 = vld [vmem:[#allocation9 + $0x56c] ss:$48 sps:$4 sm:$0xff]  }
 0x495   :  { %7442 = vmatpush1.bf16.msra.mxu0 %v20159_v51  ;;  %v20240_v51 = vld [vmem:[#allocation9 + $0x568] ss:$48 sps:$4 sm:$0xff]  }
 0x496   :  { %7528 = vmatpush1.bf16.msra.mxu1 %v20162_v10  ;;  %7443 = vmatprep.subr.bf16.mxu0 %v20167_v27  ;;  %v20245_v10 = vld [vmem:[#allocation9 + $0x5c4] ss:$48 sps:$4 sm:$0xff]   ;;  %v20243_v27 = vld [vmem:[#allocation9 + $0x5c0] ss:$48 sps:$4 sm:$0xff]  }
 0x497   :  { %7529 = vmatprep.subr.bf16.mxu1 %v20170_v20  ;;  %v20246_v20 = vld [vmem:[#allocation9 + $0x5c8] ss:$48 sps:$4 sm:$0xff]  }
 0x499   :  { %7444 = vmatpush1.bf16.msra.mxu0 %v20165_v16  ;;  %v20248_v16 = vld [vmem:[#allocation9 + $0x5cc] ss:$48 sps:$4 sm:$0xff]  }
 0x49a   :  { %7530 = vmatpush1.bf16.msra.mxu1 %v20168_v52  ;;  %7445 = vmatprep.subr.bf16.mxu0 %v20173_v11  ;;  %v20251_v52 = vld [vmem:[#allocation9 + $0x624] ss:$48 sps:$4 sm:$0xff]   ;;  %v20249_v11 = vld [vmem:[#allocation9 + $0x620] ss:$48 sps:$4 sm:$0xff]  }
 0x49b   :  { %7531 = vmatprep.subr.bf16.mxu1 %v20176_v23  ;;  %v20252_v23 = vld [vmem:[#allocation9 + $0x628] ss:$48 sps:$4 sm:$0xff]  }
 0x49d   :  { %7446 = vmatpush1.bf16.msra.mxu0 %v20171_v12  ;;  %v20254_v12 = vld [vmem:[#allocation9 + $0x62c] ss:$48 sps:$4 sm:$0xff]  }
 0x49e   :  { %7532 = vmatpush1.bf16.msra.mxu1 %v20174_v53  ;;  %7447 = vmatprep.subr.bf16.mxu0 %v20179_v24  ;;  %v20257_v53 = vld [vmem:[#allocation9 + $0x684] ss:$48 sps:$4 sm:$0xff]   ;;  %v20255_v24 = vld [vmem:[#allocation9 + $0x680] ss:$48 sps:$4 sm:$0xff]  }
 0x49f   :  { %7533 = vmatprep.subr.bf16.mxu1 %v20182_v37  ;;  %v20258_v37 = vld [vmem:[#allocation9 + $0x688] ss:$48 sps:$4 sm:$0xff]  }
 0x4a1   :  { %7448 = vmatpush1.bf16.msra.mxu0 %v20177_v55  ;;  %v20260_v55 = vld [vmem:[#allocation9 + $0x68c] ss:$48 sps:$4 sm:$0xff]  }
 0x4a2   :  { %7534 = vmatpush1.bf16.msra.mxu1 %v20180_v28  ;;  %7449 = vmatprep.subr.bf16.mxu0 %v20185_v29  ;;  %v20263_v28 = vld [vmem:[#allocation9 + $0x6e4] ss:$48 sps:$4 sm:$0xff]   ;;  %v20261_v29 = vld [vmem:[#allocation9 + $0x6e0] ss:$48 sps:$4 sm:$0xff]  }
 0x4a3   :  { %7535 = vmatprep.subr.bf16.mxu1 %v20188_v31  ;;  %v20264_v31 = vld [vmem:[#allocation9 + $0x6e8] ss:$48 sps:$4 sm:$0xff]  }
 0x4a5   :  { %7450 = vmatpush1.bf16.msra.mxu0 %v20183_v30  ;;  %v20266_v30 = vld [vmem:[#allocation9 + $0x6ec] ss:$48 sps:$4 sm:$0xff]  }
 0x4a6   :  { %7536 = vmatpush1.bf16.msra.mxu1 %v20186_v39  ;;  %7451 = vmatprep.subr.bf16.mxu0 %v20191_v54  ;;  %v20269_v39 = vld [vmem:[#allocation9 + $0x744] ss:$48 sps:$4 sm:$0xff]   ;;  %v20267_v54 = vld [vmem:[#allocation9 + $0x740] ss:$48 sps:$4 sm:$0xff]  }
 0x4a7   :  { %7537 = vmatprep.subr.bf16.mxu1 %v20194_v32  ;;  %v20275_v32 = vld [vmem:[#allocation9 + $0x7a4] ss:$48 sps:$4 sm:$0xff]  }
 0x4a9   :  { %7452 = vmatpush1.bf16.msra.mxu0 %v20189_v41  ;;  %v20270_v41 = vld [vmem:[#allocation9 + $0x748] ss:$48 sps:$4 sm:$0xff]  }
 0x4aa   :  { %7538 = vmatpush1.bf16.msra.mxu1 %v20192_v42  ;;  %7453 = vmatprep.subr.bf16.mxu0 %v20197_v45  ;;  %v20273_v42 = vld [vmem:[#allocation9 + $0x7a0] ss:$48 sps:$4 sm:$0xff]   ;;  %v20276_v45 = vld [vmem:[#allocation9 + $0x7a8] ss:$48 sps:$4 sm:$0xff]  }
 0x4ab   :  { %7539 = vmatprep.subr.bf16.mxu1 %v20200_v50  ;;  %v20279_v50 = vld [vmem:[#allocation9 + $0x800] ss:$48 sps:$4 sm:$0xff]  }
 0x4ad   :  { %7454 = vmatpush1.bf16.msra.mxu0 %v20195_v33  ;;  %v20281_v33 = vld [vmem:[#allocation9 + $0x804] ss:$48 sps:$4 sm:$0xff]  }
 0x4ae   :  { %7540 = vmatpush1.bf16.msra.mxu1 %v20198_v58  ;;  %7455 = vmatprep.subr.bf16.mxu0 %v20203_v34  ;;  %v20284_v58 = vld [vmem:[#allocation9 + $0x80c] ss:$48 sps:$4 sm:$0xff]   ;;  %v20282_v34 = vld [vmem:[#allocation9 + $0x808] ss:$48 sps:$4 sm:$0xff]  }
 0x4af   :  { %7541 = vmatprep.subr.bf16.mxu1 %v20206_v43  ;;  %v20285_v43 = vld [vmem:[#allocation9 + $0x860] ss:$48 sps:$4 sm:$0xff]  }
 0x4b1   :  { %7456 = vmatpush1.bf16.msra.mxu0 %v20201_v59  ;;  %v20287_v59 = vld [vmem:[#allocation9 + $0x864] ss:$48 sps:$4 sm:$0xff]  }
 0x4b2   :  { %7542 = vmatpush1.bf16.msra.mxu1 %v20204_v60  ;;  %7457 = vmatprep.subr.bf16.mxu0 %v20209_v61  ;;  %v20290_v60 = vld [vmem:[#allocation9 + $0x86c] ss:$48 sps:$4 sm:$0xff]   ;;  %v20288_v61 = vld [vmem:[#allocation9 + $0x868] ss:$48 sps:$4 sm:$0xff]  }
 0x4b3   :  { %7543 = vmatprep.subr.bf16.mxu1 %v20212_v35  ;;  %v20291_v35 = vld [vmem:[#allocation9 + $0x8c0] ss:$48 sps:$4 sm:$0xff]  }
 0x4b5   :  { %7458 = vmatpush1.bf16.msra.mxu0 %v20207_v17  ;;  %v20293_v17 = vld [vmem:[#allocation9 + $0x8c4] ss:$48 sps:$4 sm:$0xff]  }
 0x4b6   :  { %7544 = vmatpush1.bf16.msra.mxu1 %v20210_v19  ;;  %7459 = vmatprep.subr.bf16.mxu0 %v20215_v62  ;;  %v20296_v19 = vld [vmem:[#allocation9 + $0x8cc] ss:$48 sps:$4 sm:$0xff]   ;;  %v20294_v62 = vld [vmem:[#allocation9 + $0x8c8] ss:$48 sps:$4 sm:$0xff]  }
 0x4b7   :  { %7545 = vmatprep.subr.bf16.mxu1 %v20218_v63  ;;  %v20297_v63 = vld [vmem:[#allocation9 + $0x920] ss:$48 sps:$4 sm:$0xff]  }
 0x4b9   :  { %7460 = vmatpush1.bf16.msra.mxu0 %v20213_v18  ;;  %v20299_v18 = vld [vmem:[#allocation9 + $0x924] ss:$48 sps:$4 sm:$0xff]  }
 0x4ba   :  { %7546 = vmatpush1.bf16.msra.mxu1 %v20216_v22  ;;  %7461 = vmatprep.subr.bf16.mxu0 %v20221_v36  ;;  %v20302_v22 = vld [vmem:[#allocation9 + $0x92c] ss:$48 sps:$4 sm:$0xff]   ;;  %v20300_v36 = vld [vmem:[#allocation9 + $0x928] ss:$48 sps:$4 sm:$0xff]  }
 0x4bb   :  { %7547 = vmatprep.subr.bf16.mxu1 %v20224_v1  ;;  %v20303_v1 = vld [vmem:[#allocation9 + $0x980] ss:$48 sps:$4 sm:$0xff]  }
 0x4bd   :  { %7462 = vmatpush1.bf16.msra.mxu0 %v20219_v0  ;;  %v20305_v0 = vld [vmem:[#allocation9 + $0x984] ss:$48 sps:$4 sm:$0xff]  }
 0x4be   :  { %7548 = vmatpush1.bf16.msra.mxu1 %v20222_v25  ;;  %7463 = vmatprep.subr.bf16.mxu0 %v20227_v2  ;;  %v20308_v25 = vld [vmem:[#allocation9 + $0x98c] ss:$48 sps:$4 sm:$0xff]   ;;  %v20306_v2 = vld [vmem:[#allocation9 + $0x988] ss:$48 sps:$4 sm:$0xff]  }
 0x4bf   :  { %7549 = vmatprep.subr.bf16.mxu1 %v20230_v3  ;;  %v20309_v3 = vld [vmem:[#allocation9 + $0x9e0] ss:$48 sps:$4 sm:$0xff]  }
 0x4c1   :  { %7464 = vmatpush1.bf16.msra.mxu0 %v20225_v46  ;;  %v20311_v46 = vld [vmem:[#allocation9 + $0x9e4] ss:$48 sps:$4 sm:$0xff]  }
 0x4c2   :  { %7550 = vmatpush1.bf16.msra.mxu1 %v20228_v4  ;;  %7465 = vmatprep.subr.bf16.mxu0 %v20233_v5  ;;  %v20314_v4 = vld [vmem:[#allocation9 + $0x9ec] ss:$48 sps:$4 sm:$0xff]   ;;  %v20312_v5 = vld [vmem:[#allocation9 + $0x9e8] ss:$48 sps:$4 sm:$0xff]  }
 0x4c3   :  { %7551 = vmatprep.subr.bf16.mxu1 %v20236_v47  ;;  %v20315_v47 = vld [vmem:[#allocation9 + $0xa40] ss:$48 sps:$4 sm:$0xff]  }
 0x4c5   :  { %7466 = vmatpush1.bf16.msra.mxu0 %v20231_v26  ;;  %v20317_v26 = vld [vmem:[#allocation9 + $0xa44] ss:$48 sps:$4 sm:$0xff]  }
 0x4c6   :  { %7552 = vmatpush1.bf16.msra.mxu1 %v20234_v6  ;;  %7467 = vmatprep.subr.bf16.mxu0 %v20239_v7  ;;  %v20320_v6 = vld [vmem:[#allocation9 + $0xa4c] ss:$48 sps:$4 sm:$0xff]   ;;  %v20318_v7 = vld [vmem:[#allocation9 + $0xa48] ss:$48 sps:$4 sm:$0xff]  }
 0x4c7   :  { %7553 = vmatprep.subr.bf16.mxu1 %v20242_v9  ;;  %v20321_v9 = vld [vmem:[#allocation9 + $0xaa0] ss:$48 sps:$4 sm:$0xff]  }
 0x4c9   :  { %7468 = vmatpush1.bf16.msra.mxu0 %v20237_v8  ;;  %v20323_v8 = vld [vmem:[#allocation9 + $0xaa4] ss:$48 sps:$4 sm:$0xff]  }
 0x4ca   :  { %7554 = vmatpush1.bf16.msra.mxu1 %v20240_v51  ;;  %7469 = vmatprep.subr.bf16.mxu0 %v20245_v10  ;;  %v20326_v51 = vld [vmem:[#allocation9 + $0xaac] ss:$48 sps:$4 sm:$0xff]   ;;  %v20324_v10 = vld [vmem:[#allocation9 + $0xaa8] ss:$48 sps:$4 sm:$0xff]  }
 0x4cb   :  { %7555 = vmatprep.subr.bf16.mxu1 %v20248_v16  ;;  %v20327_v16 = vld [vmem:[#allocation9 + $0xb00] ss:$48 sps:$4 sm:$0xff]  }
 0x4cd   :  { %7470 = vmatpush1.bf16.msra.mxu0 %v20243_v27  ;;  %v20329_v27 = vld [vmem:[#allocation9 + $0xb04] ss:$48 sps:$4 sm:$0xff]  }
 0x4ce   :  { %7556 = vmatpush1.bf16.msra.mxu1 %v20246_v20  ;;  %7482 = vmatprep.subr.bf16.mxu0 %v20251_v52  ;;  %v20332_v20 = vld [vmem:[#allocation9 + $0xb0c] ss:$48 sps:$4 sm:$0xff]   ;;  %v20330_v52 = vld [vmem:[#allocation9 + $0xb08] ss:$48 sps:$4 sm:$0xff]  }
 0x4cf   :  { %7568 = vmatprep.subr.bf16.mxu1 %v20254_v12  ;;  %v20338_v12 = vld [vmem:[#allocation9 + $0xb6c] ss:$48 sps:$4 sm:$0xff]  }
 0x4d0   :  { %7472 = vmatmul.mubr.bf16.vlgmr.msra.gmra.mrb[24].mxu0 %v23212_v56 }
 0x4d1   :  { %7558 = vmatmul.mubr.bf16.vlgmr.msra.gmra.mrb[24].mxu1 %v23212_v56  ;;  %7483 = vmatpush1.bf16.msra.mxu0 %v20249_v11  ;;  %v20272_v56 = vld [vmem:[#allocation9 + $0x74c] ss:$48 sps:$4 sm:$0xff]   ;;  %v20335_v11 = vld [vmem:[#allocation9 + $0xb64] ss:$48 sps:$4 sm:$0xff]  }
 0x4d2   :  { %7514 = vmatprep.mubr.bf16.mxu0 %v23227_v38  ;;  %7569 = vmatpush1.bf16.msra.mxu1 %v20252_v23  ;;  %v20333_v23 = vld [vmem:[#allocation9 + $0xb60] ss:$48 sps:$4 sm:$0xff]  }
 0x4d3   :  { %7600 = vmatprep.mubr.bf16.mxu1 %v23227_v38  ;;  %7484 = vmatprep.subr.bf16.mxu0 %v20257_v53  ;;  %v20278_v38 = vld [vmem:[#allocation9 + $0x7ac] ss:$48 sps:$4 sm:$0xff]   ;;  %v20336_v53 = vld [vmem:[#allocation9 + $0xb68] ss:$48 sps:$4 sm:$0xff]  }
 0x4d4   :  { %7570 = vmatprep.subr.bf16.mxu1 %v20260_v55  ;;  %v20344_v55 = vld [vmem:[#allocation9 + $0xbcc] ss:$48 sps:$4 sm:$0xff]  }
 0x4d5   :  { %7485 = vmatpush1.bf16.msra.mxu0 %v20255_v24  ;;  %v20341_v24 = vld [vmem:[#allocation9 + $0xbc4] ss:$48 sps:$4 sm:$0xff]  }
 0x4d6   :  { %7571 = vmatpush1.bf16.msra.mxu1 %v20258_v37  ;;  %7486 = vmatprep.subr.bf16.mxu0 %v20263_v28  ;;  %v20339_v37 = vld [vmem:[#allocation9 + $0xbc0] ss:$48 sps:$4 sm:$0xff]   ;;  %v20342_v28 = vld [vmem:[#allocation9 + $0xbc8] ss:$48 sps:$4 sm:$0xff]  }
 0x4d7   :  { %7572 = vmatprep.subr.bf16.mxu1 %v20266_v30  ;;  %v20350_v30 = vld [vmem:[#allocation10 + $0xc] ss:$48 sps:$4 sm:$0xff]  }
 0x4d9   :  { %7487 = vmatpush1.bf16.msra.mxu0 %v20261_v29  ;;  %v20347_v29 = vld [vmem:[#allocation10 + $0x4] ss:$48 sps:$4 sm:$0xff]  }
 0x4da   :  { %7573 = vmatpush1.bf16.msra.mxu1 %v20264_v31  ;;  %7488 = vmatprep.subr.bf16.mxu0 %v20269_v39  ;;  %v245_v31 = vld [vmem:[%s23713_s23 + $0x48] sm:$0xff] }
 0x4db   :  { %7574 = vmatprep.subr.bf16.mxu1 %v20272_v56  ;;  %v249_v39 = vld [vmem:[%s23713_s23 + $0x68] sm:$0xff]  ;;  %v20348_v56 = vld [vmem:[#allocation10 + $0x8] ss:$48 sps:$4 sm:$0xff]  }
 0x4dd   :  { %7489 = vmatpush1.bf16.msra.mxu0 %v20267_v54  ;;  %v20345_v54 = vld [vmem:[#allocation10] ss:$48 sps:$4 sm:$0xff]  }
 0x4de   :  { %7575 = vmatpush1.bf16.msra.mxu1 %v20270_v41  ;;  %7490 = vmatprep.subr.bf16.mxu0 %v20275_v32  ;;  %v20353_v41 = vld [vmem:[#allocation10 + $0x64] ss:$48 sps:$4 sm:$0xff]   ;;  %v20356_v32 = vld [vmem:[#allocation10 + $0x6c] ss:$48 sps:$4 sm:$0xff]  }
 0x4df   :  { %7576 = vmatprep.subr.bf16.mxu1 %v20278_v38  ;;  %v20351_v38 = vld [vmem:[#allocation10 + $0x60] ss:$48 sps:$4 sm:$0xff]  }
 0x4e1   :  { %7491 = vmatpush1.bf16.msra.mxu0 %v20273_v42  ;;  %v23257_v42 = vpack.c.bf16 %v249_v39, %v245_v31  ;;  %v20426_v31 = vld [vmem:[#allocation10 + $0x4e8] ss:$48 sps:$4 sm:$0xff]   ;;  %v20431_v39 = vld [vmem:[#allocation10 + $0x544] ss:$48 sps:$4 sm:$0xff]  }
 0x4e2   :  { %7577 = vmatpush1.bf16.msra.mxu1 %v20276_v45  ;;  %7492 = vmatprep.subr.bf16.mxu0 %v20281_v33  ;;  %v20354_v45 = vld [vmem:[#allocation10 + $0x68] ss:$48 sps:$4 sm:$0xff]   ;;  %v20359_v33 = vld [vmem:[#allocation10 + $0xc4] ss:$48 sps:$4 sm:$0xff]  }
 0x4e3   :  { %7578 = vmatprep.subr.bf16.mxu1 %v20284_v58  ;;  %v20357_v58 = vld [vmem:[#allocation10 + $0xc0] ss:$48 sps:$4 sm:$0xff]  }
 0x4e5   :  { %7493 = vmatpush1.bf16.msra.mxu0 %v20279_v50  ;;  %v20362_v50 = vld [vmem:[#allocation10 + $0xcc] ss:$48 sps:$4 sm:$0xff]  }
 0x4e6   :  { %7579 = vmatpush1.bf16.msra.mxu1 %v20282_v34  ;;  %7494 = vmatprep.subr.bf16.mxu0 %v20287_v59  ;;  %v20360_v34 = vld [vmem:[#allocation10 + $0xc8] ss:$48 sps:$4 sm:$0xff]   ;;  %v20365_v59 = vld [vmem:[#allocation10 + $0x124] ss:$48 sps:$4 sm:$0xff]  }
 0x4e7   :  { %7580 = vmatprep.subr.bf16.mxu1 %v20290_v60  ;;  %v20366_v60 = vld [vmem:[#allocation10 + $0x128] ss:$48 sps:$4 sm:$0xff]  }
 0x4e9   :  { %7495 = vmatpush1.bf16.msra.mxu0 %v20285_v43  ;;  %v20363_v43 = vld [vmem:[#allocation10 + $0x120] ss:$48 sps:$4 sm:$0xff]  }
 0x4ea   :  { %7581 = vmatpush1.bf16.msra.mxu1 %v20288_v61  ;;  %7496 = vmatprep.subr.bf16.mxu0 %v20293_v17  ;;  %v20371_v61 = vld [vmem:[#allocation10 + $0x184] ss:$48 sps:$4 sm:$0xff]   ;;  %v20374_v17 = vld [vmem:[#allocation10 + $0x18c] ss:$48 sps:$4 sm:$0xff]  }
 0x4eb   :  { %7582 = vmatprep.subr.bf16.mxu1 %v20296_v19  ;;  %v20372_v19 = vld [vmem:[#allocation10 + $0x188] ss:$48 sps:$4 sm:$0xff]  }
 0x4ed   :  { %7497 = vmatpush1.bf16.msra.mxu0 %v20291_v35  ;;  %v20369_v35 = vld [vmem:[#allocation10 + $0x180] ss:$48 sps:$4 sm:$0xff]  }
 0x4ee   :  { %7583 = vmatpush1.bf16.msra.mxu1 %v20294_v62  ;;  %7498 = vmatprep.subr.bf16.mxu0 %v20299_v18  ;;  %v20377_v62 = vld [vmem:[#allocation10 + $0x1e4] ss:$48 sps:$4 sm:$0xff]   ;;  %v20380_v18 = vld [vmem:[#allocation10 + $0x1ec] ss:$48 sps:$4 sm:$0xff]  }
 0x4ef   :  { %7584 = vmatprep.subr.bf16.mxu1 %v20302_v22  ;;  %v20378_v22 = vld [vmem:[#allocation10 + $0x1e8] ss:$48 sps:$4 sm:$0xff]  }
 0x4f1   :  { %7499 = vmatpush1.bf16.msra.mxu0 %v20297_v63  ;;  %v20375_v63 = vld [vmem:[#allocation10 + $0x1e0] ss:$48 sps:$4 sm:$0xff]  }
 0x4f2   :  { %7585 = vmatpush1.bf16.msra.mxu1 %v20300_v36  ;;  %7500 = vmatprep.subr.bf16.mxu0 %v20305_v0  ;;  %v20383_v36 = vld [vmem:[#allocation10 + $0x244] ss:$48 sps:$4 sm:$0xff]   ;;  %v20386_v0 = vld [vmem:[#allocation10 + $0x24c] ss:$48 sps:$4 sm:$0xff]  }
 0x4f3   :  { %7586 = vmatprep.subr.bf16.mxu1 %v20308_v25  ;;  %v20384_v25 = vld [vmem:[#allocation10 + $0x248] ss:$48 sps:$4 sm:$0xff]  }
 0x4f5   :  { %7501 = vmatpush1.bf16.msra.mxu0 %v20303_v1  ;;  %v20381_v1 = vld [vmem:[#allocation10 + $0x240] ss:$48 sps:$4 sm:$0xff]  }
 0x4f6   :  { %7587 = vmatpush1.bf16.msra.mxu1 %v20306_v2  ;;  %7502 = vmatprep.subr.bf16.mxu0 %v20311_v46  ;;  %v20389_v2 = vld [vmem:[#allocation10 + $0x2a4] ss:$48 sps:$4 sm:$0xff]   ;;  %v20392_v46 = vld [vmem:[#allocation10 + $0x2ac] ss:$48 sps:$4 sm:$0xff]  }
 0x4f7   :  { %7588 = vmatprep.subr.bf16.mxu1 %v20314_v4  ;;  %v20390_v4 = vld [vmem:[#allocation10 + $0x2a8] ss:$48 sps:$4 sm:$0xff]  }
 0x4f9   :  { %7503 = vmatpush1.bf16.msra.mxu0 %v20309_v3  ;;  %v20387_v3 = vld [vmem:[#allocation10 + $0x2a0] ss:$48 sps:$4 sm:$0xff]  }
 0x4fa   :  { %7589 = vmatpush1.bf16.msra.mxu1 %v20312_v5  ;;  %7504 = vmatprep.subr.bf16.mxu0 %v20317_v26  ;;  %v20395_v5 = vld [vmem:[#allocation10 + $0x304] ss:$48 sps:$4 sm:$0xff]   ;;  %v20398_v26 = vld [vmem:[#allocation10 + $0x30c] ss:$48 sps:$4 sm:$0xff]  }
 0x4fb   :  { %7590 = vmatprep.subr.bf16.mxu1 %v20320_v6  ;;  %v20396_v6 = vld [vmem:[#allocation10 + $0x308] ss:$48 sps:$4 sm:$0xff]  }
 0x4fd   :  { %7505 = vmatpush1.bf16.msra.mxu0 %v20315_v47  ;;  %v20393_v47 = vld [vmem:[#allocation10 + $0x300] ss:$48 sps:$4 sm:$0xff]  }
 0x4fe   :  { %7591 = vmatpush1.bf16.msra.mxu1 %v20318_v7  ;;  %7506 = vmatprep.subr.bf16.mxu0 %v20323_v8  ;;  %v20401_v7 = vld [vmem:[#allocation10 + $0x364] ss:$48 sps:$4 sm:$0xff]   ;;  %v20404_v8 = vld [vmem:[#allocation10 + $0x36c] ss:$48 sps:$4 sm:$0xff]  }
 0x4ff   :  { %7592 = vmatprep.subr.bf16.mxu1 %v20326_v51  ;;  %v20402_v51 = vld [vmem:[#allocation10 + $0x368] ss:$48 sps:$4 sm:$0xff]  }
 0x501   :  { %7507 = vmatpush1.bf16.msra.mxu0 %v20321_v9  ;;  %v20399_v9 = vld [vmem:[#allocation10 + $0x360] ss:$48 sps:$4 sm:$0xff]  }
 0x502   :  { %7593 = vmatpush1.bf16.msra.mxu1 %v20324_v10  ;;  %7508 = vmatprep.subr.bf16.mxu0 %v20329_v27  ;;  %v20407_v10 = vld [vmem:[#allocation10 + $0x3c4] ss:$48 sps:$4 sm:$0xff]   ;;  %v20410_v27 = vld [vmem:[#allocation10 + $0x3cc] ss:$48 sps:$4 sm:$0xff]  }
 0x503   :  { %7594 = vmatprep.subr.bf16.mxu1 %v20332_v20  ;;  %v20408_v20 = vld [vmem:[#allocation10 + $0x3c8] ss:$48 sps:$4 sm:$0xff]  }
 0x505   :  { %7509 = vmatpush1.bf16.msra.mxu0 %v20327_v16  ;;  %v20405_v16 = vld [vmem:[#allocation10 + $0x3c0] ss:$48 sps:$4 sm:$0xff]  }
 0x506   :  { %7595 = vmatpush1.bf16.msra.mxu1 %v20330_v52  ;;  %7510 = vmatprep.subr.bf16.mxu0 %v20335_v11  ;;  %v20413_v52 = vld [vmem:[#allocation10 + $0x424] ss:$48 sps:$4 sm:$0xff]   ;;  %v20416_v11 = vld [vmem:[#allocation10 + $0x42c] ss:$48 sps:$4 sm:$0xff]  }
 0x507   :  { %7596 = vmatprep.subr.bf16.mxu1 %v20338_v12  ;;  %v20411_v12 = vld [vmem:[#allocation10 + $0x420] ss:$48 sps:$4 sm:$0xff]  }
 0x509   :  { %7511 = vmatpush1.bf16.msra.mxu0 %v20333_v23  ;;  %v20414_v23 = vld [vmem:[#allocation10 + $0x428] ss:$48 sps:$4 sm:$0xff]  }
 0x50a   :  { %7597 = vmatpush1.bf16.msra.mxu1 %v20336_v53  ;;  %7512 = vmatprep.subr.bf16.mxu0 %v20341_v24  ;;  %v20419_v53 = vld [vmem:[#allocation10 + $0x484] ss:$48 sps:$4 sm:$0xff]   ;;  %v20422_v24 = vld [vmem:[#allocation10 + $0x48c] ss:$48 sps:$4 sm:$0xff]  }
 0x50b   :  { %7598 = vmatprep.subr.bf16.mxu1 %v20344_v55  ;;  %v20417_v55 = vld [vmem:[#allocation10 + $0x480] ss:$48 sps:$4 sm:$0xff]  }
 0x50d   :  { %7513 = vmatpush1.bf16.msra.mxu0 %v20339_v37  ;;  %v20420_v37 = vld [vmem:[#allocation10 + $0x488] ss:$48 sps:$4 sm:$0xff]  }
 0x50e   :  { %7599 = vmatpush1.bf16.msra.mxu1 %v20342_v28  ;;  %9597 = vmatprep.subr.bf16.mxu0 %v20347_v29  ;;  %v20425_v28 = vld [vmem:[#allocation10 + $0x4e4] ss:$48 sps:$4 sm:$0xff]   ;;  %v20428_v29 = vld [vmem:[#allocation10 + $0x4ec] ss:$48 sps:$4 sm:$0xff]  }
 0x50f   :  { %9683 = vmatprep.subr.bf16.mxu1 %v20350_v30  ;;  %v20423_v30 = vld [vmem:[#allocation10 + $0x4e0] ss:$48 sps:$4 sm:$0xff]  }
 0x510   :  { %7515 = vmatmul.mubr.bf16.vlgmr.msra.gmra.mrb[24].mxu0 %v23217_v57 }
 0x511   :  { %7601 = vmatmul.mubr.bf16.vlgmr.msra.gmra.mrb[24].mxu1 %v23217_v57  ;;  %9598 = vmatpush1.bf16.msra.mxu0 %v20345_v54  ;;  %v20368_v57 = vld [vmem:[#allocation10 + $0x12c] ss:$48 sps:$4 sm:$0xff]  }
 0x512   :  { %9684 = vmatpush1.bf16.msra.mxu1 %v20348_v56  ;;  %9599 = vmatprep.subr.bf16.mxu0 %v20353_v41  ;;  %v20434_v54 = vld [vmem:[#allocation10 + $0x54c] ss:$48 sps:$4 sm:$0xff]   ;;  %v20429_v56 = vld [vmem:[#allocation10 + $0x540] ss:$48 sps:$4 sm:$0xff]   ;;  %v20432_v41 = vld [vmem:[#allocation10 + $0x548] ss:$48 sps:$4 sm:$0xff]  }
 0x513   :  { %9685 = vmatprep.subr.bf16.mxu1 %v20356_v32  ;;  %9629 = vmatprep.mubr.bf16.mxu0 %v23257_v42  ;;  %v20437_v32 = vld [vmem:[#allocation10 + $0x5a4] ss:$48 sps:$4 sm:$0xff]  }
 0x514   :  { %9715 = vmatprep.mubr.bf16.mxu1 %v23257_v42 }
 0x515   :  { %9600 = vmatpush1.bf16.msra.mxu0 %v20351_v38  ;;  %v20440_v38 = vld [vmem:[#allocation10 + $0x5ac] ss:$48 sps:$4 sm:$0xff]  }
 0x516   :  { %9686 = vmatpush1.bf16.msra.mxu1 %v20354_v45  ;;  %9601 = vmatprep.subr.bf16.mxu0 %v20359_v33  ;;  %v20435_v45 = vld [vmem:[#allocation10 + $0x5a0] ss:$48 sps:$4 sm:$0xff]   ;;  %v244_v33 = vld [vmem:[%s23713_s23 + $0x40] sm:$0xff] }
 0x517   :  { %9687 = vmatprep.subr.bf16.mxu1 %v20362_v50  ;;  %v248_v50 = vld [vmem:[%s23713_s23 + $0x60] sm:$0xff] }
 0x519   :  { %9602 = vmatpush1.bf16.msra.mxu0 %v20357_v58  ;;  %v20438_v58 = vld [vmem:[#allocation10 + $0x5a8] ss:$48 sps:$4 sm:$0xff]  }
 0x51a   :  { %9688 = vmatpush1.bf16.msra.mxu1 %v20360_v34  ;;  %9603 = vmatprep.subr.bf16.mxu0 %v20365_v59  ;;  %v20443_v34 = vld [vmem:[#allocation10 + $0x604] ss:$48 sps:$4 sm:$0xff]   ;;  %v20446_v59 = vld [vmem:[#allocation10 + $0x60c] ss:$48 sps:$4 sm:$0xff]  }
 0x51b   :  { %9689 = vmatprep.subr.bf16.mxu1 %v20368_v57  ;;  %v23269_v57 = vpack.c.bf16 %v248_v50, %v244_v33  ;;  %v20515_v33 = vld [vmem:[#allocation10 + $0xa84] ss:$48 sps:$4 sm:$0xff]   ;;  %v20518_v50 = vld [vmem:[#allocation10 + $0xa8c] ss:$48 sps:$4 sm:$0xff]  }
 0x51d   :  { %9604 = vmatpush1.bf16.msra.mxu0 %v20363_v43  ;;  %v247_v43 = vld [vmem:[%s23713_s23 + $0x58] sm:$0xff] }
 0x51e   :  { %9690 = vmatpush1.bf16.msra.mxu1 %v20366_v60  ;;  %9605 = vmatprep.subr.bf16.mxu0 %v20371_v61  ;;  %v251_v60 = vld [vmem:[%s23713_s23 + $0x78] sm:$0xff] }
 0x51f   :  { %9691 = vmatprep.subr.bf16.mxu1 %v20374_v17  ;;  %v20441_v61 = vld [vmem:[#allocation10 + $0x600] ss:$48 sps:$4 sm:$0xff]   ;;  %v20444_v17 = vld [vmem:[#allocation10 + $0x608] ss:$48 sps:$4 sm:$0xff]  }
 0x521   :  { %9606 = vmatpush1.bf16.msra.mxu0 %v20369_v35  ;;  %v20449_v35 = vld [vmem:[#allocation10 + $0x664] ss:$48 sps:$4 sm:$0xff]  }
 0x522   :  { %9692 = vmatpush1.bf16.msra.mxu1 %v20372_v19  ;;  %9607 = vmatprep.subr.bf16.mxu0 %v20377_v62  ;;  %v20452_v19 = vld [vmem:[#allocation10 + $0x66c] ss:$48 sps:$4 sm:$0xff]   ;;  %v23277_v62 = vpack.c.bf16 %v251_v60, %v247_v43  ;;  %v20519_v60 = vld [vmem:[#allocation10 + $0xae0] ss:$48 sps:$4 sm:$0xff]  }
 0x523   :  { %9693 = vmatprep.subr.bf16.mxu1 %v20380_v18  ;;  %v20447_v18 = vld [vmem:[#allocation10 + $0x660] ss:$48 sps:$4 sm:$0xff]   ;;  %v20524_v43 = vld [vmem:[#allocation10 + $0xaec] ss:$48 sps:$4 sm:$0xff]  }
 0x525   :  { %9608 = vmatpush1.bf16.msra.mxu0 %v20375_v63  ;;  %v20450_v63 = vld [vmem:[#allocation10 + $0x668] ss:$48 sps:$4 sm:$0xff]  }
 0x526   :  { %9694 = vmatpush1.bf16.msra.mxu1 %v20378_v22  ;;  %9609 = vmatprep.subr.bf16.mxu0 %v20383_v36  ;;  %v20455_v22 = vld [vmem:[#allocation10 + $0x6c4] ss:$48 sps:$4 sm:$0xff]   ;;  %v20458_v36 = vld [vmem:[#allocation10 + $0x6cc] ss:$48 sps:$4 sm:$0xff]  }
 0x527   :  { %9695 = vmatprep.subr.bf16.mxu1 %v20386_v0  ;;  %v20453_v0 = vld [vmem:[#allocation10 + $0x6c0] ss:$48 sps:$4 sm:$0xff]  }
 0x529   :  { %9610 = vmatpush1.bf16.msra.mxu0 %v20381_v1  ;;  %v20456_v1 = vld [vmem:[#allocation10 + $0x6c8] ss:$48 sps:$4 sm:$0xff]  }
 0x52a   :  { %9696 = vmatpush1.bf16.msra.mxu1 %v20384_v25  ;;  %9611 = vmatprep.subr.bf16.mxu0 %v20389_v2  ;;  %v20461_v25 = vld [vmem:[#allocation10 + $0x724] ss:$48 sps:$4 sm:$0xff]   ;;  %v20464_v2 = vld [vmem:[#allocation10 + $0x72c] ss:$48 sps:$4 sm:$0xff]  }
 0x52b   :  { %9697 = vmatprep.subr.bf16.mxu1 %v20392_v46  ;;  %v20459_v46 = vld [vmem:[#allocation10 + $0x720] ss:$48 sps:$4 sm:$0xff]  }
 0x52d   :  { %9612 = vmatpush1.bf16.msra.mxu0 %v20387_v3  ;;  %v20462_v3 = vld [vmem:[#allocation10 + $0x728] ss:$48 sps:$4 sm:$0xff]  }
 0x52e   :  { %9698 = vmatpush1.bf16.msra.mxu1 %v20390_v4  ;;  %9613 = vmatprep.subr.bf16.mxu0 %v20395_v5  ;;  %v20467_v4 = vld [vmem:[#allocation10 + $0x784] ss:$48 sps:$4 sm:$0xff]   ;;  %v20470_v5 = vld [vmem:[#allocation10 + $0x78c] ss:$48 sps:$4 sm:$0xff]  }
 0x52f   :  { %9699 = vmatprep.subr.bf16.mxu1 %v20398_v26  ;;  %v20465_v26 = vld [vmem:[#allocation10 + $0x780] ss:$48 sps:$4 sm:$0xff]  }
 0x531   :  { %9614 = vmatpush1.bf16.msra.mxu0 %v20393_v47  ;;  %v20468_v47 = vld [vmem:[#allocation10 + $0x788] ss:$48 sps:$4 sm:$0xff]  }
 0x532   :  { %9700 = vmatpush1.bf16.msra.mxu1 %v20396_v6  ;;  %9615 = vmatprep.subr.bf16.mxu0 %v20401_v7  ;;  %v20473_v6 = vld [vmem:[#allocation10 + $0x7e4] ss:$48 sps:$4 sm:$0xff]   ;;  %v20476_v7 = vld [vmem:[#allocation10 + $0x7ec] ss:$48 sps:$4 sm:$0xff]  }
 0x533   :  { %9701 = vmatprep.subr.bf16.mxu1 %v20404_v8  ;;  %v20471_v8 = vld [vmem:[#allocation10 + $0x7e0] ss:$48 sps:$4 sm:$0xff]  }
 0x535   :  { %9616 = vmatpush1.bf16.msra.mxu0 %v20399_v9  ;;  %v20474_v9 = vld [vmem:[#allocation10 + $0x7e8] ss:$48 sps:$4 sm:$0xff]  }
 0x536   :  { %9702 = vmatpush1.bf16.msra.mxu1 %v20402_v51  ;;  %9617 = vmatprep.subr.bf16.mxu0 %v20407_v10  ;;  %v20479_v51 = vld [vmem:[#allocation10 + $0x844] ss:$48 sps:$4 sm:$0xff]   ;;  %v20482_v10 = vld [vmem:[#allocation10 + $0x84c] ss:$48 sps:$4 sm:$0xff]  }
 0x537   :  { %9703 = vmatprep.subr.bf16.mxu1 %v20410_v27  ;;  %v20477_v27 = vld [vmem:[#allocation10 + $0x840] ss:$48 sps:$4 sm:$0xff]  }
 0x539   :  { %9618 = vmatpush1.bf16.msra.mxu0 %v20405_v16  ;;  %v20480_v16 = vld [vmem:[#allocation10 + $0x848] ss:$48 sps:$4 sm:$0xff]  }
 0x53a   :  { %9704 = vmatpush1.bf16.msra.mxu1 %v20408_v20  ;;  %9619 = vmatprep.subr.bf16.mxu0 %v20413_v52  ;;  %v20485_v20 = vld [vmem:[#allocation10 + $0x8a4] ss:$48 sps:$4 sm:$0xff]   ;;  %v20488_v52 = vld [vmem:[#allocation10 + $0x8ac] ss:$48 sps:$4 sm:$0xff]  }
 0x53b   :  { %9705 = vmatprep.subr.bf16.mxu1 %v20416_v11  ;;  %v20483_v11 = vld [vmem:[#allocation10 + $0x8a0] ss:$48 sps:$4 sm:$0xff]  }
 0x53d   :  { %9620 = vmatpush1.bf16.msra.mxu0 %v20411_v12  ;;  %v20486_v12 = vld [vmem:[#allocation10 + $0x8a8] ss:$48 sps:$4 sm:$0xff]  }
 0x53e   :  { %9706 = vmatpush1.bf16.msra.mxu1 %v20414_v23  ;;  %9621 = vmatprep.subr.bf16.mxu0 %v20419_v53  ;;  %v20491_v23 = vld [vmem:[#allocation10 + $0x904] ss:$48 sps:$4 sm:$0xff]   ;;  %v20494_v53 = vld [vmem:[#allocation10 + $0x90c] ss:$48 sps:$4 sm:$0xff]  }
 0x53f   :  { %9707 = vmatprep.subr.bf16.mxu1 %v20422_v24  ;;  %v20489_v24 = vld [vmem:[#allocation10 + $0x900] ss:$48 sps:$4 sm:$0xff]  }
 0x541   :  { %9622 = vmatpush1.bf16.msra.mxu0 %v20417_v55  ;;  %v20492_v55 = vld [vmem:[#allocation10 + $0x908] ss:$48 sps:$4 sm:$0xff]  }
 0x542   :  { %9708 = vmatpush1.bf16.msra.mxu1 %v20420_v37  ;;  %9623 = vmatprep.subr.bf16.mxu0 %v20425_v28  ;;  %v20497_v37 = vld [vmem:[#allocation10 + $0x964] ss:$48 sps:$4 sm:$0xff]   ;;  %v20500_v28 = vld [vmem:[#allocation10 + $0x96c] ss:$48 sps:$4 sm:$0xff]  }
 0x543   :  { %9709 = vmatprep.subr.bf16.mxu1 %v20428_v29  ;;  %v20495_v29 = vld [vmem:[#allocation10 + $0x960] ss:$48 sps:$4 sm:$0xff]  }
 0x545   :  { %9624 = vmatpush1.bf16.msra.mxu0 %v20423_v30  ;;  %v20498_v30 = vld [vmem:[#allocation10 + $0x968] ss:$48 sps:$4 sm:$0xff]  }
 0x546   :  { %9710 = vmatpush1.bf16.msra.mxu1 %v20426_v31  ;;  %9625 = vmatprep.subr.bf16.mxu0 %v20431_v39  ;;  %v20503_v31 = vld [vmem:[#allocation10 + $0x9c4] ss:$48 sps:$4 sm:$0xff]   ;;  %v20506_v39 = vld [vmem:[#allocation10 + $0x9cc] ss:$48 sps:$4 sm:$0xff]  }
 0x547   :  { %9711 = vmatprep.subr.bf16.mxu1 %v20434_v54  ;;  %v20501_v54 = vld [vmem:[#allocation10 + $0x9c0] ss:$48 sps:$4 sm:$0xff]  }
 0x549   :  { %9626 = vmatpush1.bf16.msra.mxu0 %v20429_v56  ;;  %v20504_v56 = vld [vmem:[#allocation10 + $0x9c8] ss:$48 sps:$4 sm:$0xff]  }
 0x54a   :  { %9712 = vmatpush1.bf16.msra.mxu1 %v20432_v41  ;;  %9627 = vmatprep.subr.bf16.mxu0 %v20437_v32  ;;  %v20509_v41 = vld [vmem:[#allocation10 + $0xa24] ss:$48 sps:$4 sm:$0xff]   ;;  %v20512_v32 = vld [vmem:[#allocation10 + $0xa2c] ss:$48 sps:$4 sm:$0xff]  }
 0x54b   :  { %9713 = vmatprep.subr.bf16.mxu1 %v20440_v38  ;;  %v20507_v38 = vld [vmem:[#allocation10 + $0xa20] ss:$48 sps:$4 sm:$0xff]  }
 0x54d   :  { %9628 = vmatpush1.bf16.msra.mxu0 %v20435_v45  ;;  %v20510_v45 = vld [vmem:[#allocation10 + $0xa28] ss:$48 sps:$4 sm:$0xff]  }
 0x54e   :  { %9714 = vmatpush1.bf16.msra.mxu1 %v20438_v58  ;;  %9640 = vmatprep.subr.bf16.mxu0 %v20443_v34  ;;  %v20513_v58 = vld [vmem:[#allocation10 + $0xa80] ss:$48 sps:$4 sm:$0xff]   ;;  %v20516_v34 = vld [vmem:[#allocation10 + $0xa88] ss:$48 sps:$4 sm:$0xff]  }
 0x54f   :  { %9726 = vmatprep.subr.bf16.mxu1 %v20446_v59  ;;  %v20521_v59 = vld [vmem:[#allocation10 + $0xae4] ss:$48 sps:$4 sm:$0xff]  }
 0x550   :  { %9630 = vmatmul.mubr.bf16.vlgmr.msra.gmra.mrb[16].mxu0 %v23269_v57 }
 0x551   :  { %9641 = vmatpush1.bf16.msra.mxu0 %v20441_v61  ;;  %9716 = vmatmul.mubr.bf16.vlgmr.msra.gmra.mrb[16].mxu1 %v23269_v57  ;;  %v20522_v61 = vld [vmem:[#allocation10 + $0xae8] ss:$48 sps:$4 sm:$0xff]  }
 0x552   :  { %9727 = vmatpush1.bf16.msra.mxu1 %v20444_v17  ;;  %9642 = vmatprep.subr.bf16.mxu0 %v20449_v35  ;;  %v20527_v17 = vld [vmem:[#allocation10 + $0xb44] ss:$48 sps:$4 sm:$0xff]   ;;  %v20530_v35 = vld [vmem:[#allocation10 + $0xb4c] ss:$48 sps:$4 sm:$0xff]  }
 0x553   :  { %9728 = vmatprep.subr.bf16.mxu1 %v20452_v19  ;;  %9672 = vmatprep.mubr.bf16.mxu0 %v23277_v62  ;;  %v20525_v19 = vld [vmem:[#allocation10 + $0xb40] ss:$48 sps:$4 sm:$0xff]  }
 0x554   :  { %9758 = vmatprep.mubr.bf16.mxu1 %v23277_v62 }
 0x555   :  { %9643 = vmatpush1.bf16.msra.mxu0 %v20447_v18  ;;  %v20528_v18 = vld [vmem:[#allocation10 + $0xb48] ss:$48 sps:$4 sm:$0xff]  }
 0x556   :  { %9729 = vmatpush1.bf16.msra.mxu1 %v20450_v63  ;;  %9644 = vmatprep.subr.bf16.mxu0 %v20455_v22  ;;  %v20533_v63 = vld [vmem:[#allocation10 + $0xba4] ss:$48 sps:$4 sm:$0xff]   ;;  %v20536_v22 = vld [vmem:[#allocation10 + $0xbac] ss:$48 sps:$4 sm:$0xff]  }
 0x557   :  { %9730 = vmatprep.subr.bf16.mxu1 %v20458_v36  ;;  %v20531_v36 = vld [vmem:[#allocation10 + $0xba0] ss:$48 sps:$4 sm:$0xff]  }
 0x559   :  { %9645 = vmatpush1.bf16.msra.mxu0 %v20453_v0  ;;  %v246_v0 = vld [vmem:[%s23713_s23 + $0x50] sm:$0xff] }
 0x55a   :  { %9731 = vmatpush1.bf16.msra.mxu1 %v20456_v1  ;;  %9646 = vmatprep.subr.bf16.mxu0 %v20461_v25  ;;  %v250_v1 = vld [vmem:[%s23713_s23 + $0x70] sm:$0xff] }
 0x55b   :  { %9732 = vmatprep.subr.bf16.mxu1 %v20464_v2  ;;  %v20534_v25 = vld [vmem:[#allocation10 + $0xba8] ss:$48 sps:$4 sm:$0xff]   ;;  %v20539_v2 = vld [vmem:[#allocation10 + $0x14] ss:$48 sps:$4 sm:$0xff]  }
 0x55d   :  { %9647 = vmatpush1.bf16.msra.mxu0 %v20459_v46  ;;  %v20542_v46 = vld [vmem:[#allocation10 + $0x1c] ss:$48 sps:$4 sm:$0xff]  }
 0x55e   :  { %9733 = vmatpush1.bf16.msra.mxu1 %v20462_v3  ;;  %9648 = vmatprep.subr.bf16.mxu0 %v20467_v4  ;;  %v23289_v3 = vpack.c.bf16 %v250_v1, %v246_v0  ;;  %v20537_v4 = vld [vmem:[#allocation10 + $0x10] ss:$48 sps:$4 sm:$0xff]   ;;  %v20614_v0 = vld [vmem:[#allocation10 + $0x49c] ss:$48 sps:$4 sm:$0xff]  }
 0x55f   :  { %9734 = vmatprep.subr.bf16.mxu1 %v20470_v5  ;;  %v20540_v5 = vld [vmem:[#allocation10 + $0x18] ss:$48 sps:$4 sm:$0xff]   ;;  %v20609_v1 = vld [vmem:[#allocation10 + $0x490] ss:$48 sps:$4 sm:$0xff]  }
 0x561   :  { %9649 = vmatpush1.bf16.msra.mxu0 %v20465_v26  ;;  %v20545_v26 = vld [vmem:[#allocation10 + $0x74] ss:$48 sps:$4 sm:$0xff]  }
 0x562   :  { %9735 = vmatpush1.bf16.msra.mxu1 %v20468_v47  ;;  %9650 = vmatprep.subr.bf16.mxu0 %v20473_v6  ;;  %v20548_v47 = vld [vmem:[#allocation10 + $0x7c] ss:$48 sps:$4 sm:$0xff]   ;;  %v20543_v6 = vld [vmem:[#allocation10 + $0x70] ss:$48 sps:$4 sm:$0xff]  }
 0x563   :  { %9736 = vmatprep.subr.bf16.mxu1 %v20476_v7  ;;  %v20546_v7 = vld [vmem:[#allocation10 + $0x78] ss:$48 sps:$4 sm:$0xff]  }
 0x565   :  { %9651 = vmatpush1.bf16.msra.mxu0 %v20471_v8  ;;  %v20551_v8 = vld [vmem:[#allocation10 + $0xd4] ss:$48 sps:$4 sm:$0xff]  }
 0x566   :  { %9737 = vmatpush1.bf16.msra.mxu1 %v20474_v9  ;;  %9652 = vmatprep.subr.bf16.mxu0 %v20479_v51  ;;  %v20554_v9 = vld [vmem:[#allocation10 + $0xdc] ss:$48 sps:$4 sm:$0xff]   ;;  %v20549_v51 = vld [vmem:[#allocation10 + $0xd0] ss:$48 sps:$4 sm:$0xff]  }
 0x567   :  { %9738 = vmatprep.subr.bf16.mxu1 %v20482_v10  ;;  %v20552_v10 = vld [vmem:[#allocation10 + $0xd8] ss:$48 sps:$4 sm:$0xff]  }
 0x569   :  { %9653 = vmatpush1.bf16.msra.mxu0 %v20477_v27  ;;  %v20557_v27 = vld [vmem:[#allocation10 + $0x134] ss:$48 sps:$4 sm:$0xff]  }
 0x56a   :  { %9739 = vmatpush1.bf16.msra.mxu1 %v20480_v16  ;;  %9654 = vmatprep.subr.bf16.mxu0 %v20485_v20  ;;  %v20560_v16 = vld [vmem:[#allocation10 + $0x13c] ss:$48 sps:$4 sm:$0xff]   ;;  %v20555_v20 = vld [vmem:[#allocation10 + $0x130] ss:$48 sps:$4 sm:$0xff]  }
 0x56b   :  { %9740 = vmatprep.subr.bf16.mxu1 %v20488_v52  ;;  %v20558_v52 = vld [vmem:[#allocation10 + $0x138] ss:$48 sps:$4 sm:$0xff]  }
 0x56d   :  { %9655 = vmatpush1.bf16.msra.mxu0 %v20483_v11  ;;  %v20563_v11 = vld [vmem:[#allocation10 + $0x194] ss:$48 sps:$4 sm:$0xff]  }
 0x56e   :  { %9741 = vmatpush1.bf16.msra.mxu1 %v20486_v12  ;;  %9656 = vmatprep.subr.bf16.mxu0 %v20491_v23  ;;  %v20566_v12 = vld [vmem:[#allocation10 + $0x19c] ss:$48 sps:$4 sm:$0xff]   ;;  %v20561_v23 = vld [vmem:[#allocation10 + $0x190] ss:$48 sps:$4 sm:$0xff]  }
 0x56f   :  { %9742 = vmatprep.subr.bf16.mxu1 %v20494_v53  ;;  %v20564_v53 = vld [vmem:[#allocation10 + $0x198] ss:$48 sps:$4 sm:$0xff]  }
 0x571   :  { %9657 = vmatpush1.bf16.msra.mxu0 %v20489_v24  ;;  %v20569_v24 = vld [vmem:[#allocation10 + $0x1f4] ss:$48 sps:$4 sm:$0xff]  }
 0x572   :  { %9743 = vmatpush1.bf16.msra.mxu1 %v20492_v55  ;;  %9658 = vmatprep.subr.bf16.mxu0 %v20497_v37  ;;  %v20572_v55 = vld [vmem:[#allocation10 + $0x1fc] ss:$48 sps:$4 sm:$0xff]   ;;  %v20567_v37 = vld [vmem:[#allocation10 + $0x1f0] ss:$48 sps:$4 sm:$0xff]  }
 0x573   :  { %9744 = vmatprep.subr.bf16.mxu1 %v20500_v28  ;;  %v20570_v28 = vld [vmem:[#allocation10 + $0x1f8] ss:$48 sps:$4 sm:$0xff]  }
 0x575   :  { %9659 = vmatpush1.bf16.msra.mxu0 %v20495_v29  ;;  %v20575_v29 = vld [vmem:[#allocation10 + $0x254] ss:$48 sps:$4 sm:$0xff]  }
 0x576   :  { %9745 = vmatpush1.bf16.msra.mxu1 %v20498_v30  ;;  %9660 = vmatprep.subr.bf16.mxu0 %v20503_v31  ;;  %v20578_v30 = vld [vmem:[#allocation10 + $0x25c] ss:$48 sps:$4 sm:$0xff]   ;;  %v20573_v31 = vld [vmem:[#allocation10 + $0x250] ss:$48 sps:$4 sm:$0xff]  }
 0x577   :  { %9746 = vmatprep.subr.bf16.mxu1 %v20506_v39  ;;  %v20576_v39 = vld [vmem:[#allocation10 + $0x258] ss:$48 sps:$4 sm:$0xff]  }
 0x579   :  { %9661 = vmatpush1.bf16.msra.mxu0 %v20501_v54  ;;  %v20581_v54 = vld [vmem:[#allocation10 + $0x2b4] ss:$48 sps:$4 sm:$0xff]  }
 0x57a   :  { %9747 = vmatpush1.bf16.msra.mxu1 %v20504_v56  ;;  %9662 = vmatprep.subr.bf16.mxu0 %v20509_v41  ;;  %v20584_v56 = vld [vmem:[#allocation10 + $0x2bc] ss:$48 sps:$4 sm:$0xff]   ;;  %v20579_v41 = vld [vmem:[#allocation10 + $0x2b0] ss:$48 sps:$4 sm:$0xff]  }
 0x57b   :  { %9748 = vmatprep.subr.bf16.mxu1 %v20512_v32  ;;  %v20582_v32 = vld [vmem:[#allocation10 + $0x2b8] ss:$48 sps:$4 sm:$0xff]  }
 0x57d   :  { %9663 = vmatpush1.bf16.msra.mxu0 %v20507_v38  ;;  %v20587_v38 = vld [vmem:[#allocation10 + $0x314] ss:$48 sps:$4 sm:$0xff]  }
 0x57e   :  { %9749 = vmatpush1.bf16.msra.mxu1 %v20510_v45  ;;  %9664 = vmatprep.subr.bf16.mxu0 %v20515_v33  ;;  %v20590_v45 = vld [vmem:[#allocation10 + $0x31c] ss:$48 sps:$4 sm:$0xff]   ;;  %v20585_v33 = vld [vmem:[#allocation10 + $0x310] ss:$48 sps:$4 sm:$0xff]  }
 0x57f   :  { %9750 = vmatprep.subr.bf16.mxu1 %v20518_v50  ;;  %v20588_v50 = vld [vmem:[#allocation10 + $0x318] ss:$48 sps:$4 sm:$0xff]  }
 0x581   :  { %9665 = vmatpush1.bf16.msra.mxu0 %v20513_v58  ;;  %v20593_v58 = vld [vmem:[#allocation10 + $0x374] ss:$48 sps:$4 sm:$0xff]  }
 0x582   :  { %9751 = vmatpush1.bf16.msra.mxu1 %v20516_v34  ;;  %9666 = vmatprep.subr.bf16.mxu0 %v20521_v59  ;;  %v20596_v34 = vld [vmem:[#allocation10 + $0x37c] ss:$48 sps:$4 sm:$0xff]   ;;  %v20591_v59 = vld [vmem:[#allocation10 + $0x370] ss:$48 sps:$4 sm:$0xff]  }
 0x583   :  { %9752 = vmatprep.subr.bf16.mxu1 %v20524_v43  ;;  %v20594_v43 = vld [vmem:[#allocation10 + $0x378] ss:$48 sps:$4 sm:$0xff]  }
 0x585   :  { %9667 = vmatpush1.bf16.msra.mxu0 %v20519_v60  ;;  %v20599_v60 = vld [vmem:[#allocation10 + $0x3d4] ss:$48 sps:$4 sm:$0xff]  }
 0x586   :  { %9753 = vmatpush1.bf16.msra.mxu1 %v20522_v61  ;;  %9668 = vmatprep.subr.bf16.mxu0 %v20527_v17  ;;  %v20602_v61 = vld [vmem:[#allocation10 + $0x3dc] ss:$48 sps:$4 sm:$0xff]   ;;  %v20597_v17 = vld [vmem:[#allocation10 + $0x3d0] ss:$48 sps:$4 sm:$0xff]  }
 0x587   :  { %9754 = vmatprep.subr.bf16.mxu1 %v20530_v35  ;;  %v20600_v35 = vld [vmem:[#allocation10 + $0x3d8] ss:$48 sps:$4 sm:$0xff]  }
 0x589   :  { %9669 = vmatpush1.bf16.msra.mxu0 %v20525_v19  ;;  %v20605_v19 = vld [vmem:[#allocation10 + $0x434] ss:$48 sps:$4 sm:$0xff]  }
 0x58a   :  { %9755 = vmatpush1.bf16.msra.mxu1 %v20528_v18  ;;  %9670 = vmatprep.subr.bf16.mxu0 %v20533_v63  ;;  %v20608_v18 = vld [vmem:[#allocation10 + $0x43c] ss:$48 sps:$4 sm:$0xff]   ;;  %v20603_v63 = vld [vmem:[#allocation10 + $0x430] ss:$48 sps:$4 sm:$0xff]  }
 0x58b   :  { %9756 = vmatprep.subr.bf16.mxu1 %v20536_v22  ;;  %v20606_v22 = vld [vmem:[#allocation10 + $0x438] ss:$48 sps:$4 sm:$0xff]  }
 0x58d   :  { %9671 = vmatpush1.bf16.msra.mxu0 %v20531_v36  ;;  %v20611_v36 = vld [vmem:[#allocation10 + $0x494] ss:$48 sps:$4 sm:$0xff]  }
 0x58e   :  { %9757 = vmatpush1.bf16.msra.mxu1 %v20534_v25  ;;  %9769 = vmatprep.subr.bf16.mxu0 %v20539_v2  ;;  %v20612_v25 = vld [vmem:[#allocation10 + $0x498] ss:$48 sps:$4 sm:$0xff]   ;;  %v20617_v2 = vld [vmem:[#allocation10 + $0x4f4] ss:$48 sps:$4 sm:$0xff]  }
 0x58f   :  { %9855 = vmatprep.subr.bf16.mxu1 %v20542_v46  ;;  %v20620_v46 = vld [vmem:[#allocation10 + $0x4fc] ss:$48 sps:$4 sm:$0xff]  }
 0x590   :  { %9673 = vmatmul.mubr.bf16.vlgmr.msra.gmra.mrb[16].mxu0 %v23289_v3 }
 0x591   :  { %9759 = vmatmul.mubr.bf16.vlgmr.msra.gmra.mrb[16].mxu1 %v23289_v3  ;;  %9770 = vmatpush1.bf16.msra.mxu0 %v20537_v4  ;;  %v20615_v4 = vld [vmem:[#allocation10 + $0x4f0] ss:$48 sps:$4 sm:$0xff]  }
 0x592   :  { %9856 = vmatpush1.bf16.msra.mxu1 %v20540_v5  ;;  %9771 = vmatprep.subr.bf16.mxu0 %v20545_v26  ;;  %v20618_v5 = vld [vmem:[#allocation10 + $0x4f8] ss:$48 sps:$4 sm:$0xff]   ;;  %v20623_v26 = vld [vmem:[#allocation10 + $0x554] ss:$48 sps:$4 sm:$0xff]  }
 0x593   :  { %9857 = vmatprep.subr.bf16.mxu1 %v20548_v47  ;;  %9801 = vmatprep.mubr.bf16.mxu0 %v23257_v42  ;;  %v20626_v47 = vld [vmem:[#allocation10 + $0x55c] ss:$48 sps:$4 sm:$0xff]  }
 0x594   :  { %9887 = vmatprep.mubr.bf16.mxu1 %v23257_v42 }
 0x595   :  { %9772 = vmatpush1.bf16.msra.mxu0 %v20543_v6  ;;  %v20621_v6 = vld [vmem:[#allocation10 + $0x550] ss:$48 sps:$4 sm:$0xff]  }
 0x596   :  { %9858 = vmatpush1.bf16.msra.mxu1 %v20546_v7  ;;  %9773 = vmatprep.subr.bf16.mxu0 %v20551_v8  ;;  %v20624_v7 = vld [vmem:[#allocation10 + $0x558] ss:$48 sps:$4 sm:$0xff]   ;;  %v20629_v8 = vld [vmem:[#allocation10 + $0x5b4] ss:$48 sps:$4 sm:$0xff]  }
 0x597   :  { %9859 = vmatprep.subr.bf16.mxu1 %v20554_v9  ;;  %v20632_v9 = vld [vmem:[#allocation10 + $0x5bc] ss:$48 sps:$4 sm:$0xff]  }
 0x599   :  { %9774 = vmatpush1.bf16.msra.mxu0 %v20549_v51  ;;  %v20627_v51 = vld [vmem:[#allocation10 + $0x5b0] ss:$48 sps:$4 sm:$0xff]  }
 0x59a   :  { %9860 = vmatpush1.bf16.msra.mxu1 %v20552_v10  ;;  %9775 = vmatprep.subr.bf16.mxu0 %v20557_v27  ;;  %v20630_v10 = vld [vmem:[#allocation10 + $0x5b8] ss:$48 sps:$4 sm:$0xff]   ;;  %v20635_v27 = vld [vmem:[#allocation10 + $0x614] ss:$48 sps:$4 sm:$0xff]  }
 0x59b   :  { %9861 = vmatprep.subr.bf16.mxu1 %v20560_v16  ;;  %v20638_v16 = vld [vmem:[#allocation10 + $0x61c] ss:$48 sps:$4 sm:$0xff]  }
 0x59d   :  { %9776 = vmatpush1.bf16.msra.mxu0 %v20555_v20  ;;  %v20633_v20 = vld [vmem:[#allocation10 + $0x610] ss:$48 sps:$4 sm:$0xff]  }
 0x59e   :  { %9862 = vmatpush1.bf16.msra.mxu1 %v20558_v52  ;;  %9777 = vmatprep.subr.bf16.mxu0 %v20563_v11  ;;  %v20636_v52 = vld [vmem:[#allocation10 + $0x618] ss:$48 sps:$4 sm:$0xff]   ;;  %v20641_v11 = vld [vmem:[#allocation10 + $0x674] ss:$48 sps:$4 sm:$0xff]  }
 0x59f   :  { %9863 = vmatprep.subr.bf16.mxu1 %v20566_v12  ;;  %v20644_v12 = vld [vmem:[#allocation10 + $0x67c] ss:$48 sps:$4 sm:$0xff]  }
 0x5a1   :  { %9778 = vmatpush1.bf16.msra.mxu0 %v20561_v23  ;;  %v20639_v23 = vld [vmem:[#allocation10 + $0x670] ss:$48 sps:$4 sm:$0xff]  }
 0x5a2   :  { %9864 = vmatpush1.bf16.msra.mxu1 %v20564_v53  ;;  %9779 = vmatprep.subr.bf16.mxu0 %v20569_v24  ;;  %v20642_v53 = vld [vmem:[#allocation10 + $0x678] ss:$48 sps:$4 sm:$0xff]   ;;  %v20647_v24 = vld [vmem:[#allocation10 + $0x6d4] ss:$48 sps:$4 sm:$0xff]  }
 0x5a3   :  { %9865 = vmatprep.subr.bf16.mxu1 %v20572_v55  ;;  %v20650_v55 = vld [vmem:[#allocation10 + $0x6dc] ss:$48 sps:$4 sm:$0xff]  }
 0x5a5   :  { %9780 = vmatpush1.bf16.msra.mxu0 %v20567_v37  ;;  %v20645_v37 = vld [vmem:[#allocation10 + $0x6d0] ss:$48 sps:$4 sm:$0xff]  }
 0x5a6   :  { %9866 = vmatpush1.bf16.msra.mxu1 %v20570_v28  ;;  %9781 = vmatprep.subr.bf16.mxu0 %v20575_v29  ;;  %v20648_v28 = vld [vmem:[#allocation10 + $0x6d8] ss:$48 sps:$4 sm:$0xff]   ;;  %v20653_v29 = vld [vmem:[#allocation10 + $0x734] ss:$48 sps:$4 sm:$0xff]  }
 0x5a7   :  { %9867 = vmatprep.subr.bf16.mxu1 %v20578_v30  ;;  %v20656_v30 = vld [vmem:[#allocation10 + $0x73c] ss:$48 sps:$4 sm:$0xff]  }
 0x5a9   :  { %9782 = vmatpush1.bf16.msra.mxu0 %v20573_v31  ;;  %v20651_v31 = vld [vmem:[#allocation10 + $0x730] ss:$48 sps:$4 sm:$0xff]  }
 0x5aa   :  { %9868 = vmatpush1.bf16.msra.mxu1 %v20576_v39  ;;  %9783 = vmatprep.subr.bf16.mxu0 %v20581_v54  ;;  %v20654_v39 = vld [vmem:[#allocation10 + $0x738] ss:$48 sps:$4 sm:$0xff]   ;;  %v20659_v54 = vld [vmem:[#allocation10 + $0x794] ss:$48 sps:$4 sm:$0xff]  }
 0x5ab   :  { %9869 = vmatprep.subr.bf16.mxu1 %v20584_v56  ;;  %v20662_v56 = vld [vmem:[#allocation10 + $0x79c] ss:$48 sps:$4 sm:$0xff]  }
 0x5ad   :  { %9784 = vmatpush1.bf16.msra.mxu0 %v20579_v41  ;;  %v20657_v41 = vld [vmem:[#allocation10 + $0x790] ss:$48 sps:$4 sm:$0xff]  }
 0x5ae   :  { %9870 = vmatpush1.bf16.msra.mxu1 %v20582_v32  ;;  %9785 = vmatprep.subr.bf16.mxu0 %v20587_v38  ;;  %v20660_v32 = vld [vmem:[#allocation10 + $0x798] ss:$48 sps:$4 sm:$0xff]   ;;  %v20665_v38 = vld [vmem:[#allocation10 + $0x7f4] ss:$48 sps:$4 sm:$0xff]  }
 0x5af   :  { %9871 = vmatprep.subr.bf16.mxu1 %v20590_v45  ;;  %v20668_v45 = vld [vmem:[#allocation10 + $0x7fc] ss:$48 sps:$4 sm:$0xff]  }
 0x5b1   :  { %9786 = vmatpush1.bf16.msra.mxu0 %v20585_v33  ;;  %v20663_v33 = vld [vmem:[#allocation10 + $0x7f0] ss:$48 sps:$4 sm:$0xff]  }
 0x5b2   :  { %9872 = vmatpush1.bf16.msra.mxu1 %v20588_v50  ;;  %9787 = vmatprep.subr.bf16.mxu0 %v20593_v58  ;;  %v20666_v50 = vld [vmem:[#allocation10 + $0x7f8] ss:$48 sps:$4 sm:$0xff]   ;;  %v20671_v58 = vld [vmem:[#allocation10 + $0x854] ss:$48 sps:$4 sm:$0xff]  }
 0x5b3   :  { %9873 = vmatprep.subr.bf16.mxu1 %v20596_v34 }
 0x5b5   :  { %9788 = vmatpush1.bf16.msra.mxu0 %v20591_v59  ;;  %v20674_v59 = vld [vmem:[#allocation10 + $0x85c] ss:$48 sps:$4 sm:$0xff]  }
 0x5b6   :  { %9874 = vmatpush1.bf16.msra.mxu1 %v20594_v43  ;;  %9789 = vmatprep.subr.bf16.mxu0 %v20599_v60 }
 0x5b7   :  { %9875 = vmatprep.subr.bf16.mxu1 %v20602_v61 }
 0x5b9   :  { %9790 = vmatpush1.bf16.msra.mxu0 %v20597_v17 }
 0x5ba   :  { %9876 = vmatpush1.bf16.msra.mxu1 %v20600_v35  ;;  %9791 = vmatprep.subr.bf16.mxu0 %v20605_v19  ;;  %v20669_v35 = vld [vmem:[#allocation10 + $0x850] ss:$48 sps:$4 sm:$0xff]  }
 0x5bb   :  { %9877 = vmatprep.subr.bf16.mxu1 %v20608_v18 }
 0x5bd   :  { %9792 = vmatpush1.bf16.msra.mxu0 %v20603_v63  ;;  %v20672_v63 = vld [vmem:[#allocation10 + $0x858] ss:$48 sps:$4 sm:$0xff]  }
 0x5be   :  { %9878 = vmatpush1.bf16.msra.mxu1 %v20606_v22  ;;  %9793 = vmatprep.subr.bf16.mxu0 %v20611_v36  ;;  %v20677_v22 = vld [vmem:[#allocation10 + $0x8b4] ss:$48 sps:$4 sm:$0xff]  }
 0x5bf   :  { %9879 = vmatprep.subr.bf16.mxu1 %v20614_v0  ;;  %v20680_v0 = vld [vmem:[#allocation10 + $0x8bc] ss:$48 sps:$4 sm:$0xff]  }
 0x5c1   :  { %9794 = vmatpush1.bf16.msra.mxu0 %v20609_v1  ;;  %v20675_v1 = vld [vmem:[#allocation10 + $0x8b0] ss:$48 sps:$4 sm:$0xff]  }
 0x5c2   :  { %9880 = vmatpush1.bf16.msra.mxu1 %v20612_v25  ;;  %9795 = vmatprep.subr.bf16.mxu0 %v20617_v2  ;;  %v20678_v25 = vld [vmem:[#allocation10 + $0x8b8] ss:$48 sps:$4 sm:$0xff]   ;;  %v20683_v2 = vld [vmem:[#allocation10 + $0x914] ss:$48 sps:$4 sm:$0xff]  }
 0x5c3   :  { %9881 = vmatprep.subr.bf16.mxu1 %v20620_v46  ;;  %v20686_v46 = vld [vmem:[#allocation10 + $0x91c] ss:$48 sps:$4 sm:$0xff]  }
 0x5c5   :  { %9796 = vmatpush1.bf16.msra.mxu0 %v20615_v4  ;;  %v20681_v4 = vld [vmem:[#allocation10 + $0x910] ss:$48 sps:$4 sm:$0xff]  }
 0x5c6   :  { %9882 = vmatpush1.bf16.msra.mxu1 %v20618_v5  ;;  %9797 = vmatprep.subr.bf16.mxu0 %v20623_v26  ;;  %v20684_v5 = vld [vmem:[#allocation10 + $0x918] ss:$48 sps:$4 sm:$0xff]   ;;  %v20689_v26 = vld [vmem:[#allocation10 + $0x974] ss:$48 sps:$4 sm:$0xff]  }
 0x5c7   :  { %9883 = vmatprep.subr.bf16.mxu1 %v20626_v47  ;;  %v20692_v47 = vld [vmem:[#allocation10 + $0x97c] ss:$48 sps:$4 sm:$0xff]  }
 0x5c9   :  { %9798 = vmatpush1.bf16.msra.mxu0 %v20621_v6  ;;  %v20687_v6 = vld [vmem:[#allocation10 + $0x970] ss:$48 sps:$4 sm:$0xff]  }
 0x5ca   :  { %9884 = vmatpush1.bf16.msra.mxu1 %v20624_v7  ;;  %9799 = vmatprep.subr.bf16.mxu0 %v20629_v8  ;;  %v20690_v7 = vld [vmem:[#allocation10 + $0x978] ss:$48 sps:$4 sm:$0xff]   ;;  %v20695_v8 = vld [vmem:[#allocation10 + $0x9d4] ss:$48 sps:$4 sm:$0xff]  }
 0x5cb   :  { %9885 = vmatprep.subr.bf16.mxu1 %v20632_v9  ;;  %v20698_v9 = vld [vmem:[#allocation10 + $0x9dc] ss:$48 sps:$4 sm:$0xff]  }
 0x5cd   :  { %9800 = vmatpush1.bf16.msra.mxu0 %v20627_v51  ;;  %v20693_v51 = vld [vmem:[#allocation10 + $0x9d0] ss:$48 sps:$4 sm:$0xff]  }
 0x5ce   :  { %9886 = vmatpush1.bf16.msra.mxu1 %v20630_v10  ;;  %9812 = vmatprep.subr.bf16.mxu0 %v20635_v27  ;;  %v20696_v10 = vld [vmem:[#allocation10 + $0x9d8] ss:$48 sps:$4 sm:$0xff]   ;;  %v20701_v27 = vld [vmem:[#allocation10 + $0xa34] ss:$48 sps:$4 sm:$0xff]  }
 0x5cf   :  { %9898 = vmatprep.subr.bf16.mxu1 %v20638_v16  ;;  %v20704_v16 = vld [vmem:[#allocation10 + $0xa3c] ss:$48 sps:$4 sm:$0xff]  }
 0x5d0   :  { %9802 = vmatmul.mubr.bf16.vlgmr.msra.gmra.mrb[20].mxu0 %v23269_v57 }
 0x5d1   :  { %9813 = vmatpush1.bf16.msra.mxu0 %v20633_v20  ;;  %9888 = vmatmul.mubr.bf16.vlgmr.msra.gmra.mrb[20].mxu1 %v23269_v57  ;;  %v20699_v20 = vld [vmem:[#allocation10 + $0xa30] ss:$48 sps:$4 sm:$0xff]  }
 0x5d2   :  { %9899 = vmatpush1.bf16.msra.mxu1 %v20636_v52  ;;  %9814 = vmatprep.subr.bf16.mxu0 %v20641_v11  ;;  %v20702_v52 = vld [vmem:[#allocation10 + $0xa38] ss:$48 sps:$4 sm:$0xff]   ;;  %v20707_v11 = vld [vmem:[#allocation10 + $0xa94] ss:$48 sps:$4 sm:$0xff]  }
 0x5d3   :  { %9900 = vmatprep.subr.bf16.mxu1 %v20644_v12  ;;  %9844 = vmatprep.mubr.bf16.mxu0 %v23277_v62  ;;  %v20710_v12 = vld [vmem:[#allocation10 + $0xa9c] ss:$48 sps:$4 sm:$0xff]  }
 0x5d4   :  { %9930 = vmatprep.mubr.bf16.mxu1 %v23277_v62 }
 0x5d5   :  { %9815 = vmatpush1.bf16.msra.mxu0 %v20639_v23  ;;  %v20705_v23 = vld [vmem:[#allocation10 + $0xa90] ss:$48 sps:$4 sm:$0xff]  }
 0x5d6   :  { %9901 = vmatpush1.bf16.msra.mxu1 %v20642_v53  ;;  %9816 = vmatprep.subr.bf16.mxu0 %v20647_v24  ;;  %v20708_v53 = vld [vmem:[#allocation10 + $0xa98] ss:$48 sps:$4 sm:$0xff]   ;;  %v20713_v24 = vld [vmem:[#allocation10 + $0xaf4] ss:$48 sps:$4 sm:$0xff]  }
 0x5d7   :  { %9902 = vmatprep.subr.bf16.mxu1 %v20650_v55  ;;  %v20716_v55 = vld [vmem:[#allocation10 + $0xafc] ss:$48 sps:$4 sm:$0xff]  }
 0x5d9   :  { %9817 = vmatpush1.bf16.msra.mxu0 %v20645_v37  ;;  %v20711_v37 = vld [vmem:[#allocation10 + $0xaf0] ss:$48 sps:$4 sm:$0xff]  }
 0x5da   :  { %9903 = vmatpush1.bf16.msra.mxu1 %v20648_v28  ;;  %9818 = vmatprep.subr.bf16.mxu0 %v20653_v29  ;;  %v20714_v28 = vld [vmem:[#allocation10 + $0xaf8] ss:$48 sps:$4 sm:$0xff]   ;;  %v20719_v29 = vld [vmem:[#allocation10 + $0xb54] ss:$48 sps:$4 sm:$0xff]  }
 0x5db   :  { %9904 = vmatprep.subr.bf16.mxu1 %v20656_v30  ;;  %v20722_v30 = vld [vmem:[#allocation10 + $0xb5c] ss:$48 sps:$4 sm:$0xff]  }
 0x5dd   :  { %9819 = vmatpush1.bf16.msra.mxu0 %v20651_v31  ;;  %v20717_v31 = vld [vmem:[#allocation10 + $0xb50] ss:$48 sps:$4 sm:$0xff]  }
 0x5de   :  { %9905 = vmatpush1.bf16.msra.mxu1 %v20654_v39  ;;  %9820 = vmatprep.subr.bf16.mxu0 %v20659_v54  ;;  %v20720_v39 = vld [vmem:[#allocation10 + $0xb58] ss:$48 sps:$4 sm:$0xff]   ;;  %v20725_v54 = vld [vmem:[#allocation10 + $0xbb4] ss:$48 sps:$4 sm:$0xff]  }
 0x5df   :  { %9906 = vmatprep.subr.bf16.mxu1 %v20662_v56  ;;  %v20728_v56 = vld [vmem:[#allocation10 + $0xbbc] ss:$48 sps:$4 sm:$0xff]  }
 0x5e1   :  { %9821 = vmatpush1.bf16.msra.mxu0 %v20657_v41  ;;  %v20723_v41 = vld [vmem:[#allocation10 + $0xbb0] ss:$48 sps:$4 sm:$0xff]  }
 0x5e2   :  { %9907 = vmatpush1.bf16.msra.mxu1 %v20660_v32  ;;  %9822 = vmatprep.subr.bf16.mxu0 %v20665_v38  ;;  %v20726_v32 = vld [vmem:[#allocation10 + $0xbb8] ss:$48 sps:$4 sm:$0xff]   ;;  %v20731_v38 = vld [vmem:[#allocation10 + $0x24] ss:$48 sps:$4 sm:$0xff]  }
 0x5e3   :  { %v23299_v34 = vpop.f32.mrb[24].mxu0  ;;  %9908 = vmatprep.subr.bf16.mxu1 %v20668_v45  ;;  %v20734_v45 = vld [vmem:[#allocation10 + $0x2c] ss:$48 sps:$4 sm:$0xff]  }
 0x5e4   :  { %v23301_v43 = vpop.f32.mrb[24].mxu1  ;;  %v23303_v60 = vpop.f32.mrb[25].mxu0 }
 0x5e5   :  { %v23305_v61 = vpop.f32.mrb[25].mxu1  ;;  %v23307_v17 = vpop.f32.mrb[26].mxu0  ;;  %9823 = vmatpush1.bf16.msra.mxu0 %v20663_v33  ;;  %v20729_v33 = vld [vmem:[#allocation10 + $0x20] ss:$48 sps:$4 sm:$0xff]  }
 0x5e6   :  { %v23309_v19 = vpop.f32.mrb[26].mxu1  ;;  %9909 = vmatpush1.bf16.msra.mxu1 %v20666_v50  ;;  %v23311_v18 = vpop.f32.mrb[27].mxu0  ;;  %9824 = vmatprep.subr.bf16.mxu0 %v20671_v58  ;;  %v20732_v50 = vld [vmem:[#allocation10 + $0x28] ss:$48 sps:$4 sm:$0xff]   ;;  %v20737_v58 = vld [vmem:[#allocation10 + $0x84] ss:$48 sps:$4 sm:$0xff]  }
 0x5e7   :  { %v23313_v36 = vpop.f32.mrb[27].mxu1  ;;  %9910 = vmatprep.subr.bf16.mxu1 %v20674_v59  ;;  %v20740_v59 = vld [vmem:[#allocation10 + $0x8c] ss:$48 sps:$4 sm:$0xff]  }
 0x5e9   :  { %9825 = vmatpush1.bf16.msra.mxu0 %v20669_v35  ;;  %v20735_v35 = vld [vmem:[#allocation10 + $0x80] ss:$48 sps:$4 sm:$0xff]  }
 0x5ea   :  { %9911 = vmatpush1.bf16.msra.mxu1 %v20672_v63  ;;  %9826 = vmatprep.subr.bf16.mxu0 %v20677_v22  ;;  %v20738_v63 = vld [vmem:[#allocation10 + $0x88] ss:$48 sps:$4 sm:$0xff]   ;;  %v20743_v22 = vld [vmem:[#allocation10 + $0xe4] ss:$48 sps:$4 sm:$0xff]  }
 0x5eb   :  { %9912 = vmatprep.subr.bf16.mxu1 %v20680_v0  ;;  %v20746_v0 = vld [vmem:[#allocation10 + $0xec] ss:$48 sps:$4 sm:$0xff]  }
 0x5ed   :  { %9827 = vmatpush1.bf16.msra.mxu0 %v20675_v1  ;;  %v20741_v1 = vld [vmem:[#allocation10 + $0xe0] ss:$48 sps:$4 sm:$0xff]  }
 0x5ee   :  { %9913 = vmatpush1.bf16.msra.mxu1 %v20678_v25  ;;  %9828 = vmatprep.subr.bf16.mxu0 %v20683_v2  ;;  %v20744_v25 = vld [vmem:[#allocation10 + $0xe8] ss:$48 sps:$4 sm:$0xff]   ;;  %v20749_v2 = vld [vmem:[#allocation10 + $0x144] ss:$48 sps:$4 sm:$0xff]  }
 0x5ef   :  { %9914 = vmatprep.subr.bf16.mxu1 %v20686_v46  ;;  %v20752_v46 = vld [vmem:[#allocation10 + $0x14c] ss:$48 sps:$4 sm:$0xff]  }
 0x5f1   :  { %9829 = vmatpush1.bf16.msra.mxu0 %v20681_v4  ;;  %v20747_v4 = vld [vmem:[#allocation10 + $0x140] ss:$48 sps:$4 sm:$0xff]  }
 0x5f2   :  { %9915 = vmatpush1.bf16.msra.mxu1 %v20684_v5  ;;  %9830 = vmatprep.subr.bf16.mxu0 %v20689_v26  ;;  %v20750_v5 = vld [vmem:[#allocation10 + $0x148] ss:$48 sps:$4 sm:$0xff]   ;;  %v20755_v26 = vld [vmem:[#allocation10 + $0x1a4] ss:$48 sps:$4 sm:$0xff]  }
 0x5f3   :  { %9916 = vmatprep.subr.bf16.mxu1 %v20692_v47  ;;  %v20758_v47 = vld [vmem:[#allocation10 + $0x1ac] ss:$48 sps:$4 sm:$0xff]  }
 0x5f5   :  { %9831 = vmatpush1.bf16.msra.mxu0 %v20687_v6  ;;  %v20753_v6 = vld [vmem:[#allocation10 + $0x1a0] ss:$48 sps:$4 sm:$0xff]  }
 0x5f6   :  { %9917 = vmatpush1.bf16.msra.mxu1 %v20690_v7  ;;  %9832 = vmatprep.subr.bf16.mxu0 %v20695_v8  ;;  %v20761_v7 = vld [vmem:[#allocation10 + $0x204] ss:$48 sps:$4 sm:$0xff]   ;;  %v20764_v8 = vld [vmem:[#allocation10 + $0x20c] ss:$48 sps:$4 sm:$0xff]  }
 0x5f7   :  { %9918 = vmatprep.subr.bf16.mxu1 %v20698_v9  ;;  %v20759_v9 = vld [vmem:[#allocation10 + $0x200] ss:$48 sps:$4 sm:$0xff]  }
 0x5f9   :  { %9833 = vmatpush1.bf16.msra.mxu0 %v20693_v51  ;;  %v20762_v51 = vld [vmem:[#allocation10 + $0x208] ss:$48 sps:$4 sm:$0xff]  }
 0x5fa   :  { %9919 = vmatpush1.bf16.msra.mxu1 %v20696_v10  ;;  %9834 = vmatprep.subr.bf16.mxu0 %v20701_v27  ;;  %v20767_v10 = vld [vmem:[#allocation10 + $0x264] ss:$48 sps:$4 sm:$0xff]   ;;  %v20770_v27 = vld [vmem:[#allocation10 + $0x26c] ss:$48 sps:$4 sm:$0xff]  }
 0x5fb   :  { %9920 = vmatprep.subr.bf16.mxu1 %v20704_v16  ;;  %v20765_v16 = vld [vmem:[#allocation10 + $0x260] ss:$48 sps:$4 sm:$0xff]  }
 0x5fd   :  { %9835 = vmatpush1.bf16.msra.mxu0 %v20699_v20  ;;  %v20768_v20 = vld [vmem:[#allocation10 + $0x268] ss:$48 sps:$4 sm:$0xff]  }
 0x5fe   :  { %9921 = vmatpush1.bf16.msra.mxu1 %v20702_v52  ;;  %9836 = vmatprep.subr.bf16.mxu0 %v20707_v11  ;;  %v20773_v52 = vld [vmem:[#allocation10 + $0x2c4] ss:$48 sps:$4 sm:$0xff]   ;;  %v20776_v11 = vld [vmem:[#allocation10 + $0x2cc] ss:$48 sps:$4 sm:$0xff]  }
 0x5ff   :  { %9922 = vmatprep.subr.bf16.mxu1 %v20710_v12  ;;  %v20771_v12 = vld [vmem:[#allocation10 + $0x2c0] ss:$48 sps:$4 sm:$0xff]  }
 0x601   :  { %9837 = vmatpush1.bf16.msra.mxu0 %v20705_v23  ;;  %v20774_v23 = vld [vmem:[#allocation10 + $0x2c8] ss:$48 sps:$4 sm:$0xff]  }
 0x602   :  { %9923 = vmatpush1.bf16.msra.mxu1 %v20708_v53  ;;  %9838 = vmatprep.subr.bf16.mxu0 %v20713_v24  ;;  %v20779_v53 = vld [vmem:[#allocation10 + $0x324] ss:$48 sps:$4 sm:$0xff]   ;;  %v20782_v24 = vld [vmem:[#allocation10 + $0x32c] ss:$48 sps:$4 sm:$0xff]  }
 0x603   :  { %9924 = vmatprep.subr.bf16.mxu1 %v20716_v55  ;;  %v20777_v55 = vld [vmem:[#allocation10 + $0x320] ss:$48 sps:$4 sm:$0xff]  }
 0x605   :  { %9839 = vmatpush1.bf16.msra.mxu0 %v20711_v37  ;;  %v20780_v37 = vld [vmem:[#allocation10 + $0x328] ss:$48 sps:$4 sm:$0xff]  }
 0x606   :  { %9925 = vmatpush1.bf16.msra.mxu1 %v20714_v28  ;;  %9840 = vmatprep.subr.bf16.mxu0 %v20719_v29  ;;  %v20785_v28 = vld [vmem:[#allocation10 + $0x384] ss:$48 sps:$4 sm:$0xff]   ;;  %v20788_v29 = vld [vmem:[#allocation10 + $0x38c] ss:$48 sps:$4 sm:$0xff]  }
 0x607   :  { %9926 = vmatprep.subr.bf16.mxu1 %v20722_v30  ;;  %v20783_v30 = vld [vmem:[#allocation10 + $0x380] ss:$48 sps:$4 sm:$0xff]  }
 0x609   :  { %9841 = vmatpush1.bf16.msra.mxu0 %v20717_v31  ;;  %v20786_v31 = vld [vmem:[#allocation10 + $0x388] ss:$48 sps:$4 sm:$0xff]  }
 0x60a   :  { %9927 = vmatpush1.bf16.msra.mxu1 %v20720_v39  ;;  %9842 = vmatprep.subr.bf16.mxu0 %v20725_v54  ;;  %v20791_v39 = vld [vmem:[#allocation10 + $0x3e4] ss:$48 sps:$4 sm:$0xff]   ;;  %v20794_v54 = vld [vmem:[#allocation10 + $0x3ec] ss:$48 sps:$4 sm:$0xff]  }
 0x60b   :  { %9928 = vmatprep.subr.bf16.mxu1 %v20728_v56  ;;  %v20789_v56 = vld [vmem:[#allocation10 + $0x3e0] ss:$48 sps:$4 sm:$0xff]  }
 0x60d   :  { %9843 = vmatpush1.bf16.msra.mxu0 %v20723_v41  ;;  %v20792_v41 = vld [vmem:[#allocation10 + $0x3e8] ss:$48 sps:$4 sm:$0xff]  }
 0x60e   :  { %9929 = vmatpush1.bf16.msra.mxu1 %v20726_v32  ;;  %9941 = vmatprep.subr.bf16.mxu0 %v20731_v38  ;;  %v20797_v32 = vld [vmem:[#allocation10 + $0x444] ss:$48 sps:$4 sm:$0xff]   ;;  %v20800_v38 = vld [vmem:[#allocation10 + $0x44c] ss:$48 sps:$4 sm:$0xff]  }
 0x60f   :  { %10027 = vmatprep.subr.bf16.mxu1 %v20734_v45  ;;  %v20795_v45 = vld [vmem:[#allocation10 + $0x440] ss:$48 sps:$4 sm:$0xff]  }
 0x610   :  { %9845 = vmatmul.mubr.bf16.vlgmr.msra.gmra.mrb[20].mxu0 %v23289_v3 }
 0x611   :  { %9931 = vmatmul.mubr.bf16.vlgmr.msra.gmra.mrb[20].mxu1 %v23289_v3  ;;  %9942 = vmatpush1.bf16.msra.mxu0 %v20729_v33  ;;  %v20798_v33 = vld [vmem:[#allocation10 + $0x448] ss:$48 sps:$4 sm:$0xff]  }
 0x612   :  { %10028 = vmatpush1.bf16.msra.mxu1 %v20732_v50  ;;  %9943 = vmatprep.subr.bf16.mxu0 %v20737_v58  ;;  %v20803_v50 = vld [vmem:[#allocation10 + $0x4a4] ss:$48 sps:$4 sm:$0xff]   ;;  %v20806_v58 = vld [vmem:[#allocation10 + $0x4ac] ss:$48 sps:$4 sm:$0xff]  }
 0x613   :  { %10029 = vmatprep.subr.bf16.mxu1 %v20740_v59  ;;  %9973 = vmatprep.mubr.bf16.mxu0 %v23257_v42  ;;  %v20801_v59 = vld [vmem:[#allocation10 + $0x4a0] ss:$48 sps:$4 sm:$0xff]  }
 0x614   :  { %10059 = vmatprep.mubr.bf16.mxu1 %v23257_v42  ;;  %v20756_v42 = vld [vmem:[#allocation10 + $0x1a8] ss:$48 sps:$4 sm:$0xff]  }
 0x615   :  { %9944 = vmatpush1.bf16.msra.mxu0 %v20735_v35  ;;  %v20804_v35 = vld [vmem:[#allocation10 + $0x4a8] ss:$48 sps:$4 sm:$0xff]  }
 0x616   :  { %10030 = vmatpush1.bf16.msra.mxu1 %v20738_v63  ;;  %9945 = vmatprep.subr.bf16.mxu0 %v20743_v22  ;;  %v20809_v63 = vld [vmem:[#allocation10 + $0x504] ss:$48 sps:$4 sm:$0xff]   ;;  %v20812_v22 = vld [vmem:[#allocation10 + $0x50c] ss:$48 sps:$4 sm:$0xff]  }
 0x617   :  { %10031 = vmatprep.subr.bf16.mxu1 %v20746_v0  ;;  %v20807_v0 = vld [vmem:[#allocation10 + $0x500] ss:$48 sps:$4 sm:$0xff]  }
 0x619   :  { %9946 = vmatpush1.bf16.msra.mxu0 %v20741_v1  ;;  %v20810_v1 = vld [vmem:[#allocation10 + $0x508] ss:$48 sps:$4 sm:$0xff]  }
 0x61a   :  { %10032 = vmatpush1.bf16.msra.mxu1 %v20744_v25  ;;  %9947 = vmatprep.subr.bf16.mxu0 %v20749_v2  ;;  %v20815_v25 = vld [vmem:[#allocation10 + $0x564] ss:$48 sps:$4 sm:$0xff]   ;;  %v20818_v2 = vld [vmem:[#allocation10 + $0x56c] ss:$48 sps:$4 sm:$0xff]  }
 0x61b   :  { %10033 = vmatprep.subr.bf16.mxu1 %v20752_v46  ;;  %v20813_v46 = vld [vmem:[#allocation10 + $0x560] ss:$48 sps:$4 sm:$0xff]  }
 0x61d   :  { %9948 = vmatpush1.bf16.msra.mxu0 %v20747_v4  ;;  %v20816_v4 = vld [vmem:[#allocation10 + $0x568] ss:$48 sps:$4 sm:$0xff]  }
 0x61e   :  { %10034 = vmatpush1.bf16.msra.mxu1 %v20750_v5  ;;  %9949 = vmatprep.subr.bf16.mxu0 %v20755_v26  ;;  %v20821_v5 = vld [vmem:[#allocation10 + $0x5c4] ss:$48 sps:$4 sm:$0xff]   ;;  %v20824_v26 = vld [vmem:[#allocation10 + $0x5cc] ss:$48 sps:$4 sm:$0xff]  }
 0x61f   :  { %10035 = vmatprep.subr.bf16.mxu1 %v20758_v47  ;;  %v20819_v47 = vld [vmem:[#allocation10 + $0x5c0] ss:$48 sps:$4 sm:$0xff]  }
 0x621   :  { %9950 = vmatpush1.bf16.msra.mxu0 %v20753_v6  ;;  %v20822_v6 = vld [vmem:[#allocation10 + $0x5c8] ss:$48 sps:$4 sm:$0xff]  }
 0x622   :  { %10036 = vmatpush1.bf16.msra.mxu1 %v20756_v42  ;;  %9951 = vmatprep.subr.bf16.mxu0 %v20761_v7  ;;  %v20827_v42 = vld [vmem:[#allocation10 + $0x624] ss:$48 sps:$4 sm:$0xff]   ;;  %v20830_v7 = vld [vmem:[#allocation10 + $0x62c] ss:$48 sps:$4 sm:$0xff]  }
 0x623   :  { %10037 = vmatprep.subr.bf16.mxu1 %v20764_v8  ;;  %v20825_v8 = vld [vmem:[#allocation10 + $0x620] ss:$48 sps:$4 sm:$0xff]  }
 0x625   :  { %9952 = vmatpush1.bf16.msra.mxu0 %v20759_v9  ;;  %v20828_v9 = vld [vmem:[#allocation10 + $0x628] ss:$48 sps:$4 sm:$0xff]  }
 0x626   :  { %10038 = vmatpush1.bf16.msra.mxu1 %v20762_v51  ;;  %9953 = vmatprep.subr.bf16.mxu0 %v20767_v10  ;;  %v20833_v51 = vld [vmem:[#allocation10 + $0x684] ss:$48 sps:$4 sm:$0xff]   ;;  %v20836_v10 = vld [vmem:[#allocation10 + $0x68c] ss:$48 sps:$4 sm:$0xff]  }
 0x627   :  { %10039 = vmatprep.subr.bf16.mxu1 %v20770_v27  ;;  %v20831_v27 = vld [vmem:[#allocation10 + $0x680] ss:$48 sps:$4 sm:$0xff]  }
 0x629   :  { %9954 = vmatpush1.bf16.msra.mxu0 %v20765_v16  ;;  %v20834_v16 = vld [vmem:[#allocation10 + $0x688] ss:$48 sps:$4 sm:$0xff]  }
 0x62a   :  { %10040 = vmatpush1.bf16.msra.mxu1 %v20768_v20  ;;  %9955 = vmatprep.subr.bf16.mxu0 %v20773_v52  ;;  %v20839_v20 = vld [vmem:[#allocation10 + $0x6e4] ss:$48 sps:$4 sm:$0xff]   ;;  %v20842_v52 = vld [vmem:[#allocation10 + $0x6ec] ss:$48 sps:$4 sm:$0xff]  }
 0x62b   :  { %10041 = vmatprep.subr.bf16.mxu1 %v20776_v11  ;;  %v20837_v11 = vld [vmem:[#allocation10 + $0x6e0] ss:$48 sps:$4 sm:$0xff]  }
 0x62d   :  { %9956 = vmatpush1.bf16.msra.mxu0 %v20771_v12  ;;  %v20840_v12 = vld [vmem:[#allocation10 + $0x6e8] ss:$48 sps:$4 sm:$0xff]  }
 0x62e   :  { %10042 = vmatpush1.bf16.msra.mxu1 %v20774_v23  ;;  %9957 = vmatprep.subr.bf16.mxu0 %v20779_v53  ;;  %v20845_v23 = vld [vmem:[#allocation10 + $0x744] ss:$48 sps:$4 sm:$0xff]   ;;  %v20848_v53 = vld [vmem:[#allocation10 + $0x74c] ss:$48 sps:$4 sm:$0xff]  }
 0x62f   :  { %10043 = vmatprep.subr.bf16.mxu1 %v20782_v24  ;;  %v20846_v24 = vld [vmem:[#allocation10 + $0x748] ss:$48 sps:$4 sm:$0xff]  }
 0x631   :  { %9958 = vmatpush1.bf16.msra.mxu0 %v20777_v55  ;;  %v20851_v55 = vld [vmem:[#allocation10 + $0x7a4] ss:$48 sps:$4 sm:$0xff]  }
 0x632   :  { %10044 = vmatpush1.bf16.msra.mxu1 %v20780_v37  ;;  %9959 = vmatprep.subr.bf16.mxu0 %v20785_v28  ;;  %v20854_v37 = vld [vmem:[#allocation10 + $0x7ac] ss:$48 sps:$4 sm:$0xff]   ;;  %v20849_v28 = vld [vmem:[#allocation10 + $0x7a0] ss:$48 sps:$4 sm:$0xff]  }
 0x633   :  { %10045 = vmatprep.subr.bf16.mxu1 %v20788_v29  ;;  %v20857_v29 = vld [vmem:[#allocation10 + $0x804] ss:$48 sps:$4 sm:$0xff]  }
 0x635   :  { %9960 = vmatpush1.bf16.msra.mxu0 %v20783_v30  ;;  %v20860_v30 = vld [vmem:[#allocation10 + $0x80c] ss:$48 sps:$4 sm:$0xff]  }
 0x636   :  { %10046 = vmatpush1.bf16.msra.mxu1 %v20786_v31  ;;  %9961 = vmatprep.subr.bf16.mxu0 %v20791_v39  ;;  %v20855_v31 = vld [vmem:[#allocation10 + $0x800] ss:$48 sps:$4 sm:$0xff]   ;;  %v20858_v39 = vld [vmem:[#allocation10 + $0x808] ss:$48 sps:$4 sm:$0xff]  }
 0x637   :  { %10047 = vmatprep.subr.bf16.mxu1 %v20794_v54  ;;  %v20863_v54 = vld [vmem:[#allocation10 + $0x864] ss:$48 sps:$4 sm:$0xff]  }
 0x639   :  { %9962 = vmatpush1.bf16.msra.mxu0 %v20789_v56 }
 0x63a   :  { %10048 = vmatpush1.bf16.msra.mxu1 %v20792_v41  ;;  %9963 = vmatprep.subr.bf16.mxu0 %v20797_v32  ;;  %v20866_v41 = vld [vmem:[#allocation10 + $0x86c] ss:$48 sps:$4 sm:$0xff]  }
 0x63b   :  { %10049 = vmatprep.subr.bf16.mxu1 %v20800_v38 }
 0x63d   :  { %9964 = vmatpush1.bf16.msra.mxu0 %v20795_v45 }
 0x63e   :  { %10050 = vmatpush1.bf16.msra.mxu1 %v20798_v33  ;;  %9965 = vmatprep.subr.bf16.mxu0 %v20803_v50  ;;  %v20861_v50 = vld [vmem:[#allocation10 + $0x860] ss:$48 sps:$4 sm:$0xff]  }
 0x63f   :  { %10051 = vmatprep.subr.bf16.mxu1 %v20806_v58 }
 0x641   :  { %9966 = vmatpush1.bf16.msra.mxu0 %v20801_v59 }
 0x642   :  { %10052 = vmatpush1.bf16.msra.mxu1 %v20804_v35  ;;  %9967 = vmatprep.subr.bf16.mxu0 %v20809_v63  ;;  %v20864_v35 = vld [vmem:[#allocation10 + $0x868] ss:$48 sps:$4 sm:$0xff]   ;;  %v20869_v63 = vld [vmem:[#allocation10 + $0x8c4] ss:$48 sps:$4 sm:$0xff]  }
 0x643   :  { %10053 = vmatprep.subr.bf16.mxu1 %v20812_v22 }
 0x645   :  { %9968 = vmatpush1.bf16.msra.mxu0 %v20807_v0  ;;  %v20872_v0 = vld [vmem:[#allocation10 + $0x8cc] ss:$48 sps:$4 sm:$0xff]  }
 0x646   :  { %10054 = vmatpush1.bf16.msra.mxu1 %v20810_v1  ;;  %9969 = vmatprep.subr.bf16.mxu0 %v20815_v25  ;;  %v20867_v1 = vld [vmem:[#allocation10 + $0x8c0] ss:$48 sps:$4 sm:$0xff]   ;;  %v20870_v25 = vld [vmem:[#allocation10 + $0x8c8] ss:$48 sps:$4 sm:$0xff]  }
 0x647   :  { %10055 = vmatprep.subr.bf16.mxu1 %v20818_v2  ;;  %v20875_v2 = vld [vmem:[#allocation10 + $0x924] ss:$48 sps:$4 sm:$0xff]  }
 0x649   :  { %9970 = vmatpush1.bf16.msra.mxu0 %v20813_v46  ;;  %v20878_v46 = vld [vmem:[#allocation10 + $0x92c] ss:$48 sps:$4 sm:$0xff]  }
 0x64a   :  { %10056 = vmatpush1.bf16.msra.mxu1 %v20816_v4  ;;  %9971 = vmatprep.subr.bf16.mxu0 %v20821_v5  ;;  %v20873_v4 = vld [vmem:[#allocation10 + $0x920] ss:$48 sps:$4 sm:$0xff]   ;;  %v20876_v5 = vld [vmem:[#allocation10 + $0x928] ss:$48 sps:$4 sm:$0xff]  }
 0x64b   :  { %10057 = vmatprep.subr.bf16.mxu1 %v20824_v26  ;;  %v20881_v26 = vld [vmem:[#allocation10 + $0x984] ss:$48 sps:$4 sm:$0xff]  }
 0x64d   :  { %9972 = vmatpush1.bf16.msra.mxu0 %v20819_v47  ;;  %v20884_v47 = vld [vmem:[#allocation10 + $0x98c] ss:$48 sps:$4 sm:$0xff]  }
 0x64e   :  { %10058 = vmatpush1.bf16.msra.mxu1 %v20822_v6  ;;  %9984 = vmatprep.subr.bf16.mxu0 %v20827_v42  ;;  %v20879_v6 = vld [vmem:[#allocation10 + $0x980] ss:$48 sps:$4 sm:$0xff]   ;;  %v20882_v42 = vld [vmem:[#allocation10 + $0x988] ss:$48 sps:$4 sm:$0xff]  }
 0x64f   :  { %10070 = vmatprep.subr.bf16.mxu1 %v20830_v7  ;;  %v20887_v7 = vld [vmem:[#allocation10 + $0x9e4] ss:$48 sps:$4 sm:$0xff]  }
 0x650   :  { %9974 = vmatmul.mubr.bf16.vlgmr.msra.gmra.mrb[28].mxu0 %v23269_v57 }
 0x651   :  { %9985 = vmatpush1.bf16.msra.mxu0 %v20825_v8  ;;  %10060 = vmatmul.mubr.bf16.vlgmr.msra.gmra.mrb[28].mxu1 %v23269_v57  ;;  %v20843_v57 = vld [vmem:[#allocation10 + $0x740] ss:$48 sps:$4 sm:$0xff]   ;;  %v20890_v8 = vld [vmem:[#allocation10 + $0x9ec] ss:$48 sps:$4 sm:$0xff]  }
 0x652   :  { %10071 = vmatpush1.bf16.msra.mxu1 %v20828_v9  ;;  %9986 = vmatprep.subr.bf16.mxu0 %v20833_v51  ;;  %v20885_v9 = vld [vmem:[#allocation10 + $0x9e0] ss:$48 sps:$4 sm:$0xff]   ;;  %v20888_v51 = vld [vmem:[#allocation10 + $0x9e8] ss:$48 sps:$4 sm:$0xff]  }
 0x653   :  { %10072 = vmatprep.subr.bf16.mxu1 %v20836_v10  ;;  %10016 = vmatprep.mubr.bf16.mxu0 %v23277_v62  ;;  %v20893_v10 = vld [vmem:[#allocation10 + $0xa44] ss:$48 sps:$4 sm:$0xff]  }
 0x654   :  { %10102 = vmatprep.mubr.bf16.mxu1 %v23277_v62  ;;  %v20852_v62 = vld [vmem:[#allocation10 + $0x7a8] ss:$48 sps:$4 sm:$0xff]  }
 0x655   :  { %9987 = vmatpush1.bf16.msra.mxu0 %v20831_v27  ;;  %v20896_v27 = vld [vmem:[#allocation10 + $0xa4c] ss:$48 sps:$4 sm:$0xff]  }
 0x656   :  { %10073 = vmatpush1.bf16.msra.mxu1 %v20834_v16  ;;  %9988 = vmatprep.subr.bf16.mxu0 %v20839_v20  ;;  %v20891_v16 = vld [vmem:[#allocation10 + $0xa40] ss:$48 sps:$4 sm:$0xff]   ;;  %v20894_v20 = vld [vmem:[#allocation10 + $0xa48] ss:$48 sps:$4 sm:$0xff]  }
 0x657   :  { %10074 = vmatprep.subr.bf16.mxu1 %v20842_v52  ;;  %v20899_v52 = vld [vmem:[#allocation10 + $0xaa4] ss:$48 sps:$4 sm:$0xff]  }
 0x659   :  { %9989 = vmatpush1.bf16.msra.mxu0 %v20837_v11  ;;  %v20902_v11 = vld [vmem:[#allocation10 + $0xaac] ss:$48 sps:$4 sm:$0xff]  }
 0x65a   :  { %10075 = vmatpush1.bf16.msra.mxu1 %v20840_v12  ;;  %9990 = vmatprep.subr.bf16.mxu0 %v20845_v23  ;;  %v20897_v12 = vld [vmem:[#allocation10 + $0xaa0] ss:$48 sps:$4 sm:$0xff]   ;;  %v20900_v23 = vld [vmem:[#allocation10 + $0xaa8] ss:$48 sps:$4 sm:$0xff]  }
 0x65b   :  { %10076 = vmatprep.subr.bf16.mxu1 %v20848_v53  ;;  %v20905_v53 = vld [vmem:[#allocation10 + $0xb04] ss:$48 sps:$4 sm:$0xff]  }
 0x65d   :  { %9991 = vmatpush1.bf16.msra.mxu0 %v20843_v57  ;;  %v20908_v57 = vld [vmem:[#allocation10 + $0xb0c] ss:$48 sps:$4 sm:$0xff]  }
 0x65e   :  { %10077 = vmatpush1.bf16.msra.mxu1 %v20846_v24  ;;  %9992 = vmatprep.subr.bf16.mxu0 %v20851_v55  ;;  %v20903_v24 = vld [vmem:[#allocation10 + $0xb00] ss:$48 sps:$4 sm:$0xff]   ;;  %v20906_v55 = vld [vmem:[#allocation10 + $0xb08] ss:$48 sps:$4 sm:$0xff]  }
 0x65f   :  { %10078 = vmatprep.subr.bf16.mxu1 %v20854_v37  ;;  %v20911_v37 = vld [vmem:[#allocation10 + $0xb64] ss:$48 sps:$4 sm:$0xff]  }
 0x661   :  { %9993 = vmatpush1.bf16.msra.mxu0 %v20849_v28  ;;  %v20914_v28 = vld [vmem:[#allocation10 + $0xb6c] ss:$48 sps:$4 sm:$0xff]  }
 0x662   :  { %10079 = vmatpush1.bf16.msra.mxu1 %v20852_v62  ;;  %9994 = vmatprep.subr.bf16.mxu0 %v20857_v29  ;;  %v20909_v62 = vld [vmem:[#allocation10 + $0xb60] ss:$48 sps:$4 sm:$0xff]   ;;  %v20912_v29 = vld [vmem:[#allocation10 + $0xb68] ss:$48 sps:$4 sm:$0xff]  }
 0x663   :  { %v23323_v56 = vpop.f32.mrb[16].mxu0  ;;  %10080 = vmatprep.subr.bf16.mxu1 %v20860_v30  ;;  %v20917_v30 = vld [vmem:[#allocation10 + $0xbc4] ss:$48 sps:$4 sm:$0xff]  }
 0x664   :  { %v23325_v32 = vpop.f32.mrb[16].mxu1  ;;  %v23327_v38 = vpop.f32.mrb[17].mxu0 }
 0x665   :  { %v23329_v45 = vpop.f32.mrb[17].mxu1  ;;  %v23331_v33 = vpop.f32.mrb[18].mxu0  ;;  %9995 = vmatpush1.bf16.msra.mxu0 %v20855_v31  ;;  %v20920_v31 = vld [vmem:[#allocation10 + $0xbcc] ss:$48 sps:$4 sm:$0xff]  }
 0x666   :  { %v23333_v58 = vpop.f32.mrb[18].mxu1  ;;  %10081 = vmatpush1.bf16.msra.mxu1 %v20858_v39  ;;  %v23335_v59 = vpop.f32.mrb[19].mxu0  ;;  %9996 = vmatprep.subr.bf16.mxu0 %v20863_v54  ;;  %v20915_v39 = vld [vmem:[#allocation10 + $0xbc0] ss:$48 sps:$4 sm:$0xff]   ;;  %v20918_v54 = vld [vmem:[#allocation10 + $0xbc8] ss:$48 sps:$4 sm:$0xff]  }
 0x667   :  { %v23337_v22 = vpop.f32.mrb[19].mxu1  ;;  %10082 = vmatprep.subr.bf16.mxu1 %v20866_v41  ;;  %v20923_v41 = vld [vmem:[#allocation15 + $0x4] ss:$48 sps:$4 sm:$0xff]  }
 0x669   :  { %9997 = vmatpush1.bf16.msra.mxu0 %v20861_v50  ;;  %v20926_v50 = vld [vmem:[#allocation15 + $0xc] ss:$48 sps:$4 sm:$0xff]  }
 0x66a   :  { %10083 = vmatpush1.bf16.msra.mxu1 %v20864_v35  ;;  %9998 = vmatprep.subr.bf16.mxu0 %v20869_v63  ;;  %v20921_v35 = vld [vmem:[#allocation15] ss:$48 sps:$4 sm:$0xff]   ;;  %v20924_v63 = vld [vmem:[#allocation15 + $0x8] ss:$48 sps:$4 sm:$0xff]  }
 0x66b   :  { %10084 = vmatprep.subr.bf16.mxu1 %v20872_v0  ;;  %v20929_v0 = vld [vmem:[#allocation15 + $0x64] ss:$48 sps:$4 sm:$0xff]  }
 0x66d   :  { %9999 = vmatpush1.bf16.msra.mxu0 %v20867_v1  ;;  %v20932_v1 = vld [vmem:[#allocation15 + $0x6c] ss:$48 sps:$4 sm:$0xff]  }
 0x66e   :  { %10085 = vmatpush1.bf16.msra.mxu1 %v20870_v25  ;;  %10000 = vmatprep.subr.bf16.mxu0 %v20875_v2  ;;  %v20927_v25 = vld [vmem:[#allocation15 + $0x60] ss:$48 sps:$4 sm:$0xff]   ;;  %v20930_v2 = vld [vmem:[#allocation15 + $0x68] ss:$48 sps:$4 sm:$0xff]  }
 0x66f   :  { %10086 = vmatprep.subr.bf16.mxu1 %v20878_v46  ;;  %v20935_v46 = vld [vmem:[#allocation15 + $0xc4] ss:$48 sps:$4 sm:$0xff]  }
 0x671   :  { %10001 = vmatpush1.bf16.msra.mxu0 %v20873_v4  ;;  %v20938_v4 = vld [vmem:[#allocation15 + $0xcc] ss:$48 sps:$4 sm:$0xff]  }
 0x672   :  { %10087 = vmatpush1.bf16.msra.mxu1 %v20876_v5  ;;  %10002 = vmatprep.subr.bf16.mxu0 %v20881_v26  ;;  %v20933_v5 = vld [vmem:[#allocation15 + $0xc0] ss:$48 sps:$4 sm:$0xff]   ;;  %v20936_v26 = vld [vmem:[#allocation15 + $0xc8] ss:$48 sps:$4 sm:$0xff]  }
 0x673   :  { %10088 = vmatprep.subr.bf16.mxu1 %v20884_v47  ;;  %v20941_v47 = vld [vmem:[#allocation15 + $0x124] ss:$48 sps:$4 sm:$0xff]  }
 0x675   :  { %10003 = vmatpush1.bf16.msra.mxu0 %v20879_v6  ;;  %v20944_v6 = vld [vmem:[#allocation15 + $0x12c] ss:$48 sps:$4 sm:$0xff]  }
 0x676   :  { %10089 = vmatpush1.bf16.msra.mxu1 %v20882_v42  ;;  %10004 = vmatprep.subr.bf16.mxu0 %v20887_v7  ;;  %v20939_v42 = vld [vmem:[#allocation15 + $0x120] ss:$48 sps:$4 sm:$0xff]   ;;  %v20947_v7 = vld [vmem:[#allocation15 + $0x184] ss:$48 sps:$4 sm:$0xff]  }
 0x677   :  { %10090 = vmatprep.subr.bf16.mxu1 %v20890_v8  ;;  %v20950_v8 = vld [vmem:[#allocation15 + $0x18c] ss:$48 sps:$4 sm:$0xff]  }
 0x679   :  { %10005 = vmatpush1.bf16.msra.mxu0 %v20885_v9  ;;  %v20945_v9 = vld [vmem:[#allocation15 + $0x180] ss:$48 sps:$4 sm:$0xff]  }
 0x67a   :  { %10091 = vmatpush1.bf16.msra.mxu1 %v20888_v51  ;;  %10006 = vmatprep.subr.bf16.mxu0 %v20893_v10  ;;  %v20948_v51 = vld [vmem:[#allocation15 + $0x188] ss:$48 sps:$4 sm:$0xff]   ;;  %v20953_v10 = vld [vmem:[#allocation15 + $0x1e4] ss:$48 sps:$4 sm:$0xff]  }
 0x67b   :  { %10092 = vmatprep.subr.bf16.mxu1 %v20896_v27  ;;  %v20956_v27 = vld [vmem:[#allocation15 + $0x1ec] ss:$48 sps:$4 sm:$0xff]  }
 0x67d   :  { %10007 = vmatpush1.bf16.msra.mxu0 %v20891_v16  ;;  %v20951_v16 = vld [vmem:[#allocation15 + $0x1e0] ss:$48 sps:$4 sm:$0xff]  }
 0x67e   :  { %10093 = vmatpush1.bf16.msra.mxu1 %v20894_v20  ;;  %10008 = vmatprep.subr.bf16.mxu0 %v20899_v52  ;;  %v20954_v20 = vld [vmem:[#allocation15 + $0x1e8] ss:$48 sps:$4 sm:$0xff]   ;;  %v20959_v52 = vld [vmem:[#allocation15 + $0x244] ss:$48 sps:$4 sm:$0xff]  }
 0x67f   :  { %10094 = vmatprep.subr.bf16.mxu1 %v20902_v11  ;;  %v20962_v11 = vld [vmem:[#allocation15 + $0x24c] ss:$48 sps:$4 sm:$0xff]  }
 0x681   :  { %10009 = vmatpush1.bf16.msra.mxu0 %v20897_v12  ;;  %v20957_v12 = vld [vmem:[#allocation15 + $0x240] ss:$48 sps:$4 sm:$0xff]  }
 0x682   :  { %10095 = vmatpush1.bf16.msra.mxu1 %v20900_v23  ;;  %10010 = vmatprep.subr.bf16.mxu0 %v20905_v53  ;;  %v20960_v23 = vld [vmem:[#allocation15 + $0x248] ss:$48 sps:$4 sm:$0xff]   ;;  %v20965_v53 = vld [vmem:[#allocation15 + $0x2a4] ss:$48 sps:$4 sm:$0xff]  }
 0x683   :  { %10096 = vmatprep.subr.bf16.mxu1 %v20908_v57  ;;  %v20968_v57 = vld [vmem:[#allocation15 + $0x2ac] ss:$48 sps:$4 sm:$0xff]  }
 0x685   :  { %10011 = vmatpush1.bf16.msra.mxu0 %v20903_v24  ;;  %v20963_v24 = vld [vmem:[#allocation15 + $0x2a0] ss:$48 sps:$4 sm:$0xff]  }
 0x686   :  { %10097 = vmatpush1.bf16.msra.mxu1 %v20906_v55  ;;  %10012 = vmatprep.subr.bf16.mxu0 %v20911_v37  ;;  %v20966_v55 = vld [vmem:[#allocation15 + $0x2a8] ss:$48 sps:$4 sm:$0xff]   ;;  %v20971_v37 = vld [vmem:[#allocation15 + $0x304] ss:$48 sps:$4 sm:$0xff]  }
 0x687   :  { %10098 = vmatprep.subr.bf16.mxu1 %v20914_v28  ;;  %v20974_v28 = vld [vmem:[#allocation15 + $0x30c] ss:$48 sps:$4 sm:$0xff]  }
 0x689   :  { %10013 = vmatpush1.bf16.msra.mxu0 %v20909_v62  ;;  %v20969_v62 = vld [vmem:[#allocation15 + $0x300] ss:$48 sps:$4 sm:$0xff]  }
 0x68a   :  { %10099 = vmatpush1.bf16.msra.mxu1 %v20912_v29  ;;  %10014 = vmatprep.subr.bf16.mxu0 %v20917_v30  ;;  %v20972_v29 = vld [vmem:[#allocation15 + $0x308] ss:$48 sps:$4 sm:$0xff]   ;;  %v20977_v30 = vld [vmem:[#allocation15 + $0x364] ss:$48 sps:$4 sm:$0xff]  }
 0x68b   :  { %10100 = vmatprep.subr.bf16.mxu1 %v20920_v31  ;;  %v20980_v31 = vld [vmem:[#allocation15 + $0x36c] ss:$48 sps:$4 sm:$0xff]  }
 0x68d   :  { %10015 = vmatpush1.bf16.msra.mxu0 %v20915_v39  ;;  %v20975_v39 = vld [vmem:[#allocation15 + $0x360] ss:$48 sps:$4 sm:$0xff]  }
 0x68e   :  { %10101 = vmatpush1.bf16.msra.mxu1 %v20918_v54  ;;  %13039 = vmatprep.subr.bf16.mxu0 %v20923_v41  ;;  %v20978_v54 = vld [vmem:[#allocation15 + $0x368] ss:$48 sps:$4 sm:$0xff]  }
 0x68f   :  { %13125 = vmatprep.subr.bf16.mxu1 %v20926_v50 }
 0x690   :  { %10017 = vmatmul.mubr.bf16.vlgmr.msra.gmra.mrb[28].mxu0 %v23289_v3 }
 0x691   :  { %10103 = vmatmul.mubr.bf16.vlgmr.msra.gmra.mrb[28].mxu1 %v23289_v3  ;;  %13040 = vmatpush1.bf16.msra.mxu0 %v20921_v35  ;;  %v20942_v3 = vld [vmem:[#allocation15 + $0x128] ss:$48 sps:$4 sm:$0xff]  }
 0x692   :  { %13126 = vmatpush1.bf16.msra.mxu1 %v20924_v63  ;;  %13041 = vmatprep.subr.bf16.mxu0 %v20929_v0 }
 0x693   :  { %13127 = vmatprep.subr.bf16.mxu1 %v20932_v1 }
 0x695   :  { %13042 = vmatpush1.bf16.msra.mxu0 %v20927_v25 }
 0x696   :  { %13128 = vmatpush1.bf16.msra.mxu1 %v20930_v2  ;;  %13043 = vmatprep.subr.bf16.mxu0 %v20935_v46  ;;  %v20983_v46 = vld [vmem:[#allocation15 + $0x3c4] ss:$48 sps:$4 sm:$0xff]  }
 0x697   :  { %13129 = vmatprep.subr.bf16.mxu1 %v20938_v4  ;;  %v20981_v4 = vld [vmem:[#allocation15 + $0x3c0] ss:$48 sps:$4 sm:$0xff]  }
 0x699   :  { %13044 = vmatpush1.bf16.msra.mxu0 %v20933_v5  ;;  %v20984_v5 = vld [vmem:[#allocation15 + $0x3c8] ss:$48 sps:$4 sm:$0xff]  }
 0x69a   :  { %13130 = vmatpush1.bf16.msra.mxu1 %v20936_v26  ;;  %13045 = vmatprep.subr.bf16.mxu0 %v20941_v47  ;;  %v20986_v26 = vld [vmem:[#allocation15 + $0x3cc] ss:$48 sps:$4 sm:$0xff]   ;;  %v20989_v47 = vld [vmem:[#allocation15 + $0x424] ss:$48 sps:$4 sm:$0xff]  }
 0x69b   :  { %13131 = vmatprep.subr.bf16.mxu1 %v20944_v6  ;;  %v20992_v6 = vld [vmem:[#allocation15 + $0x42c] ss:$48 sps:$4 sm:$0xff]  }
 0x69d   :  { %13046 = vmatpush1.bf16.msra.mxu0 %v20939_v42  ;;  %v20987_v42 = vld [vmem:[#allocation15 + $0x420] ss:$48 sps:$4 sm:$0xff]  }
 0x69e   :  { %13132 = vmatpush1.bf16.msra.mxu1 %v20942_v3  ;;  %13047 = vmatprep.subr.bf16.mxu0 %v20947_v7  ;;  %v20990_v3 = vld [vmem:[#allocation15 + $0x428] ss:$48 sps:$4 sm:$0xff]   ;;  %v20995_v7 = vld [vmem:[#allocation15 + $0x484] ss:$48 sps:$4 sm:$0xff]  }
 0x69f   :  { %13133 = vmatprep.subr.bf16.mxu1 %v20950_v8  ;;  %v20998_v8 = vld [vmem:[#allocation15 + $0x48c] ss:$48 sps:$4 sm:$0xff]  }
 0x6a1   :  { %13048 = vmatpush1.bf16.msra.mxu0 %v20945_v9  ;;  %v20993_v9 = vld [vmem:[#allocation15 + $0x480] ss:$48 sps:$4 sm:$0xff]  }
 0x6a2   :  { %13134 = vmatpush1.bf16.msra.mxu1 %v20948_v51  ;;  %13049 = vmatprep.subr.bf16.mxu0 %v20953_v10  ;;  %v20996_v51 = vld [vmem:[#allocation15 + $0x488] ss:$48 sps:$4 sm:$0xff]   ;;  %v21001_v10 = vld [vmem:[#allocation15 + $0x4e4] ss:$48 sps:$4 sm:$0xff]  }
 0x6a3   :  { %13135 = vmatprep.subr.bf16.mxu1 %v20956_v27  ;;  %v21004_v27 = vld [vmem:[#allocation15 + $0x4ec] ss:$48 sps:$4 sm:$0xff]  }
 0x6a5   :  { %13050 = vmatpush1.bf16.msra.mxu0 %v20951_v16  ;;  %v20999_v16 = vld [vmem:[#allocation15 + $0x4e0] ss:$48 sps:$4 sm:$0xff]  }
 0x6a6   :  { %13136 = vmatpush1.bf16.msra.mxu1 %v20954_v20  ;;  %13051 = vmatprep.subr.bf16.mxu0 %v20959_v52  ;;  %v21002_v20 = vld [vmem:[#allocation15 + $0x4e8] ss:$48 sps:$4 sm:$0xff]   ;;  %v21007_v52 = vld [vmem:[#allocation15 + $0x544] ss:$48 sps:$4 sm:$0xff]  }
 0x6a7   :  { %13137 = vmatprep.subr.bf16.mxu1 %v20962_v11  ;;  %v21010_v11 = vld [vmem:[#allocation15 + $0x54c] ss:$48 sps:$4 sm:$0xff]  }
 0x6a9   :  { %13052 = vmatpush1.bf16.msra.mxu0 %v20957_v12  ;;  %v21005_v12 = vld [vmem:[#allocation15 + $0x540] ss:$48 sps:$4 sm:$0xff]  }
 0x6aa   :  { %13138 = vmatpush1.bf16.msra.mxu1 %v20960_v23  ;;  %13053 = vmatprep.subr.bf16.mxu0 %v20965_v53  ;;  %v21008_v23 = vld [vmem:[#allocation15 + $0x548] ss:$48 sps:$4 sm:$0xff]   ;;  %v21013_v53 = vld [vmem:[#allocation15 + $0x5a4] ss:$48 sps:$4 sm:$0xff]  }
 0x6ab   :  { %13139 = vmatprep.subr.bf16.mxu1 %v20968_v57  ;;  %v21016_v57 = vld [vmem:[#allocation15 + $0x5ac] ss:$48 sps:$4 sm:$0xff]  }
 0x6ad   :  { %13054 = vmatpush1.bf16.msra.mxu0 %v20963_v24  ;;  %v21011_v24 = vld [vmem:[#allocation15 + $0x5a0] ss:$48 sps:$4 sm:$0xff]  }
 0x6ae   :  { %13140 = vmatpush1.bf16.msra.mxu1 %v20966_v55  ;;  %13055 = vmatprep.subr.bf16.mxu0 %v20971_v37  ;;  %v21014_v55 = vld [vmem:[#allocation15 + $0x5a8] ss:$48 sps:$4 sm:$0xff]   ;;  %v21019_v37 = vld [vmem:[#allocation15 + $0x604] ss:$48 sps:$4 sm:$0xff]  }
 0x6af   :  { %13141 = vmatprep.subr.bf16.mxu1 %v20974_v28  ;;  %v21022_v28 = vld [vmem:[#allocation15 + $0x60c] ss:$48 sps:$4 sm:$0xff]  }
 0x6b1   :  { %13056 = vmatpush1.bf16.msra.mxu0 %v20969_v62  ;;  %v5105_v62 = vld [vmem:[#allocation12] sm:$0xff] }
 0x6b2   :  { %13142 = vmatpush1.bf16.msra.mxu1 %v20972_v29  ;;  %13057 = vmatprep.subr.bf16.mxu0 %v20977_v30  ;;  %v5107_v29 = vld [vmem:[#allocation13] sm:$0xff]  ;;  %v5118_v30 = vrot.slane %v5105_v62, %v23109_v13 }
 0x6b3   :  { %13143 = vmatprep.subr.bf16.mxu1 %v20980_v31  ;;  %v7620_v31 = vrot.slane %v5107_v29, %v23109_v13 }
 0x6b5   :  { %13058 = vmatpush1.bf16.msra.mxu0 %v20975_v39  ;;  %v5126_v39 = vrot.slane %v5105_v62, %v23111_v14 }
 0x6b6   :  { %13144 = vmatpush1.bf16.msra.mxu1 %v20978_v54  ;;  %13059 = vmatprep.subr.bf16.mxu0 %v20983_v46  ;;  %v7628_v54 = vrot.slane %v5107_v29, %v23111_v14  ;;  %v5122_v46 = vrot.slane %v5105_v62, %v23113_v15 }
 0x6b7   :  { %13145 = vmatprep.subr.bf16.mxu1 %v20986_v26  ;;  %v7632_v26 = vrot.slane %v5107_v29, %v23117_v21 }
 0x6b9   :  { %13060 = vmatpush1.bf16.msra.mxu0 %v20981_v4  ;;  %v7624_v4 = vrot.slane %v5107_v29, %v23113_v15 }
 0x6ba   :  { %13146 = vmatpush1.bf16.msra.mxu1 %v20984_v5  ;;  %13061 = vmatprep.subr.bf16.mxu0 %v20989_v47  ;;  %v5130_v5 = vrot.slane %v5105_v62, %v23117_v21  ;;  %v18765_v47 = vadd.f32 %v7620_v31, %v5118_v30 }
 0x6bb   :  { %13147 = vmatprep.subr.bf16.mxu1 %v20992_v6  ;;  %v18773_v6 = vadd.f32 %v7628_v54, %v5126_v39 }
 0x6bd   :  { %13062 = vmatpush1.bf16.msra.mxu0 %v20987_v42  ;;  %v18767_v42 = vadd.f32 %v7624_v4, %v5122_v46 }
 0x6be   :  { %13148 = vmatpush1.bf16.msra.mxu1 %v20990_v3  ;;  %13063 = vmatprep.subr.bf16.mxu0 %v20995_v7  ;;  %v18775_v3 = vadd.f32 %v7632_v26, %v5130_v5  ;;  %v18766_v7 = vadd.f32 %v18765_v47, %v23323_v56  ;;  %v5146_v56 = vrot.slane %v5105_v62, %v23131_v48 }
 0x6bf   :  { %13149 = vmatprep.subr.bf16.mxu1 %v20998_v8  ;;  %v5134_v8 = vrot.slane %v5105_v62, %v23125_v40 }
 0x6c0   :  { %v18780_v31 = vadd.f32 %v18775_v3, %v23337_v22 }
 0x6c1   :  { %13064 = vmatpush1.bf16.msra.mxu0 %v20993_v9  ;;  %v7636_v9 = vrot.slane %v5107_v29, %v23125_v40 }
 0x6c2   :  { %13150 = vmatpush1.bf16.msra.mxu1 %v20996_v51  ;;  %13065 = vmatprep.subr.bf16.mxu0 %v21001_v10  ;;  %v18774_v51 = vadd.f32 %v18773_v6, %v23325_v32  ;;  %v5142_v10 = vrot.slane %v5105_v62, %v23127_v49  ;;  %v17839_v46 = vmul.f32 -1.442695, %v18780_v31 }
 0x6c3   :  { %13151 = vmatprep.subr.bf16.mxu1 %v21004_v27  ;;  %v7644_v27 = vrot.slane %v5107_v29, %v23127_v49  ;;  %v18781_v32 = vadd.f32 %v7636_v9, %v5134_v8 }
 0x6c5   :  { %13066 = vmatpush1.bf16.msra.mxu0 %v20999_v16  ;;  %v18768_v16 = vadd.f32 %v18767_v42, %v23327_v38  ;;  %v18772_v38 = vadd.f32 %v18767_v42, %v23335_v59 }
 0x6c6   :  { %13152 = vmatpush1.bf16.msra.mxu1 %v21002_v20  ;;  %13067 = vmatprep.subr.bf16.mxu0 %v21007_v52  ;;  %v5138_v20 = vrot.slane %v5105_v62, %v23129_v44  ;;  %v7640_v52 = vrot.slane %v5107_v29, %v23129_v44 }
 0x6c7   :  { %13153 = vmatprep.subr.bf16.mxu1 %v21010_v11  ;;  %v18776_v11 = vadd.f32 %v18775_v3, %v23329_v45  ;;  %v17837_v54 = vmul.f32 -1.442695, %v18772_v38 }
 0x6c9   :  { %13068 = vmatpush1.bf16.msra.mxu0 %v21005_v12  ;;  %v7648_v12 = vrot.slane %v5107_v29, %v23131_v48  ;;  %v17835_v30 = vmul.f32 -1.442695, %v18776_v11 }
 0x6ca   :  { %13154 = vmatpush1.bf16.msra.mxu1 %v21008_v23  ;;  %13069 = vmatprep.subr.bf16.mxu0 %v21013_v53  ;;  %v17832_v23 = vmul.f32 -1.442695, %v18766_v7  ;;  %v18770_v53 = vadd.f32 %v18765_v47, %v23331_v33 }
 0x6cb   :  { %13155 = vmatprep.subr.bf16.mxu1 %v21016_v57  ;;  %v17834_v57 = vmul.f32 -1.442695, %v18774_v51  ;;  %v18791_v45 = vadd.f32 %v7648_v12, %v5146_v56 }
 0x6cc   :  { %22185 = vpow2.f32 %v17832_v23  ;;  %v17836_v62 = vmul.f32 -1.442695, %v18770_v53  ;;  %v5106_v23 = vld [vmem:[#allocation12 + $0x8] sm:$0xf] }
 0x6cd   :  { %13070 = vmatpush1.bf16.msra.mxu0 %v21011_v24  ;;  %v18778_v24 = vadd.f32 %v18773_v6, %v23333_v58  ;;  %22187 = vpow2.f32 %v17834_v57  ;;  %v5150_v38 = vrot.slane %v5106_v23, %v23109_v13 }
 0x6ce   :  { %13156 = vmatpush1.bf16.msra.mxu1 %v21014_v55  ;;  %13082 = vmatprep.subr.bf16.mxu0 %v21019_v37  ;;  %v18789_v55 = vadd.f32 %v7644_v27, %v5142_v10  ;;  %v17833_v37 = vmul.f32 -1.442695, %v18768_v16 }
 0x6cf   :  { %13168 = vmatprep.subr.bf16.mxu1 %v21022_v28  ;;  %v18783_v28 = vadd.f32 %v7640_v52, %v5138_v20  ;;  %v17838_v39 = vmul.f32 -1.442695, %v18778_v24 }
 0x6d0   :  { %22189 = vpow2.f32 %v17833_v37 }
 0x6d1   :  { %22191 = vpow2.f32 %v17835_v30 }
 0x6d2   :  { %22193 = vpow2.f32 %v17836_v62 }
 0x6d3   :  { %22195 = vpow2.f32 %v17838_v39 }
 0x6d4   :  { %22197 = vpow2.f32 %v17837_v54  ;;  %v5154_v54 = vrot.slane %v5106_v23, %v23113_v15 }
 0x6d5   :  { %22199 = vpow2.f32 %v17839_v46 }
 0x6d6   :  { %v22186_v42 = vpop.eup %22185 }
 0x6d7   :  { %v10145_v9 = vadd.f32 1.0, %v22186_v42 }
 0x6e3   :  { %v23341_v41 = vpop.f32.mrb[20].mxu0 }
 0x6e4   :  { %v23343_v50 = vpop.f32.mrb[20].mxu1  ;;  %v23345_v35 = vpop.f32.mrb[21].mxu0  ;;  %v18782_v29 = vadd.f32 %v18781_v32, %v23341_v41 }
 0x6e5   :  { %v23347_v63 = vpop.f32.mrb[21].mxu1  ;;  %v23349_v0 = vpop.f32.mrb[22].mxu0  ;;  %v18790_v33 = vadd.f32 %v18789_v55, %v23343_v50  ;;  %v18784_v58 = vadd.f32 %v18783_v28, %v23345_v35 }
 0x6e6   :  { %v23351_v1 = vpop.f32.mrb[22].mxu1  ;;  %v23353_v25 = vpop.f32.mrb[23].mxu0  ;;  %v18792_v59 = vadd.f32 %v18791_v45, %v23347_v63  ;;  %v17840_v4 = vmul.f32 -1.442695, %v18782_v29  ;;  %v18786_v22 = vadd.f32 %v18781_v32, %v23349_v0  ;;  %v5158_v29 = vrot.slane %v5106_v23, %v23111_v14 }
 0x6e7   :  { %v23355_v2 = vpop.f32.mrb[23].mxu1  ;;  %v17842_v5 = vmul.f32 -1.442695, %v18790_v33  ;;  %v18794_v41 = vadd.f32 %v18789_v55, %v23351_v1  ;;  %v17841_v26 = vmul.f32 -1.442695, %v18784_v58  ;;  %v18788_v50 = vadd.f32 %v18783_v28, %v23353_v25  ;;  %v22188_v0 = vpop.eup %22187 }
 0x6e8   :  { %v17843_v47 = vmul.f32 -1.442695, %v18792_v59  ;;  %v18796_v35 = vadd.f32 %v18791_v45, %v23355_v2  ;;  %22201 = vpow2.f32 %v17840_v4  ;;  %v17844_v6 = vmul.f32 -1.442695, %v18786_v22  ;;  %v22190_v8 = vpop.eup %22189  ;;  %v5108_v45 = vld [vmem:[#allocation13 + $0x8] sm:$0xf] }
 0x6e9   :  { %22203 = vpow2.f32 %v17842_v5  ;;  %v17846_v63 = vmul.f32 -1.442695, %v18794_v41  ;;  %v17845_v3 = vmul.f32 -1.442695, %v18788_v50  ;;  %v22192_v1 = vpop.eup %22191  ;;  %v10147_v51 = vadd.f32 1.0, %v22188_v0 }
 0x6ea   :  { %22205 = vpow2.f32 %v17841_v26  ;;  %v17847_v7 = vmul.f32 -1.442695, %v18796_v35  ;;  %v22194_v25 = vpop.eup %22193  ;;  %v10146_v2 = vadd.f32 1.0, %v22190_v8  ;;  %v10148_v16 = vadd.f32 1.0, %v22192_v1 }
 0x6eb   :  { %22207 = vpow2.f32 %v17843_v47  ;;  %v22196_v10 = vpop.eup %22195  ;;  %v10149_v52 = vadd.f32 1.0, %v22194_v25  ;;  %v5162_v58 = vrot.slane %v5106_v23, %v23117_v21  ;;  %v18797_v59 = vadd.f32 %v23299_v34, %v5150_v38 }
 0x6ec   :  { %22209 = vpow2.f32 %v17844_v6  ;;  %v22198_v27 = vpop.eup %22197  ;;  %v10151_v56 = vadd.f32 1.0, %v22196_v10  ;;  %v7652_v22 = vrot.slane %v5108_v45, %v23109_v13  ;;  %v7660_v26 = vrot.slane %v5108_v45, %v23111_v14 }
 0x6ed   :  { %22211 = vpow2.f32 %v17846_v63  ;;  %v22200_v20 = vpop.eup %22199  ;;  %v10150_v53 = vadd.f32 1.0, %v22198_v27  ;;  %v7656_v50 = vrot.slane %v5108_v45, %v23113_v15  ;;  %v18801_v35 = vadd.f32 %v23301_v43, %v5158_v29 }
 0x6ee   :  { %22213 = vpow2.f32 %v17845_v3  ;;  %v10152_v57 = vadd.f32 1.0, %v22200_v20  ;;  %v7664_v63 = vrot.slane %v5108_v45, %v23117_v21  ;;  %v18798_v34 = vadd.f32 %v23303_v60, %v5154_v54 }
 0x6ef   :  { %22215 = vpow2.f32 %v17847_v7  ;;  %v18802_v3 = vadd.f32 %v23305_v61, %v5162_v58  ;;  %v18799_v0 = vadd.f32 %v23307_v17, %v5150_v38  ;;  %v18803_v1 = vadd.f32 %v23309_v19, %v5158_v29 }
 0x6f0   :  { %22217 = vrcp.f32 %v10145_v9  ;;  %v18800_v9 = vadd.f32 %v23311_v18, %v5154_v54 }
 0x6f1   :  { %22219 = vrcp.f32 %v10147_v51 }
 0x6f2   :  { %v22202_v11 = vpop.eup %22201  ;;  %22221 = vrcp.f32 %v10146_v2  ;;  %v18804_v2 = vadd.f32 %v23313_v36, %v5162_v58 }
 0x6f3   :  { %v22204_v12 = vpop.eup %22203  ;;  %22223 = vrcp.f32 %v10148_v16  ;;  %v10201_v55 = vadd.f32 1.0, %v22202_v11 }
 0x6f4   :  { %v22206_v32 = vpop.eup %22205  ;;  %22225 = vrcp.f32 %v10149_v52  ;;  %v10203_v28 = vadd.f32 1.0, %v22204_v12 }
 0x6f5   :  { %v22208_v24 = vpop.eup %22207  ;;  %22227 = vrcp.f32 %v10151_v56  ;;  %v10202_v31 = vadd.f32 1.0, %v22206_v32 }
 0x6f6   :  { %v22210_v37 = vpop.eup %22209  ;;  %22229 = vrcp.f32 %v10150_v53  ;;  %v10204_v39 = vadd.f32 1.0, %v22208_v24 }
 0x6f7   :  { %v22212_v30 = vpop.eup %22211  ;;  %22231 = vrcp.f32 %v10152_v57  ;;  %v10205_v46 = vadd.f32 1.0, %v22210_v37 }
 0x6f8   :  { %v22214_v62 = vpop.eup %22213  ;;  %22233 = vrcp.f32 %v10201_v55  ;;  %v10207_v4 = vadd.f32 1.0, %v22212_v30 }
 0x6f9   :  { %v22216_v33 = vpop.eup %22215  ;;  %22235 = vrcp.f32 %v10203_v28  ;;  %v10206_v41 = vadd.f32 1.0, %v22214_v62 }
 0x6fa   :  { %v22218_v5 = vpop.eup %22217  ;;  %22237 = vrcp.f32 %v10202_v31  ;;  %v10208_v6 = vadd.f32 1.0, %v22216_v33 }
 0x6fb   :  { %v22220_v47 = vpop.eup %22219  ;;  %22239 = vrcp.f32 %v10204_v39 }
 0x6fc   :  { %v22222_v42 = vpop.eup %22221  ;;  %22241 = vrcp.f32 %v10205_v46 }
 0x6fd   :  { %v22224_v8 = vpop.eup %22223  ;;  %22243 = vrcp.f32 %v10207_v4 }
 0x6fe   :  { %v22226_v10 = vpop.eup %22225  ;;  %22245 = vrcp.f32 %v10206_v41 }
 0x6ff   :  { %v22228_v17 = vpop.eup %22227  ;;  %22247 = vrcp.f32 %v10208_v6 }
 0x700   :  { %v22230_v18 = vpop.eup %22229 }
 0x701   :  { %v22232_v24 = vpop.eup %22231 }
 0x702   :  { %v22234_v28 = vpop.eup %22233 }
 0x703   :  { %v22236_v29 = vpop.eup %22235 }
 0x704   :  { %v22238_v58 = vpop.eup %22237  ;;  %v10251_v6 = vsub.f32 1.0, %v22236_v29 }
 0x763   :  { %v10018_v7 = vpop.f32.mrb[28].mxu0 }
 0x764   :  { %v18805_v43 = vadd.f32 %v10018_v7, %v7652_v22  ;;  %v10104_v25 = vpop.f32.mrb[28].mxu1  ;;  %v10020_v51 = vpop.f32.mrb[29].mxu0 }
 0x765   :  { %v18809_v60 = vadd.f32 %v10104_v25, %v7660_v26  ;;  %v18806_v27 = vadd.f32 %v10020_v51, %v7656_v50  ;;  %v10106_v61 = vpop.f32.mrb[29].mxu1  ;;  %v10022_v16 = vpop.f32.mrb[30].mxu0  ;;  %v22355_v51 = vld [vmem:[%s23713_s23 + $0x48] sm:$0xff] }
 0x766   :  { %v10225_v20 = vmul.f32 %v22218_v5, %v18805_v43  ;;  %v18810_v52 = vadd.f32 %v10106_v61, %v7664_v63  ;;  %v18807_v11 = vadd.f32 %v10022_v16, %v7652_v22  ;;  %v10108_v19 = vpop.f32.mrb[30].mxu1  ;;  %v10024_v56 = vpop.f32.mrb[31].mxu0  ;;  %v22356_v16 = vld [vmem:[%s23713_s23 + $0x58] sm:$0xff] }
 0x767   :  { %v10227_v12 = vmul.f32 %v22220_v47, %v18809_v60  ;;  %v10226_v23 = vmul.f32 %v22222_v42, %v18806_v27  ;;  %v18811_v53 = vadd.f32 %v10108_v19, %v7660_v26  ;;  %v18808_v32 = vadd.f32 %v10024_v56, %v7656_v50  ;;  %v10110_v57 = vpop.f32.mrb[31].mxu1  ;;  %v22240_v22 = vpop.eup %22239  ;;  %v22353_v42 = vld [vmem:[%s23713_s23 + $0x40] sm:$0xff] }
 0x768   :  { %v10233_v36 = vadd.f32 %v18797_v59, %v10225_v20  ;;  %v10228_v55 = vmul.f32 %v22224_v8, %v18810_v52  ;;  %v10229_v37 = vmul.f32 %v22226_v10, %v18807_v11  ;;  %v18812_v38 = vadd.f32 %v10110_v57, %v7664_v63  ;;  %v22242_v5 = vpop.eup %22241  ;;  %v22354_v8 = vld [vmem:[%s23713_s23 + $0x50] sm:$0xff]  ;;  %v22357_v56 = vld [vmem:[%s23713_s23 + $0x60] sm:$0xff] }
 0x769   :  { %v10235_v30 = vadd.f32 %v18801_v35, %v10227_v12  ;;  %v10234_v31 = vadd.f32 %v18798_v34, %v10226_v23  ;;  %v10231_v45 = vmul.f32 %v22228_v17, %v18811_v53  ;;  %v10230_v62 = vmul.f32 %v22230_v18, %v18808_v32  ;;  %v22244_v41 = vpop.eup %22243  ;;  %v22358_v57 = vld [vmem:[%s23713_s23 + $0x70] sm:$0xff] }
 0x76a   :  { %22249 = vtanh.f32 %v10233_v36  ;;  %v10236_v39 = vadd.f32 %v18802_v3, %v10228_v55  ;;  %v10237_v33 = vadd.f32 %v18799_v0, %v10229_v37  ;;  %v10232_v54 = vmul.f32 %v22232_v24, %v18812_v38  ;;  %v22246_v26 = vpop.eup %22245 }
 0x76b   :  { %22251 = vtanh.f32 %v10235_v30  ;;  %v10239_v46 = vadd.f32 %v18803_v1, %v10231_v45  ;;  %v10238_v4 = vadd.f32 %v18800_v9, %v10230_v62  ;;  %v22248_v50 = vpop.eup %22247  ;;  %v10249_v47 = vsub.f32 1.0, %v22234_v28  ;;  %v22360_v62 = vld [vmem:[%s23713_s23 + $0x78] sm:$0xff] }
 0x76c   :  { %22253 = vtanh.f32 %v10234_v31  ;;  %v10240_v59 = vadd.f32 %v18804_v2, %v10232_v54  ;;  %v10265_v34 = vmul.f32 %v22353_v42, %v22234_v28  ;;  %v10250_v3 = vsub.f32 1.0, %v22238_v58  ;;  %v22359_v28 = vld [vmem:[%s23713_s23 + $0x68] sm:$0xff]  ;;  %v21029_v42 = vld [vmem:[#allocation15 + $0x6c0] ss:$48 sps:$4 sm:$0xff]  }
 0x76d   :  { %22255 = vtanh.f32 %v10236_v39  ;;  %v10267_v1 = vmul.f32 %v22354_v8, %v22236_v29  ;;  %v10252_v9 = vsub.f32 1.0, %v22240_v22  ;;  %v10266_v10 = vmul.f32 %v22355_v51, %v22238_v58  ;;  %v21038_v8 = vld [vmem:[#allocation15 + $0x728] ss:$48 sps:$4 sm:$0xff]   ;;  %v21049_v51 = vld [vmem:[#allocation15 + $0x7e4] ss:$48 sps:$4 sm:$0xff]  }
 0x76e   :  { %22257 = vtanh.f32 %v10237_v33  ;;  %v10253_v2 = vsub.f32 1.0, %v22242_v5  ;;  %v10268_v17 = vmul.f32 %v22356_v16, %v22240_v22  ;;  %v10255_v20 = vsub.f32 1.0, %v22244_v41  ;;  %v21053_v16 = vld [vmem:[#allocation15 + $0x840] ss:$48 sps:$4 sm:$0xff]  }
 0x76f   :  { %22259 = vtanh.f32 %v10239_v46  ;;  %v10269_v18 = vmul.f32 %v22357_v56, %v22242_v5  ;;  %v10254_v12 = vsub.f32 1.0, %v22246_v26  ;;  %v10271_v24 = vmul.f32 %v22358_v57, %v22244_v41  ;;  %v21020_v5 = vld [vmem:[#allocation15 + $0x608] ss:$48 sps:$4 sm:$0xff]   ;;  %v21067_v56 = vld [vmem:[#allocation15 + $0x904] ss:$48 sps:$4 sm:$0xff]  }
 0x770   :  { %22261 = vtanh.f32 %v10238_v4  ;;  %v10256_v36 = vsub.f32 1.0, %v22248_v50  ;;  %v10270_v30 = vmul.f32 %v22359_v28, %v22246_v26  ;;  %v10272_v29 = vmul.f32 %v22360_v62, %v22248_v50  ;;  %v21025_v26 = vld [vmem:[#allocation15 + $0x664] ss:$48 sps:$4 sm:$0xff]   ;;  %v21028_v50 = vld [vmem:[#allocation15 + $0x66c] ss:$48 sps:$4 sm:$0xff]  }
 0x771   :  { %22263 = vtanh.f32 %v10240_v59  ;;  %v21017_v59 = vld [vmem:[#allocation15 + $0x600] ss:$48 sps:$4 sm:$0xff]   ;;  %v21085_v28 = vld [vmem:[#allocation15 + $0xa24] ss:$48 sps:$4 sm:$0xff]  }
 0x772   :  { %v21071_v57 = vld [vmem:[#allocation15 + $0x960] ss:$48 sps:$4 sm:$0xff]   ;;  %v21091_v62 = vld [vmem:[#allocation15 + $0xa84] ss:$48 sps:$4 sm:$0xff]  }
 0x774   :  { %v22250_v35 = vpop.eup %22249 }
 0x775   :  { %v22252_v63 = vpop.eup %22251  ;;  %v10257_v0 = vmul.f32 %v22250_v35, %v10249_v47  ;;  %v21023_v47 = vld [vmem:[#allocation15 + $0x660] ss:$48 sps:$4 sm:$0xff]   ;;  %v21026_v35 = vld [vmem:[#allocation15 + $0x668] ss:$48 sps:$4 sm:$0xff]  }
 0x776   :  { %v22254_v7 = vpop.eup %22253  ;;  %v10259_v43 = vmul.f32 %v22252_v63, %v10251_v6  ;;  %v21031_v6 = vld [vmem:[#allocation15 + $0x6c4] ss:$48 sps:$4 sm:$0xff]   ;;  %v21034_v63 = vld [vmem:[#allocation15 + $0x6cc] ss:$48 sps:$4 sm:$0xff]  }
 0x777   :  { %v22256_v25 = vpop.eup %22255  ;;  %v10273_v60 = vadd.f32 %v10265_v34, %v10257_v0  ;;  %v10258_v27 = vmul.f32 %v22254_v7, %v10250_v3  ;;  %v21032_v34 = vld [vmem:[#allocation15 + $0x6c8] ss:$48 sps:$4 sm:$0xff]   ;;  %v21037_v3 = vld [vmem:[#allocation15 + $0x724] ss:$48 sps:$4 sm:$0xff]   ;;  %v21040_v0 = vld [vmem:[#allocation15 + $0x72c] ss:$48 sps:$4 sm:$0xff]  }
 0x778   :  { %v22258_v61 = vpop.eup %22257  ;;  %v10275_v52 = vadd.f32 %v10267_v1, %v10259_v43  ;;  %v10260_v11 = vmul.f32 %v22256_v25, %v10252_v9  ;;  %v21035_v7 = vld [vmem:[#allocation15 + $0x720] ss:$48 sps:$4 sm:$0xff]   ;;  %v21043_v1 = vld [vmem:[#allocation15 + $0x784] ss:$48 sps:$4 sm:$0xff]   ;;  %v21046_v9 = vld [vmem:[#allocation15 + $0x78c] ss:$48 sps:$4 sm:$0xff]  }
 0x779   :  { %v22260_v19 = vpop.eup %22259  ;;  %18665 = vst [vmem:[%s23708_s17 + $0x40] sm:$0xff] %v10273_v60  ;;  %v10274_v23 = vadd.f32 %v10266_v10, %v10258_v27  ;;  %v10261_v53 = vmul.f32 %v22258_v61, %v10253_v2  ;;  %v21041_v43 = vld [vmem:[#allocation15 + $0x780] ss:$48 sps:$4 sm:$0xff]   ;;  %v21044_v25 = vld [vmem:[#allocation15 + $0x788] ss:$48 sps:$4 sm:$0xff]  }
 0x77a   :  { %v22262_v32 = vpop.eup %22261  ;;  %18667 = vst [vmem:[%s23708_s17 + $0x50] sm:$0xff] %v10275_v52  ;;  %v10276_v55 = vadd.f32 %v10268_v17, %v10260_v11  ;;  %v10263_v37 = vmul.f32 %v22260_v19, %v10255_v20  ;;  %v21052_v10 = vld [vmem:[#allocation15 + $0x7ec] ss:$48 sps:$4 sm:$0xff]   ;;  %v21047_v2 = vld [vmem:[#allocation15 + $0x7e0] ss:$48 sps:$4 sm:$0xff]  }
 0x77b   :  { %v22264_v38 = vpop.eup %22263  ;;  %18666 = vst [vmem:[%s23708_s17 + $0x48] sm:$0xff] %v10274_v23  ;;  %v10277_v31 = vadd.f32 %v10269_v18, %v10261_v53  ;;  %v10262_v45 = vmul.f32 %v22262_v32, %v10254_v12  ;;  %v21055_v27 = vld [vmem:[#allocation15 + $0x844] ss:$48 sps:$4 sm:$0xff]   ;;  %v21058_v61 = vld [vmem:[#allocation15 + $0x84c] ss:$48 sps:$4 sm:$0xff]  }
 0x77c   :  { %18668 = vst [vmem:[%s23708_s17 + $0x58] sm:$0xff] %v10276_v55  ;;  %v10279_v39 = vadd.f32 %v10271_v24, %v10263_v37  ;;  %v10264_v33 = vmul.f32 %v22264_v38, %v10256_v36  ;;  %v21056_v17 = vld [vmem:[#allocation15 + $0x848] ss:$48 sps:$4 sm:$0xff]   ;;  %v21061_v20 = vld [vmem:[#allocation15 + $0x8a4] ss:$48 sps:$4 sm:$0xff]  }
 0x77d   :  { %18669 = vst [vmem:[%s23708_s17 + $0x60] sm:$0xff] %v10277_v31  ;;  %v10278_v54 = vadd.f32 %v10270_v30, %v10262_v45  ;;  %v23444_v58 = vpack.c.bf16 %v10277_v31, %v10273_v60  ;;  %v21050_v60 = vld [vmem:[#allocation15 + $0x7e8] ss:$48 sps:$4 sm:$0xff]   ;;  %v21059_v11 = vld [vmem:[#allocation15 + $0x8a0] ss:$48 sps:$4 sm:$0xff]  }
 0x77e   :  { %18671 = vst [vmem:[%s23708_s17 + $0x70] sm:$0xff] %v10279_v39  ;;  %v10280_v46 = vadd.f32 %v10272_v29, %v10264_v33  ;;  %v23449_v4 = vpack.c.bf16 %v10279_v39, %v10275_v52  ;;  %v21064_v52 = vld [vmem:[#allocation15 + $0x8ac] ss:$48 sps:$4 sm:$0xff]   ;;  %v21062_v19 = vld [vmem:[#allocation15 + $0x8a8] ss:$48 sps:$4 sm:$0xff]  }
 0x77f   :  { %18670 = vst [vmem:[%s23708_s17 + $0x68] sm:$0xff] %v10278_v54  ;;  %v23454_v22 = vpack.c.bf16 %v10278_v54, %v10274_v23  ;;  %v21070_v18 = vld [vmem:[#allocation15 + $0x90c] ss:$48 sps:$4 sm:$0xff]   ;;  %v21065_v12 = vld [vmem:[#allocation15 + $0x900] ss:$48 sps:$4 sm:$0xff]  }
 0x780   :  { %18672 = vst [vmem:[%s23708_s17 + $0x78] sm:$0xff] %v10280_v46  ;;  %v23459_v41 = vpack.c.bf16 %v10280_v46, %v10276_v55  ;;  %v21068_v23 = vld [vmem:[#allocation15 + $0x908] ss:$48 sps:$4 sm:$0xff]   ;;  %v21073_v53 = vld [vmem:[#allocation15 + $0x964] ss:$48 sps:$4 sm:$0xff]  }
 0x781   :  { %13071 = vmatprep.mubr.bf16.mxu0 %v23454_v22  ;;  %13157 = vmatprep.mubr.bf16.mxu1 %v23454_v22  ;;  %v21076_v32 = vld [vmem:[#allocation15 + $0x96c] ss:$48 sps:$4 sm:$0xff]   ;;  %v21074_v24 = vld [vmem:[#allocation15 + $0x968] ss:$48 sps:$4 sm:$0xff]   ;;  %v21079_v36 = vld [vmem:[#allocation15 + $0x9c4] ss:$48 sps:$4 sm:$0xff]  }
 0x782   :  { %13072 = vmatmul.mubr.bf16.vlgmr.msra.gmra.mrb[32].mxu0 %v23444_v58  ;;  %13158 = vmatmul.mubr.bf16.vlgmr.msra.gmra.mrb[32].mxu1 %v23444_v58  ;;  %v21082_v55 = vld [vmem:[#allocation15 + $0x9cc] ss:$48 sps:$4 sm:$0xff]   ;;  %v21077_v37 = vld [vmem:[#allocation15 + $0x9c0] ss:$48 sps:$4 sm:$0xff]   ;;  %v21080_v38 = vld [vmem:[#allocation15 + $0x9c8] ss:$48 sps:$4 sm:$0xff]  }
 0x783   :  { %13083 = vmatpush1.bf16.msra.mxu0 %v21017_v59  ;;  %13169 = vmatpush1.bf16.msra.mxu1 %v21020_v5  ;;  %v21088_v30 = vld [vmem:[#allocation15 + $0xa2c] ss:$48 sps:$4 sm:$0xff]   ;;  %v21083_v31 = vld [vmem:[#allocation15 + $0xa20] ss:$48 sps:$4 sm:$0xff]   ;;  %v21086_v45 = vld [vmem:[#allocation15 + $0xa28] ss:$48 sps:$4 sm:$0xff]  }
 0x784   :  { %13114 = vmatprep.mubr.bf16.mxu0 %v23459_v41  ;;  %13200 = vmatprep.mubr.bf16.mxu1 %v23459_v41  ;;  %v21094_v29 = vld [vmem:[#allocation15 + $0xa8c] ss:$48 sps:$4 sm:$0xff]   ;;  %v21089_v39 = vld [vmem:[#allocation15 + $0xa80] ss:$48 sps:$4 sm:$0xff]   ;;  %v21092_v33 = vld [vmem:[#allocation15 + $0xa88] ss:$48 sps:$4 sm:$0xff]  }
 0x785   :  { %13084 = vmatprep.subr.bf16.mxu0 %v21025_v26  ;;  %13170 = vmatprep.subr.bf16.mxu1 %v21028_v50  ;;  %v21097_v54 = vld [vmem:[#allocation15 + $0xae4] ss:$48 sps:$4 sm:$0xff]   ;;  %v21100_v46 = vld [vmem:[#allocation15 + $0xaec] ss:$48 sps:$4 sm:$0xff]   ;;  %v21095_v59 = vld [vmem:[#allocation15 + $0xae0] ss:$48 sps:$4 sm:$0xff]  }
 0x786   :  { %v21098_v5 = vld [vmem:[#allocation15 + $0xae8] ss:$48 sps:$4 sm:$0xff]   ;;  %v21103_v26 = vld [vmem:[#allocation15 + $0xb44] ss:$48 sps:$4 sm:$0xff]   ;;  %v21106_v50 = vld [vmem:[#allocation15 + $0xb4c] ss:$48 sps:$4 sm:$0xff]  }
 0x787   :  { %13085 = vmatpush1.bf16.msra.mxu0 %v21023_v47  ;;  %13171 = vmatpush1.bf16.msra.mxu1 %v21026_v35  ;;  %v21101_v47 = vld [vmem:[#allocation15 + $0xb40] ss:$48 sps:$4 sm:$0xff]   ;;  %v21104_v35 = vld [vmem:[#allocation15 + $0xb48] ss:$48 sps:$4 sm:$0xff]  }
 0x788   :  { %13086 = vmatprep.subr.bf16.mxu0 %v21031_v6  ;;  %13172 = vmatprep.subr.bf16.mxu1 %v21034_v63  ;;  %v21109_v6 = vld [vmem:[#allocation15 + $0xba4] ss:$48 sps:$4 sm:$0xff]   ;;  %v21112_v63 = vld [vmem:[#allocation15 + $0xbac] ss:$48 sps:$4 sm:$0xff]  }
 0x78b   :  { %13087 = vmatpush1.bf16.msra.mxu0 %v21029_v42  ;;  %13173 = vmatpush1.bf16.msra.mxu1 %v21032_v34  ;;  %v21107_v42 = vld [vmem:[#allocation15 + $0xba0] ss:$48 sps:$4 sm:$0xff]   ;;  %v21110_v34 = vld [vmem:[#allocation15 + $0xba8] ss:$48 sps:$4 sm:$0xff]  }
 0x78c   :  { %13088 = vmatprep.subr.bf16.mxu0 %v21037_v3  ;;  %13174 = vmatprep.subr.bf16.mxu1 %v21040_v0  ;;  %v21115_v3 = vld [vmem:[#allocation15 + $0x14] ss:$48 sps:$4 sm:$0xff]   ;;  %v21118_v0 = vld [vmem:[#allocation15 + $0x1c] ss:$48 sps:$4 sm:$0xff]  }
 0x78f   :  { %13089 = vmatpush1.bf16.msra.mxu0 %v21035_v7  ;;  %13175 = vmatpush1.bf16.msra.mxu1 %v21038_v8  ;;  %v21113_v7 = vld [vmem:[#allocation15 + $0x10] ss:$48 sps:$4 sm:$0xff]   ;;  %v21116_v8 = vld [vmem:[#allocation15 + $0x18] ss:$48 sps:$4 sm:$0xff]  }
 0x790   :  { %13090 = vmatprep.subr.bf16.mxu0 %v21043_v1  ;;  %13176 = vmatprep.subr.bf16.mxu1 %v21046_v9  ;;  %v21121_v1 = vld [vmem:[#allocation15 + $0x74] ss:$48 sps:$4 sm:$0xff]   ;;  %v21124_v9 = vld [vmem:[#allocation15 + $0x7c] ss:$48 sps:$4 sm:$0xff]  }
 0x793   :  { %13091 = vmatpush1.bf16.msra.mxu0 %v21041_v43  ;;  %13177 = vmatpush1.bf16.msra.mxu1 %v21044_v25  ;;  %v21119_v43 = vld [vmem:[#allocation15 + $0x70] ss:$48 sps:$4 sm:$0xff]   ;;  %v21122_v25 = vld [vmem:[#allocation15 + $0x78] ss:$48 sps:$4 sm:$0xff]  }
 0x794   :  { %13092 = vmatprep.subr.bf16.mxu0 %v21049_v51  ;;  %13178 = vmatprep.subr.bf16.mxu1 %v21052_v10  ;;  %v21127_v51 = vld [vmem:[#allocation15 + $0xd4] ss:$48 sps:$4 sm:$0xff]   ;;  %v21130_v10 = vld [vmem:[#allocation15 + $0xdc] ss:$48 sps:$4 sm:$0xff]  }
 0x797   :  { %13093 = vmatpush1.bf16.msra.mxu0 %v21047_v2  ;;  %13179 = vmatpush1.bf16.msra.mxu1 %v21050_v60  ;;  %v21125_v2 = vld [vmem:[#allocation15 + $0xd0] ss:$48 sps:$4 sm:$0xff]   ;;  %v21128_v60 = vld [vmem:[#allocation15 + $0xd8] ss:$48 sps:$4 sm:$0xff]  }
 0x798   :  { %13094 = vmatprep.subr.bf16.mxu0 %v21055_v27  ;;  %13180 = vmatprep.subr.bf16.mxu1 %v21058_v61  ;;  %v21133_v27 = vld [vmem:[#allocation15 + $0x134] ss:$48 sps:$4 sm:$0xff]   ;;  %v21136_v61 = vld [vmem:[#allocation15 + $0x13c] ss:$48 sps:$4 sm:$0xff]  }
 0x79b   :  { %13095 = vmatpush1.bf16.msra.mxu0 %v21053_v16  ;;  %13181 = vmatpush1.bf16.msra.mxu1 %v21056_v17  ;;  %v21131_v16 = vld [vmem:[#allocation15 + $0x130] ss:$48 sps:$4 sm:$0xff]   ;;  %v21134_v17 = vld [vmem:[#allocation15 + $0x138] ss:$48 sps:$4 sm:$0xff]  }
 0x79c   :  { %13096 = vmatprep.subr.bf16.mxu0 %v21061_v20  ;;  %13182 = vmatprep.subr.bf16.mxu1 %v21064_v52  ;;  %v21139_v20 = vld [vmem:[#allocation15 + $0x194] ss:$48 sps:$4 sm:$0xff]   ;;  %v21142_v52 = vld [vmem:[#allocation15 + $0x19c] ss:$48 sps:$4 sm:$0xff]  }
 0x79f   :  { %13097 = vmatpush1.bf16.msra.mxu0 %v21059_v11  ;;  %13183 = vmatpush1.bf16.msra.mxu1 %v21062_v19  ;;  %v21137_v11 = vld [vmem:[#allocation15 + $0x190] ss:$48 sps:$4 sm:$0xff]   ;;  %v21140_v19 = vld [vmem:[#allocation15 + $0x198] ss:$48 sps:$4 sm:$0xff]  }
 0x7a0   :  { %13098 = vmatprep.subr.bf16.mxu0 %v21067_v56  ;;  %13184 = vmatprep.subr.bf16.mxu1 %v21070_v18  ;;  %v21145_v56 = vld [vmem:[#allocation15 + $0x1f4] ss:$48 sps:$4 sm:$0xff]   ;;  %v21148_v18 = vld [vmem:[#allocation15 + $0x1fc] ss:$48 sps:$4 sm:$0xff]  }
 0x7a3   :  { %13099 = vmatpush1.bf16.msra.mxu0 %v21065_v12  ;;  %13185 = vmatpush1.bf16.msra.mxu1 %v21068_v23  ;;  %v21143_v12 = vld [vmem:[#allocation15 + $0x1f0] ss:$48 sps:$4 sm:$0xff]   ;;  %v21146_v23 = vld [vmem:[#allocation15 + $0x1f8] ss:$48 sps:$4 sm:$0xff]  }
 0x7a4   :  { %13100 = vmatprep.subr.bf16.mxu0 %v21073_v53  ;;  %13186 = vmatprep.subr.bf16.mxu1 %v21076_v32  ;;  %v21151_v53 = vld [vmem:[#allocation15 + $0x254] ss:$48 sps:$4 sm:$0xff]   ;;  %v21154_v32 = vld [vmem:[#allocation15 + $0x25c] ss:$48 sps:$4 sm:$0xff]  }
 0x7a7   :  { %13101 = vmatpush1.bf16.msra.mxu0 %v21071_v57  ;;  %13187 = vmatpush1.bf16.msra.mxu1 %v21074_v24  ;;  %v21149_v57 = vld [vmem:[#allocation15 + $0x250] ss:$48 sps:$4 sm:$0xff]   ;;  %v21152_v24 = vld [vmem:[#allocation15 + $0x258] ss:$48 sps:$4 sm:$0xff]  }
 0x7a8   :  { %13102 = vmatprep.subr.bf16.mxu0 %v21079_v36  ;;  %13188 = vmatprep.subr.bf16.mxu1 %v21082_v55  ;;  %v21157_v36 = vld [vmem:[#allocation15 + $0x2b4] ss:$48 sps:$4 sm:$0xff]   ;;  %v21160_v55 = vld [vmem:[#allocation15 + $0x2bc] ss:$48 sps:$4 sm:$0xff]  }
 0x7ab   :  { %13103 = vmatpush1.bf16.msra.mxu0 %v21077_v37  ;;  %13189 = vmatpush1.bf16.msra.mxu1 %v21080_v38  ;;  %v21155_v37 = vld [vmem:[#allocation15 + $0x2b0] ss:$48 sps:$4 sm:$0xff]   ;;  %v21158_v38 = vld [vmem:[#allocation15 + $0x2b8] ss:$48 sps:$4 sm:$0xff]  }
 0x7ac   :  { %13104 = vmatprep.subr.bf16.mxu0 %v21085_v28  ;;  %13190 = vmatprep.subr.bf16.mxu1 %v21088_v30  ;;  %v21163_v28 = vld [vmem:[#allocation15 + $0x314] ss:$48 sps:$4 sm:$0xff]   ;;  %v21166_v30 = vld [vmem:[#allocation15 + $0x31c] ss:$48 sps:$4 sm:$0xff]  }
 0x7af   :  { %13105 = vmatpush1.bf16.msra.mxu0 %v21083_v31  ;;  %13191 = vmatpush1.bf16.msra.mxu1 %v21086_v45  ;;  %v21161_v31 = vld [vmem:[#allocation15 + $0x310] ss:$48 sps:$4 sm:$0xff]   ;;  %v21164_v45 = vld [vmem:[#allocation15 + $0x318] ss:$48 sps:$4 sm:$0xff]  }
 0x7b0   :  { %13106 = vmatprep.subr.bf16.mxu0 %v21091_v62  ;;  %13192 = vmatprep.subr.bf16.mxu1 %v21094_v29  ;;  %v21169_v62 = vld [vmem:[#allocation15 + $0x374] ss:$48 sps:$4 sm:$0xff]   ;;  %v21172_v29 = vld [vmem:[#allocation15 + $0x37c] ss:$48 sps:$4 sm:$0xff]  }
 0x7b3   :  { %13107 = vmatpush1.bf16.msra.mxu0 %v21089_v39  ;;  %13193 = vmatpush1.bf16.msra.mxu1 %v21092_v33  ;;  %v21167_v39 = vld [vmem:[#allocation15 + $0x370] ss:$48 sps:$4 sm:$0xff]   ;;  %v21170_v33 = vld [vmem:[#allocation15 + $0x378] ss:$48 sps:$4 sm:$0xff]  }
 0x7b4   :  { %13108 = vmatprep.subr.bf16.mxu0 %v21097_v54  ;;  %13194 = vmatprep.subr.bf16.mxu1 %v21100_v46  ;;  %v21175_v54 = vld [vmem:[#allocation15 + $0x3d4] ss:$48 sps:$4 sm:$0xff]   ;;  %v21178_v46 = vld [vmem:[#allocation15 + $0x3dc] ss:$48 sps:$4 sm:$0xff]  }
 0x7b7   :  { %13109 = vmatpush1.bf16.msra.mxu0 %v21095_v59  ;;  %13195 = vmatpush1.bf16.msra.mxu1 %v21098_v5  ;;  %v21173_v59 = vld [vmem:[#allocation15 + $0x3d0] ss:$48 sps:$4 sm:$0xff]   ;;  %v21176_v5 = vld [vmem:[#allocation15 + $0x3d8] ss:$48 sps:$4 sm:$0xff]  }
 0x7b8   :  { %13110 = vmatprep.subr.bf16.mxu0 %v21103_v26  ;;  %13196 = vmatprep.subr.bf16.mxu1 %v21106_v50  ;;  %v21181_v26 = vld [vmem:[#allocation15 + $0x434] ss:$48 sps:$4 sm:$0xff]   ;;  %v21184_v50 = vld [vmem:[#allocation15 + $0x43c] ss:$48 sps:$4 sm:$0xff]  }
 0x7bb   :  { %13111 = vmatpush1.bf16.msra.mxu0 %v21101_v47  ;;  %13197 = vmatpush1.bf16.msra.mxu1 %v21104_v35  ;;  %v21179_v47 = vld [vmem:[#allocation15 + $0x430] ss:$48 sps:$4 sm:$0xff]   ;;  %v21182_v35 = vld [vmem:[#allocation15 + $0x438] ss:$48 sps:$4 sm:$0xff]  }
 0x7bc   :  { %13112 = vmatprep.subr.bf16.mxu0 %v21109_v6  ;;  %13198 = vmatprep.subr.bf16.mxu1 %v21112_v63  ;;  %v21187_v6 = vld [vmem:[#allocation15 + $0x494] ss:$48 sps:$4 sm:$0xff]   ;;  %v21190_v63 = vld [vmem:[#allocation15 + $0x49c] ss:$48 sps:$4 sm:$0xff]  }
 0x7bf   :  { %13113 = vmatpush1.bf16.msra.mxu0 %v21107_v42  ;;  %13199 = vmatpush1.bf16.msra.mxu1 %v21110_v34  ;;  %v21185_v42 = vld [vmem:[#allocation15 + $0x490] ss:$48 sps:$4 sm:$0xff]   ;;  %v21188_v34 = vld [vmem:[#allocation15 + $0x498] ss:$48 sps:$4 sm:$0xff]  }
 0x7c0   :  { %13211 = vmatprep.subr.bf16.mxu0 %v21115_v3  ;;  %13297 = vmatprep.subr.bf16.mxu1 %v21118_v0  ;;  %v21193_v3 = vld [vmem:[#allocation15 + $0x4f4] ss:$48 sps:$4 sm:$0xff]   ;;  %v21196_v0 = vld [vmem:[#allocation15 + $0x4fc] ss:$48 sps:$4 sm:$0xff]  }
 0x7c2   :  { %13115 = vmatmul.mubr.bf16.vlgmr.msra.gmra.mrb[32].mxu0 %v23449_v4  ;;  %13201 = vmatmul.mubr.bf16.vlgmr.msra.gmra.mrb[32].mxu1 %v23449_v4 }
 0x7c3   :  { %13212 = vmatpush1.bf16.msra.mxu0 %v21113_v7  ;;  %13243 = vmatprep.mubr.bf16.mxu0 %v23454_v22  ;;  %v21191_v7 = vld [vmem:[#allocation15 + $0x4f0] ss:$48 sps:$4 sm:$0xff]  }
 0x7c4   :  { %13298 = vmatpush1.bf16.msra.mxu1 %v21116_v8  ;;  %13329 = vmatprep.mubr.bf16.mxu1 %v23454_v22  ;;  %v21194_v8 = vld [vmem:[#allocation15 + $0x4f8] ss:$48 sps:$4 sm:$0xff]  }
 0x7c5   :  { %13213 = vmatprep.subr.bf16.mxu0 %v21121_v1  ;;  %13299 = vmatprep.subr.bf16.mxu1 %v21124_v9  ;;  %v21199_v1 = vld [vmem:[#allocation15 + $0x554] ss:$48 sps:$4 sm:$0xff]   ;;  %v21202_v9 = vld [vmem:[#allocation15 + $0x55c] ss:$48 sps:$4 sm:$0xff]  }
 0x7c7   :  { %13214 = vmatpush1.bf16.msra.mxu0 %v21119_v43  ;;  %v21197_v43 = vld [vmem:[#allocation15 + $0x550] ss:$48 sps:$4 sm:$0xff]  }
 0x7c8   :  { %13300 = vmatpush1.bf16.msra.mxu1 %v21122_v25  ;;  %13215 = vmatprep.subr.bf16.mxu0 %v21127_v51  ;;  %v21200_v25 = vld [vmem:[#allocation15 + $0x558] ss:$48 sps:$4 sm:$0xff]   ;;  %v21205_v51 = vld [vmem:[#allocation15 + $0x5b4] ss:$48 sps:$4 sm:$0xff]  }
 0x7c9   :  { %13301 = vmatprep.subr.bf16.mxu1 %v21130_v10  ;;  %v21208_v10 = vld [vmem:[#allocation15 + $0x5bc] ss:$48 sps:$4 sm:$0xff]  }
 0x7cb   :  { %13216 = vmatpush1.bf16.msra.mxu0 %v21125_v2  ;;  %v21203_v2 = vld [vmem:[#allocation15 + $0x5b0] ss:$48 sps:$4 sm:$0xff]  }
 0x7cc   :  { %13302 = vmatpush1.bf16.msra.mxu1 %v21128_v60  ;;  %13217 = vmatprep.subr.bf16.mxu0 %v21133_v27  ;;  %v21206_v60 = vld [vmem:[#allocation15 + $0x5b8] ss:$48 sps:$4 sm:$0xff]   ;;  %v21211_v27 = vld [vmem:[#allocation15 + $0x614] ss:$48 sps:$4 sm:$0xff]  }
 0x7cd   :  { %13303 = vmatprep.subr.bf16.mxu1 %v21136_v61  ;;  %v21214_v61 = vld [vmem:[#allocation15 + $0x61c] ss:$48 sps:$4 sm:$0xff]  }
 0x7cf   :  { %13218 = vmatpush1.bf16.msra.mxu0 %v21131_v16  ;;  %v21209_v16 = vld [vmem:[#allocation15 + $0x610] ss:$48 sps:$4 sm:$0xff]  }
 0x7d0   :  { %13304 = vmatpush1.bf16.msra.mxu1 %v21134_v17  ;;  %13219 = vmatprep.subr.bf16.mxu0 %v21139_v20  ;;  %v21212_v17 = vld [vmem:[#allocation15 + $0x618] ss:$48 sps:$4 sm:$0xff]   ;;  %v21217_v20 = vld [vmem:[#allocation15 + $0x674] ss:$48 sps:$4 sm:$0xff]  }
 0x7d1   :  { %13305 = vmatprep.subr.bf16.mxu1 %v21142_v52  ;;  %v21220_v52 = vld [vmem:[#allocation15 + $0x67c] ss:$48 sps:$4 sm:$0xff]  }
 0x7d3   :  { %13220 = vmatpush1.bf16.msra.mxu0 %v21137_v11  ;;  %v21215_v11 = vld [vmem:[#allocation15 + $0x670] ss:$48 sps:$4 sm:$0xff]  }
 0x7d4   :  { %13306 = vmatpush1.bf16.msra.mxu1 %v21140_v19  ;;  %13221 = vmatprep.subr.bf16.mxu0 %v21145_v56  ;;  %v21218_v19 = vld [vmem:[#allocation15 + $0x678] ss:$48 sps:$4 sm:$0xff]   ;;  %v21223_v56 = vld [vmem:[#allocation15 + $0x6d4] ss:$48 sps:$4 sm:$0xff]  }
 0x7d5   :  { %13307 = vmatprep.subr.bf16.mxu1 %v21148_v18  ;;  %v21226_v18 = vld [vmem:[#allocation15 + $0x6dc] ss:$48 sps:$4 sm:$0xff]  }
 0x7d7   :  { %13222 = vmatpush1.bf16.msra.mxu0 %v21143_v12  ;;  %v21221_v12 = vld [vmem:[#allocation15 + $0x6d0] ss:$48 sps:$4 sm:$0xff]  }
 0x7d8   :  { %13308 = vmatpush1.bf16.msra.mxu1 %v21146_v23  ;;  %13223 = vmatprep.subr.bf16.mxu0 %v21151_v53  ;;  %v21224_v23 = vld [vmem:[#allocation15 + $0x6d8] ss:$48 sps:$4 sm:$0xff]   ;;  %v21229_v53 = vld [vmem:[#allocation15 + $0x734] ss:$48 sps:$4 sm:$0xff]  }
 0x7d9   :  { %13309 = vmatprep.subr.bf16.mxu1 %v21154_v32  ;;  %v21232_v32 = vld [vmem:[#allocation15 + $0x73c] ss:$48 sps:$4 sm:$0xff]  }
 0x7db   :  { %13224 = vmatpush1.bf16.msra.mxu0 %v21149_v57  ;;  %v21227_v57 = vld [vmem:[#allocation15 + $0x730] ss:$48 sps:$4 sm:$0xff]  }
 0x7dc   :  { %13310 = vmatpush1.bf16.msra.mxu1 %v21152_v24  ;;  %13225 = vmatprep.subr.bf16.mxu0 %v21157_v36  ;;  %v21230_v24 = vld [vmem:[#allocation15 + $0x738] ss:$48 sps:$4 sm:$0xff]   ;;  %v21235_v36 = vld [vmem:[#allocation15 + $0x794] ss:$48 sps:$4 sm:$0xff]  }
 0x7dd   :  { %13311 = vmatprep.subr.bf16.mxu1 %v21160_v55  ;;  %v21238_v55 = vld [vmem:[#allocation15 + $0x79c] ss:$48 sps:$4 sm:$0xff]  }
 0x7df   :  { %13226 = vmatpush1.bf16.msra.mxu0 %v21155_v37  ;;  %v21233_v37 = vld [vmem:[#allocation15 + $0x790] ss:$48 sps:$4 sm:$0xff]  }
 0x7e0   :  { %13312 = vmatpush1.bf16.msra.mxu1 %v21158_v38  ;;  %13227 = vmatprep.subr.bf16.mxu0 %v21163_v28  ;;  %v21236_v38 = vld [vmem:[#allocation15 + $0x798] ss:$48 sps:$4 sm:$0xff]   ;;  %v21241_v28 = vld [vmem:[#allocation15 + $0x7f4] ss:$48 sps:$4 sm:$0xff]  }
 0x7e1   :  { %13313 = vmatprep.subr.bf16.mxu1 %v21166_v30  ;;  %v21244_v30 = vld [vmem:[#allocation15 + $0x7fc] ss:$48 sps:$4 sm:$0xff]  }
 0x7e3   :  { %13228 = vmatpush1.bf16.msra.mxu0 %v21161_v31  ;;  %v21239_v31 = vld [vmem:[#allocation15 + $0x7f0] ss:$48 sps:$4 sm:$0xff]  }
 0x7e4   :  { %13314 = vmatpush1.bf16.msra.mxu1 %v21164_v45  ;;  %13229 = vmatprep.subr.bf16.mxu0 %v21169_v62  ;;  %v21242_v45 = vld [vmem:[#allocation15 + $0x7f8] ss:$48 sps:$4 sm:$0xff]   ;;  %v21247_v62 = vld [vmem:[#allocation15 + $0x854] ss:$48 sps:$4 sm:$0xff]  }
 0x7e5   :  { %13315 = vmatprep.subr.bf16.mxu1 %v21172_v29  ;;  %v21250_v29 = vld [vmem:[#allocation15 + $0x85c] ss:$48 sps:$4 sm:$0xff]  }
 0x7e7   :  { %13230 = vmatpush1.bf16.msra.mxu0 %v21167_v39  ;;  %v21245_v39 = vld [vmem:[#allocation15 + $0x850] ss:$48 sps:$4 sm:$0xff]  }
 0x7e8   :  { %13316 = vmatpush1.bf16.msra.mxu1 %v21170_v33  ;;  %13231 = vmatprep.subr.bf16.mxu0 %v21175_v54  ;;  %v21248_v33 = vld [vmem:[#allocation15 + $0x858] ss:$48 sps:$4 sm:$0xff]   ;;  %v21253_v54 = vld [vmem:[#allocation15 + $0x8b4] ss:$48 sps:$4 sm:$0xff]  }
 0x7e9   :  { %13317 = vmatprep.subr.bf16.mxu1 %v21178_v46  ;;  %v21256_v46 = vld [vmem:[#allocation15 + $0x8bc] ss:$48 sps:$4 sm:$0xff]  }
 0x7eb   :  { %13232 = vmatpush1.bf16.msra.mxu0 %v21173_v59  ;;  %v21251_v59 = vld [vmem:[#allocation15 + $0x8b0] ss:$48 sps:$4 sm:$0xff]  }
 0x7ec   :  { %13318 = vmatpush1.bf16.msra.mxu1 %v21176_v5  ;;  %13233 = vmatprep.subr.bf16.mxu0 %v21181_v26  ;;  %v21254_v5 = vld [vmem:[#allocation15 + $0x8b8] ss:$48 sps:$4 sm:$0xff]   ;;  %v21259_v26 = vld [vmem:[#allocation15 + $0x914] ss:$48 sps:$4 sm:$0xff]  }
 0x7ed   :  { %13319 = vmatprep.subr.bf16.mxu1 %v21184_v50  ;;  %v21262_v50 = vld [vmem:[#allocation15 + $0x91c] ss:$48 sps:$4 sm:$0xff]  }
 0x7ef   :  { %13234 = vmatpush1.bf16.msra.mxu0 %v21179_v47  ;;  %v21257_v47 = vld [vmem:[#allocation15 + $0x910] ss:$48 sps:$4 sm:$0xff]  }
 0x7f0   :  { %13320 = vmatpush1.bf16.msra.mxu1 %v21182_v35  ;;  %13235 = vmatprep.subr.bf16.mxu0 %v21187_v6  ;;  %v21260_v35 = vld [vmem:[#allocation15 + $0x918] ss:$48 sps:$4 sm:$0xff]   ;;  %v21265_v6 = vld [vmem:[#allocation15 + $0x974] ss:$48 sps:$4 sm:$0xff]  }
 0x7f1   :  { %13321 = vmatprep.subr.bf16.mxu1 %v21190_v63  ;;  %v21268_v63 = vld [vmem:[#allocation15 + $0x97c] ss:$48 sps:$4 sm:$0xff]  }
 0x7f3   :  { %13236 = vmatpush1.bf16.msra.mxu0 %v21185_v42  ;;  %v21263_v42 = vld [vmem:[#allocation15 + $0x970] ss:$48 sps:$4 sm:$0xff]  }
 0x7f4   :  { %13322 = vmatpush1.bf16.msra.mxu1 %v21188_v34  ;;  %13237 = vmatprep.subr.bf16.mxu0 %v21193_v3  ;;  %v21266_v34 = vld [vmem:[#allocation15 + $0x978] ss:$48 sps:$4 sm:$0xff]   ;;  %v21271_v3 = vld [vmem:[#allocation15 + $0x9d4] ss:$48 sps:$4 sm:$0xff]  }
 0x7f5   :  { %13323 = vmatprep.subr.bf16.mxu1 %v21196_v0  ;;  %v21274_v0 = vld [vmem:[#allocation15 + $0x9dc] ss:$48 sps:$4 sm:$0xff]  }
 0x7f7   :  { %13238 = vmatpush1.bf16.msra.mxu0 %v21191_v7  ;;  %v21269_v7 = vld [vmem:[#allocation15 + $0x9d0] ss:$48 sps:$4 sm:$0xff]  }
 0x7f8   :  { %13324 = vmatpush1.bf16.msra.mxu1 %v21194_v8  ;;  %13239 = vmatprep.subr.bf16.mxu0 %v21199_v1  ;;  %v21272_v8 = vld [vmem:[#allocation15 + $0x9d8] ss:$48 sps:$4 sm:$0xff]   ;;  %v21277_v1 = vld [vmem:[#allocation15 + $0xa34] ss:$48 sps:$4 sm:$0xff]  }
 0x7f9   :  { %13325 = vmatprep.subr.bf16.mxu1 %v21202_v9  ;;  %v21280_v9 = vld [vmem:[#allocation15 + $0xa3c] ss:$48 sps:$4 sm:$0xff]  }
 0x7fb   :  { %13240 = vmatpush1.bf16.msra.mxu0 %v21197_v43  ;;  %v21275_v43 = vld [vmem:[#allocation15 + $0xa30] ss:$48 sps:$4 sm:$0xff]  }
 0x7fc   :  { %13326 = vmatpush1.bf16.msra.mxu1 %v21200_v25  ;;  %13241 = vmatprep.subr.bf16.mxu0 %v21205_v51  ;;  %v21278_v25 = vld [vmem:[#allocation15 + $0xa38] ss:$48 sps:$4 sm:$0xff]   ;;  %v21283_v51 = vld [vmem:[#allocation15 + $0xa94] ss:$48 sps:$4 sm:$0xff]  }
 0x7fd   :  { %13327 = vmatprep.subr.bf16.mxu1 %v21208_v10  ;;  %v21286_v10 = vld [vmem:[#allocation15 + $0xa9c] ss:$48 sps:$4 sm:$0xff]  }
 0x7ff   :  { %13242 = vmatpush1.bf16.msra.mxu0 %v21203_v2  ;;  %v21281_v2 = vld [vmem:[#allocation15 + $0xa90] ss:$48 sps:$4 sm:$0xff]  }
 0x800   :  { %13328 = vmatpush1.bf16.msra.mxu1 %v21206_v60  ;;  %13254 = vmatprep.subr.bf16.mxu0 %v21211_v27  ;;  %v21284_v60 = vld [vmem:[#allocation15 + $0xa98] ss:$48 sps:$4 sm:$0xff]   ;;  %v21289_v27 = vld [vmem:[#allocation15 + $0xaf4] ss:$48 sps:$4 sm:$0xff]  }
 0x801   :  { %13340 = vmatprep.subr.bf16.mxu1 %v21214_v61  ;;  %v21292_v61 = vld [vmem:[#allocation15 + $0xafc] ss:$48 sps:$4 sm:$0xff]  }
 0x802   :  { %13244 = vmatmul.mubr.bf16.vlgmr.msra.gmra.mrb[36].mxu0 %v23444_v58 }
 0x803   :  { %13330 = vmatmul.mubr.bf16.vlgmr.msra.gmra.mrb[36].mxu1 %v23444_v58  ;;  %13255 = vmatpush1.bf16.msra.mxu0 %v21209_v16  ;;  %v21287_v16 = vld [vmem:[#allocation15 + $0xaf0] ss:$48 sps:$4 sm:$0xff]  }
 0x804   :  { %13286 = vmatprep.mubr.bf16.mxu0 %v23459_v41  ;;  %13341 = vmatpush1.bf16.msra.mxu1 %v21212_v17  ;;  %v21290_v17 = vld [vmem:[#allocation15 + $0xaf8] ss:$48 sps:$4 sm:$0xff]  }
 0x805   :  { %13372 = vmatprep.mubr.bf16.mxu1 %v23459_v41  ;;  %13256 = vmatprep.subr.bf16.mxu0 %v21217_v20  ;;  %v21295_v20 = vld [vmem:[#allocation15 + $0xb54] ss:$48 sps:$4 sm:$0xff]  }
 0x806   :  { %13342 = vmatprep.subr.bf16.mxu1 %v21220_v52  ;;  %v21298_v52 = vld [vmem:[#allocation15 + $0xb5c] ss:$48 sps:$4 sm:$0xff]  }
 0x807   :  { %13257 = vmatpush1.bf16.msra.mxu0 %v21215_v11  ;;  %v21293_v11 = vld [vmem:[#allocation15 + $0xb50] ss:$48 sps:$4 sm:$0xff]  }
 0x808   :  { %13343 = vmatpush1.bf16.msra.mxu1 %v21218_v19  ;;  %13258 = vmatprep.subr.bf16.mxu0 %v21223_v56  ;;  %v21296_v19 = vld [vmem:[#allocation15 + $0xb58] ss:$48 sps:$4 sm:$0xff]   ;;  %v21301_v56 = vld [vmem:[#allocation15 + $0xbb4] ss:$48 sps:$4 sm:$0xff]  }
 0x809   :  { %13344 = vmatprep.subr.bf16.mxu1 %v21226_v18  ;;  %v21304_v18 = vld [vmem:[#allocation15 + $0xbbc] ss:$48 sps:$4 sm:$0xff]  }
 0x80b   :  { %13259 = vmatpush1.bf16.msra.mxu0 %v21221_v12  ;;  %v21299_v12 = vld [vmem:[#allocation15 + $0xbb0] ss:$48 sps:$4 sm:$0xff]  }
 0x80c   :  { %13345 = vmatpush1.bf16.msra.mxu1 %v21224_v23  ;;  %13260 = vmatprep.subr.bf16.mxu0 %v21229_v53  ;;  %v21302_v23 = vld [vmem:[#allocation15 + $0xbb8] ss:$48 sps:$4 sm:$0xff]   ;;  %v21307_v53 = vld [vmem:[#allocation15 + $0x24] ss:$48 sps:$4 sm:$0xff]  }
 0x80d   :  { %13346 = vmatprep.subr.bf16.mxu1 %v21232_v32  ;;  %v21310_v32 = vld [vmem:[#allocation15 + $0x2c] ss:$48 sps:$4 sm:$0xff]  }
 0x80f   :  { %13261 = vmatpush1.bf16.msra.mxu0 %v21227_v57  ;;  %v21305_v57 = vld [vmem:[#allocation15 + $0x20] ss:$48 sps:$4 sm:$0xff]  }
 0x810   :  { %13347 = vmatpush1.bf16.msra.mxu1 %v21230_v24  ;;  %13262 = vmatprep.subr.bf16.mxu0 %v21235_v36  ;;  %v21308_v24 = vld [vmem:[#allocation15 + $0x28] ss:$48 sps:$4 sm:$0xff]   ;;  %v21313_v36 = vld [vmem:[#allocation15 + $0x84] ss:$48 sps:$4 sm:$0xff]  }
 0x811   :  { %13348 = vmatprep.subr.bf16.mxu1 %v21238_v55  ;;  %v21316_v55 = vld [vmem:[#allocation15 + $0x8c] ss:$48 sps:$4 sm:$0xff]  }
 0x813   :  { %13263 = vmatpush1.bf16.msra.mxu0 %v21233_v37  ;;  %v21311_v37 = vld [vmem:[#allocation15 + $0x80] ss:$48 sps:$4 sm:$0xff]  }
 0x814   :  { %13349 = vmatpush1.bf16.msra.mxu1 %v21236_v38  ;;  %13264 = vmatprep.subr.bf16.mxu0 %v21241_v28  ;;  %v21314_v38 = vld [vmem:[#allocation15 + $0x88] ss:$48 sps:$4 sm:$0xff]   ;;  %v21319_v28 = vld [vmem:[#allocation15 + $0xe4] ss:$48 sps:$4 sm:$0xff]  }
 0x815   :  { %13350 = vmatprep.subr.bf16.mxu1 %v21244_v30  ;;  %v21322_v30 = vld [vmem:[#allocation15 + $0xec] ss:$48 sps:$4 sm:$0xff]  }
 0x817   :  { %13265 = vmatpush1.bf16.msra.mxu0 %v21239_v31  ;;  %v21317_v31 = vld [vmem:[#allocation15 + $0xe0] ss:$48 sps:$4 sm:$0xff]  }
 0x818   :  { %13351 = vmatpush1.bf16.msra.mxu1 %v21242_v45  ;;  %13266 = vmatprep.subr.bf16.mxu0 %v21247_v62  ;;  %v21320_v45 = vld [vmem:[#allocation15 + $0xe8] ss:$48 sps:$4 sm:$0xff]   ;;  %v21325_v62 = vld [vmem:[#allocation15 + $0x144] ss:$48 sps:$4 sm:$0xff]  }
 0x819   :  { %13352 = vmatprep.subr.bf16.mxu1 %v21250_v29  ;;  %v21328_v29 = vld [vmem:[#allocation15 + $0x14c] ss:$48 sps:$4 sm:$0xff]  }
 0x81b   :  { %13267 = vmatpush1.bf16.msra.mxu0 %v21245_v39  ;;  %v21323_v39 = vld [vmem:[#allocation15 + $0x140] ss:$48 sps:$4 sm:$0xff]  }
 0x81c   :  { %13353 = vmatpush1.bf16.msra.mxu1 %v21248_v33  ;;  %13268 = vmatprep.subr.bf16.mxu0 %v21253_v54  ;;  %v21326_v33 = vld [vmem:[#allocation15 + $0x148] ss:$48 sps:$4 sm:$0xff]   ;;  %v21331_v54 = vld [vmem:[#allocation15 + $0x1a4] ss:$48 sps:$4 sm:$0xff]  }
 0x81d   :  { %13354 = vmatprep.subr.bf16.mxu1 %v21256_v46  ;;  %v21334_v46 = vld [vmem:[#allocation15 + $0x1ac] ss:$48 sps:$4 sm:$0xff]  }
 0x81f   :  { %13269 = vmatpush1.bf16.msra.mxu0 %v21251_v59  ;;  %v21332_v59 = vld [vmem:[#allocation15 + $0x1a8] ss:$48 sps:$4 sm:$0xff]  }
 0x820   :  { %13355 = vmatpush1.bf16.msra.mxu1 %v21254_v5  ;;  %13270 = vmatprep.subr.bf16.mxu0 %v21259_v26  ;;  %v21337_v5 = vld [vmem:[#allocation15 + $0x204] ss:$48 sps:$4 sm:$0xff]   ;;  %v21340_v26 = vld [vmem:[#allocation15 + $0x20c] ss:$48 sps:$4 sm:$0xff]  }
 0x821   :  { %13356 = vmatprep.subr.bf16.mxu1 %v21262_v50  ;;  %v21335_v50 = vld [vmem:[#allocation15 + $0x200] ss:$48 sps:$4 sm:$0xff]  }
 0x823   :  { %13271 = vmatpush1.bf16.msra.mxu0 %v21257_v47  ;;  %v21338_v47 = vld [vmem:[#allocation15 + $0x208] ss:$48 sps:$4 sm:$0xff]  }
 0x824   :  { %13357 = vmatpush1.bf16.msra.mxu1 %v21260_v35  ;;  %13272 = vmatprep.subr.bf16.mxu0 %v21265_v6  ;;  %v21343_v35 = vld [vmem:[#allocation15 + $0x264] ss:$48 sps:$4 sm:$0xff]   ;;  %v21346_v6 = vld [vmem:[#allocation15 + $0x26c] ss:$48 sps:$4 sm:$0xff]  }
 0x825   :  { %13358 = vmatprep.subr.bf16.mxu1 %v21268_v63  ;;  %v21341_v63 = vld [vmem:[#allocation15 + $0x260] ss:$48 sps:$4 sm:$0xff]  }
 0x827   :  { %13273 = vmatpush1.bf16.msra.mxu0 %v21263_v42  ;;  %v21344_v42 = vld [vmem:[#allocation15 + $0x268] ss:$48 sps:$4 sm:$0xff]  }
 0x828   :  { %13359 = vmatpush1.bf16.msra.mxu1 %v21266_v34  ;;  %13274 = vmatprep.subr.bf16.mxu0 %v21271_v3  ;;  %v21349_v34 = vld [vmem:[#allocation15 + $0x2c4] ss:$48 sps:$4 sm:$0xff]   ;;  %v21352_v3 = vld [vmem:[#allocation15 + $0x2cc] ss:$48 sps:$4 sm:$0xff]  }
 0x829   :  { %13360 = vmatprep.subr.bf16.mxu1 %v21274_v0  ;;  %v21347_v0 = vld [vmem:[#allocation15 + $0x2c0] ss:$48 sps:$4 sm:$0xff]  }
 0x82b   :  { %13275 = vmatpush1.bf16.msra.mxu0 %v21269_v7  ;;  %v21350_v7 = vld [vmem:[#allocation15 + $0x2c8] ss:$48 sps:$4 sm:$0xff]  }
 0x82c   :  { %13361 = vmatpush1.bf16.msra.mxu1 %v21272_v8  ;;  %13276 = vmatprep.subr.bf16.mxu0 %v21277_v1  ;;  %v21355_v8 = vld [vmem:[#allocation15 + $0x324] ss:$48 sps:$4 sm:$0xff]   ;;  %v21358_v1 = vld [vmem:[#allocation15 + $0x32c] ss:$48 sps:$4 sm:$0xff]  }
 0x82d   :  { %13362 = vmatprep.subr.bf16.mxu1 %v21280_v9  ;;  %v21353_v9 = vld [vmem:[#allocation15 + $0x320] ss:$48 sps:$4 sm:$0xff]  }
 0x82f   :  { %13277 = vmatpush1.bf16.msra.mxu0 %v21275_v43  ;;  %v21356_v43 = vld [vmem:[#allocation15 + $0x328] ss:$48 sps:$4 sm:$0xff]  }
 0x830   :  { %13363 = vmatpush1.bf16.msra.mxu1 %v21278_v25  ;;  %13278 = vmatprep.subr.bf16.mxu0 %v21283_v51  ;;  %v21361_v25 = vld [vmem:[#allocation15 + $0x384] ss:$48 sps:$4 sm:$0xff]   ;;  %v21364_v51 = vld [vmem:[#allocation15 + $0x38c] ss:$48 sps:$4 sm:$0xff]  }
 0x831   :  { %13364 = vmatprep.subr.bf16.mxu1 %v21286_v10  ;;  %v21359_v10 = vld [vmem:[#allocation15 + $0x380] ss:$48 sps:$4 sm:$0xff]  }
 0x833   :  { %13279 = vmatpush1.bf16.msra.mxu0 %v21281_v2  ;;  %v21362_v2 = vld [vmem:[#allocation15 + $0x388] ss:$48 sps:$4 sm:$0xff]  }
 0x834   :  { %13365 = vmatpush1.bf16.msra.mxu1 %v21284_v60  ;;  %13280 = vmatprep.subr.bf16.mxu0 %v21289_v27  ;;  %v21367_v60 = vld [vmem:[#allocation15 + $0x3e4] ss:$48 sps:$4 sm:$0xff]   ;;  %v21370_v27 = vld [vmem:[#allocation15 + $0x3ec] ss:$48 sps:$4 sm:$0xff]  }
 0x835   :  { %13366 = vmatprep.subr.bf16.mxu1 %v21292_v61  ;;  %v21365_v61 = vld [vmem:[#allocation15 + $0x3e0] ss:$48 sps:$4 sm:$0xff]  }
 0x837   :  { %13281 = vmatpush1.bf16.msra.mxu0 %v21287_v16  ;;  %v21368_v16 = vld [vmem:[#allocation15 + $0x3e8] ss:$48 sps:$4 sm:$0xff]  }
 0x838   :  { %13367 = vmatpush1.bf16.msra.mxu1 %v21290_v17  ;;  %13282 = vmatprep.subr.bf16.mxu0 %v21295_v20  ;;  %v21373_v17 = vld [vmem:[#allocation15 + $0x444] ss:$48 sps:$4 sm:$0xff]   ;;  %v21376_v20 = vld [vmem:[#allocation15 + $0x44c] ss:$48 sps:$4 sm:$0xff]  }
 0x839   :  { %13368 = vmatprep.subr.bf16.mxu1 %v21298_v52  ;;  %v21371_v52 = vld [vmem:[#allocation15 + $0x440] ss:$48 sps:$4 sm:$0xff]  }
 0x83b   :  { %13283 = vmatpush1.bf16.msra.mxu0 %v21293_v11  ;;  %v21374_v11 = vld [vmem:[#allocation15 + $0x448] ss:$48 sps:$4 sm:$0xff]  }
 0x83c   :  { %13369 = vmatpush1.bf16.msra.mxu1 %v21296_v19  ;;  %13284 = vmatprep.subr.bf16.mxu0 %v21301_v56  ;;  %v21379_v19 = vld [vmem:[#allocation15 + $0x4a4] ss:$48 sps:$4 sm:$0xff]   ;;  %v21382_v56 = vld [vmem:[#allocation15 + $0x4ac] ss:$48 sps:$4 sm:$0xff]  }
 0x83d   :  { %13370 = vmatprep.subr.bf16.mxu1 %v21304_v18  ;;  %v21377_v18 = vld [vmem:[#allocation15 + $0x4a0] ss:$48 sps:$4 sm:$0xff]  }
 0x83f   :  { %13285 = vmatpush1.bf16.msra.mxu0 %v21299_v12  ;;  %v21380_v12 = vld [vmem:[#allocation15 + $0x4a8] ss:$48 sps:$4 sm:$0xff]  }
 0x840   :  { %13371 = vmatpush1.bf16.msra.mxu1 %v21302_v23  ;;  %13383 = vmatprep.subr.bf16.mxu0 %v21307_v53  ;;  %v21385_v23 = vld [vmem:[#allocation15 + $0x504] ss:$48 sps:$4 sm:$0xff]   ;;  %v21388_v53 = vld [vmem:[#allocation15 + $0x50c] ss:$48 sps:$4 sm:$0xff]  }
 0x841   :  { %13469 = vmatprep.subr.bf16.mxu1 %v21310_v32  ;;  %v21383_v32 = vld [vmem:[#allocation15 + $0x500] ss:$48 sps:$4 sm:$0xff]  }
 0x842   :  { %13287 = vmatmul.mubr.bf16.vlgmr.msra.gmra.mrb[36].mxu0 %v23449_v4 }
 0x843   :  { %13373 = vmatmul.mubr.bf16.vlgmr.msra.gmra.mrb[36].mxu1 %v23449_v4  ;;  %13384 = vmatpush1.bf16.msra.mxu0 %v21305_v57  ;;  %v21386_v57 = vld [vmem:[#allocation15 + $0x508] ss:$48 sps:$4 sm:$0xff]  }
 0x844   :  { %13415 = vmatprep.mubr.bf16.mxu0 %v23454_v22  ;;  %13470 = vmatpush1.bf16.msra.mxu1 %v21308_v24  ;;  %v21391_v24 = vld [vmem:[#allocation15 + $0x564] ss:$48 sps:$4 sm:$0xff]  }
 0x845   :  { %13501 = vmatprep.mubr.bf16.mxu1 %v23454_v22  ;;  %13385 = vmatprep.subr.bf16.mxu0 %v21313_v36  ;;  %v21329_v22 = vld [vmem:[#allocation15 + $0x1a0] ss:$48 sps:$4 sm:$0xff]   ;;  %v21394_v36 = vld [vmem:[#allocation15 + $0x56c] ss:$48 sps:$4 sm:$0xff]  }
 0x846   :  { %13471 = vmatprep.subr.bf16.mxu1 %v21316_v55  ;;  %v21389_v55 = vld [vmem:[#allocation15 + $0x560] ss:$48 sps:$4 sm:$0xff]  }
 0x847   :  { %13386 = vmatpush1.bf16.msra.mxu0 %v21311_v37  ;;  %v21392_v37 = vld [vmem:[#allocation15 + $0x568] ss:$48 sps:$4 sm:$0xff]  }
 0x848   :  { %13472 = vmatpush1.bf16.msra.mxu1 %v21314_v38  ;;  %13387 = vmatprep.subr.bf16.mxu0 %v21319_v28  ;;  %v21397_v38 = vld [vmem:[#allocation15 + $0x5c4] ss:$48 sps:$4 sm:$0xff]   ;;  %v21400_v28 = vld [vmem:[#allocation15 + $0x5cc] ss:$48 sps:$4 sm:$0xff]  }
 0x849   :  { %13473 = vmatprep.subr.bf16.mxu1 %v21322_v30  ;;  %v21395_v30 = vld [vmem:[#allocation15 + $0x5c0] ss:$48 sps:$4 sm:$0xff]  }
 0x84b   :  { %13388 = vmatpush1.bf16.msra.mxu0 %v21317_v31  ;;  %v21398_v31 = vld [vmem:[#allocation15 + $0x5c8] ss:$48 sps:$4 sm:$0xff]  }
 0x84c   :  { %13474 = vmatpush1.bf16.msra.mxu1 %v21320_v45  ;;  %13389 = vmatprep.subr.bf16.mxu0 %v21325_v62  ;;  %v21403_v45 = vld [vmem:[#allocation15 + $0x624] ss:$48 sps:$4 sm:$0xff]   ;;  %v21406_v62 = vld [vmem:[#allocation15 + $0x62c] ss:$48 sps:$4 sm:$0xff]  }
 0x84d   :  { %13475 = vmatprep.subr.bf16.mxu1 %v21328_v29  ;;  %v21401_v29 = vld [vmem:[#allocation15 + $0x620] ss:$48 sps:$4 sm:$0xff]  }
 0x84f   :  { %13390 = vmatpush1.bf16.msra.mxu0 %v21323_v39  ;;  %v21404_v39 = vld [vmem:[#allocation15 + $0x628] ss:$48 sps:$4 sm:$0xff]  }
 0x850   :  { %13476 = vmatpush1.bf16.msra.mxu1 %v21326_v33  ;;  %13391 = vmatprep.subr.bf16.mxu0 %v21331_v54  ;;  %v21409_v33 = vld [vmem:[#allocation15 + $0x684] ss:$48 sps:$4 sm:$0xff]   ;;  %v21412_v54 = vld [vmem:[#allocation15 + $0x68c] ss:$48 sps:$4 sm:$0xff]  }
 0x851   :  { %13477 = vmatprep.subr.bf16.mxu1 %v21334_v46  ;;  %v21407_v46 = vld [vmem:[#allocation15 + $0x680] ss:$48 sps:$4 sm:$0xff]  }
 0x853   :  { %13392 = vmatpush1.bf16.msra.mxu0 %v21329_v22  ;;  %v21410_v22 = vld [vmem:[#allocation15 + $0x688] ss:$48 sps:$4 sm:$0xff]  }
 0x854   :  { %13478 = vmatpush1.bf16.msra.mxu1 %v21332_v59  ;;  %13393 = vmatprep.subr.bf16.mxu0 %v21337_v5  ;;  %v21415_v59 = vld [vmem:[#allocation15 + $0x6e4] ss:$48 sps:$4 sm:$0xff]   ;;  %v21418_v5 = vld [vmem:[#allocation15 + $0x6ec] ss:$48 sps:$4 sm:$0xff]  }
 0x855   :  { %13479 = vmatprep.subr.bf16.mxu1 %v21340_v26  ;;  %v21413_v26 = vld [vmem:[#allocation15 + $0x6e0] ss:$48 sps:$4 sm:$0xff]  }
 0x857   :  { %13394 = vmatpush1.bf16.msra.mxu0 %v21335_v50  ;;  %v21416_v50 = vld [vmem:[#allocation15 + $0x6e8] ss:$48 sps:$4 sm:$0xff]  }
 0x858   :  { %13480 = vmatpush1.bf16.msra.mxu1 %v21338_v47  ;;  %13395 = vmatprep.subr.bf16.mxu0 %v21343_v35  ;;  %v21421_v47 = vld [vmem:[#allocation15 + $0x744] ss:$48 sps:$4 sm:$0xff]   ;;  %v21419_v35 = vld [vmem:[#allocation15 + $0x740] ss:$48 sps:$4 sm:$0xff]  }
 0x859   :  { %13481 = vmatprep.subr.bf16.mxu1 %v21346_v6  ;;  %v21422_v6 = vld [vmem:[#allocation15 + $0x748] ss:$48 sps:$4 sm:$0xff]  }
 0x85b   :  { %13396 = vmatpush1.bf16.msra.mxu0 %v21341_v63  ;;  %v21427_v63 = vld [vmem:[#allocation15 + $0x7a4] ss:$48 sps:$4 sm:$0xff]  }
 0x85c   :  { %13482 = vmatpush1.bf16.msra.mxu1 %v21344_v42  ;;  %13397 = vmatprep.subr.bf16.mxu0 %v21349_v34  ;;  %v21430_v42 = vld [vmem:[#allocation15 + $0x7ac] ss:$48 sps:$4 sm:$0xff]   ;;  %v21428_v34 = vld [vmem:[#allocation15 + $0x7a8] ss:$48 sps:$4 sm:$0xff]  }
 0x85d   :  { %13483 = vmatprep.subr.bf16.mxu1 %v21352_v3  ;;  %v21433_v3 = vld [vmem:[#allocation15 + $0x804] ss:$48 sps:$4 sm:$0xff]  }
 0x85f   :  { %13398 = vmatpush1.bf16.msra.mxu0 %v21347_v0  ;;  %v21436_v0 = vld [vmem:[#allocation15 + $0x80c] ss:$48 sps:$4 sm:$0xff]  }
 0x860   :  { %13484 = vmatpush1.bf16.msra.mxu1 %v21350_v7  ;;  %13399 = vmatprep.subr.bf16.mxu0 %v21355_v8  ;;  %v21431_v7 = vld [vmem:[#allocation15 + $0x800] ss:$48 sps:$4 sm:$0xff]   ;;  %v21434_v8 = vld [vmem:[#allocation15 + $0x808] ss:$48 sps:$4 sm:$0xff]  }
 0x861   :  { %13485 = vmatprep.subr.bf16.mxu1 %v21358_v1  ;;  %v21439_v1 = vld [vmem:[#allocation15 + $0x864] ss:$48 sps:$4 sm:$0xff]  }
 0x863   :  { %13400 = vmatpush1.bf16.msra.mxu0 %v21353_v9  ;;  %v21442_v9 = vld [vmem:[#allocation15 + $0x86c] ss:$48 sps:$4 sm:$0xff]  }
 0x864   :  { %13486 = vmatpush1.bf16.msra.mxu1 %v21356_v43  ;;  %13401 = vmatprep.subr.bf16.mxu0 %v21361_v25  ;;  %v21437_v43 = vld [vmem:[#allocation15 + $0x860] ss:$48 sps:$4 sm:$0xff]   ;;  %v21440_v25 = vld [vmem:[#allocation15 + $0x868] ss:$48 sps:$4 sm:$0xff]  }
 0x865   :  { %13487 = vmatprep.subr.bf16.mxu1 %v21364_v51  ;;  %v21445_v51 = vld [vmem:[#allocation15 + $0x8c4] ss:$48 sps:$4 sm:$0xff]  }
 0x867   :  { %13402 = vmatpush1.bf16.msra.mxu0 %v21359_v10  ;;  %v21448_v10 = vld [vmem:[#allocation15 + $0x8cc] ss:$48 sps:$4 sm:$0xff]  }
 0x868   :  { %13488 = vmatpush1.bf16.msra.mxu1 %v21362_v2  ;;  %13403 = vmatprep.subr.bf16.mxu0 %v21367_v60  ;;  %v21443_v2 = vld [vmem:[#allocation15 + $0x8c0] ss:$48 sps:$4 sm:$0xff]   ;;  %v21446_v60 = vld [vmem:[#allocation15 + $0x8c8] ss:$48 sps:$4 sm:$0xff]  }
 0x869   :  { %13489 = vmatprep.subr.bf16.mxu1 %v21370_v27  ;;  %v21451_v27 = vld [vmem:[#allocation15 + $0x924] ss:$48 sps:$4 sm:$0xff]  }
 0x86b   :  { %13404 = vmatpush1.bf16.msra.mxu0 %v21365_v61  ;;  %v21454_v61 = vld [vmem:[#allocation15 + $0x92c] ss:$48 sps:$4 sm:$0xff]  }
 0x86c   :  { %13490 = vmatpush1.bf16.msra.mxu1 %v21368_v16  ;;  %13405 = vmatprep.subr.bf16.mxu0 %v21373_v17  ;;  %v21449_v16 = vld [vmem:[#allocation15 + $0x920] ss:$48 sps:$4 sm:$0xff]   ;;  %v21452_v17 = vld [vmem:[#allocation15 + $0x928] ss:$48 sps:$4 sm:$0xff]  }
 0x86d   :  { %13491 = vmatprep.subr.bf16.mxu1 %v21376_v20  ;;  %v21457_v20 = vld [vmem:[#allocation15 + $0x984] ss:$48 sps:$4 sm:$0xff]  }
 0x86f   :  { %13406 = vmatpush1.bf16.msra.mxu0 %v21371_v52  ;;  %v21460_v52 = vld [vmem:[#allocation15 + $0x98c] ss:$48 sps:$4 sm:$0xff]  }
 0x870   :  { %13492 = vmatpush1.bf16.msra.mxu1 %v21374_v11  ;;  %13407 = vmatprep.subr.bf16.mxu0 %v21379_v19  ;;  %v21455_v11 = vld [vmem:[#allocation15 + $0x980] ss:$48 sps:$4 sm:$0xff]   ;;  %v21458_v19 = vld [vmem:[#allocation15 + $0x988] ss:$48 sps:$4 sm:$0xff]  }
 0x871   :  { %13493 = vmatprep.subr.bf16.mxu1 %v21382_v56  ;;  %v21463_v56 = vld [vmem:[#allocation15 + $0x9e4] ss:$48 sps:$4 sm:$0xff]  }
 0x873   :  { %13408 = vmatpush1.bf16.msra.mxu0 %v21377_v18  ;;  %v21466_v18 = vld [vmem:[#allocation15 + $0x9ec] ss:$48 sps:$4 sm:$0xff]  }
 0x874   :  { %13494 = vmatpush1.bf16.msra.mxu1 %v21380_v12  ;;  %13409 = vmatprep.subr.bf16.mxu0 %v21385_v23  ;;  %v21461_v12 = vld [vmem:[#allocation15 + $0x9e0] ss:$48 sps:$4 sm:$0xff]   ;;  %v21464_v23 = vld [vmem:[#allocation15 + $0x9e8] ss:$48 sps:$4 sm:$0xff]  }
 0x875   :  { %13495 = vmatprep.subr.bf16.mxu1 %v21388_v53  ;;  %v21469_v53 = vld [vmem:[#allocation15 + $0xa44] ss:$48 sps:$4 sm:$0xff]  }
 0x877   :  { %13410 = vmatpush1.bf16.msra.mxu0 %v21383_v32  ;;  %v21472_v32 = vld [vmem:[#allocation15 + $0xa4c] ss:$48 sps:$4 sm:$0xff]  }
 0x878   :  { %13496 = vmatpush1.bf16.msra.mxu1 %v21386_v57  ;;  %13411 = vmatprep.subr.bf16.mxu0 %v21391_v24  ;;  %v21467_v57 = vld [vmem:[#allocation15 + $0xa40] ss:$48 sps:$4 sm:$0xff]   ;;  %v21470_v24 = vld [vmem:[#allocation15 + $0xa48] ss:$48 sps:$4 sm:$0xff]  }
 0x879   :  { %13497 = vmatprep.subr.bf16.mxu1 %v21394_v36  ;;  %v21475_v36 = vld [vmem:[#allocation15 + $0xaa4] ss:$48 sps:$4 sm:$0xff]  }
 0x87b   :  { %13412 = vmatpush1.bf16.msra.mxu0 %v21389_v55  ;;  %v21478_v55 = vld [vmem:[#allocation15 + $0xaac] ss:$48 sps:$4 sm:$0xff]  }
 0x87c   :  { %13498 = vmatpush1.bf16.msra.mxu1 %v21392_v37  ;;  %13413 = vmatprep.subr.bf16.mxu0 %v21397_v38  ;;  %v21473_v37 = vld [vmem:[#allocation15 + $0xaa0] ss:$48 sps:$4 sm:$0xff]   ;;  %v21476_v38 = vld [vmem:[#allocation15 + $0xaa8] ss:$48 sps:$4 sm:$0xff]  }
 0x87d   :  { %13499 = vmatprep.subr.bf16.mxu1 %v21400_v28  ;;  %v21481_v28 = vld [vmem:[#allocation15 + $0xb04] ss:$48 sps:$4 sm:$0xff]  }
 0x87f   :  { %13414 = vmatpush1.bf16.msra.mxu0 %v21395_v30  ;;  %v21484_v30 = vld [vmem:[#allocation15 + $0xb0c] ss:$48 sps:$4 sm:$0xff]  }
 0x880   :  { %13500 = vmatpush1.bf16.msra.mxu1 %v21398_v31  ;;  %13426 = vmatprep.subr.bf16.mxu0 %v21403_v45  ;;  %v21479_v31 = vld [vmem:[#allocation15 + $0xb00] ss:$48 sps:$4 sm:$0xff]   ;;  %v21482_v45 = vld [vmem:[#allocation15 + $0xb08] ss:$48 sps:$4 sm:$0xff]  }
 0x881   :  { %13512 = vmatprep.subr.bf16.mxu1 %v21406_v62  ;;  %v21487_v62 = vld [vmem:[#allocation15 + $0xb64] ss:$48 sps:$4 sm:$0xff]  }
 0x882   :  { %13416 = vmatmul.mubr.bf16.vlgmr.msra.gmra.mrb[40].mxu0 %v23444_v58 }
 0x883   :  { %13502 = vmatmul.mubr.bf16.vlgmr.msra.gmra.mrb[40].mxu1 %v23444_v58  ;;  %13427 = vmatpush1.bf16.msra.mxu0 %v21401_v29  ;;  %v21424_v58 = vld [vmem:[#allocation15 + $0x74c] ss:$48 sps:$4 sm:$0xff]  }
 0x884   :  { %13458 = vmatprep.mubr.bf16.mxu0 %v23459_v41  ;;  %13513 = vmatpush1.bf16.msra.mxu1 %v21404_v39  ;;  %v21490_v29 = vld [vmem:[#allocation15 + $0xb6c] ss:$48 sps:$4 sm:$0xff]   ;;  %v21485_v39 = vld [vmem:[#allocation15 + $0xb60] ss:$48 sps:$4 sm:$0xff]  }
 0x885   :  { %13544 = vmatprep.mubr.bf16.mxu1 %v23459_v41  ;;  %13428 = vmatprep.subr.bf16.mxu0 %v21409_v33  ;;  %v21425_v41 = vld [vmem:[#allocation15 + $0x7a0] ss:$48 sps:$4 sm:$0xff]   ;;  %v21488_v33 = vld [vmem:[#allocation15 + $0xb68] ss:$48 sps:$4 sm:$0xff]  }
 0x886   :  { %13514 = vmatprep.subr.bf16.mxu1 %v21412_v54  ;;  %v21493_v54 = vld [vmem:[#allocation15 + $0xbc4] ss:$48 sps:$4 sm:$0xff]  }
 0x887   :  { %13429 = vmatpush1.bf16.msra.mxu0 %v21407_v46  ;;  %v21496_v46 = vld [vmem:[#allocation15 + $0xbcc] ss:$48 sps:$4 sm:$0xff]  }
 0x888   :  { %13515 = vmatpush1.bf16.msra.mxu1 %v21410_v22  ;;  %13430 = vmatprep.subr.bf16.mxu0 %v21415_v59  ;;  %v21491_v22 = vld [vmem:[#allocation15 + $0xbc0] ss:$48 sps:$4 sm:$0xff]   ;;  %v21494_v59 = vld [vmem:[#allocation15 + $0xbc8] ss:$48 sps:$4 sm:$0xff]  }
 0x889   :  { %13516 = vmatprep.subr.bf16.mxu1 %v21418_v5  ;;  %v21499_v5 = vld [vmem:[#allocation16 + $0x4] ss:$48 sps:$4 sm:$0xff]  }
 0x88b   :  { %13431 = vmatpush1.bf16.msra.mxu0 %v21413_v26  ;;  %v21502_v26 = vld [vmem:[#allocation16 + $0xc] ss:$48 sps:$4 sm:$0xff]  }
 0x88c   :  { %13517 = vmatpush1.bf16.msra.mxu1 %v21416_v50  ;;  %13432 = vmatprep.subr.bf16.mxu0 %v21421_v47  ;;  %v253_v50 = vld [vmem:[%s23713_s23 + $0x88] sm:$0xff] }
 0x88d   :  { %13518 = vmatprep.subr.bf16.mxu1 %v21424_v58  ;;  %v257_v47 = vld [vmem:[%s23713_s23 + $0xa8] sm:$0xff]  ;;  %v21497_v58 = vld [vmem:[#allocation16] ss:$48 sps:$4 sm:$0xff]  }
 0x88f   :  { %13433 = vmatpush1.bf16.msra.mxu0 %v21419_v35  ;;  %v21500_v35 = vld [vmem:[#allocation16 + $0x8] ss:$48 sps:$4 sm:$0xff]  }
 0x890   :  { %13519 = vmatpush1.bf16.msra.mxu1 %v21422_v6  ;;  %13434 = vmatprep.subr.bf16.mxu0 %v21427_v63  ;;  %v21505_v6 = vld [vmem:[#allocation16 + $0x64] ss:$48 sps:$4 sm:$0xff]   ;;  %v21508_v63 = vld [vmem:[#allocation16 + $0x6c] ss:$48 sps:$4 sm:$0xff]  }
 0x891   :  { %13520 = vmatprep.subr.bf16.mxu1 %v21430_v42  ;;  %v23489_v42 = vpack.c.bf16 %v257_v47, %v253_v50  ;;  %v21578_v50 = vld [vmem:[#allocation16 + $0x4e8] ss:$48 sps:$4 sm:$0xff]   ;;  %v21583_v47 = vld [vmem:[#allocation16 + $0x544] ss:$48 sps:$4 sm:$0xff]  }
 0x893   :  { %13435 = vmatpush1.bf16.msra.mxu0 %v21425_v41  ;;  %v21503_v41 = vld [vmem:[#allocation16 + $0x60] ss:$48 sps:$4 sm:$0xff]  }
 0x894   :  { %13521 = vmatpush1.bf16.msra.mxu1 %v21428_v34  ;;  %13436 = vmatprep.subr.bf16.mxu0 %v21433_v3  ;;  %v21506_v34 = vld [vmem:[#allocation16 + $0x68] ss:$48 sps:$4 sm:$0xff]   ;;  %v21511_v3 = vld [vmem:[#allocation16 + $0xc4] ss:$48 sps:$4 sm:$0xff]  }
 0x895   :  { %13522 = vmatprep.subr.bf16.mxu1 %v21436_v0  ;;  %v21514_v0 = vld [vmem:[#allocation16 + $0xcc] ss:$48 sps:$4 sm:$0xff]  }
 0x897   :  { %13437 = vmatpush1.bf16.msra.mxu0 %v21431_v7  ;;  %v21509_v7 = vld [vmem:[#allocation16 + $0xc0] ss:$48 sps:$4 sm:$0xff]  }
 0x898   :  { %13523 = vmatpush1.bf16.msra.mxu1 %v21434_v8  ;;  %13438 = vmatprep.subr.bf16.mxu0 %v21439_v1  ;;  %v21512_v8 = vld [vmem:[#allocation16 + $0xc8] ss:$48 sps:$4 sm:$0xff]   ;;  %v21517_v1 = vld [vmem:[#allocation16 + $0x124] ss:$48 sps:$4 sm:$0xff]  }
 0x899   :  { %13524 = vmatprep.subr.bf16.mxu1 %v21442_v9  ;;  %v21515_v9 = vld [vmem:[#allocation16 + $0x120] ss:$48 sps:$4 sm:$0xff]  }
 0x89b   :  { %13439 = vmatpush1.bf16.msra.mxu0 %v21437_v43  ;;  %v21518_v43 = vld [vmem:[#allocation16 + $0x128] ss:$48 sps:$4 sm:$0xff]  }
 0x89c   :  { %13525 = vmatpush1.bf16.msra.mxu1 %v21440_v25  ;;  %13440 = vmatprep.subr.bf16.mxu0 %v21445_v51  ;;  %v21523_v25 = vld [vmem:[#allocation16 + $0x184] ss:$48 sps:$4 sm:$0xff]   ;;  %v21526_v51 = vld [vmem:[#allocation16 + $0x18c] ss:$48 sps:$4 sm:$0xff]  }
 0x89d   :  { %13526 = vmatprep.subr.bf16.mxu1 %v21448_v10  ;;  %v21521_v10 = vld [vmem:[#allocation16 + $0x180] ss:$48 sps:$4 sm:$0xff]  }
 0x89f   :  { %13441 = vmatpush1.bf16.msra.mxu0 %v21443_v2  ;;  %v21524_v2 = vld [vmem:[#allocation16 + $0x188] ss:$48 sps:$4 sm:$0xff]  }
 0x8a0   :  { %13527 = vmatpush1.bf16.msra.mxu1 %v21446_v60  ;;  %13442 = vmatprep.subr.bf16.mxu0 %v21451_v27  ;;  %v21529_v60 = vld [vmem:[#allocation16 + $0x1e4] ss:$48 sps:$4 sm:$0xff]   ;;  %v21532_v27 = vld [vmem:[#allocation16 + $0x1ec] ss:$48 sps:$4 sm:$0xff]  }
 0x8a1   :  { %13528 = vmatprep.subr.bf16.mxu1 %v21454_v61  ;;  %v21527_v61 = vld [vmem:[#allocation16 + $0x1e0] ss:$48 sps:$4 sm:$0xff]  }
 0x8a3   :  { %13443 = vmatpush1.bf16.msra.mxu0 %v21449_v16  ;;  %v21530_v16 = vld [vmem:[#allocation16 + $0x1e8] ss:$48 sps:$4 sm:$0xff]  }
 0x8a4   :  { %13529 = vmatpush1.bf16.msra.mxu1 %v21452_v17  ;;  %13444 = vmatprep.subr.bf16.mxu0 %v21457_v20  ;;  %v21535_v17 = vld [vmem:[#allocation16 + $0x244] ss:$48 sps:$4 sm:$0xff]   ;;  %v21538_v20 = vld [vmem:[#allocation16 + $0x24c] ss:$48 sps:$4 sm:$0xff]  }
 0x8a5   :  { %13530 = vmatprep.subr.bf16.mxu1 %v21460_v52  ;;  %v21533_v52 = vld [vmem:[#allocation16 + $0x240] ss:$48 sps:$4 sm:$0xff]  }
 0x8a7   :  { %13445 = vmatpush1.bf16.msra.mxu0 %v21455_v11  ;;  %v21536_v11 = vld [vmem:[#allocation16 + $0x248] ss:$48 sps:$4 sm:$0xff]  }
 0x8a8   :  { %13531 = vmatpush1.bf16.msra.mxu1 %v21458_v19  ;;  %13446 = vmatprep.subr.bf16.mxu0 %v21463_v56  ;;  %v21541_v19 = vld [vmem:[#allocation16 + $0x2a4] ss:$48 sps:$4 sm:$0xff]   ;;  %v21544_v56 = vld [vmem:[#allocation16 + $0x2ac] ss:$48 sps:$4 sm:$0xff]  }
 0x8a9   :  { %13532 = vmatprep.subr.bf16.mxu1 %v21466_v18  ;;  %v21539_v18 = vld [vmem:[#allocation16 + $0x2a0] ss:$48 sps:$4 sm:$0xff]  }
 0x8ab   :  { %13447 = vmatpush1.bf16.msra.mxu0 %v21461_v12  ;;  %v21542_v12 = vld [vmem:[#allocation16 + $0x2a8] ss:$48 sps:$4 sm:$0xff]  }
 0x8ac   :  { %13533 = vmatpush1.bf16.msra.mxu1 %v21464_v23  ;;  %13448 = vmatprep.subr.bf16.mxu0 %v21469_v53  ;;  %v21547_v23 = vld [vmem:[#allocation16 + $0x304] ss:$48 sps:$4 sm:$0xff]   ;;  %v21550_v53 = vld [vmem:[#allocation16 + $0x30c] ss:$48 sps:$4 sm:$0xff]  }
 0x8ad   :  { %13534 = vmatprep.subr.bf16.mxu1 %v21472_v32  ;;  %v21545_v32 = vld [vmem:[#allocation16 + $0x300] ss:$48 sps:$4 sm:$0xff]  }
 0x8af   :  { %13449 = vmatpush1.bf16.msra.mxu0 %v21467_v57  ;;  %v21548_v57 = vld [vmem:[#allocation16 + $0x308] ss:$48 sps:$4 sm:$0xff]  }
 0x8b0   :  { %13535 = vmatpush1.bf16.msra.mxu1 %v21470_v24  ;;  %13450 = vmatprep.subr.bf16.mxu0 %v21475_v36  ;;  %v21553_v24 = vld [vmem:[#allocation16 + $0x364] ss:$48 sps:$4 sm:$0xff]   ;;  %v21556_v36 = vld [vmem:[#allocation16 + $0x36c] ss:$48 sps:$4 sm:$0xff]  }
 0x8b1   :  { %13536 = vmatprep.subr.bf16.mxu1 %v21478_v55  ;;  %v21551_v55 = vld [vmem:[#allocation16 + $0x360] ss:$48 sps:$4 sm:$0xff]  }
 0x8b3   :  { %13451 = vmatpush1.bf16.msra.mxu0 %v21473_v37  ;;  %v21554_v37 = vld [vmem:[#allocation16 + $0x368] ss:$48 sps:$4 sm:$0xff]  }
 0x8b4   :  { %13537 = vmatpush1.bf16.msra.mxu1 %v21476_v38  ;;  %13452 = vmatprep.subr.bf16.mxu0 %v21481_v28  ;;  %v21559_v38 = vld [vmem:[#allocation16 + $0x3c4] ss:$48 sps:$4 sm:$0xff]   ;;  %v21562_v28 = vld [vmem:[#allocation16 + $0x3cc] ss:$48 sps:$4 sm:$0xff]  }
 0x8b5   :  { %13538 = vmatprep.subr.bf16.mxu1 %v21484_v30  ;;  %v21557_v30 = vld [vmem:[#allocation16 + $0x3c0] ss:$48 sps:$4 sm:$0xff]  }
 0x8b7   :  { %13453 = vmatpush1.bf16.msra.mxu0 %v21479_v31  ;;  %v21560_v31 = vld [vmem:[#allocation16 + $0x3c8] ss:$48 sps:$4 sm:$0xff]  }
 0x8b8   :  { %13539 = vmatpush1.bf16.msra.mxu1 %v21482_v45  ;;  %13454 = vmatprep.subr.bf16.mxu0 %v21487_v62  ;;  %v21565_v45 = vld [vmem:[#allocation16 + $0x424] ss:$48 sps:$4 sm:$0xff]   ;;  %v21568_v62 = vld [vmem:[#allocation16 + $0x42c] ss:$48 sps:$4 sm:$0xff]  }
 0x8b9   :  { %13540 = vmatprep.subr.bf16.mxu1 %v21490_v29  ;;  %v21563_v29 = vld [vmem:[#allocation16 + $0x420] ss:$48 sps:$4 sm:$0xff]  }
 0x8bb   :  { %13455 = vmatpush1.bf16.msra.mxu0 %v21485_v39  ;;  %v21566_v39 = vld [vmem:[#allocation16 + $0x428] ss:$48 sps:$4 sm:$0xff]  }
 0x8bc   :  { %13541 = vmatpush1.bf16.msra.mxu1 %v21488_v33  ;;  %13456 = vmatprep.subr.bf16.mxu0 %v21493_v54  ;;  %v21571_v33 = vld [vmem:[#allocation16 + $0x484] ss:$48 sps:$4 sm:$0xff]   ;;  %v21574_v54 = vld [vmem:[#allocation16 + $0x48c] ss:$48 sps:$4 sm:$0xff]  }
 0x8bd   :  { %13542 = vmatprep.subr.bf16.mxu1 %v21496_v46  ;;  %v21569_v46 = vld [vmem:[#allocation16 + $0x480] ss:$48 sps:$4 sm:$0xff]  }
 0x8bf   :  { %13457 = vmatpush1.bf16.msra.mxu0 %v21491_v22  ;;  %v21572_v22 = vld [vmem:[#allocation16 + $0x488] ss:$48 sps:$4 sm:$0xff]  }
 0x8c0   :  { %13543 = vmatpush1.bf16.msra.mxu1 %v21494_v59  ;;  %15541 = vmatprep.subr.bf16.mxu0 %v21499_v5  ;;  %v21577_v59 = vld [vmem:[#allocation16 + $0x4e4] ss:$48 sps:$4 sm:$0xff]   ;;  %v21580_v5 = vld [vmem:[#allocation16 + $0x4ec] ss:$48 sps:$4 sm:$0xff]  }
 0x8c1   :  { %15627 = vmatprep.subr.bf16.mxu1 %v21502_v26  ;;  %v21575_v26 = vld [vmem:[#allocation16 + $0x4e0] ss:$48 sps:$4 sm:$0xff]  }
 0x8c2   :  { %13459 = vmatmul.mubr.bf16.vlgmr.msra.gmra.mrb[40].mxu0 %v23449_v4 }
 0x8c3   :  { %13545 = vmatmul.mubr.bf16.vlgmr.msra.gmra.mrb[40].mxu1 %v23449_v4  ;;  %15542 = vmatpush1.bf16.msra.mxu0 %v21497_v58  ;;  %v21520_v4 = vld [vmem:[#allocation16 + $0x12c] ss:$48 sps:$4 sm:$0xff]  }
 0x8c4   :  { %15628 = vmatpush1.bf16.msra.mxu1 %v21500_v35  ;;  %15543 = vmatprep.subr.bf16.mxu0 %v21505_v6  ;;  %v21586_v58 = vld [vmem:[#allocation16 + $0x54c] ss:$48 sps:$4 sm:$0xff]   ;;  %v21581_v35 = vld [vmem:[#allocation16 + $0x540] ss:$48 sps:$4 sm:$0xff]   ;;  %v21584_v6 = vld [vmem:[#allocation16 + $0x548] ss:$48 sps:$4 sm:$0xff]  }
 0x8c5   :  { %15629 = vmatprep.subr.bf16.mxu1 %v21508_v63  ;;  %15573 = vmatprep.mubr.bf16.mxu0 %v23489_v42  ;;  %v21589_v63 = vld [vmem:[#allocation16 + $0x5a4] ss:$48 sps:$4 sm:$0xff]  }
 0x8c6   :  { %15659 = vmatprep.mubr.bf16.mxu1 %v23489_v42 }
 0x8c7   :  { %15544 = vmatpush1.bf16.msra.mxu0 %v21503_v41  ;;  %v21592_v41 = vld [vmem:[#allocation16 + $0x5ac] ss:$48 sps:$4 sm:$0xff]  }
 0x8c8   :  { %15630 = vmatpush1.bf16.msra.mxu1 %v21506_v34  ;;  %15545 = vmatprep.subr.bf16.mxu0 %v21511_v3  ;;  %v21587_v34 = vld [vmem:[#allocation16 + $0x5a0] ss:$48 sps:$4 sm:$0xff]  }
 0x8c9   :  { %15631 = vmatprep.subr.bf16.mxu1 %v21514_v0  ;;  %v252_v3 = vld [vmem:[%s23713_s23 + $0x80] sm:$0xff] }
 0x8ca   :  { %v256_v0 = vld [vmem:[%s23713_s23 + $0xa0] sm:$0xff] }
 0x8cb   :  { %15546 = vmatpush1.bf16.msra.mxu0 %v21509_v7  ;;  %v21590_v7 = vld [vmem:[#allocation16 + $0x5a8] ss:$48 sps:$4 sm:$0xff]  }
 0x8cc   :  { %15632 = vmatpush1.bf16.msra.mxu1 %v21512_v8  ;;  %15547 = vmatprep.subr.bf16.mxu0 %v21517_v1  ;;  %v21595_v8 = vld [vmem:[#allocation16 + $0x604] ss:$48 sps:$4 sm:$0xff]   ;;  %v21598_v1 = vld [vmem:[#allocation16 + $0x60c] ss:$48 sps:$4 sm:$0xff]  }
 0x8cd   :  { %15633 = vmatprep.subr.bf16.mxu1 %v21520_v4  ;;  %v23501_v4 = vpack.c.bf16 %v256_v0, %v252_v3  ;;  %v21667_v3 = vld [vmem:[#allocation16 + $0xa84] ss:$48 sps:$4 sm:$0xff]   ;;  %v21670_v0 = vld [vmem:[#allocation16 + $0xa8c] ss:$48 sps:$4 sm:$0xff]  }
 0x8cf   :  { %15548 = vmatpush1.bf16.msra.mxu0 %v21515_v9  ;;  %v255_v9 = vld [vmem:[%s23713_s23 + $0x98] sm:$0xff] }
 0x8d0   :  { %15634 = vmatpush1.bf16.msra.mxu1 %v21518_v43  ;;  %15549 = vmatprep.subr.bf16.mxu0 %v21523_v25  ;;  %v259_v43 = vld [vmem:[%s23713_s23 + $0xb8] sm:$0xff]  ;;  %v21593_v25 = vld [vmem:[#allocation16 + $0x600] ss:$48 sps:$4 sm:$0xff]  }
 0x8d1   :  { %15635 = vmatprep.subr.bf16.mxu1 %v21526_v51  ;;  %v21596_v51 = vld [vmem:[#allocation16 + $0x608] ss:$48 sps:$4 sm:$0xff]  }
 0x8d3   :  { %15550 = vmatpush1.bf16.msra.mxu0 %v21521_v10  ;;  %v21601_v10 = vld [vmem:[#allocation16 + $0x664] ss:$48 sps:$4 sm:$0xff]  }
 0x8d4   :  { %15636 = vmatpush1.bf16.msra.mxu1 %v21524_v2  ;;  %15551 = vmatprep.subr.bf16.mxu0 %v21529_v60  ;;  %v21604_v2 = vld [vmem:[#allocation16 + $0x66c] ss:$48 sps:$4 sm:$0xff]   ;;  %v23509_v60 = vpack.c.bf16 %v259_v43, %v255_v9  ;;  %v21671_v43 = vld [vmem:[#allocation16 + $0xae0] ss:$48 sps:$4 sm:$0xff]  }
 0x8d5   :  { %15637 = vmatprep.subr.bf16.mxu1 %v21532_v27  ;;  %v21599_v27 = vld [vmem:[#allocation16 + $0x660] ss:$48 sps:$4 sm:$0xff]   ;;  %v21676_v9 = vld [vmem:[#allocation16 + $0xaec] ss:$48 sps:$4 sm:$0xff]  }
 0x8d7   :  { %15552 = vmatpush1.bf16.msra.mxu0 %v21527_v61  ;;  %v21602_v61 = vld [vmem:[#allocation16 + $0x668] ss:$48 sps:$4 sm:$0xff]  }
 0x8d8   :  { %15638 = vmatpush1.bf16.msra.mxu1 %v21530_v16  ;;  %15553 = vmatprep.subr.bf16.mxu0 %v21535_v17  ;;  %v21607_v16 = vld [vmem:[#allocation16 + $0x6c4] ss:$48 sps:$4 sm:$0xff]   ;;  %v21610_v17 = vld [vmem:[#allocation16 + $0x6cc] ss:$48 sps:$4 sm:$0xff]  }
 0x8d9   :  { %15639 = vmatprep.subr.bf16.mxu1 %v21538_v20  ;;  %v21605_v20 = vld [vmem:[#allocation16 + $0x6c0] ss:$48 sps:$4 sm:$0xff]  }
 0x8db   :  { %15554 = vmatpush1.bf16.msra.mxu0 %v21533_v52  ;;  %v21608_v52 = vld [vmem:[#allocation16 + $0x6c8] ss:$48 sps:$4 sm:$0xff]  }
 0x8dc   :  { %15640 = vmatpush1.bf16.msra.mxu1 %v21536_v11  ;;  %15555 = vmatprep.subr.bf16.mxu0 %v21541_v19  ;;  %v21613_v11 = vld [vmem:[#allocation16 + $0x724] ss:$48 sps:$4 sm:$0xff]   ;;  %v21616_v19 = vld [vmem:[#allocation16 + $0x72c] ss:$48 sps:$4 sm:$0xff]  }
 0x8dd   :  { %15641 = vmatprep.subr.bf16.mxu1 %v21544_v56  ;;  %v21611_v56 = vld [vmem:[#allocation16 + $0x720] ss:$48 sps:$4 sm:$0xff]  }
 0x8df   :  { %15556 = vmatpush1.bf16.msra.mxu0 %v21539_v18  ;;  %v21614_v18 = vld [vmem:[#allocation16 + $0x728] ss:$48 sps:$4 sm:$0xff]  }
 0x8e0   :  { %15642 = vmatpush1.bf16.msra.mxu1 %v21542_v12  ;;  %15557 = vmatprep.subr.bf16.mxu0 %v21547_v23  ;;  %v21619_v12 = vld [vmem:[#allocation16 + $0x784] ss:$48 sps:$4 sm:$0xff]   ;;  %v21622_v23 = vld [vmem:[#allocation16 + $0x78c] ss:$48 sps:$4 sm:$0xff]  }
 0x8e1   :  { %15643 = vmatprep.subr.bf16.mxu1 %v21550_v53  ;;  %v21617_v53 = vld [vmem:[#allocation16 + $0x780] ss:$48 sps:$4 sm:$0xff]  }
 0x8e3   :  { %15558 = vmatpush1.bf16.msra.mxu0 %v21545_v32  ;;  %v21620_v32 = vld [vmem:[#allocation16 + $0x788] ss:$48 sps:$4 sm:$0xff]  }
 0x8e4   :  { %15644 = vmatpush1.bf16.msra.mxu1 %v21548_v57  ;;  %15559 = vmatprep.subr.bf16.mxu0 %v21553_v24  ;;  %v21625_v57 = vld [vmem:[#allocation16 + $0x7e4] ss:$48 sps:$4 sm:$0xff]   ;;  %v21628_v24 = vld [vmem:[#allocation16 + $0x7ec] ss:$48 sps:$4 sm:$0xff]  }
 0x8e5   :  { %15645 = vmatprep.subr.bf16.mxu1 %v21556_v36  ;;  %v21623_v36 = vld [vmem:[#allocation16 + $0x7e0] ss:$48 sps:$4 sm:$0xff]  }
 0x8e7   :  { %15560 = vmatpush1.bf16.msra.mxu0 %v21551_v55  ;;  %v21626_v55 = vld [vmem:[#allocation16 + $0x7e8] ss:$48 sps:$4 sm:$0xff]  }
 0x8e8   :  { %15646 = vmatpush1.bf16.msra.mxu1 %v21554_v37  ;;  %15561 = vmatprep.subr.bf16.mxu0 %v21559_v38  ;;  %v21631_v37 = vld [vmem:[#allocation16 + $0x844] ss:$48 sps:$4 sm:$0xff]   ;;  %v21634_v38 = vld [vmem:[#allocation16 + $0x84c] ss:$48 sps:$4 sm:$0xff]  }
 0x8e9   :  { %15647 = vmatprep.subr.bf16.mxu1 %v21562_v28  ;;  %v21629_v28 = vld [vmem:[#allocation16 + $0x840] ss:$48 sps:$4 sm:$0xff]  }
 0x8eb   :  { %15562 = vmatpush1.bf16.msra.mxu0 %v21557_v30  ;;  %v21632_v30 = vld [vmem:[#allocation16 + $0x848] ss:$48 sps:$4 sm:$0xff]  }
 0x8ec   :  { %15648 = vmatpush1.bf16.msra.mxu1 %v21560_v31  ;;  %15563 = vmatprep.subr.bf16.mxu0 %v21565_v45  ;;  %v21637_v31 = vld [vmem:[#allocation16 + $0x8a4] ss:$48 sps:$4 sm:$0xff]   ;;  %v21640_v45 = vld [vmem:[#allocation16 + $0x8ac] ss:$48 sps:$4 sm:$0xff]  }
 0x8ed   :  { %15649 = vmatprep.subr.bf16.mxu1 %v21568_v62  ;;  %v21635_v62 = vld [vmem:[#allocation16 + $0x8a0] ss:$48 sps:$4 sm:$0xff]  }
 0x8ef   :  { %15564 = vmatpush1.bf16.msra.mxu0 %v21563_v29  ;;  %v21638_v29 = vld [vmem:[#allocation16 + $0x8a8] ss:$48 sps:$4 sm:$0xff]  }
 0x8f0   :  { %15650 = vmatpush1.bf16.msra.mxu1 %v21566_v39  ;;  %15565 = vmatprep.subr.bf16.mxu0 %v21571_v33  ;;  %v21643_v39 = vld [vmem:[#allocation16 + $0x904] ss:$48 sps:$4 sm:$0xff]   ;;  %v21646_v33 = vld [vmem:[#allocation16 + $0x90c] ss:$48 sps:$4 sm:$0xff]  }
 0x8f1   :  { %15651 = vmatprep.subr.bf16.mxu1 %v21574_v54  ;;  %v21641_v54 = vld [vmem:[#allocation16 + $0x900] ss:$48 sps:$4 sm:$0xff]  }
 0x8f3   :  { %15566 = vmatpush1.bf16.msra.mxu0 %v21569_v46  ;;  %v21644_v46 = vld [vmem:[#allocation16 + $0x908] ss:$48 sps:$4 sm:$0xff]  }
 0x8f4   :  { %15652 = vmatpush1.bf16.msra.mxu1 %v21572_v22  ;;  %15567 = vmatprep.subr.bf16.mxu0 %v21577_v59  ;;  %v21649_v22 = vld [vmem:[#allocation16 + $0x964] ss:$48 sps:$4 sm:$0xff]   ;;  %v21652_v59 = vld [vmem:[#allocation16 + $0x96c] ss:$48 sps:$4 sm:$0xff]  }
 0x8f5   :  { %15653 = vmatprep.subr.bf16.mxu1 %v21580_v5  ;;  %v21647_v5 = vld [vmem:[#allocation16 + $0x960] ss:$48 sps:$4 sm:$0xff]  }
 0x8f7   :  { %15568 = vmatpush1.bf16.msra.mxu0 %v21575_v26  ;;  %v21650_v26 = vld [vmem:[#allocation16 + $0x968] ss:$48 sps:$4 sm:$0xff]  }
 0x8f8   :  { %15654 = vmatpush1.bf16.msra.mxu1 %v21578_v50  ;;  %15569 = vmatprep.subr.bf16.mxu0 %v21583_v47  ;;  %v21655_v50 = vld [vmem:[#allocation16 + $0x9c4] ss:$48 sps:$4 sm:$0xff]   ;;  %v21658_v47 = vld [vmem:[#allocation16 + $0x9cc] ss:$48 sps:$4 sm:$0xff]  }
 0x8f9   :  { %15655 = vmatprep.subr.bf16.mxu1 %v21586_v58  ;;  %v21653_v58 = vld [vmem:[#allocation16 + $0x9c0] ss:$48 sps:$4 sm:$0xff]  }
 0x8fb   :  { %15570 = vmatpush1.bf16.msra.mxu0 %v21581_v35  ;;  %v21656_v35 = vld [vmem:[#allocation16 + $0x9c8] ss:$48 sps:$4 sm:$0xff]  }
 0x8fc   :  { %15656 = vmatpush1.bf16.msra.mxu1 %v21584_v6  ;;  %15571 = vmatprep.subr.bf16.mxu0 %v21589_v63  ;;  %v21661_v6 = vld [vmem:[#allocation16 + $0xa24] ss:$48 sps:$4 sm:$0xff]   ;;  %v21664_v63 = vld [vmem:[#allocation16 + $0xa2c] ss:$48 sps:$4 sm:$0xff]  }
 0x8fd   :  { %15657 = vmatprep.subr.bf16.mxu1 %v21592_v41  ;;  %v21659_v41 = vld [vmem:[#allocation16 + $0xa20] ss:$48 sps:$4 sm:$0xff]  }
 0x8ff   :  { %15572 = vmatpush1.bf16.msra.mxu0 %v21587_v34  ;;  %v21662_v34 = vld [vmem:[#allocation16 + $0xa28] ss:$48 sps:$4 sm:$0xff]  }
 0x900   :  { %15658 = vmatpush1.bf16.msra.mxu1 %v21590_v7  ;;  %15584 = vmatprep.subr.bf16.mxu0 %v21595_v8  ;;  %v21665_v7 = vld [vmem:[#allocation16 + $0xa80] ss:$48 sps:$4 sm:$0xff]   ;;  %v21668_v8 = vld [vmem:[#allocation16 + $0xa88] ss:$48 sps:$4 sm:$0xff]  }
 0x901   :  { %15670 = vmatprep.subr.bf16.mxu1 %v21598_v1  ;;  %v21673_v1 = vld [vmem:[#allocation16 + $0xae4] ss:$48 sps:$4 sm:$0xff]  }
 0x902   :  { %15574 = vmatmul.mubr.bf16.vlgmr.msra.gmra.mrb[32].mxu0 %v23501_v4 }
 0x903   :  { %15585 = vmatpush1.bf16.msra.mxu0 %v21593_v25  ;;  %15660 = vmatmul.mubr.bf16.vlgmr.msra.gmra.mrb[32].mxu1 %v23501_v4  ;;  %v21674_v25 = vld [vmem:[#allocation16 + $0xae8] ss:$48 sps:$4 sm:$0xff]  }
 0x904   :  { %15671 = vmatpush1.bf16.msra.mxu1 %v21596_v51  ;;  %15586 = vmatprep.subr.bf16.mxu0 %v21601_v10  ;;  %v21679_v51 = vld [vmem:[#allocation16 + $0xb44] ss:$48 sps:$4 sm:$0xff]   ;;  %v21682_v10 = vld [vmem:[#allocation16 + $0xb4c] ss:$48 sps:$4 sm:$0xff]  }
 0x905   :  { %15672 = vmatprep.subr.bf16.mxu1 %v21604_v2  ;;  %15616 = vmatprep.mubr.bf16.mxu0 %v23509_v60  ;;  %v21677_v2 = vld [vmem:[#allocation16 + $0xb40] ss:$48 sps:$4 sm:$0xff]  }
 0x906   :  { %15702 = vmatprep.mubr.bf16.mxu1 %v23509_v60 }
 0x907   :  { %15587 = vmatpush1.bf16.msra.mxu0 %v21599_v27  ;;  %v21680_v27 = vld [vmem:[#allocation16 + $0xb48] ss:$48 sps:$4 sm:$0xff]  }
 0x908   :  { %15673 = vmatpush1.bf16.msra.mxu1 %v21602_v61  ;;  %15588 = vmatprep.subr.bf16.mxu0 %v21607_v16  ;;  %v21685_v61 = vld [vmem:[#allocation16 + $0xba4] ss:$48 sps:$4 sm:$0xff]   ;;  %v21688_v16 = vld [vmem:[#allocation16 + $0xbac] ss:$48 sps:$4 sm:$0xff]  }
 0x909   :  { %15674 = vmatprep.subr.bf16.mxu1 %v21610_v17  ;;  %v21683_v17 = vld [vmem:[#allocation16 + $0xba0] ss:$48 sps:$4 sm:$0xff]  }
 0x90b   :  { %15589 = vmatpush1.bf16.msra.mxu0 %v21605_v20  ;;  %v254_v20 = vld [vmem:[%s23713_s23 + $0x90] sm:$0xff] }
 0x90c   :  { %15675 = vmatpush1.bf16.msra.mxu1 %v21608_v52  ;;  %15590 = vmatprep.subr.bf16.mxu0 %v21613_v11  ;;  %v258_v52 = vld [vmem:[%s23713_s23 + $0xb0] sm:$0xff]  ;;  %v21686_v11 = vld [vmem:[#allocation16 + $0xba8] ss:$48 sps:$4 sm:$0xff]  }
 0x90d   :  { %15676 = vmatprep.subr.bf16.mxu1 %v21616_v19  ;;  %v21691_v19 = vld [vmem:[#allocation16 + $0x14] ss:$48 sps:$4 sm:$0xff]  }
 0x90f   :  { %15591 = vmatpush1.bf16.msra.mxu0 %v21611_v56  ;;  %v21694_v56 = vld [vmem:[#allocation16 + $0x1c] ss:$48 sps:$4 sm:$0xff]  }
 0x910   :  { %15677 = vmatpush1.bf16.msra.mxu1 %v21614_v18  ;;  %15592 = vmatprep.subr.bf16.mxu0 %v21619_v12  ;;  %v23521_v18 = vpack.c.bf16 %v258_v52, %v254_v20  ;;  %v21689_v12 = vld [vmem:[#allocation16 + $0x10] ss:$48 sps:$4 sm:$0xff]   ;;  %v21766_v20 = vld [vmem:[#allocation16 + $0x49c] ss:$48 sps:$4 sm:$0xff]  }
 0x911   :  { %15678 = vmatprep.subr.bf16.mxu1 %v21622_v23  ;;  %v21692_v23 = vld [vmem:[#allocation16 + $0x18] ss:$48 sps:$4 sm:$0xff]   ;;  %v21761_v52 = vld [vmem:[#allocation16 + $0x490] ss:$48 sps:$4 sm:$0xff]  }
 0x913   :  { %15593 = vmatpush1.bf16.msra.mxu0 %v21617_v53  ;;  %v21697_v53 = vld [vmem:[#allocation16 + $0x74] ss:$48 sps:$4 sm:$0xff]  }
 0x914   :  { %15679 = vmatpush1.bf16.msra.mxu1 %v21620_v32  ;;  %15594 = vmatprep.subr.bf16.mxu0 %v21625_v57  ;;  %v21700_v32 = vld [vmem:[#allocation16 + $0x7c] ss:$48 sps:$4 sm:$0xff]   ;;  %v21695_v57 = vld [vmem:[#allocation16 + $0x70] ss:$48 sps:$4 sm:$0xff]  }
 0x915   :  { %15680 = vmatprep.subr.bf16.mxu1 %v21628_v24  ;;  %v21698_v24 = vld [vmem:[#allocation16 + $0x78] ss:$48 sps:$4 sm:$0xff]  }
 0x917   :  { %15595 = vmatpush1.bf16.msra.mxu0 %v21623_v36  ;;  %v21703_v36 = vld [vmem:[#allocation16 + $0xd4] ss:$48 sps:$4 sm:$0xff]  }
 0x918   :  { %15681 = vmatpush1.bf16.msra.mxu1 %v21626_v55  ;;  %15596 = vmatprep.subr.bf16.mxu0 %v21631_v37  ;;  %v21706_v55 = vld [vmem:[#allocation16 + $0xdc] ss:$48 sps:$4 sm:$0xff]   ;;  %v21701_v37 = vld [vmem:[#allocation16 + $0xd0] ss:$48 sps:$4 sm:$0xff]  }
 0x919   :  { %15682 = vmatprep.subr.bf16.mxu1 %v21634_v38  ;;  %v21704_v38 = vld [vmem:[#allocation16 + $0xd8] ss:$48 sps:$4 sm:$0xff]  }
 0x91b   :  { %15597 = vmatpush1.bf16.msra.mxu0 %v21629_v28  ;;  %v21709_v28 = vld [vmem:[#allocation16 + $0x134] ss:$48 sps:$4 sm:$0xff]  }
 0x91c   :  { %15683 = vmatpush1.bf16.msra.mxu1 %v21632_v30  ;;  %15598 = vmatprep.subr.bf16.mxu0 %v21637_v31  ;;  %v21712_v30 = vld [vmem:[#allocation16 + $0x13c] ss:$48 sps:$4 sm:$0xff]   ;;  %v21707_v31 = vld [vmem:[#allocation16 + $0x130] ss:$48 sps:$4 sm:$0xff]  }
 0x91d   :  { %15684 = vmatprep.subr.bf16.mxu1 %v21640_v45  ;;  %v21710_v45 = vld [vmem:[#allocation16 + $0x138] ss:$48 sps:$4 sm:$0xff]  }
 0x91f   :  { %15599 = vmatpush1.bf16.msra.mxu0 %v21635_v62  ;;  %v21715_v62 = vld [vmem:[#allocation16 + $0x194] ss:$48 sps:$4 sm:$0xff]  }
 0x920   :  { %15685 = vmatpush1.bf16.msra.mxu1 %v21638_v29  ;;  %15600 = vmatprep.subr.bf16.mxu0 %v21643_v39  ;;  %v21718_v29 = vld [vmem:[#allocation16 + $0x19c] ss:$48 sps:$4 sm:$0xff]   ;;  %v21713_v39 = vld [vmem:[#allocation16 + $0x190] ss:$48 sps:$4 sm:$0xff]  }
 0x921   :  { %15686 = vmatprep.subr.bf16.mxu1 %v21646_v33  ;;  %v21716_v33 = vld [vmem:[#allocation16 + $0x198] ss:$48 sps:$4 sm:$0xff]  }
 0x923   :  { %15601 = vmatpush1.bf16.msra.mxu0 %v21641_v54  ;;  %v21721_v54 = vld [vmem:[#allocation16 + $0x1f4] ss:$48 sps:$4 sm:$0xff]  }
 0x924   :  { %15687 = vmatpush1.bf16.msra.mxu1 %v21644_v46  ;;  %15602 = vmatprep.subr.bf16.mxu0 %v21649_v22  ;;  %v21724_v46 = vld [vmem:[#allocation16 + $0x1fc] ss:$48 sps:$4 sm:$0xff]   ;;  %v21719_v22 = vld [vmem:[#allocation16 + $0x1f0] ss:$48 sps:$4 sm:$0xff]  }
 0x925   :  { %15688 = vmatprep.subr.bf16.mxu1 %v21652_v59  ;;  %v21722_v59 = vld [vmem:[#allocation16 + $0x1f8] ss:$48 sps:$4 sm:$0xff]  }
 0x927   :  { %15603 = vmatpush1.bf16.msra.mxu0 %v21647_v5  ;;  %v21727_v5 = vld [vmem:[#allocation16 + $0x254] ss:$48 sps:$4 sm:$0xff]  }
 0x928   :  { %15689 = vmatpush1.bf16.msra.mxu1 %v21650_v26  ;;  %15604 = vmatprep.subr.bf16.mxu0 %v21655_v50  ;;  %v21730_v26 = vld [vmem:[#allocation16 + $0x25c] ss:$48 sps:$4 sm:$0xff]   ;;  %v21725_v50 = vld [vmem:[#allocation16 + $0x250] ss:$48 sps:$4 sm:$0xff]  }
 0x929   :  { %15690 = vmatprep.subr.bf16.mxu1 %v21658_v47  ;;  %v21728_v47 = vld [vmem:[#allocation16 + $0x258] ss:$48 sps:$4 sm:$0xff]  }
 0x92b   :  { %15605 = vmatpush1.bf16.msra.mxu0 %v21653_v58  ;;  %v21733_v58 = vld [vmem:[#allocation16 + $0x2b4] ss:$48 sps:$4 sm:$0xff]  }
 0x92c   :  { %15691 = vmatpush1.bf16.msra.mxu1 %v21656_v35  ;;  %15606 = vmatprep.subr.bf16.mxu0 %v21661_v6  ;;  %v21736_v35 = vld [vmem:[#allocation16 + $0x2bc] ss:$48 sps:$4 sm:$0xff]   ;;  %v21731_v6 = vld [vmem:[#allocation16 + $0x2b0] ss:$48 sps:$4 sm:$0xff]  }
 0x92d   :  { %15692 = vmatprep.subr.bf16.mxu1 %v21664_v63  ;;  %v21734_v63 = vld [vmem:[#allocation16 + $0x2b8] ss:$48 sps:$4 sm:$0xff]  }
 0x92f   :  { %15607 = vmatpush1.bf16.msra.mxu0 %v21659_v41  ;;  %v21739_v41 = vld [vmem:[#allocation16 + $0x314] ss:$48 sps:$4 sm:$0xff]  }
 0x930   :  { %15693 = vmatpush1.bf16.msra.mxu1 %v21662_v34  ;;  %15608 = vmatprep.subr.bf16.mxu0 %v21667_v3  ;;  %v21742_v34 = vld [vmem:[#allocation16 + $0x31c] ss:$48 sps:$4 sm:$0xff]   ;;  %v21737_v3 = vld [vmem:[#allocation16 + $0x310] ss:$48 sps:$4 sm:$0xff]  }
 0x931   :  { %15694 = vmatprep.subr.bf16.mxu1 %v21670_v0  ;;  %v21740_v0 = vld [vmem:[#allocation16 + $0x318] ss:$48 sps:$4 sm:$0xff]  }
 0x933   :  { %15609 = vmatpush1.bf16.msra.mxu0 %v21665_v7  ;;  %v21745_v7 = vld [vmem:[#allocation16 + $0x374] ss:$48 sps:$4 sm:$0xff]  }
 0x934   :  { %15695 = vmatpush1.bf16.msra.mxu1 %v21668_v8  ;;  %15610 = vmatprep.subr.bf16.mxu0 %v21673_v1  ;;  %v21748_v8 = vld [vmem:[#allocation16 + $0x37c] ss:$48 sps:$4 sm:$0xff]   ;;  %v21743_v1 = vld [vmem:[#allocation16 + $0x370] ss:$48 sps:$4 sm:$0xff]  }
 0x935   :  { %15696 = vmatprep.subr.bf16.mxu1 %v21676_v9  ;;  %v21746_v9 = vld [vmem:[#allocation16 + $0x378] ss:$48 sps:$4 sm:$0xff]  }
 0x937   :  { %15611 = vmatpush1.bf16.msra.mxu0 %v21671_v43  ;;  %v21751_v43 = vld [vmem:[#allocation16 + $0x3d4] ss:$48 sps:$4 sm:$0xff]  }
 0x938   :  { %15697 = vmatpush1.bf16.msra.mxu1 %v21674_v25  ;;  %15612 = vmatprep.subr.bf16.mxu0 %v21679_v51  ;;  %v21754_v25 = vld [vmem:[#allocation16 + $0x3dc] ss:$48 sps:$4 sm:$0xff]   ;;  %v21749_v51 = vld [vmem:[#allocation16 + $0x3d0] ss:$48 sps:$4 sm:$0xff]  }
 0x939   :  { %15698 = vmatprep.subr.bf16.mxu1 %v21682_v10  ;;  %v21752_v10 = vld [vmem:[#allocation16 + $0x3d8] ss:$48 sps:$4 sm:$0xff]  }
 0x93b   :  { %15613 = vmatpush1.bf16.msra.mxu0 %v21677_v2  ;;  %v21757_v2 = vld [vmem:[#allocation16 + $0x434] ss:$48 sps:$4 sm:$0xff]  }
 0x93c   :  { %15699 = vmatpush1.bf16.msra.mxu1 %v21680_v27  ;;  %15614 = vmatprep.subr.bf16.mxu0 %v21685_v61  ;;  %v21760_v27 = vld [vmem:[#allocation16 + $0x43c] ss:$48 sps:$4 sm:$0xff]   ;;  %v21755_v61 = vld [vmem:[#allocation16 + $0x430] ss:$48 sps:$4 sm:$0xff]  }
 0x93d   :  { %15700 = vmatprep.subr.bf16.mxu1 %v21688_v16  ;;  %v21758_v16 = vld [vmem:[#allocation16 + $0x438] ss:$48 sps:$4 sm:$0xff]  }
 0x93f   :  { %15615 = vmatpush1.bf16.msra.mxu0 %v21683_v17  ;;  %v21763_v17 = vld [vmem:[#allocation16 + $0x494] ss:$48 sps:$4 sm:$0xff]  }
 0x940   :  { %15701 = vmatpush1.bf16.msra.mxu1 %v21686_v11  ;;  %15713 = vmatprep.subr.bf16.mxu0 %v21691_v19  ;;  %v21764_v11 = vld [vmem:[#allocation16 + $0x498] ss:$48 sps:$4 sm:$0xff]   ;;  %v21769_v19 = vld [vmem:[#allocation16 + $0x4f4] ss:$48 sps:$4 sm:$0xff]  }
 0x941   :  { %15799 = vmatprep.subr.bf16.mxu1 %v21694_v56  ;;  %v21772_v56 = vld [vmem:[#allocation16 + $0x4fc] ss:$48 sps:$4 sm:$0xff]  }
 0x942   :  { %15617 = vmatmul.mubr.bf16.vlgmr.msra.gmra.mrb[32].mxu0 %v23521_v18 }
 0x943   :  { %15703 = vmatmul.mubr.bf16.vlgmr.msra.gmra.mrb[32].mxu1 %v23521_v18  ;;  %15714 = vmatpush1.bf16.msra.mxu0 %v21689_v12  ;;  %v21767_v12 = vld [vmem:[#allocation16 + $0x4f0] ss:$48 sps:$4 sm:$0xff]  }
 0x944   :  { %15800 = vmatpush1.bf16.msra.mxu1 %v21692_v23  ;;  %15715 = vmatprep.subr.bf16.mxu0 %v21697_v53  ;;  %v21770_v23 = vld [vmem:[#allocation16 + $0x4f8] ss:$48 sps:$4 sm:$0xff]   ;;  %v21775_v53 = vld [vmem:[#allocation16 + $0x554] ss:$48 sps:$4 sm:$0xff]  }
 0x945   :  { %15801 = vmatprep.subr.bf16.mxu1 %v21700_v32  ;;  %15745 = vmatprep.mubr.bf16.mxu0 %v23489_v42  ;;  %v21778_v32 = vld [vmem:[#allocation16 + $0x55c] ss:$48 sps:$4 sm:$0xff]  }
 0x946   :  { %15831 = vmatprep.mubr.bf16.mxu1 %v23489_v42 }
 0x947   :  { %15716 = vmatpush1.bf16.msra.mxu0 %v21695_v57  ;;  %v21773_v57 = vld [vmem:[#allocation16 + $0x550] ss:$48 sps:$4 sm:$0xff]  }
 0x948   :  { %15802 = vmatpush1.bf16.msra.mxu1 %v21698_v24  ;;  %15717 = vmatprep.subr.bf16.mxu0 %v21703_v36  ;;  %v21776_v24 = vld [vmem:[#allocation16 + $0x558] ss:$48 sps:$4 sm:$0xff]   ;;  %v21781_v36 = vld [vmem:[#allocation16 + $0x5b4] ss:$48 sps:$4 sm:$0xff]  }
 0x949   :  { %15803 = vmatprep.subr.bf16.mxu1 %v21706_v55  ;;  %v21784_v55 = vld [vmem:[#allocation16 + $0x5bc] ss:$48 sps:$4 sm:$0xff]  }
 0x94b   :  { %15718 = vmatpush1.bf16.msra.mxu0 %v21701_v37  ;;  %v21779_v37 = vld [vmem:[#allocation16 + $0x5b0] ss:$48 sps:$4 sm:$0xff]  }
 0x94c   :  { %15804 = vmatpush1.bf16.msra.mxu1 %v21704_v38  ;;  %15719 = vmatprep.subr.bf16.mxu0 %v21709_v28  ;;  %v21782_v38 = vld [vmem:[#allocation16 + $0x5b8] ss:$48 sps:$4 sm:$0xff]   ;;  %v21787_v28 = vld [vmem:[#allocation16 + $0x614] ss:$48 sps:$4 sm:$0xff]  }
 0x94d   :  { %15805 = vmatprep.subr.bf16.mxu1 %v21712_v30  ;;  %v21790_v30 = vld [vmem:[#allocation16 + $0x61c] ss:$48 sps:$4 sm:$0xff]  }
 0x94f   :  { %15720 = vmatpush1.bf16.msra.mxu0 %v21707_v31  ;;  %v21785_v31 = vld [vmem:[#allocation16 + $0x610] ss:$48 sps:$4 sm:$0xff]  }
 0x950   :  { %15806 = vmatpush1.bf16.msra.mxu1 %v21710_v45  ;;  %15721 = vmatprep.subr.bf16.mxu0 %v21715_v62  ;;  %v21788_v45 = vld [vmem:[#allocation16 + $0x618] ss:$48 sps:$4 sm:$0xff]   ;;  %v21793_v62 = vld [vmem:[#allocation16 + $0x674] ss:$48 sps:$4 sm:$0xff]  }
 0x951   :  { %15807 = vmatprep.subr.bf16.mxu1 %v21718_v29  ;;  %v21796_v29 = vld [vmem:[#allocation16 + $0x67c] ss:$48 sps:$4 sm:$0xff]  }
 0x953   :  { %15722 = vmatpush1.bf16.msra.mxu0 %v21713_v39  ;;  %v21791_v39 = vld [vmem:[#allocation16 + $0x670] ss:$48 sps:$4 sm:$0xff]  }
 0x954   :  { %15808 = vmatpush1.bf16.msra.mxu1 %v21716_v33  ;;  %15723 = vmatprep.subr.bf16.mxu0 %v21721_v54  ;;  %v21794_v33 = vld [vmem:[#allocation16 + $0x678] ss:$48 sps:$4 sm:$0xff]   ;;  %v21799_v54 = vld [vmem:[#allocation16 + $0x6d4] ss:$48 sps:$4 sm:$0xff]  }
 0x955   :  { %15809 = vmatprep.subr.bf16.mxu1 %v21724_v46  ;;  %v21802_v46 = vld [vmem:[#allocation16 + $0x6dc] ss:$48 sps:$4 sm:$0xff]  }
 0x957   :  { %15724 = vmatpush1.bf16.msra.mxu0 %v21719_v22  ;;  %v21797_v22 = vld [vmem:[#allocation16 + $0x6d0] ss:$48 sps:$4 sm:$0xff]  }
 0x958   :  { %15810 = vmatpush1.bf16.msra.mxu1 %v21722_v59  ;;  %15725 = vmatprep.subr.bf16.mxu0 %v21727_v5  ;;  %v21800_v59 = vld [vmem:[#allocation16 + $0x6d8] ss:$48 sps:$4 sm:$0xff]   ;;  %v21805_v5 = vld [vmem:[#allocation16 + $0x734] ss:$48 sps:$4 sm:$0xff]  }
 0x959   :  { %15811 = vmatprep.subr.bf16.mxu1 %v21730_v26  ;;  %v21808_v26 = vld [vmem:[#allocation16 + $0x73c] ss:$48 sps:$4 sm:$0xff]  }
 0x95b   :  { %15726 = vmatpush1.bf16.msra.mxu0 %v21725_v50  ;;  %v21803_v50 = vld [vmem:[#allocation16 + $0x730] ss:$48 sps:$4 sm:$0xff]  }
 0x95c   :  { %15812 = vmatpush1.bf16.msra.mxu1 %v21728_v47  ;;  %15727 = vmatprep.subr.bf16.mxu0 %v21733_v58  ;;  %v21806_v47 = vld [vmem:[#allocation16 + $0x738] ss:$48 sps:$4 sm:$0xff]   ;;  %v21811_v58 = vld [vmem:[#allocation16 + $0x794] ss:$48 sps:$4 sm:$0xff]  }
 0x95d   :  { %15813 = vmatprep.subr.bf16.mxu1 %v21736_v35  ;;  %v21814_v35 = vld [vmem:[#allocation16 + $0x79c] ss:$48 sps:$4 sm:$0xff]  }
 0x95f   :  { %15728 = vmatpush1.bf16.msra.mxu0 %v21731_v6  ;;  %v21809_v6 = vld [vmem:[#allocation16 + $0x790] ss:$48 sps:$4 sm:$0xff]  }
 0x960   :  { %15814 = vmatpush1.bf16.msra.mxu1 %v21734_v63  ;;  %15729 = vmatprep.subr.bf16.mxu0 %v21739_v41  ;;  %v21812_v63 = vld [vmem:[#allocation16 + $0x798] ss:$48 sps:$4 sm:$0xff]   ;;  %v21817_v41 = vld [vmem:[#allocation16 + $0x7f4] ss:$48 sps:$4 sm:$0xff]  }
 0x961   :  { %15815 = vmatprep.subr.bf16.mxu1 %v21742_v34  ;;  %v21820_v34 = vld [vmem:[#allocation16 + $0x7fc] ss:$48 sps:$4 sm:$0xff]  }
 0x963   :  { %15730 = vmatpush1.bf16.msra.mxu0 %v21737_v3  ;;  %v21815_v3 = vld [vmem:[#allocation16 + $0x7f0] ss:$48 sps:$4 sm:$0xff]  }
 0x964   :  { %15816 = vmatpush1.bf16.msra.mxu1 %v21740_v0  ;;  %15731 = vmatprep.subr.bf16.mxu0 %v21745_v7  ;;  %v21818_v0 = vld [vmem:[#allocation16 + $0x7f8] ss:$48 sps:$4 sm:$0xff]   ;;  %v21823_v7 = vld [vmem:[#allocation16 + $0x854] ss:$48 sps:$4 sm:$0xff]  }
 0x965   :  { %15817 = vmatprep.subr.bf16.mxu1 %v21748_v8 }
 0x967   :  { %15732 = vmatpush1.bf16.msra.mxu0 %v21743_v1  ;;  %v21826_v1 = vld [vmem:[#allocation16 + $0x85c] ss:$48 sps:$4 sm:$0xff]  }
 0x968   :  { %15818 = vmatpush1.bf16.msra.mxu1 %v21746_v9  ;;  %15733 = vmatprep.subr.bf16.mxu0 %v21751_v43 }
 0x969   :  { %15819 = vmatprep.subr.bf16.mxu1 %v21754_v25 }
 0x96b   :  { %15734 = vmatpush1.bf16.msra.mxu0 %v21749_v51 }
 0x96c   :  { %15820 = vmatpush1.bf16.msra.mxu1 %v21752_v10  ;;  %15735 = vmatprep.subr.bf16.mxu0 %v21757_v2  ;;  %v21821_v10 = vld [vmem:[#allocation16 + $0x850] ss:$48 sps:$4 sm:$0xff]  }
 0x96d   :  { %15821 = vmatprep.subr.bf16.mxu1 %v21760_v27 }
 0x96f   :  { %15736 = vmatpush1.bf16.msra.mxu0 %v21755_v61  ;;  %v21824_v61 = vld [vmem:[#allocation16 + $0x858] ss:$48 sps:$4 sm:$0xff]  }
 0x970   :  { %15822 = vmatpush1.bf16.msra.mxu1 %v21758_v16  ;;  %15737 = vmatprep.subr.bf16.mxu0 %v21763_v17  ;;  %v21829_v16 = vld [vmem:[#allocation16 + $0x8b4] ss:$48 sps:$4 sm:$0xff]  }
 0x971   :  { %15823 = vmatprep.subr.bf16.mxu1 %v21766_v20  ;;  %v21832_v20 = vld [vmem:[#allocation16 + $0x8bc] ss:$48 sps:$4 sm:$0xff]  }
 0x973   :  { %15738 = vmatpush1.bf16.msra.mxu0 %v21761_v52  ;;  %v21827_v52 = vld [vmem:[#allocation16 + $0x8b0] ss:$48 sps:$4 sm:$0xff]  }
 0x974   :  { %15824 = vmatpush1.bf16.msra.mxu1 %v21764_v11  ;;  %15739 = vmatprep.subr.bf16.mxu0 %v21769_v19  ;;  %v21830_v11 = vld [vmem:[#allocation16 + $0x8b8] ss:$48 sps:$4 sm:$0xff]   ;;  %v21835_v19 = vld [vmem:[#allocation16 + $0x914] ss:$48 sps:$4 sm:$0xff]  }
 0x975   :  { %15825 = vmatprep.subr.bf16.mxu1 %v21772_v56  ;;  %v21838_v56 = vld [vmem:[#allocation16 + $0x91c] ss:$48 sps:$4 sm:$0xff]  }
 0x977   :  { %15740 = vmatpush1.bf16.msra.mxu0 %v21767_v12  ;;  %v21833_v12 = vld [vmem:[#allocation16 + $0x910] ss:$48 sps:$4 sm:$0xff]  }
 0x978   :  { %15826 = vmatpush1.bf16.msra.mxu1 %v21770_v23  ;;  %15741 = vmatprep.subr.bf16.mxu0 %v21775_v53  ;;  %v21836_v23 = vld [vmem:[#allocation16 + $0x918] ss:$48 sps:$4 sm:$0xff]   ;;  %v21841_v53 = vld [vmem:[#allocation16 + $0x974] ss:$48 sps:$4 sm:$0xff]  }
 0x979   :  { %15827 = vmatprep.subr.bf16.mxu1 %v21778_v32  ;;  %v21844_v32 = vld [vmem:[#allocation16 + $0x97c] ss:$48 sps:$4 sm:$0xff]  }
 0x97b   :  { %15742 = vmatpush1.bf16.msra.mxu0 %v21773_v57  ;;  %v21839_v57 = vld [vmem:[#allocation16 + $0x970] ss:$48 sps:$4 sm:$0xff]  }
 0x97c   :  { %15828 = vmatpush1.bf16.msra.mxu1 %v21776_v24  ;;  %15743 = vmatprep.subr.bf16.mxu0 %v21781_v36  ;;  %v21842_v24 = vld [vmem:[#allocation16 + $0x978] ss:$48 sps:$4 sm:$0xff]   ;;  %v21847_v36 = vld [vmem:[#allocation16 + $0x9d4] ss:$48 sps:$4 sm:$0xff]  }
 0x97d   :  { %15829 = vmatprep.subr.bf16.mxu1 %v21784_v55  ;;  %v21850_v55 = vld [vmem:[#allocation16 + $0x9dc] ss:$48 sps:$4 sm:$0xff]  }
 0x97f   :  { %15744 = vmatpush1.bf16.msra.mxu0 %v21779_v37  ;;  %v21845_v37 = vld [vmem:[#allocation16 + $0x9d0] ss:$48 sps:$4 sm:$0xff]  }
 0x980   :  { %15830 = vmatpush1.bf16.msra.mxu1 %v21782_v38  ;;  %15756 = vmatprep.subr.bf16.mxu0 %v21787_v28  ;;  %v21848_v38 = vld [vmem:[#allocation16 + $0x9d8] ss:$48 sps:$4 sm:$0xff]   ;;  %v21853_v28 = vld [vmem:[#allocation16 + $0xa34] ss:$48 sps:$4 sm:$0xff]  }
 0x981   :  { %15842 = vmatprep.subr.bf16.mxu1 %v21790_v30  ;;  %v21856_v30 = vld [vmem:[#allocation16 + $0xa3c] ss:$48 sps:$4 sm:$0xff]  }
 0x982   :  { %15746 = vmatmul.mubr.bf16.vlgmr.msra.gmra.mrb[36].mxu0 %v23501_v4 }
 0x983   :  { %15757 = vmatpush1.bf16.msra.mxu0 %v21785_v31  ;;  %15832 = vmatmul.mubr.bf16.vlgmr.msra.gmra.mrb[36].mxu1 %v23501_v4  ;;  %v21851_v31 = vld [vmem:[#allocation16 + $0xa30] ss:$48 sps:$4 sm:$0xff]  }
 0x984   :  { %15843 = vmatpush1.bf16.msra.mxu1 %v21788_v45  ;;  %15758 = vmatprep.subr.bf16.mxu0 %v21793_v62  ;;  %v21854_v45 = vld [vmem:[#allocation16 + $0xa38] ss:$48 sps:$4 sm:$0xff]   ;;  %v21859_v62 = vld [vmem:[#allocation16 + $0xa94] ss:$48 sps:$4 sm:$0xff]  }
 0x985   :  { %15844 = vmatprep.subr.bf16.mxu1 %v21796_v29  ;;  %15788 = vmatprep.mubr.bf16.mxu0 %v23509_v60  ;;  %v21862_v29 = vld [vmem:[#allocation16 + $0xa9c] ss:$48 sps:$4 sm:$0xff]  }
 0x986   :  { %15874 = vmatprep.mubr.bf16.mxu1 %v23509_v60 }
 0x987   :  { %15759 = vmatpush1.bf16.msra.mxu0 %v21791_v39  ;;  %v21857_v39 = vld [vmem:[#allocation16 + $0xa90] ss:$48 sps:$4 sm:$0xff]  }
 0x988   :  { %15845 = vmatpush1.bf16.msra.mxu1 %v21794_v33  ;;  %15760 = vmatprep.subr.bf16.mxu0 %v21799_v54  ;;  %v21860_v33 = vld [vmem:[#allocation16 + $0xa98] ss:$48 sps:$4 sm:$0xff]   ;;  %v21865_v54 = vld [vmem:[#allocation16 + $0xaf4] ss:$48 sps:$4 sm:$0xff]  }
 0x989   :  { %15846 = vmatprep.subr.bf16.mxu1 %v21802_v46  ;;  %v21868_v46 = vld [vmem:[#allocation16 + $0xafc] ss:$48 sps:$4 sm:$0xff]  }
 0x98b   :  { %15761 = vmatpush1.bf16.msra.mxu0 %v21797_v22  ;;  %v21863_v22 = vld [vmem:[#allocation16 + $0xaf0] ss:$48 sps:$4 sm:$0xff]  }
 0x98c   :  { %15847 = vmatpush1.bf16.msra.mxu1 %v21800_v59  ;;  %15762 = vmatprep.subr.bf16.mxu0 %v21805_v5  ;;  %v21866_v59 = vld [vmem:[#allocation16 + $0xaf8] ss:$48 sps:$4 sm:$0xff]   ;;  %v21871_v5 = vld [vmem:[#allocation16 + $0xb54] ss:$48 sps:$4 sm:$0xff]  }
 0x98d   :  { %15848 = vmatprep.subr.bf16.mxu1 %v21808_v26  ;;  %v21874_v26 = vld [vmem:[#allocation16 + $0xb5c] ss:$48 sps:$4 sm:$0xff]  }
 0x98f   :  { %15763 = vmatpush1.bf16.msra.mxu0 %v21803_v50  ;;  %v21869_v50 = vld [vmem:[#allocation16 + $0xb50] ss:$48 sps:$4 sm:$0xff]  }
 0x990   :  { %15849 = vmatpush1.bf16.msra.mxu1 %v21806_v47  ;;  %15764 = vmatprep.subr.bf16.mxu0 %v21811_v58  ;;  %v21872_v47 = vld [vmem:[#allocation16 + $0xb58] ss:$48 sps:$4 sm:$0xff]   ;;  %v21877_v58 = vld [vmem:[#allocation16 + $0xbb4] ss:$48 sps:$4 sm:$0xff]  }
 0x991   :  { %15850 = vmatprep.subr.bf16.mxu1 %v21814_v35  ;;  %v21880_v35 = vld [vmem:[#allocation16 + $0xbbc] ss:$48 sps:$4 sm:$0xff]  }
 0x993   :  { %15765 = vmatpush1.bf16.msra.mxu0 %v21809_v6  ;;  %v21875_v6 = vld [vmem:[#allocation16 + $0xbb0] ss:$48 sps:$4 sm:$0xff]  }
 0x994   :  { %15851 = vmatpush1.bf16.msra.mxu1 %v21812_v63  ;;  %15766 = vmatprep.subr.bf16.mxu0 %v21817_v41  ;;  %v21878_v63 = vld [vmem:[#allocation16 + $0xbb8] ss:$48 sps:$4 sm:$0xff]   ;;  %v21883_v41 = vld [vmem:[#allocation16 + $0x24] ss:$48 sps:$4 sm:$0xff]  }
 0x995   :  { %v23531_v8 = vpop.f32.mrb[40].mxu0  ;;  %15852 = vmatprep.subr.bf16.mxu1 %v21820_v34  ;;  %v21886_v34 = vld [vmem:[#allocation16 + $0x2c] ss:$48 sps:$4 sm:$0xff]  }
 0x996   :  { %v23533_v9 = vpop.f32.mrb[40].mxu1  ;;  %v23535_v43 = vpop.f32.mrb[41].mxu0 }
 0x997   :  { %v23537_v25 = vpop.f32.mrb[41].mxu1  ;;  %v23539_v51 = vpop.f32.mrb[42].mxu0  ;;  %15767 = vmatpush1.bf16.msra.mxu0 %v21815_v3  ;;  %v21881_v3 = vld [vmem:[#allocation16 + $0x20] ss:$48 sps:$4 sm:$0xff]  }
 0x998   :  { %v23541_v2 = vpop.f32.mrb[42].mxu1  ;;  %15853 = vmatpush1.bf16.msra.mxu1 %v21818_v0  ;;  %v23543_v27 = vpop.f32.mrb[43].mxu0  ;;  %15768 = vmatprep.subr.bf16.mxu0 %v21823_v7  ;;  %v21884_v0 = vld [vmem:[#allocation16 + $0x28] ss:$48 sps:$4 sm:$0xff]   ;;  %v21889_v7 = vld [vmem:[#allocation16 + $0x84] ss:$48 sps:$4 sm:$0xff]  }
 0x999   :  { %v23545_v17 = vpop.f32.mrb[43].mxu1  ;;  %15854 = vmatprep.subr.bf16.mxu1 %v21826_v1  ;;  %v21892_v1 = vld [vmem:[#allocation16 + $0x8c] ss:$48 sps:$4 sm:$0xff]  }
 0x99b   :  { %15769 = vmatpush1.bf16.msra.mxu0 %v21821_v10  ;;  %v21887_v10 = vld [vmem:[#allocation16 + $0x80] ss:$48 sps:$4 sm:$0xff]  }
 0x99c   :  { %15855 = vmatpush1.bf16.msra.mxu1 %v21824_v61  ;;  %15770 = vmatprep.subr.bf16.mxu0 %v21829_v16  ;;  %v21890_v61 = vld [vmem:[#allocation16 + $0x88] ss:$48 sps:$4 sm:$0xff]   ;;  %v21895_v16 = vld [vmem:[#allocation16 + $0xe4] ss:$48 sps:$4 sm:$0xff]  }
 0x99d   :  { %15856 = vmatprep.subr.bf16.mxu1 %v21832_v20  ;;  %v21898_v20 = vld [vmem:[#allocation16 + $0xec] ss:$48 sps:$4 sm:$0xff]  }
 0x99f   :  { %15771 = vmatpush1.bf16.msra.mxu0 %v21827_v52  ;;  %v21893_v52 = vld [vmem:[#allocation16 + $0xe0] ss:$48 sps:$4 sm:$0xff]  }
 0x9a0   :  { %15857 = vmatpush1.bf16.msra.mxu1 %v21830_v11  ;;  %15772 = vmatprep.subr.bf16.mxu0 %v21835_v19  ;;  %v21896_v11 = vld [vmem:[#allocation16 + $0xe8] ss:$48 sps:$4 sm:$0xff]   ;;  %v21901_v19 = vld [vmem:[#allocation16 + $0x144] ss:$48 sps:$4 sm:$0xff]  }
 0x9a1   :  { %15858 = vmatprep.subr.bf16.mxu1 %v21838_v56  ;;  %v21904_v56 = vld [vmem:[#allocation16 + $0x14c] ss:$48 sps:$4 sm:$0xff]  }
 0x9a3   :  { %15773 = vmatpush1.bf16.msra.mxu0 %v21833_v12  ;;  %v21899_v12 = vld [vmem:[#allocation16 + $0x140] ss:$48 sps:$4 sm:$0xff]  }
 0x9a4   :  { %15859 = vmatpush1.bf16.msra.mxu1 %v21836_v23  ;;  %15774 = vmatprep.subr.bf16.mxu0 %v21841_v53  ;;  %v21902_v23 = vld [vmem:[#allocation16 + $0x148] ss:$48 sps:$4 sm:$0xff]   ;;  %v21907_v53 = vld [vmem:[#allocation16 + $0x1a4] ss:$48 sps:$4 sm:$0xff]  }
 0x9a5   :  { %15860 = vmatprep.subr.bf16.mxu1 %v21844_v32  ;;  %v21910_v32 = vld [vmem:[#allocation16 + $0x1ac] ss:$48 sps:$4 sm:$0xff]  }
 0x9a7   :  { %15775 = vmatpush1.bf16.msra.mxu0 %v21839_v57  ;;  %v21905_v57 = vld [vmem:[#allocation16 + $0x1a0] ss:$48 sps:$4 sm:$0xff]  }
 0x9a8   :  { %15861 = vmatpush1.bf16.msra.mxu1 %v21842_v24  ;;  %15776 = vmatprep.subr.bf16.mxu0 %v21847_v36  ;;  %v21913_v24 = vld [vmem:[#allocation16 + $0x204] ss:$48 sps:$4 sm:$0xff]   ;;  %v21916_v36 = vld [vmem:[#allocation16 + $0x20c] ss:$48 sps:$4 sm:$0xff]  }
 0x9a9   :  { %15862 = vmatprep.subr.bf16.mxu1 %v21850_v55  ;;  %v21911_v55 = vld [vmem:[#allocation16 + $0x200] ss:$48 sps:$4 sm:$0xff]  }
 0x9ab   :  { %15777 = vmatpush1.bf16.msra.mxu0 %v21845_v37  ;;  %v21914_v37 = vld [vmem:[#allocation16 + $0x208] ss:$48 sps:$4 sm:$0xff]  }
 0x9ac   :  { %15863 = vmatpush1.bf16.msra.mxu1 %v21848_v38  ;;  %15778 = vmatprep.subr.bf16.mxu0 %v21853_v28  ;;  %v21919_v38 = vld [vmem:[#allocation16 + $0x264] ss:$48 sps:$4 sm:$0xff]   ;;  %v21922_v28 = vld [vmem:[#allocation16 + $0x26c] ss:$48 sps:$4 sm:$0xff]  }
 0x9ad   :  { %15864 = vmatprep.subr.bf16.mxu1 %v21856_v30  ;;  %v21917_v30 = vld [vmem:[#allocation16 + $0x260] ss:$48 sps:$4 sm:$0xff]  }
 0x9af   :  { %15779 = vmatpush1.bf16.msra.mxu0 %v21851_v31  ;;  %v21920_v31 = vld [vmem:[#allocation16 + $0x268] ss:$48 sps:$4 sm:$0xff]  }
 0x9b0   :  { %15865 = vmatpush1.bf16.msra.mxu1 %v21854_v45  ;;  %15780 = vmatprep.subr.bf16.mxu0 %v21859_v62  ;;  %v21925_v45 = vld [vmem:[#allocation16 + $0x2c4] ss:$48 sps:$4 sm:$0xff]   ;;  %v21928_v62 = vld [vmem:[#allocation16 + $0x2cc] ss:$48 sps:$4 sm:$0xff]  }
 0x9b1   :  { %15866 = vmatprep.subr.bf16.mxu1 %v21862_v29  ;;  %v21923_v29 = vld [vmem:[#allocation16 + $0x2c0] ss:$48 sps:$4 sm:$0xff]  }
 0x9b3   :  { %15781 = vmatpush1.bf16.msra.mxu0 %v21857_v39  ;;  %v21926_v39 = vld [vmem:[#allocation16 + $0x2c8] ss:$48 sps:$4 sm:$0xff]  }
 0x9b4   :  { %15867 = vmatpush1.bf16.msra.mxu1 %v21860_v33  ;;  %15782 = vmatprep.subr.bf16.mxu0 %v21865_v54  ;;  %v21931_v33 = vld [vmem:[#allocation16 + $0x324] ss:$48 sps:$4 sm:$0xff]   ;;  %v21934_v54 = vld [vmem:[#allocation16 + $0x32c] ss:$48 sps:$4 sm:$0xff]  }
 0x9b5   :  { %15868 = vmatprep.subr.bf16.mxu1 %v21868_v46  ;;  %v21929_v46 = vld [vmem:[#allocation16 + $0x320] ss:$48 sps:$4 sm:$0xff]  }
 0x9b7   :  { %15783 = vmatpush1.bf16.msra.mxu0 %v21863_v22  ;;  %v21932_v22 = vld [vmem:[#allocation16 + $0x328] ss:$48 sps:$4 sm:$0xff]  }
 0x9b8   :  { %15869 = vmatpush1.bf16.msra.mxu1 %v21866_v59  ;;  %15784 = vmatprep.subr.bf16.mxu0 %v21871_v5  ;;  %v21937_v59 = vld [vmem:[#allocation16 + $0x384] ss:$48 sps:$4 sm:$0xff]   ;;  %v21940_v5 = vld [vmem:[#allocation16 + $0x38c] ss:$48 sps:$4 sm:$0xff]  }
 0x9b9   :  { %15870 = vmatprep.subr.bf16.mxu1 %v21874_v26  ;;  %v21935_v26 = vld [vmem:[#allocation16 + $0x380] ss:$48 sps:$4 sm:$0xff]  }
 0x9bb   :  { %15785 = vmatpush1.bf16.msra.mxu0 %v21869_v50  ;;  %v21938_v50 = vld [vmem:[#allocation16 + $0x388] ss:$48 sps:$4 sm:$0xff]  }
 0x9bc   :  { %15871 = vmatpush1.bf16.msra.mxu1 %v21872_v47  ;;  %15786 = vmatprep.subr.bf16.mxu0 %v21877_v58  ;;  %v21943_v47 = vld [vmem:[#allocation16 + $0x3e4] ss:$48 sps:$4 sm:$0xff]   ;;  %v21946_v58 = vld [vmem:[#allocation16 + $0x3ec] ss:$48 sps:$4 sm:$0xff]  }
 0x9bd   :  { %15872 = vmatprep.subr.bf16.mxu1 %v21880_v35  ;;  %v21941_v35 = vld [vmem:[#allocation16 + $0x3e0] ss:$48 sps:$4 sm:$0xff]  }
 0x9bf   :  { %15787 = vmatpush1.bf16.msra.mxu0 %v21875_v6  ;;  %v21944_v6 = vld [vmem:[#allocation16 + $0x3e8] ss:$48 sps:$4 sm:$0xff]  }
 0x9c0   :  { %15873 = vmatpush1.bf16.msra.mxu1 %v21878_v63  ;;  %15885 = vmatprep.subr.bf16.mxu0 %v21883_v41  ;;  %v21949_v63 = vld [vmem:[#allocation16 + $0x444] ss:$48 sps:$4 sm:$0xff]   ;;  %v21952_v41 = vld [vmem:[#allocation16 + $0x44c] ss:$48 sps:$4 sm:$0xff]  }
 0x9c1   :  { %15971 = vmatprep.subr.bf16.mxu1 %v21886_v34  ;;  %v21947_v34 = vld [vmem:[#allocation16 + $0x440] ss:$48 sps:$4 sm:$0xff]  }
 0x9c2   :  { %15789 = vmatmul.mubr.bf16.vlgmr.msra.gmra.mrb[36].mxu0 %v23521_v18 }
 0x9c3   :  { %15875 = vmatmul.mubr.bf16.vlgmr.msra.gmra.mrb[36].mxu1 %v23521_v18  ;;  %15886 = vmatpush1.bf16.msra.mxu0 %v21881_v3  ;;  %v21950_v3 = vld [vmem:[#allocation16 + $0x448] ss:$48 sps:$4 sm:$0xff]  }
 0x9c4   :  { %15972 = vmatpush1.bf16.msra.mxu1 %v21884_v0  ;;  %15887 = vmatprep.subr.bf16.mxu0 %v21889_v7  ;;  %v21955_v0 = vld [vmem:[#allocation16 + $0x4a4] ss:$48 sps:$4 sm:$0xff]   ;;  %v21958_v7 = vld [vmem:[#allocation16 + $0x4ac] ss:$48 sps:$4 sm:$0xff]  }
 0x9c5   :  { %15973 = vmatprep.subr.bf16.mxu1 %v21892_v1  ;;  %15917 = vmatprep.mubr.bf16.mxu0 %v23489_v42  ;;  %v21953_v1 = vld [vmem:[#allocation16 + $0x4a0] ss:$48 sps:$4 sm:$0xff]  }
 0x9c6   :  { %16003 = vmatprep.mubr.bf16.mxu1 %v23489_v42  ;;  %v21908_v42 = vld [vmem:[#allocation16 + $0x1a8] ss:$48 sps:$4 sm:$0xff]  }
 0x9c7   :  { %15888 = vmatpush1.bf16.msra.mxu0 %v21887_v10  ;;  %v21956_v10 = vld [vmem:[#allocation16 + $0x4a8] ss:$48 sps:$4 sm:$0xff]  }
 0x9c8   :  { %15974 = vmatpush1.bf16.msra.mxu1 %v21890_v61  ;;  %15889 = vmatprep.subr.bf16.mxu0 %v21895_v16  ;;  %v21961_v61 = vld [vmem:[#allocation16 + $0x504] ss:$48 sps:$4 sm:$0xff]   ;;  %v21964_v16 = vld [vmem:[#allocation16 + $0x50c] ss:$48 sps:$4 sm:$0xff]  }
 0x9c9   :  { %15975 = vmatprep.subr.bf16.mxu1 %v21898_v20  ;;  %v21959_v20 = vld [vmem:[#allocation16 + $0x500] ss:$48 sps:$4 sm:$0xff]  }
 0x9cb   :  { %15890 = vmatpush1.bf16.msra.mxu0 %v21893_v52  ;;  %v21962_v52 = vld [vmem:[#allocation16 + $0x508] ss:$48 sps:$4 sm:$0xff]  }
 0x9cc   :  { %15976 = vmatpush1.bf16.msra.mxu1 %v21896_v11  ;;  %15891 = vmatprep.subr.bf16.mxu0 %v21901_v19  ;;  %v21967_v11 = vld [vmem:[#allocation16 + $0x564] ss:$48 sps:$4 sm:$0xff]   ;;  %v21970_v19 = vld [vmem:[#allocation16 + $0x56c] ss:$48 sps:$4 sm:$0xff]  }
 0x9cd   :  { %15977 = vmatprep.subr.bf16.mxu1 %v21904_v56  ;;  %v21965_v56 = vld [vmem:[#allocation16 + $0x560] ss:$48 sps:$4 sm:$0xff]  }
 0x9cf   :  { %15892 = vmatpush1.bf16.msra.mxu0 %v21899_v12  ;;  %v21968_v12 = vld [vmem:[#allocation16 + $0x568] ss:$48 sps:$4 sm:$0xff]  }
 0x9d0   :  { %15978 = vmatpush1.bf16.msra.mxu1 %v21902_v23  ;;  %15893 = vmatprep.subr.bf16.mxu0 %v21907_v53  ;;  %v21973_v23 = vld [vmem:[#allocation16 + $0x5c4] ss:$48 sps:$4 sm:$0xff]   ;;  %v21976_v53 = vld [vmem:[#allocation16 + $0x5cc] ss:$48 sps:$4 sm:$0xff]  }
 0x9d1   :  { %15979 = vmatprep.subr.bf16.mxu1 %v21910_v32  ;;  %v21971_v32 = vld [vmem:[#allocation16 + $0x5c0] ss:$48 sps:$4 sm:$0xff]  }
 0x9d3   :  { %15894 = vmatpush1.bf16.msra.mxu0 %v21905_v57  ;;  %v21974_v57 = vld [vmem:[#allocation16 + $0x5c8] ss:$48 sps:$4 sm:$0xff]  }
 0x9d4   :  { %15980 = vmatpush1.bf16.msra.mxu1 %v21908_v42  ;;  %15895 = vmatprep.subr.bf16.mxu0 %v21913_v24  ;;  %v21979_v42 = vld [vmem:[#allocation16 + $0x624] ss:$48 sps:$4 sm:$0xff]   ;;  %v21982_v24 = vld [vmem:[#allocation16 + $0x62c] ss:$48 sps:$4 sm:$0xff]  }
 0x9d5   :  { %15981 = vmatprep.subr.bf16.mxu1 %v21916_v36  ;;  %v21977_v36 = vld [vmem:[#allocation16 + $0x620] ss:$48 sps:$4 sm:$0xff]  }
 0x9d7   :  { %15896 = vmatpush1.bf16.msra.mxu0 %v21911_v55  ;;  %v21980_v55 = vld [vmem:[#allocation16 + $0x628] ss:$48 sps:$4 sm:$0xff]  }
 0x9d8   :  { %15982 = vmatpush1.bf16.msra.mxu1 %v21914_v37  ;;  %15897 = vmatprep.subr.bf16.mxu0 %v21919_v38  ;;  %v21985_v37 = vld [vmem:[#allocation16 + $0x684] ss:$48 sps:$4 sm:$0xff]   ;;  %v21988_v38 = vld [vmem:[#allocation16 + $0x68c] ss:$48 sps:$4 sm:$0xff]  }
 0x9d9   :  { %15983 = vmatprep.subr.bf16.mxu1 %v21922_v28  ;;  %v21983_v28 = vld [vmem:[#allocation16 + $0x680] ss:$48 sps:$4 sm:$0xff]  }
 0x9db   :  { %15898 = vmatpush1.bf16.msra.mxu0 %v21917_v30  ;;  %v21986_v30 = vld [vmem:[#allocation16 + $0x688] ss:$48 sps:$4 sm:$0xff]  }
 0x9dc   :  { %15984 = vmatpush1.bf16.msra.mxu1 %v21920_v31  ;;  %15899 = vmatprep.subr.bf16.mxu0 %v21925_v45  ;;  %v21991_v31 = vld [vmem:[#allocation16 + $0x6e4] ss:$48 sps:$4 sm:$0xff]   ;;  %v21994_v45 = vld [vmem:[#allocation16 + $0x6ec] ss:$48 sps:$4 sm:$0xff]  }
 0x9dd   :  { %15985 = vmatprep.subr.bf16.mxu1 %v21928_v62  ;;  %v21989_v62 = vld [vmem:[#allocation16 + $0x6e0] ss:$48 sps:$4 sm:$0xff]  }
 0x9df   :  { %15900 = vmatpush1.bf16.msra.mxu0 %v21923_v29  ;;  %v21992_v29 = vld [vmem:[#allocation16 + $0x6e8] ss:$48 sps:$4 sm:$0xff]  }
 0x9e0   :  { %15986 = vmatpush1.bf16.msra.mxu1 %v21926_v39  ;;  %15901 = vmatprep.subr.bf16.mxu0 %v21931_v33  ;;  %v21997_v39 = vld [vmem:[#allocation16 + $0x744] ss:$48 sps:$4 sm:$0xff]   ;;  %v22000_v33 = vld [vmem:[#allocation16 + $0x74c] ss:$48 sps:$4 sm:$0xff]  }
 0x9e1   :  { %15987 = vmatprep.subr.bf16.mxu1 %v21934_v54  ;;  %v21998_v54 = vld [vmem:[#allocation16 + $0x748] ss:$48 sps:$4 sm:$0xff]  }
 0x9e3   :  { %15902 = vmatpush1.bf16.msra.mxu0 %v21929_v46  ;;  %v22003_v46 = vld [vmem:[#allocation16 + $0x7a4] ss:$48 sps:$4 sm:$0xff]  }
 0x9e4   :  { %15988 = vmatpush1.bf16.msra.mxu1 %v21932_v22  ;;  %15903 = vmatprep.subr.bf16.mxu0 %v21937_v59  ;;  %v22006_v22 = vld [vmem:[#allocation16 + $0x7ac] ss:$48 sps:$4 sm:$0xff]   ;;  %v22001_v59 = vld [vmem:[#allocation16 + $0x7a0] ss:$48 sps:$4 sm:$0xff]  }
 0x9e5   :  { %15989 = vmatprep.subr.bf16.mxu1 %v21940_v5  ;;  %v22009_v5 = vld [vmem:[#allocation16 + $0x804] ss:$48 sps:$4 sm:$0xff]  }
 0x9e7   :  { %15904 = vmatpush1.bf16.msra.mxu0 %v21935_v26  ;;  %v22012_v26 = vld [vmem:[#allocation16 + $0x80c] ss:$48 sps:$4 sm:$0xff]  }
 0x9e8   :  { %15990 = vmatpush1.bf16.msra.mxu1 %v21938_v50  ;;  %15905 = vmatprep.subr.bf16.mxu0 %v21943_v47  ;;  %v22007_v50 = vld [vmem:[#allocation16 + $0x800] ss:$48 sps:$4 sm:$0xff]   ;;  %v22010_v47 = vld [vmem:[#allocation16 + $0x808] ss:$48 sps:$4 sm:$0xff]  }
 0x9e9   :  { %15991 = vmatprep.subr.bf16.mxu1 %v21946_v58  ;;  %v22015_v58 = vld [vmem:[#allocation16 + $0x864] ss:$48 sps:$4 sm:$0xff]  }
 0x9eb   :  { %15906 = vmatpush1.bf16.msra.mxu0 %v21941_v35 }
 0x9ec   :  { %15992 = vmatpush1.bf16.msra.mxu1 %v21944_v6  ;;  %15907 = vmatprep.subr.bf16.mxu0 %v21949_v63  ;;  %v22018_v6 = vld [vmem:[#allocation16 + $0x86c] ss:$48 sps:$4 sm:$0xff]  }
 0x9ed   :  { %15993 = vmatprep.subr.bf16.mxu1 %v21952_v41 }
 0x9ef   :  { %15908 = vmatpush1.bf16.msra.mxu0 %v21947_v34 }
 0x9f0   :  { %15994 = vmatpush1.bf16.msra.mxu1 %v21950_v3  ;;  %15909 = vmatprep.subr.bf16.mxu0 %v21955_v0  ;;  %v22013_v0 = vld [vmem:[#allocation16 + $0x860] ss:$48 sps:$4 sm:$0xff]  }
 0x9f1   :  { %15995 = vmatprep.subr.bf16.mxu1 %v21958_v7 }
 0x9f3   :  { %15910 = vmatpush1.bf16.msra.mxu0 %v21953_v1 }
 0x9f4   :  { %15996 = vmatpush1.bf16.msra.mxu1 %v21956_v10  ;;  %15911 = vmatprep.subr.bf16.mxu0 %v21961_v61  ;;  %v22016_v10 = vld [vmem:[#allocation16 + $0x868] ss:$48 sps:$4 sm:$0xff]   ;;  %v22021_v61 = vld [vmem:[#allocation16 + $0x8c4] ss:$48 sps:$4 sm:$0xff]  }
 0x9f5   :  { %15997 = vmatprep.subr.bf16.mxu1 %v21964_v16 }
 0x9f7   :  { %15912 = vmatpush1.bf16.msra.mxu0 %v21959_v20  ;;  %v22024_v20 = vld [vmem:[#allocation16 + $0x8cc] ss:$48 sps:$4 sm:$0xff]  }
 0x9f8   :  { %15998 = vmatpush1.bf16.msra.mxu1 %v21962_v52  ;;  %15913 = vmatprep.subr.bf16.mxu0 %v21967_v11  ;;  %v22019_v52 = vld [vmem:[#allocation16 + $0x8c0] ss:$48 sps:$4 sm:$0xff]   ;;  %v22022_v11 = vld [vmem:[#allocation16 + $0x8c8] ss:$48 sps:$4 sm:$0xff]  }
 0x9f9   :  { %15999 = vmatprep.subr.bf16.mxu1 %v21970_v19  ;;  %v22027_v19 = vld [vmem:[#allocation16 + $0x924] ss:$48 sps:$4 sm:$0xff]  }
 0x9fb   :  { %15914 = vmatpush1.bf16.msra.mxu0 %v21965_v56  ;;  %v22030_v56 = vld [vmem:[#allocation16 + $0x92c] ss:$48 sps:$4 sm:$0xff]  }
 0x9fc   :  { %16000 = vmatpush1.bf16.msra.mxu1 %v21968_v12  ;;  %15915 = vmatprep.subr.bf16.mxu0 %v21973_v23  ;;  %v22025_v12 = vld [vmem:[#allocation16 + $0x920] ss:$48 sps:$4 sm:$0xff]   ;;  %v22028_v23 = vld [vmem:[#allocation16 + $0x928] ss:$48 sps:$4 sm:$0xff]  }
 0x9fd   :  { %16001 = vmatprep.subr.bf16.mxu1 %v21976_v53  ;;  %v22033_v53 = vld [vmem:[#allocation16 + $0x984] ss:$48 sps:$4 sm:$0xff]  }
 0x9ff   :  { %15916 = vmatpush1.bf16.msra.mxu0 %v21971_v32  ;;  %v22036_v32 = vld [vmem:[#allocation16 + $0x98c] ss:$48 sps:$4 sm:$0xff]  }
 0xa00   :  { %16002 = vmatpush1.bf16.msra.mxu1 %v21974_v57  ;;  %15928 = vmatprep.subr.bf16.mxu0 %v21979_v42  ;;  %v22031_v57 = vld [vmem:[#allocation16 + $0x980] ss:$48 sps:$4 sm:$0xff]   ;;  %v22034_v42 = vld [vmem:[#allocation16 + $0x988] ss:$48 sps:$4 sm:$0xff]  }
 0xa01   :  { %16014 = vmatprep.subr.bf16.mxu1 %v21982_v24  ;;  %v22039_v24 = vld [vmem:[#allocation16 + $0x9e4] ss:$48 sps:$4 sm:$0xff]  }
 0xa02   :  { %15918 = vmatmul.mubr.bf16.vlgmr.msra.gmra.mrb[44].mxu0 %v23501_v4 }
 0xa03   :  { %15929 = vmatpush1.bf16.msra.mxu0 %v21977_v36  ;;  %16004 = vmatmul.mubr.bf16.vlgmr.msra.gmra.mrb[44].mxu1 %v23501_v4  ;;  %v21995_v4 = vld [vmem:[#allocation16 + $0x740] ss:$48 sps:$4 sm:$0xff]   ;;  %v22042_v36 = vld [vmem:[#allocation16 + $0x9ec] ss:$48 sps:$4 sm:$0xff]  }
 0xa04   :  { %16015 = vmatpush1.bf16.msra.mxu1 %v21980_v55  ;;  %15930 = vmatprep.subr.bf16.mxu0 %v21985_v37  ;;  %v22037_v55 = vld [vmem:[#allocation16 + $0x9e0] ss:$48 sps:$4 sm:$0xff]   ;;  %v22040_v37 = vld [vmem:[#allocation16 + $0x9e8] ss:$48 sps:$4 sm:$0xff]  }
 0xa05   :  { %16016 = vmatprep.subr.bf16.mxu1 %v21988_v38  ;;  %15960 = vmatprep.mubr.bf16.mxu0 %v23509_v60  ;;  %v22045_v38 = vld [vmem:[#allocation16 + $0xa44] ss:$48 sps:$4 sm:$0xff]  }
 0xa06   :  { %16046 = vmatprep.mubr.bf16.mxu1 %v23509_v60  ;;  %v22004_v60 = vld [vmem:[#allocation16 + $0x7a8] ss:$48 sps:$4 sm:$0xff]  }
 0xa07   :  { %15931 = vmatpush1.bf16.msra.mxu0 %v21983_v28  ;;  %v22048_v28 = vld [vmem:[#allocation16 + $0xa4c] ss:$48 sps:$4 sm:$0xff]  }
 0xa08   :  { %16017 = vmatpush1.bf16.msra.mxu1 %v21986_v30  ;;  %15932 = vmatprep.subr.bf16.mxu0 %v21991_v31  ;;  %v22043_v30 = vld [vmem:[#allocation16 + $0xa40] ss:$48 sps:$4 sm:$0xff]   ;;  %v22046_v31 = vld [vmem:[#allocation16 + $0xa48] ss:$48 sps:$4 sm:$0xff]  }
 0xa09   :  { %16018 = vmatprep.subr.bf16.mxu1 %v21994_v45  ;;  %v22051_v45 = vld [vmem:[#allocation16 + $0xaa4] ss:$48 sps:$4 sm:$0xff]  }
 0xa0b   :  { %15933 = vmatpush1.bf16.msra.mxu0 %v21989_v62  ;;  %v22054_v62 = vld [vmem:[#allocation16 + $0xaac] ss:$48 sps:$4 sm:$0xff]  }
 0xa0c   :  { %16019 = vmatpush1.bf16.msra.mxu1 %v21992_v29  ;;  %15934 = vmatprep.subr.bf16.mxu0 %v21997_v39  ;;  %v22049_v29 = vld [vmem:[#allocation16 + $0xaa0] ss:$48 sps:$4 sm:$0xff]   ;;  %v22052_v39 = vld [vmem:[#allocation16 + $0xaa8] ss:$48 sps:$4 sm:$0xff]  }
 0xa0d   :  { %16020 = vmatprep.subr.bf16.mxu1 %v22000_v33  ;;  %v22057_v33 = vld [vmem:[#allocation16 + $0xb04] ss:$48 sps:$4 sm:$0xff]  }
 0xa0f   :  { %15935 = vmatpush1.bf16.msra.mxu0 %v21995_v4  ;;  %v22060_v4 = vld [vmem:[#allocation16 + $0xb0c] ss:$48 sps:$4 sm:$0xff]  }
 0xa10   :  { %16021 = vmatpush1.bf16.msra.mxu1 %v21998_v54  ;;  %15936 = vmatprep.subr.bf16.mxu0 %v22003_v46  ;;  %v22055_v54 = vld [vmem:[#allocation16 + $0xb00] ss:$48 sps:$4 sm:$0xff]   ;;  %v22058_v46 = vld [vmem:[#allocation16 + $0xb08] ss:$48 sps:$4 sm:$0xff]  }
 0xa11   :  { %16022 = vmatprep.subr.bf16.mxu1 %v22006_v22  ;;  %v22063_v22 = vld [vmem:[#allocation16 + $0xb64] ss:$48 sps:$4 sm:$0xff]  }
 0xa13   :  { %15937 = vmatpush1.bf16.msra.mxu0 %v22001_v59  ;;  %v22066_v59 = vld [vmem:[#allocation16 + $0xb6c] ss:$48 sps:$4 sm:$0xff]  }
 0xa14   :  { %16023 = vmatpush1.bf16.msra.mxu1 %v22004_v60  ;;  %15938 = vmatprep.subr.bf16.mxu0 %v22009_v5  ;;  %v22061_v60 = vld [vmem:[#allocation16 + $0xb60] ss:$48 sps:$4 sm:$0xff]   ;;  %v22064_v5 = vld [vmem:[#allocation16 + $0xb68] ss:$48 sps:$4 sm:$0xff]  }
 0xa15   :  { %v23555_v35 = vpop.f32.mrb[32].mxu0  ;;  %16024 = vmatprep.subr.bf16.mxu1 %v22012_v26  ;;  %v22069_v26 = vld [vmem:[#allocation16 + $0xbc4] ss:$48 sps:$4 sm:$0xff]  }
 0xa16   :  { %v23557_v63 = vpop.f32.mrb[32].mxu1  ;;  %v23559_v41 = vpop.f32.mrb[33].mxu0 }
 0xa17   :  { %v23561_v34 = vpop.f32.mrb[33].mxu1  ;;  %v23563_v3 = vpop.f32.mrb[34].mxu0  ;;  %15939 = vmatpush1.bf16.msra.mxu0 %v22007_v50  ;;  %v22072_v50 = vld [vmem:[#allocation16 + $0xbcc] ss:$48 sps:$4 sm:$0xff]  }
 0xa18   :  { %v23565_v7 = vpop.f32.mrb[34].mxu1  ;;  %16025 = vmatpush1.bf16.msra.mxu1 %v22010_v47  ;;  %v23567_v1 = vpop.f32.mrb[35].mxu0  ;;  %15940 = vmatprep.subr.bf16.mxu0 %v22015_v58  ;;  %v22067_v47 = vld [vmem:[#allocation16 + $0xbc0] ss:$48 sps:$4 sm:$0xff]   ;;  %v22070_v58 = vld [vmem:[#allocation16 + $0xbc8] ss:$48 sps:$4 sm:$0xff]  }
 0xa19   :  { %v23569_v16 = vpop.f32.mrb[35].mxu1  ;;  %16026 = vmatprep.subr.bf16.mxu1 %v22018_v6  ;;  %v22073_v6 = vld [vmem:[#allocation21 + $0x40] sm:$0xff]  }
 0xa1b   :  { %15941 = vmatpush1.bf16.msra.mxu0 %v22013_v0  ;;  %v22074_v0 = vld [vmem:[#allocation21 + $0xc0] sm:$0xff]  }
 0xa1c   :  { %16027 = vmatpush1.bf16.msra.mxu1 %v22016_v10  ;;  %15942 = vmatprep.subr.bf16.mxu0 %v22021_v61  ;;  %v22075_v10 = vld [vmem:[#allocation21] sm:$0xff]  }
 0xa1d   :  { %16028 = vmatprep.subr.bf16.mxu1 %v22024_v20  ;;  %v22076_v61 = vld [vmem:[#allocation21 + $0x80] sm:$0xff]  }
 0xa1f   :  { %15943 = vmatpush1.bf16.msra.mxu0 %v22019_v52 }
 0xa20   :  { %16029 = vmatpush1.bf16.msra.mxu1 %v22022_v11  ;;  %15944 = vmatprep.subr.bf16.mxu0 %v22027_v19 }
 0xa21   :  { %16030 = vmatprep.subr.bf16.mxu1 %v22030_v56 }
 0xa23   :  { %15945 = vmatpush1.bf16.msra.mxu0 %v22025_v12  ;;  %v22077_v12 = vld [vmem:[#allocation21 + $0x48] sm:$0xff]  }
 0xa24   :  { %16031 = vmatpush1.bf16.msra.mxu1 %v22028_v23  ;;  %15946 = vmatprep.subr.bf16.mxu0 %v22033_v53  ;;  %v22078_v23 = vld [vmem:[#allocation21 + $0xc8] sm:$0xff]  }
 0xa25   :  { %16032 = vmatprep.subr.bf16.mxu1 %v22036_v32 }
 0xa27   :  { %15947 = vmatpush1.bf16.msra.mxu0 %v22031_v57  ;;  %v22079_v57 = vld [vmem:[#allocation21 + $0x8] sm:$0xff]  }
 0xa28   :  { %16033 = vmatpush1.bf16.msra.mxu1 %v22034_v42  ;;  %15948 = vmatprep.subr.bf16.mxu0 %v22039_v24  ;;  %v22081_v24 = vld [vmem:[#allocation21 + $0x50] sm:$0xff]  }
 0xa29   :  { %16034 = vmatprep.subr.bf16.mxu1 %v22042_v36  ;;  %v22082_v36 = vld [vmem:[#allocation21 + $0xd0] sm:$0xff]  }
 0xa2b   :  { %15949 = vmatpush1.bf16.msra.mxu0 %v22037_v55  ;;  %v22083_v55 = vld [vmem:[#allocation21 + $0x10] sm:$0xff]  }
 0xa2c   :  { %16035 = vmatpush1.bf16.msra.mxu1 %v22040_v37  ;;  %15950 = vmatprep.subr.bf16.mxu0 %v22045_v38  ;;  %v22084_v37 = vld [vmem:[#allocation21 + $0x90] sm:$0xff]   ;;  %v22085_v38 = vld [vmem:[#allocation21 + $0x58] sm:$0xff]  }
 0xa2d   :  { %16036 = vmatprep.subr.bf16.mxu1 %v22048_v28  ;;  %v22086_v28 = vld [vmem:[#allocation21 + $0xd8] sm:$0xff]  }
 0xa2f   :  { %15951 = vmatpush1.bf16.msra.mxu0 %v22043_v30  ;;  %v22087_v30 = vld [vmem:[#allocation21 + $0x18] sm:$0xff]  }
 0xa30   :  { %16037 = vmatpush1.bf16.msra.mxu1 %v22046_v31  ;;  %15952 = vmatprep.subr.bf16.mxu0 %v22051_v45  ;;  %v22088_v31 = vld [vmem:[#allocation21 + $0x98] sm:$0xff]   ;;  %v22089_v45 = vld [vmem:[#allocation21 + $0x60] sm:$0xff]  }
 0xa31   :  { %16038 = vmatprep.subr.bf16.mxu1 %v22054_v62  ;;  %v22090_v62 = vld [vmem:[#allocation21 + $0xe0] sm:$0xff]  }
 0xa33   :  { %15953 = vmatpush1.bf16.msra.mxu0 %v22049_v29  ;;  %v22091_v29 = vld [vmem:[#allocation21 + $0x20] sm:$0xff]  }
 0xa34   :  { %16039 = vmatpush1.bf16.msra.mxu1 %v22052_v39  ;;  %15954 = vmatprep.subr.bf16.mxu0 %v22057_v33  ;;  %v22092_v39 = vld [vmem:[#allocation21 + $0xa0] sm:$0xff]   ;;  %v22093_v33 = vld [vmem:[#allocation21 + $0x68] sm:$0xff]  }
 0xa35   :  { %16040 = vmatprep.subr.bf16.mxu1 %v22060_v4  ;;  %v22094_v4 = vld [vmem:[#allocation21 + $0xe8] sm:$0xff]  }
 0xa37   :  { %15955 = vmatpush1.bf16.msra.mxu0 %v22055_v54  ;;  %v22095_v54 = vld [vmem:[#allocation21 + $0x28] sm:$0xff]  }
 0xa38   :  { %16041 = vmatpush1.bf16.msra.mxu1 %v22058_v46  ;;  %15956 = vmatprep.subr.bf16.mxu0 %v22063_v22  ;;  %v22096_v46 = vld [vmem:[#allocation21 + $0xa8] sm:$0xff]   ;;  %v22097_v22 = vld [vmem:[#allocation21 + $0x70] sm:$0xff]  }
 0xa39   :  { %16042 = vmatprep.subr.bf16.mxu1 %v22066_v59  ;;  %v22098_v59 = vld [vmem:[#allocation21 + $0xf0] sm:$0xff]  }
 0xa3b   :  { %15957 = vmatpush1.bf16.msra.mxu0 %v22061_v60  ;;  %v22099_v60 = vld [vmem:[#allocation21 + $0x30] sm:$0xff]  }
 0xa3c   :  { %16043 = vmatpush1.bf16.msra.mxu1 %v22064_v5  ;;  %15958 = vmatprep.subr.bf16.mxu0 %v22069_v26  ;;  %v22100_v5 = vld [vmem:[#allocation21 + $0xb0] sm:$0xff]   ;;  %v22101_v26 = vld [vmem:[#allocation21 + $0x78] sm:$0xff]  }
 0xa3d   :  { %16044 = vmatprep.subr.bf16.mxu1 %v22072_v50  ;;  %v22102_v50 = vld [vmem:[#allocation21 + $0xf8] sm:$0xff]  }
 0xa3f   :  { %15959 = vmatpush1.bf16.msra.mxu0 %v22067_v47  ;;  %v22103_v47 = vld [vmem:[#allocation21 + $0x38] sm:$0xff]  }
 0xa40   :  { %16045 = vmatpush1.bf16.msra.mxu1 %v22070_v58  ;;  %18681 = vmatprep.subr.bf16.mxu0 %v22073_v6  ;;  %v22104_v58 = vld [vmem:[#allocation21 + $0xb8] sm:$0xff]   ;;  %v11049_v6 = vld [vmem:[#allocation18] sm:$0xff] }
 0xa41   :  { %18703 = vmatprep.subr.bf16.mxu1 %v22074_v0  ;;  %v11051_v0 = vld [vmem:[#allocation19] sm:$0xff] }
 0xa42   :  { %15961 = vmatmul.mubr.bf16.vlgmr.msra.gmra.mrb[44].mxu0 %v23521_v18 }
 0xa43   :  { %16047 = vmatmul.mubr.bf16.vlgmr.msra.gmra.mrb[44].mxu1 %v23521_v18  ;;  %18682 = vmatpush3.bf16.msra.mxu0 %v22075_v10  ;;  %v22080_v18 = vld [vmem:[#allocation21 + $0x88] sm:$0xff]   ;;  %v11062_v10 = vrot.slane %v11049_v6, %v23109_v13 }
 0xa44   :  { %18704 = vmatpush3.bf16.msra.mxu1 %v22076_v61  ;;  %18683 = vmatprep.subr.bf16.mxu0 %v22077_v12  ;;  %v13564_v61 = vrot.slane %v11051_v0, %v23109_v13  ;;  %v11070_v12 = vrot.slane %v11049_v6, %v23111_v14 }
 0xa45   :  { %18705 = vmatprep.subr.bf16.mxu1 %v22078_v23  ;;  %v13572_v23 = vrot.slane %v11051_v0, %v23111_v14 }
 0xa47   :  { %18684 = vmatpush3.bf16.msra.mxu0 %v22079_v57  ;;  %v11066_v57 = vrot.slane %v11049_v6, %v23113_v15 }
 0xa48   :  { %18706 = vmatpush3.bf16.msra.mxu1 %v22080_v18  ;;  %18685 = vmatprep.subr.bf16.mxu0 %v22081_v24  ;;  %v13568_v18 = vrot.slane %v11051_v0, %v23113_v15  ;;  %v11074_v24 = vrot.slane %v11049_v6, %v23117_v21 }
 0xa49   :  { %18707 = vmatprep.subr.bf16.mxu1 %v22082_v36  ;;  %v13576_v36 = vrot.slane %v11051_v0, %v23117_v21 }
 0xa4b   :  { %18686 = vmatpush3.bf16.msra.mxu0 %v22083_v55  ;;  %v18813_v55 = vadd.f32 %v13564_v61, %v11062_v10 }
 0xa4c   :  { %18708 = vmatpush3.bf16.msra.mxu1 %v22084_v37  ;;  %18687 = vmatprep.subr.bf16.mxu0 %v22085_v38  ;;  %v18821_v37 = vadd.f32 %v13572_v23, %v11070_v12  ;;  %v18815_v38 = vadd.f32 %v13568_v18, %v11066_v57 }
 0xa4d   :  { %18709 = vmatprep.subr.bf16.mxu1 %v22086_v28  ;;  %v18823_v28 = vadd.f32 %v13576_v36, %v11074_v24 }
 0xa4f   :  { %18688 = vmatpush3.bf16.msra.mxu0 %v22087_v30  ;;  %v18814_v30 = vadd.f32 %v18813_v55, %v23555_v35  ;;  %v11090_v35 = vrot.slane %v11049_v6, %v23131_v48 }
 0xa50   :  { %18710 = vmatpush3.bf16.msra.mxu1 %v22088_v31  ;;  %18689 = vmatprep.subr.bf16.mxu0 %v22089_v45  ;;  %v11078_v31 = vrot.slane %v11049_v6, %v23125_v40  ;;  %v13580_v45 = vrot.slane %v11051_v0, %v23125_v40  ;;  %v18818_v40 = vadd.f32 %v18813_v55, %v23563_v3 }
 0xa51   :  { %18711 = vmatprep.subr.bf16.mxu1 %v22090_v62  ;;  %v18822_v62 = vadd.f32 %v18821_v37, %v23557_v63 }
 0xa52   :  { %v18829_v63 = vadd.f32 %v13580_v45, %v11078_v31 }
 0xa53   :  { %18690 = vmatpush3.bf16.msra.mxu0 %v22091_v29  ;;  %v11086_v29 = vrot.slane %v11049_v6, %v23127_v49 }
 0xa54   :  { %18712 = vmatpush3.bf16.msra.mxu1 %v22092_v39  ;;  %18691 = vmatprep.subr.bf16.mxu0 %v22093_v33  ;;  %v13588_v39 = vrot.slane %v11051_v0, %v23127_v49  ;;  %v18816_v33 = vadd.f32 %v18815_v38, %v23559_v41  ;;  %v18820_v41 = vadd.f32 %v18815_v38, %v23567_v1 }
 0xa55   :  { %18713 = vmatprep.subr.bf16.mxu1 %v22094_v4  ;;  %v11082_v4 = vrot.slane %v11049_v6, %v23129_v44 }
 0xa56   :  { %v18837_v49 = vadd.f32 %v13588_v39, %v11086_v29 }
 0xa57   :  { %18692 = vmatpush3.bf16.msra.mxu0 %v22095_v54  ;;  %v13584_v54 = vrot.slane %v11051_v0, %v23129_v44  ;;  %v18828_v44 = vadd.f32 %v18823_v28, %v23569_v16 }
 0xa58   :  { %18714 = vmatpush3.bf16.msra.mxu1 %v22096_v46  ;;  %18693 = vmatprep.subr.bf16.mxu0 %v22097_v22  ;;  %v18824_v46 = vadd.f32 %v18823_v28, %v23561_v34  ;;  %v13592_v22 = vrot.slane %v11051_v0, %v23131_v48  ;;  %v18621_v0 = vmul.f32 -1.442695, %v18820_v41  ;;  %v11052_v41 = vld [vmem:[#allocation19 + $0x8] sm:$0xf] }
 0xa59   :  { %18715 = vmatprep.subr.bf16.mxu1 %v22098_v59  ;;  %v18616_v59 = vmul.f32 -1.442695, %v18814_v30  ;;  %v18623_v10 = vmul.f32 -1.442695, %v18828_v44 }
 0xa5a   :  { %v18839_v34 = vadd.f32 %v13592_v22, %v11090_v35 }
 0xa5b   :  { %18694 = vmatpush3.bf16.msra.mxu0 %v22099_v60  ;;  %v18618_v60 = vmul.f32 -1.442695, %v18822_v62  ;;  %22265 = vpow2.f32 %v18616_v59 }
 0xa5c   :  { %18716 = vmatpush3.bf16.msra.mxu1 %v22100_v5  ;;  %18695 = vmatprep.subr.bf16.mxu0 %v22101_v26  ;;  %v18826_v5 = vadd.f32 %v18821_v37, %v23565_v7  ;;  %v18617_v26 = vmul.f32 -1.442695, %v18816_v33 }
 0xa5d   :  { %18717 = vmatprep.subr.bf16.mxu1 %v22102_v50  ;;  %v18831_v50 = vadd.f32 %v13584_v54, %v11082_v4  ;;  %22267 = vpow2.f32 %v18618_v60  ;;  %v11050_v54 = vld [vmem:[#allocation18 + $0x8] sm:$0xf] }
 0xa5e   :  { %v18622_v6 = vmul.f32 -1.442695, %v18826_v5  ;;  %22269 = vpow2.f32 %v18617_v26  ;;  %v11094_v60 = vrot.slane %v11050_v54, %v23109_v13 }
 0xa5f   :  { %18696 = vmatpush3.bf16.msra.mxu0 %v22103_v47  ;;  %v18619_v47 = vmul.f32 -1.442695, %v18824_v46 }
 0xa60   :  { %18718 = vmatpush3.bf16.msra.mxu1 %v22104_v58  ;;  %v18620_v58 = vmul.f32 -1.442695, %v18818_v40 }
 0xa61   :  { %22271 = vpow2.f32 %v18619_v47  ;;  %v11102_v47 = vrot.slane %v11050_v54, %v23111_v14 }
 0xa62   :  { %22273 = vpow2.f32 %v18620_v58  ;;  %v11098_v58 = vrot.slane %v11050_v54, %v23113_v15 }
 0xa63   :  { %22275 = vpow2.f32 %v18622_v6 }
 0xa64   :  { %22277 = vpow2.f32 %v18621_v0 }
 0xa65   :  { %22279 = vpow2.f32 %v18623_v10  ;;  %v22266_v24 = vpop.eup %22265 }
 0xa66   :  { %v16089_v38 = vadd.f32 1.0, %v22266_v24 }
 0xa95   :  { %v23573_v20 = vpop.f32.mrb[36].mxu0 }
 0xa96   :  { %v23575_v52 = vpop.f32.mrb[36].mxu1  ;;  %v23577_v11 = vpop.f32.mrb[37].mxu0  ;;  %v18830_v48 = vadd.f32 %v18829_v63, %v23573_v20 }
 0xa97   :  { %v23579_v19 = vpop.f32.mrb[37].mxu1  ;;  %v23581_v56 = vpop.f32.mrb[38].mxu0  ;;  %v18838_v3 = vadd.f32 %v18837_v49, %v23575_v52  ;;  %v18832_v7 = vadd.f32 %v18831_v50, %v23577_v11 }
 0xa98   :  { %v23583_v53 = vpop.f32.mrb[38].mxu1  ;;  %v23585_v32 = vpop.f32.mrb[39].mxu0  ;;  %v18840_v1 = vadd.f32 %v18839_v34, %v23579_v19  ;;  %v18624_v61 = vmul.f32 -1.442695, %v18830_v48  ;;  %v18834_v16 = vadd.f32 %v18829_v63, %v23581_v56  ;;  %v11106_v48 = vrot.slane %v11050_v54, %v23117_v21 }
 0xa99   :  { %v23587_v42 = vpop.f32.mrb[39].mxu1  ;;  %v18626_v12 = vmul.f32 -1.442695, %v18838_v3  ;;  %v18842_v20 = vadd.f32 %v18837_v49, %v23583_v53  ;;  %v18625_v23 = vmul.f32 -1.442695, %v18832_v7  ;;  %v18836_v52 = vadd.f32 %v18831_v50, %v23585_v32  ;;  %v22268_v56 = vpop.eup %22267 }
 0xa9a   :  { %v18627_v57 = vmul.f32 -1.442695, %v18840_v1  ;;  %v18844_v11 = vadd.f32 %v18839_v34, %v23587_v42  ;;  %22281 = vpow2.f32 %v18624_v61  ;;  %v18628_v18 = vmul.f32 -1.442695, %v18834_v16  ;;  %v22270_v37 = vpop.eup %22269 }
 0xa9b   :  { %22283 = vpow2.f32 %v18626_v12  ;;  %v18630_v19 = vmul.f32 -1.442695, %v18842_v20  ;;  %v18629_v36 = vmul.f32 -1.442695, %v18836_v52  ;;  %v22272_v53 = vpop.eup %22271  ;;  %v16091_v28 = vadd.f32 1.0, %v22268_v56 }
 0xa9c   :  { %22285 = vpow2.f32 %v18625_v23  ;;  %v18631_v55 = vmul.f32 -1.442695, %v18844_v11  ;;  %v22274_v32 = vpop.eup %22273  ;;  %v16090_v42 = vadd.f32 1.0, %v22270_v37  ;;  %v16092_v45 = vadd.f32 1.0, %v22272_v53 }
 0xa9d   :  { %22287 = vpow2.f32 %v18627_v57  ;;  %v22276_v30 = vpop.eup %22275  ;;  %v16093_v29 = vadd.f32 1.0, %v22274_v32  ;;  %v18845_v3 = vadd.f32 %v23531_v8, %v11094_v60  ;;  %v13596_v7 = vrot.slane %v11052_v41, %v23109_v13 }
 0xa9e   :  { %22289 = vpow2.f32 %v18628_v18  ;;  %v22278_v31 = vpop.eup %22277  ;;  %v16095_v33 = vadd.f32 1.0, %v22276_v30  ;;  %v13604_v61 = vrot.slane %v11052_v41, %v23111_v14  ;;  %v13600_v16 = vrot.slane %v11052_v41, %v23113_v15 }
 0xa9f   :  { %22291 = vpow2.f32 %v18630_v19  ;;  %v22280_v62 = vpop.eup %22279  ;;  %v16094_v46 = vadd.f32 1.0, %v22278_v31  ;;  %v18849_v20 = vadd.f32 %v23533_v9, %v11102_v47  ;;  %v13608_v52 = vrot.slane %v11052_v41, %v23117_v21 }
 0xaa0   :  { %22293 = vpow2.f32 %v18629_v36  ;;  %v16096_v22 = vadd.f32 1.0, %v22280_v62  ;;  %v18846_v8 = vadd.f32 %v23535_v43, %v11098_v58  ;;  %v18850_v11 = vadd.f32 %v23537_v25, %v11106_v48 }
 0xaa1   :  { %22295 = vpow2.f32 %v18631_v55  ;;  %v18847_v13 = vadd.f32 %v23539_v51, %v11094_v60  ;;  %v18851_v14 = vadd.f32 %v23541_v2, %v11102_v47  ;;  %v18848_v15 = vadd.f32 %v23543_v27, %v11098_v58 }
 0xaa2   :  { %22297 = vrcp.f32 %v16089_v38  ;;  %v18852_v21 = vadd.f32 %v23545_v17, %v11106_v48 }
 0xaa3   :  { %22299 = vrcp.f32 %v16091_v28 }
 0xaa4   :  { %v22282_v39 = vpop.eup %22281  ;;  %22301 = vrcp.f32 %v16090_v42 }
 0xaa5   :  { %v22284_v4 = vpop.eup %22283  ;;  %22303 = vrcp.f32 %v16092_v45  ;;  %v16145_v40 = vadd.f32 1.0, %v22282_v39 }
 0xaa6   :  { %v22286_v35 = vpop.eup %22285  ;;  %22305 = vrcp.f32 %v16093_v29  ;;  %v16147_v5 = vadd.f32 1.0, %v22284_v4 }
 0xaa7   :  { %v22288_v59 = vpop.eup %22287  ;;  %22307 = vrcp.f32 %v16095_v33  ;;  %v16146_v26 = vadd.f32 1.0, %v22286_v35 }
 0xaa8   :  { %v22290_v63 = vpop.eup %22289  ;;  %22309 = vrcp.f32 %v16094_v46  ;;  %v16148_v44 = vadd.f32 1.0, %v22288_v59 }
 0xaa9   :  { %v22292_v49 = vpop.eup %22291  ;;  %22311 = vrcp.f32 %v16096_v22  ;;  %v16149_v6 = vadd.f32 1.0, %v22290_v63 }
 0xaaa   :  { %v22294_v50 = vpop.eup %22293  ;;  %22313 = vrcp.f32 %v16145_v40  ;;  %v16151_v0 = vadd.f32 1.0, %v22292_v49 }
 0xaab   :  { %v22296_v34 = vpop.eup %22295  ;;  %22315 = vrcp.f32 %v16147_v5  ;;  %v16150_v1 = vadd.f32 1.0, %v22294_v50 }
 0xaac   :  { %v22298_v10 = vpop.eup %22297  ;;  %22317 = vrcp.f32 %v16146_v26  ;;  %v16152_v23 = vadd.f32 1.0, %v22296_v34 }
 0xaad   :  { %v22300_v12 = vpop.eup %22299  ;;  %22319 = vrcp.f32 %v16148_v44 }
 0xaae   :  { %v22302_v57 = vpop.eup %22301  ;;  %22321 = vrcp.f32 %v16149_v6 }
 0xaaf   :  { %v22304_v19 = vpop.eup %22303  ;;  %22323 = vrcp.f32 %v16151_v0 }
 0xab0   :  { %v22306_v56 = vpop.eup %22305  ;;  %22325 = vrcp.f32 %v16150_v1 }
 0xab1   :  { %v22308_v51 = vpop.eup %22307  ;;  %22327 = vrcp.f32 %v16152_v23 }
 0xab2   :  { %v22310_v27 = vpop.eup %22309 }
 0xab3   :  { %v22312_v29 = vpop.eup %22311 }
 0xab4   :  { %v22314_v54 = vpop.eup %22313 }
 0xab5   :  { %v22316_v40 = vpop.eup %22315  ;;  %v16193_v6 = vsub.f32 1.0, %v22314_v54 }
 0xab6   :  { %v22318_v49 = vpop.eup %22317  ;;  %v16195_v0 = vsub.f32 1.0, %v22316_v40 }
 0xab7   :  { %v22320_v50 = vpop.eup %22319 }
 0xab8   :  { %v22322_v44 = vpop.eup %22321 }
 0xab9   :  { %v22324_v34 = vpop.eup %22323 }
 0xaba   :  { %v22326_v58 = vpop.eup %22325 }
 0xabb   :  { %v22328_v48 = vpop.eup %22327 }
 0xb15   :  { %v15962_v18 = vpop.f32.mrb[44].mxu0 }
 0xb16   :  { %v18853_v9 = vadd.f32 %v15962_v18, %v13596_v7  ;;  %v16048_v24 = vpop.f32.mrb[44].mxu1  ;;  %v15964_v36 = vpop.f32.mrb[45].mxu0 }
 0xb17   :  { %v18857_v43 = vadd.f32 %v16048_v24, %v13604_v61  ;;  %v18854_v55 = vadd.f32 %v15964_v36, %v13600_v16  ;;  %v16050_v25 = vpop.f32.mrb[45].mxu1  ;;  %v15966_v37 = vpop.f32.mrb[46].mxu0  ;;  %v22364_v24 = vld [vmem:[%s23713_s23 + $0x98] sm:$0xff] }
 0xb18   :  { %v16169_v53 = vmul.f32 %v22298_v10, %v18853_v9  ;;  %v18858_v38 = vadd.f32 %v16050_v25, %v13608_v52  ;;  %v18855_v32 = vadd.f32 %v15966_v37, %v13596_v7  ;;  %v16052_v2 = vpop.f32.mrb[46].mxu1  ;;  %v15968_v28 = vpop.f32.mrb[47].mxu0  ;;  %v16194_v10 = vsub.f32 1.0, %v22318_v49 }
 0xb19   :  { %v16171_v30 = vmul.f32 %v22300_v12, %v18857_v43  ;;  %v16170_v42 = vmul.f32 %v22302_v57, %v18854_v55  ;;  %v18859_v31 = vadd.f32 %v16052_v2, %v13604_v61  ;;  %v18856_v45 = vadd.f32 %v15968_v28, %v13600_v16  ;;  %v16054_v62 = vpop.f32.mrb[47].mxu1  ;;  %v22361_v61 = vld [vmem:[%s23713_s23 + $0x80] sm:$0xff] }
 0xb1a   :  { %v16177_v17 = vadd.f32 %v18845_v3, %v16169_v53  ;;  %v16172_v39 = vmul.f32 %v22304_v19, %v18858_v38  ;;  %v16173_v33 = vmul.f32 %v22306_v56, %v18855_v32  ;;  %v18860_v4 = vadd.f32 %v16054_v62, %v13608_v52  ;;  %v22362_v52 = vld [vmem:[%s23713_s23 + $0x90] sm:$0xff] }
 0xb1b   :  { %v16179_v46 = vadd.f32 %v18849_v20, %v16171_v30  ;;  %v16178_v35 = vadd.f32 %v18846_v8, %v16170_v42  ;;  %v16175_v22 = vmul.f32 %v22308_v51, %v18859_v31  ;;  %v16174_v59 = vmul.f32 %v22310_v27, %v18856_v45  ;;  %v22365_v51 = vld [vmem:[%s23713_s23 + $0xa0] sm:$0xff]  ;;  %v22366_v27 = vld [vmem:[%s23713_s23 + $0xb0] sm:$0xff]  ;;  %v22367_v45 = vld [vmem:[%s23713_s23 + $0xa8] sm:$0xff] }
 0xb1c   :  { %22329 = vtanh.f32 %v16177_v17  ;;  %v16180_v63 = vadd.f32 %v18850_v11, %v16172_v39  ;;  %v16181_v60 = vadd.f32 %v18847_v13, %v16173_v33  ;;  %v16176_v5 = vmul.f32 %v22312_v29, %v18860_v4  ;;  %v22363_v13 = vld [vmem:[%s23713_s23 + $0x88] sm:$0xff]  ;;  %v22368_v39 = vld [vmem:[%s23713_s23 + $0xb8] sm:$0xff] }
 0xb1d   :  { %22331 = vtanh.f32 %v16179_v46  ;;  %v16183_v26 = vadd.f32 %v18851_v14, %v16175_v22  ;;  %v16182_v41 = vadd.f32 %v18848_v15, %v16174_v59  ;;  %v16209_v16 = vmul.f32 %v22361_v61, %v22314_v54 }
 0xb1e   :  { %22333 = vtanh.f32 %v16178_v35  ;;  %v16184_v47 = vadd.f32 %v18852_v21, %v16176_v5  ;;  %v16196_v20 = vsub.f32 1.0, %v22320_v50  ;;  %v16211_v57 = vmul.f32 %v22362_v52, %v22316_v40  ;;  %v18632_v5 = vld [vmem:[#allocation22] ss:$0 sm:$0xff] }
 0xb1f   :  { %22335 = vtanh.f32 %v16180_v63  ;;  %v16210_v18 = vmul.f32 %v22363_v13, %v22318_v49  ;;  %v16197_v19 = vsub.f32 1.0, %v22322_v44  ;;  %v16212_v36 = vmul.f32 %v22364_v24, %v22320_v50 }
 0xb20   :  { %22337 = vtanh.f32 %v16181_v60  ;;  %v16199_v56 = vsub.f32 1.0, %v22324_v34  ;;  %v16198_v55 = vsub.f32 1.0, %v22326_v58  ;;  %v16213_v53 = vmul.f32 %v22365_v51, %v22322_v44 }
 0xb21   :  { %22339 = vtanh.f32 %v16183_v26  ;;  %v16200_v32 = vsub.f32 1.0, %v22328_v48  ;;  %v16215_v30 = vmul.f32 %v22366_v27, %v22324_v34  ;;  %v16214_v62 = vmul.f32 %v22367_v45, %v22326_v58 }
 0xb22   :  { %22341 = vtanh.f32 %v16182_v41  ;;  %v16216_v33 = vmul.f32 %v22368_v39, %v22328_v48 }
 0xb23   :  { %22343 = vtanh.f32 %v16184_v47 }
 0xb26   :  { %v22330_v3 = vpop.eup %22329 }
 0xb27   :  { %v22332_v7 = vpop.eup %22331  ;;  %v16201_v1 = vmul.f32 %v22330_v3, %v16193_v6 }
 0xb28   :  { %v22334_v12 = vpop.eup %22333  ;;  %v16203_v23 = vmul.f32 %v22332_v7, %v16195_v0 }
 0xb29   :  { %v22336_v8 = vpop.eup %22335  ;;  %v16202_v11 = vmul.f32 %v22334_v12, %v16194_v10  ;;  %v16217_v14 = vadd.f32 %v16209_v16, %v16201_v1 }
 0xb2a   :  { %v22338_v15 = vpop.eup %22337  ;;  %v16204_v9 = vmul.f32 %v22336_v8, %v16196_v20  ;;  %v16219_v21 = vadd.f32 %v16211_v57, %v16203_v23 }
 0xb2b   :  { %v22340_v43 = vpop.eup %22339  ;;  %v16218_v25 = vadd.f32 %v16210_v18, %v16202_v11  ;;  %v16205_v37 = vmul.f32 %v22338_v15, %v16197_v19  ;;  %18673 = vst [vmem:[%s23708_s17 + $0x80] sm:$0xff] %v16217_v14 }
 0xb2c   :  { %v22342_v38 = vpop.eup %22341  ;;  %v16220_v2 = vadd.f32 %v16212_v36, %v16204_v9  ;;  %v16207_v28 = vmul.f32 %v22340_v43, %v16199_v56  ;;  %18675 = vst [vmem:[%s23708_s17 + $0x90] sm:$0xff] %v16219_v21 }
 0xb2d   :  { %v22344_v42 = vpop.eup %22343  ;;  %v16206_v31 = vmul.f32 %v22342_v38, %v16198_v55  ;;  %18674 = vst [vmem:[%s23708_s17 + $0x88] sm:$0xff] %v16218_v25  ;;  %v16221_v29 = vadd.f32 %v16213_v53, %v16205_v37 }
 0xb2e   :  { %v16208_v17 = vmul.f32 %v22344_v42, %v16200_v32  ;;  %18676 = vst [vmem:[%s23708_s17 + $0x98] sm:$0xff] %v16220_v2  ;;  %v16223_v4 = vadd.f32 %v16215_v30, %v16207_v28 }
 0xb2f   :  { %v16222_v54 = vadd.f32 %v16214_v62, %v16206_v31  ;;  %v16225_v46 = vpack.c.bf16 %v16221_v29, %v16217_v14  ;;  %18677 = vst [vmem:[%s23708_s17 + $0xa0] sm:$0xff] %v16221_v29 }
 0xb30   :  { %v16224_v35 = vadd.f32 %v16216_v33, %v16208_v17  ;;  %v16227_v22 = vpack.c.bf16 %v16223_v4, %v16219_v21  ;;  %18679 = vst [vmem:[%s23708_s17 + $0xb0] sm:$0xff] %v16223_v4 }
 0xb31   :  { %v16226_v59 = vpack.c.bf16 %v16222_v54, %v16218_v25  ;;  %18678 = vst [vmem:[%s23708_s17 + $0xa8] sm:$0xff] %v16222_v54 }
 0xb32   :  { %v16228_v40 = vpack.c.bf16 %v16224_v35, %v16220_v2  ;;  %18680 = vst [vmem:[%s23708_s17 + $0xb8] sm:$0xff] %v16224_v35 }
 0xb33   :  { %16459 = vmatprep.mubr.bf16.mxu0 %v16226_v59 }
 0xb34   :  { %16500 = vmatprep.mubr.bf16.mxu1 %v16228_v40  ;;  %16460 = vmatmul.mubr.bf16.vlgmr.msra.gmra.mrb[48].mxu0 %v16225_v46 }
 0xb35   :  { %16501 = vmatmul.mubr.bf16.vlgmr.msra.gmra.mrb[48].mxu1 %v16227_v22 }
 0xc07   :  { %v18697_v63 = vpop.f32.mrb[48].mxu0 }
 0xc08   :  { %v18719_v60 = vpop.f32.mrb[48].mxu1  ;;  %v18698_v49 = vpop.f32.mrb[49].mxu0 }
 0xc09   :  { %v18699_v26 = vadd.f32 %v18698_v49, %v18697_v63  ;;  %v18720_v41 = vpop.f32.mrb[49].mxu1  ;;  %v18700_v50 = vpop.f32.mrb[50].mxu0 }
 0xc0a   :  { %v18721_v47 = vadd.f32 %v18720_v41, %v18719_v60  ;;  %v18722_v44 = vpop.f32.mrb[50].mxu1  ;;  %v18701_v34 = vpop.f32.mrb[51].mxu0 }
 0xc0b   :  { %v16462_v58 = vadd.f32 %v18699_v26, %v18632_v5  ;;  %v18702_v48 = vadd.f32 %v18701_v34, %v18700_v50  ;;  %v18723_v6 = vpop.f32.mrb[51].mxu1 }
 0xc0c   :  { %v18724_v3 = vadd.f32 %v18723_v6, %v18722_v44 }
 0xc0d   :  { %v16503_v0 = vadd.f32 %v18721_v47, %v16462_v58  ;;  %v16465_v7 = vadd.f32 %v18702_v48, %v18632_v5 }
 0xc0f   :  { %16509 = vst [vmem:[%s23707_s16] sm:$0xff] %v16503_v0  ;;  %v16506_v10 = vadd.f32 %v18724_v3, %v16465_v7 }
 0xc11   :  { %16510 = vst [vmem:[%s23707_s16 + $0x8] sm:$0xff] %v16506_v10 }
 0xc12   :  { %16543 = vsyncpa [#allocation3], 1 }
 0xc13   :  { %16544 = vsyncpa [#allocation5], 1 }
 0xc14   :  { %16545 = vsyncpa [#allocation8], 1 }
 0xc15   :  { %16546 = vsyncpa [#allocation11], 1 }
 0xc16   :  { %16547 = vsyncpa [#allocation14], 1 }
 0xc17   :  { %16548 = vsyncpa [#allocation17], 1 }
 0xc18   :  { %16549 = vsyncpa [#allocation20], 1 }
 0xc19   :  { %16550 = vsyncpa [#allocation23], 1 }

</bundles_post_ra>
